<compile_context>
chip_gen: v7x
topology: tpu7x:2x2x1
jax: 0.10.0
libtpu: 0.0.40
codegen_flags: <defaults>
</compile_context>

<pallas_src>
import math

import jax
import jax.numpy as jnp
from jax.experimental import pallas as pl
from jax.experimental.pallas import tpu as pltpu

# Extended column counts (stride-1 "over-complete" evaluation of each layer).
#   conv1 true cols: q1 = 24*oh1 + ow1, oh1,ow1 in 0..22  -> need 0..550
#   conv2 true cols: q2 = 48*oh2 + 2*ow2, oh2,ow2 in 0..9  -> need 0..450
#   conv3 true cols: q3 = 48*oh3 + 2*ow3, oh3,ow3 in 0..8  -> need 0..400
_E1, _E2, _E3 = 551, 451, 401


# ----------------------------------------------------------------------------
# The single fused kernel: one grid step == one batch element.
# ----------------------------------------------------------------------------
def _fused_kernel(xph_ref, w1_ref, b1_ref, w2_ref, b2_ref, w3_ref, b3_ref,
                  wfc_ref, bfc_ref, m1w_ref, m1b_ref, m2w_ref, m2b_ref,
                  q1s_ref, q1m_ref, q1b_ref, q2w_ref, q2b_ref, q_ref):
    f32 = jnp.float32

    def leaky(v):  # torch leaky_relu(negative_slope=0.01)
        return jnp.maximum(v, 0.01 * v)

    # ---- conv1: Conv2d(3, 8, k=8, s=4) via 64 per-tap matmuls on the
    #      16-phase input.  Tap (i1,j1) reads phase (i1%4, j1%4) at a
    #      contiguous lane offset 24*(i1//4) + (j1//4).
    c1 = jnp.zeros((8, _E1), f32)
    for i1 in range(8):
        for j1 in range(8):
            t = i1 * 8 + j1
            ph = (i1 % 4) * 4 + (j1 % 4)
            off = 24 * (i1 // 4) + (j1 // 4)
            win = xph_ref[0, ph, :, off:off + _E1]                    # (3, E1)
            c1 = c1 + jnp.dot(w1_ref[t], win, preferred_element_type=f32)
    c1 = leaky(c1 + b1_ref[...])                                      # (8, E1)

    # ---- conv2: Conv2d(8, 16, k=4, s=2); tap offset in conv1 cols = 24*i2+j2
    c2 = jnp.zeros((16, _E2), f32)
    for i2 in range(4):
        for j2 in range(4):
            t = i2 * 4 + j2
            off = 24 * i2 + j2
            c2 = c2 + jnp.dot(w2_ref[t], c1[:, off:off + _E2],
                              preferred_element_type=f32)
    c2 = leaky(c2 + b2_ref[...])                                      # (16, E2)

    # ---- conv3: Conv2d(16, 16, k=2, s=1); tap offset in conv2 cols = 48*i3+2*j3
    c3 = jnp.zeros((16, _E3), f32)
    for i3 in range(2):
        for j3 in range(2):
            t = i3 * 2 + j3
            off = 48 * i3 + 2 * j3
            c3 = c3 + jnp.dot(w3_ref[t], c2[:, off:off + _E3],
                              preferred_element_type=f32)
    c3 = leaky(c3 + b3_ref[...])                                      # (16, E3)

    # ---- shared_h3 (flatten + valid-column selection folded into the
    #      zero-padded weight tensor wfc_ref) + numerically stable sigmoid
    sh_pre = bfc_ref[...]                                             # (1, 16)
    for c in range(16):
        sh_pre = sh_pre + jnp.dot(c3[c:c + 1, :], wfc_ref[c],
                                  preferred_element_type=f32)
    z = jnp.exp(-jnp.abs(sh_pre))
    inv = 1.0 / (1.0 + z)
    sh = jnp.where(sh_pre >= 0.0, inv, z * inv)                       # (1, 16)

    # ---- actor: mu_h1 -> leaky -> _mu -> tanh
    mu = leaky(jnp.dot(sh, m1w_ref[...], preferred_element_type=f32)
               + m1b_ref[...])
    mu = jnp.tanh(jnp.dot(mu, m2w_ref[...], preferred_element_type=f32)
                  + m2b_ref[...])                                     # (1, n_act)

    # ---- critic: cat(sh, mu) @ Wq1  ==  sh @ Wq1[:16] + mu @ Wq1[16:]
    qh = leaky(jnp.dot(sh, q1s_ref[...], preferred_element_type=f32)
               + jnp.dot(mu, q1m_ref[...], preferred_element_type=f32)
               + q1b_ref[...])
    q = jnp.dot(qh, q2w_ref[...], preferred_element_type=f32) + q2b_ref[...]
    q_ref[0] = q.astype(q_ref.dtype)                                  # (1, 1)


# ----------------------------------------------------------------------------
# Deterministic parameter init (PyTorch-like uniform(-1/sqrt(fan_in), ...)),
# stored in the original PyTorch layouts.
# ----------------------------------------------------------------------------
def _uniform(key, shape, fan_in):
    bound = 1.0 / math.sqrt(fan_in)
    return jax.random.uniform(key, shape, jnp.float32, -bound, bound)


def init_params(key, n_actions=2):
    ks = jax.random.split(key, 16)
    p = {}
    p["c1_w"] = _uniform(ks[0], (8, 3, 8, 8), 3 * 8 * 8)       # Conv2d(3,8,k=8,s=4)
    p["c1_b"] = _uniform(ks[1], (8,), 3 * 8 * 8)
    p["c2_w"] = _uniform(ks[2], (16, 8, 4, 4), 8 * 4 * 4)      # Conv2d(8,16,k=4,s=2)
    p["c2_b"] = _uniform(ks[3], (16,), 8 * 4 * 4)
    p["c3_w"] = _uniform(ks[4], (16, 16, 2, 2), 16 * 2 * 2)    # Conv2d(16,16,k=2,s=1)
    p["c3_b"] = _uniform(ks[5], (16,), 16 * 2 * 2)
    p["fc_w"] = _uniform(ks[6], (16, 1296), 1296)              # Linear(16*9*9, 16)
    p["fc_b"] = _uniform(ks[7], (16,), 1296)
    p["mu1_w"] = _uniform(ks[8], (64, 16), 16)                 # Linear(16, 64)
    p["mu1_b"] = _uniform(ks[9], (64,), 16)
    p["mu2_w"] = _uniform(ks[10], (n_actions, 64), 64)         # Linear(64, n_actions)
    p["mu2_b"] = _uniform(ks[11], (n_actions,), 64)
    p["q1_w"] = _uniform(ks[12], (64, 16 + n_actions), 16 + n_actions)
    p["q1_b"] = _uniform(ks[13], (64,), 16 + n_actions)
    p["q2_w"] = _uniform(ks[14], (1, 64), 64)                  # Linear(64, 1)
    p["q2_b"] = _uniform(ks[15], (1,), 64)
    return p


def prepare_params(p):
    """One-time weight reorders (hoisted out of the per-forward hot path)."""
    def tapize(w):  # (O, C, kh, kw) -> (kh*kw, O, C), tap index t = i*kw + j
        kh, kw = w.shape[2], w.shape[3]
        return jnp.transpose(w, (2, 3, 0, 1)).reshape(kh * kw, w.shape[0], w.shape[1])

    # shared_h3 weight, re-indexed to the extended conv3 column space:
    #   wfc_ext[c, 48*oh3 + 2*ow3, o] = fc_w[o, c*81 + oh3*9 + ow3], zero elsewhere.
    wfc = p["fc_w"].reshape(16, 16, 9, 9)                      # (o, c, oh3, ow3)
    buf = jnp.zeros((16, 16, 9, 48), jnp.float32).at[:, :, :, 0:17:2].set(wfc)
    wfc_ext = jnp.transpose(buf.reshape(16, 16, 432)[:, :, :_E3], (1, 2, 0))

    q1t = p["q1_w"].T                                          # (16+n_act, 64)
    return {
        "w1_taps": tapize(p["c1_w"]), "b1": p["c1_b"].reshape(-1, 1),
        "w2_taps": tapize(p["c2_w"]), "b2": p["c2_b"].reshape(-1, 1),
        "w3_taps": tapize(p["c3_w"]), "b3": p["c3_b"].reshape(-1, 1),
        "wfc_ext": wfc_ext, "fc_b": p["fc_b"].reshape(1, -1),
        "mu1_wt": p["mu1_w"].T, "mu1_b": p["mu1_b"].reshape(1, -1),
        "mu2_wt": p["mu2_w"].T, "mu2_b": p["mu2_b"].reshape(1, -1),
        "q1_wt_sh": q1t[:16], "q1_wt_mu": q1t[16:],
        "q1_b": p["q1_b"].reshape(1, -1),
        "q2_wt": p["q2_w"].T, "q2_b": p["q2_b"].reshape(1, -1),
    }


# ----------------------------------------------------------------------------
# Forward pass (mirrors ActorCritic.forward: returns Q of shape (B, 1))
# ----------------------------------------------------------------------------
def actor_critic_forward(prep, s):
    # reshape(): (3,96,96) -> (1,3,96,96)
    if s.ndim == 3:
        s = s.reshape(1, 3, 96, 96)
    B = s.shape[0]

    # One-time cheap relayout of the raw input into 16 stride-4 phases:
    # xph[b, pi*4+pj, c, 24*r + t] = s[b, c, 4*r + pi, 4*t + pj]
    xp = s.reshape(B, 3, 24, 4, 24, 4)
    xph = jnp.transpose(xp, (0, 3, 5, 1, 2, 4)).reshape(B, 16, 3, 576)

    weights = (prep["w1_taps"], prep["b1"], prep["w2_taps"], prep["b2"],
               prep["w3_taps"], prep["b3"], prep["wfc_ext"], prep["fc_b"],
               prep["mu1_wt"], prep["mu1_b"], prep["mu2_wt"], prep["mu2_b"],
               prep["q1_wt_sh"], prep["q1_wt_mu"], prep["q1_b"],
               prep["q2_wt"], prep["q2_b"])

    def resident(arr):  # whole-array block, same block at every grid step
        nd = arr.ndim
        return pl.BlockSpec(arr.shape, lambda b, nd=nd: (0,) * nd)

    in_specs = [pl.BlockSpec((1, 16, 3, 576), lambda b: (b, 0, 0, 0))]
    in_specs += [resident(w) for w in weights]

    q = pl.pallas_call(
        _fused_kernel,
        out_shape=jax.ShapeDtypeStruct((B, 1, 1), jnp.float32),
        grid_spec=pltpu.PrefetchScalarGridSpec(
            num_scalar_prefetch=0,
            grid=(B,),
            in_specs=in_specs,
            out_specs=pl.BlockSpec((1, 1, 1), lambda b: (b, 0, 0)),
        ),
        compiler_params=pltpu.CompilerParams(
            dimension_semantics=("parallel",)),
    )(xph, *weights)
    return q.reshape(B, 1)


# ----------------------------------------------------------------------------
# Pure-JAX reference for correctness checking
# ----------------------------------------------------------------------------
def reference_forward(params, s):
    if s.ndim == 3:
        s = s.reshape(1, 3, 96, 96)

    def conv(x, w, b, stride):
        y = jax.lax.conv_general_dilated(
            x, w, window_strides=(stride, stride), padding="VALID",
            dimension_numbers=("NCHW", "OIHW", "NCHW"))
        return y + b.reshape(1, -1, 1, 1)

    def leaky(v):
        return jnp.where(v >= 0, v, 0.01 * v)

    x = leaky(conv(s, params["c1_w"], params["c1_b"], 4))
    x = leaky(conv(x, params["c2_w"], params["c2_b"], 2))
    x = leaky(conv(x, params["c3_w"], params["c3_b"], 1))
    B = x.shape[0]
    x = x.reshape(B, -1)
    sh = jax.nn.sigmoid(x @ params["fc_w"].T + params["fc_b"])
    mu = leaky(sh @ params["mu1_w"].T + params["mu1_b"])
    mu = jnp.tanh(mu @ params["mu2_w"].T + params["mu2_b"])
    qin = jnp.concatenate([sh, mu], axis=1)
    q = leaky(qin @ params["q1_w"].T + params["q1_b"])
    return q @ params["q2_w"].T + params["q2_b"]


if __name__ == "__main__":
    key = jax.random.PRNGKey(0)
    pkey, skey = jax.random.split(key)
    params = init_params(pkey, n_actions=2)
    prep = prepare_params(params)   # one-time reorders, outside the hot path

    # Spatial size 96 is fixed by the module's conv arithmetic (Linear(16*9*9, 16)).
    s = jax.random.uniform(skey, (2, 3, 96, 96), jnp.float32)

    fwd = jax.jit(actor_critic_forward)
    q = jax.block_until_ready(fwd(prep, s))
    assert q.shape == (2, 1) and q.dtype == jnp.float32

    q_ref = reference_forward(params, s)
    max_err = float(jnp.max(jnp.abs(q - q_ref)))
    # All-f32 path: tolerance tightened (was 2e-2) per the correctness review.
    assert max_err < 1e-3, f"mismatch vs pure-JAX reference: {max_err}"

    print("KERNEL_OK")
</pallas_src>

<mosaic_0001>
module attributes {stable_mosaic.version = 11 : i64} {
  func.func @_fused_kernel(%arg0: i32, %arg1: memref<1x16x3x576xf32, #tpu.memory_space<vmem>>, %arg2: memref<64x8x3xf32, #tpu.memory_space<vmem>>, %arg3: memref<8x1xf32, #tpu.memory_space<vmem>>, %arg4: memref<16x16x8xf32, #tpu.memory_space<vmem>>, %arg5: memref<16x1xf32, #tpu.memory_space<vmem>>, %arg6: memref<4x16x16xf32, #tpu.memory_space<vmem>>, %arg7: memref<16x1xf32, #tpu.memory_space<vmem>>, %arg8: memref<16x401x16xf32, #tpu.memory_space<vmem>>, %arg9: memref<1x16xf32, #tpu.memory_space<vmem>>, %arg10: memref<16x64xf32, #tpu.memory_space<vmem>>, %arg11: memref<1x64xf32, #tpu.memory_space<vmem>>, %arg12: memref<64x2xf32, #tpu.memory_space<vmem>>, %arg13: memref<1x2xf32, #tpu.memory_space<vmem>>, %arg14: memref<16x64xf32, #tpu.memory_space<vmem>>, %arg15: memref<2x64xf32, #tpu.memory_space<vmem>>, %arg16: memref<1x64xf32, #tpu.memory_space<vmem>>, %arg17: memref<64x1xf32, #tpu.memory_space<vmem>>, %arg18: memref<1x1xf32, #tpu.memory_space<vmem>>, %arg19: memref<1x1x1xf32, #tpu.memory_space<vmem>>) attributes {dimension_semantics = [#tpu.dimension_semantics<parallel>], iteration_bounds = array<i64: 2>, scalar_prefetch = 0 : i64, scratch_operands = 0 : i64, tpu.core_type = #tpu.core_type<tc>, window_params = [{transform_indices = @transform_0, window_bounds = array<i64: 1, 16, 3, 576>}, {pipeline_mode = #tpu.pipeline_mode<synchronous>, transform_indices = @transform_1, window_bounds = array<i64: 64, 8, 3>}, {pipeline_mode = #tpu.pipeline_mode<synchronous>, transform_indices = @transform_2, window_bounds = array<i64: 8, 1>}, {pipeline_mode = #tpu.pipeline_mode<synchronous>, transform_indices = @transform_3, window_bounds = array<i64: 16, 16, 8>}, {pipeline_mode = #tpu.pipeline_mode<synchronous>, transform_indices = @transform_4, window_bounds = array<i64: 16, 1>}, {pipeline_mode = #tpu.pipeline_mode<synchronous>, transform_indices = @transform_5, window_bounds = array<i64: 4, 16, 16>}, {pipeline_mode = #tpu.pipeline_mode<synchronous>, transform_indices = @transform_6, window_bounds = array<i64: 16, 1>}, {pipeline_mode = #tpu.pipeline_mode<synchronous>, transform_indices = @transform_7, window_bounds = array<i64: 16, 401, 16>}, {pipeline_mode = #tpu.pipeline_mode<synchronous>, transform_indices = @transform_8, window_bounds = array<i64: 1, 16>}, {pipeline_mode = #tpu.pipeline_mode<synchronous>, transform_indices = @transform_9, window_bounds = array<i64: 16, 64>}, {pipeline_mode = #tpu.pipeline_mode<synchronous>, transform_indices = @transform_10, window_bounds = array<i64: 1, 64>}, {pipeline_mode = #tpu.pipeline_mode<synchronous>, transform_indices = @transform_11, window_bounds = array<i64: 64, 2>}, {pipeline_mode = #tpu.pipeline_mode<synchronous>, transform_indices = @transform_12, window_bounds = array<i64: 1, 2>}, {pipeline_mode = #tpu.pipeline_mode<synchronous>, transform_indices = @transform_13, window_bounds = array<i64: 16, 64>}, {pipeline_mode = #tpu.pipeline_mode<synchronous>, transform_indices = @transform_14, window_bounds = array<i64: 2, 64>}, {pipeline_mode = #tpu.pipeline_mode<synchronous>, transform_indices = @transform_15, window_bounds = array<i64: 1, 64>}, {pipeline_mode = #tpu.pipeline_mode<synchronous>, transform_indices = @transform_16, window_bounds = array<i64: 64, 1>}, {pipeline_mode = #tpu.pipeline_mode<synchronous>, transform_indices = @transform_17, window_bounds = array<i64: 1, 1>}, {transform_indices = @transform_18, window_bounds = array<i64: 1, 1, 1>}]} {
    %cst = arith.constant 0.000000e+00 : f32
    %0 = vector.broadcast %cst : f32 to vector<8x551xf32>
    %c0 = arith.constant 0 : index
    %c0_0 = arith.constant 0 : index
    %c0_1 = arith.constant 0 : index
    %c0_2 = arith.constant 0 : index
    %1 = vector.load %arg1[%c0, %c0_0, %c0_1, %c0_2] : memref<1x16x3x576xf32, #tpu.memory_space<vmem>>, vector<1x1x3x551xf32>
    %2 = vector.shape_cast %1 : vector<1x1x3x551xf32> to vector<3x551xf32>
    %c0_3 = arith.constant 0 : index
    %c0_4 = arith.constant 0 : index
    %c0_5 = arith.constant 0 : index
    %3 = vector.load %arg2[%c0_3, %c0_4, %c0_5] : memref<64x8x3xf32, #tpu.memory_space<vmem>>, vector<1x8x3xf32>
    %4 = vector.shape_cast %3 : vector<1x8x3xf32> to vector<8x3xf32>
    %cst_6 = arith.constant dense<0.000000e+00> : vector<8x551xf32>
    %5 = tpu.matmul %4, %2, %cst_6 {dimension_numbers = #tpu.dot_dimension_numbers<[1], [0], [0], [1], [0, 0, 1, 1], [], []>} : vector<8x3xf32>, vector<3x551xf32>, vector<8x551xf32> -> vector<8x551xf32>
    %6 = arith.addf %0, %5 : vector<8x551xf32>
    %c0_7 = arith.constant 0 : index
    %c1 = arith.constant 1 : index
    %c0_8 = arith.constant 0 : index
    %c0_9 = arith.constant 0 : index
    %7 = vector.load %arg1[%c0_7, %c1, %c0_8, %c0_9] : memref<1x16x3x576xf32, #tpu.memory_space<vmem>>, vector<1x1x3x551xf32>
    %8 = vector.shape_cast %7 : vector<1x1x3x551xf32> to vector<3x551xf32>
    %c1_10 = arith.constant 1 : index
    %c0_11 = arith.constant 0 : index
    %c0_12 = arith.constant 0 : index
    %9 = vector.load %arg2[%c1_10, %c0_11, %c0_12] : memref<64x8x3xf32, #tpu.memory_space<vmem>>, vector<1x8x3xf32>
    %10 = vector.shape_cast %9 : vector<1x8x3xf32> to vector<8x3xf32>
    %cst_13 = arith.constant dense<0.000000e+00> : vector<8x551xf32>
    %11 = tpu.matmul %10, %8, %cst_13 {dimension_numbers = #tpu.dot_dimension_numbers<[1], [0], [0], [1], [0, 0, 1, 1], [], []>} : vector<8x3xf32>, vector<3x551xf32>, vector<8x551xf32> -> vector<8x551xf32>
    %12 = arith.addf %6, %11 : vector<8x551xf32>
    %c0_14 = arith.constant 0 : index
    %c2 = arith.constant 2 : index
    %c0_15 = arith.constant 0 : index
    %c0_16 = arith.constant 0 : index
    %13 = vector.load %arg1[%c0_14, %c2, %c0_15, %c0_16] : memref<1x16x3x576xf32, #tpu.memory_space<vmem>>, vector<1x1x3x551xf32>
    %14 = vector.shape_cast %13 : vector<1x1x3x551xf32> to vector<3x551xf32>
    %c2_17 = arith.constant 2 : index
    %c0_18 = arith.constant 0 : index
    %c0_19 = arith.constant 0 : index
    %15 = vector.load %arg2[%c2_17, %c0_18, %c0_19] : memref<64x8x3xf32, #tpu.memory_space<vmem>>, vector<1x8x3xf32>
    %16 = vector.shape_cast %15 : vector<1x8x3xf32> to vector<8x3xf32>
    %cst_20 = arith.constant dense<0.000000e+00> : vector<8x551xf32>
    %17 = tpu.matmul %16, %14, %cst_20 {dimension_numbers = #tpu.dot_dimension_numbers<[1], [0], [0], [1], [0, 0, 1, 1], [], []>} : vector<8x3xf32>, vector<3x551xf32>, vector<8x551xf32> -> vector<8x551xf32>
    %18 = arith.addf %12, %17 : vector<8x551xf32>
    %c0_21 = arith.constant 0 : index
    %c3 = arith.constant 3 : index
    %c0_22 = arith.constant 0 : index
    %c0_23 = arith.constant 0 : index
    %19 = vector.load %arg1[%c0_21, %c3, %c0_22, %c0_23] : memref<1x16x3x576xf32, #tpu.memory_space<vmem>>, vector<1x1x3x551xf32>
    %20 = vector.shape_cast %19 : vector<1x1x3x551xf32> to vector<3x551xf32>
    %c3_24 = arith.constant 3 : index
    %c0_25 = arith.constant 0 : index
    %c0_26 = arith.constant 0 : index
    %21 = vector.load %arg2[%c3_24, %c0_25, %c0_26] : memref<64x8x3xf32, #tpu.memory_space<vmem>>, vector<1x8x3xf32>
    %22 = vector.shape_cast %21 : vector<1x8x3xf32> to vector<8x3xf32>
    %cst_27 = arith.constant dense<0.000000e+00> : vector<8x551xf32>
    %23 = tpu.matmul %22, %20, %cst_27 {dimension_numbers = #tpu.dot_dimension_numbers<[1], [0], [0], [1], [0, 0, 1, 1], [], []>} : vector<8x3xf32>, vector<3x551xf32>, vector<8x551xf32> -> vector<8x551xf32>
    %24 = arith.addf %18, %23 : vector<8x551xf32>
    %c0_28 = arith.constant 0 : index
    %c0_29 = arith.constant 0 : index
    %c0_30 = arith.constant 0 : index
    %c1_31 = arith.constant 1 : index
    %25 = vector.load %arg1[%c0_28, %c0_29, %c0_30, %c1_31] : memref<1x16x3x576xf32, #tpu.memory_space<vmem>>, vector<1x1x3x551xf32>
    %26 = vector.shape_cast %25 : vector<1x1x3x551xf32> to vector<3x551xf32>
    %c4 = arith.constant 4 : index
    %c0_32 = arith.constant 0 : index
    %c0_33 = arith.constant 0 : index
    %27 = vector.load %arg2[%c4, %c0_32, %c0_33] : memref<64x8x3xf32, #tpu.memory_space<vmem>>, vector<1x8x3xf32>
    %28 = vector.shape_cast %27 : vector<1x8x3xf32> to vector<8x3xf32>
    %cst_34 = arith.constant dense<0.000000e+00> : vector<8x551xf32>
    %29 = tpu.matmul %28, %26, %cst_34 {dimension_numbers = #tpu.dot_dimension_numbers<[1], [0], [0], [1], [0, 0, 1, 1], [], []>} : vector<8x3xf32>, vector<3x551xf32>, vector<8x551xf32> -> vector<8x551xf32>
    %30 = arith.addf %24, %29 : vector<8x551xf32>
    %c0_35 = arith.constant 0 : index
    %c1_36 = arith.constant 1 : index
    %c0_37 = arith.constant 0 : index
    %c1_38 = arith.constant 1 : index
    %31 = vector.load %arg1[%c0_35, %c1_36, %c0_37, %c1_38] : memref<1x16x3x576xf32, #tpu.memory_space<vmem>>, vector<1x1x3x551xf32>
    %32 = vector.shape_cast %31 : vector<1x1x3x551xf32> to vector<3x551xf32>
    %c5 = arith.constant 5 : index
    %c0_39 = arith.constant 0 : index
    %c0_40 = arith.constant 0 : index
    %33 = vector.load %arg2[%c5, %c0_39, %c0_40] : memref<64x8x3xf32, #tpu.memory_space<vmem>>, vector<1x8x3xf32>
    %34 = vector.shape_cast %33 : vector<1x8x3xf32> to vector<8x3xf32>
    %cst_41 = arith.constant dense<0.000000e+00> : vector<8x551xf32>
    %35 = tpu.matmul %34, %32, %cst_41 {dimension_numbers = #tpu.dot_dimension_numbers<[1], [0], [0], [1], [0, 0, 1, 1], [], []>} : vector<8x3xf32>, vector<3x551xf32>, vector<8x551xf32> -> vector<8x551xf32>
    %36 = arith.addf %30, %35 : vector<8x551xf32>
    %c0_42 = arith.constant 0 : index
    %c2_43 = arith.constant 2 : index
    %c0_44 = arith.constant 0 : index
    %c1_45 = arith.constant 1 : index
    %37 = vector.load %arg1[%c0_42, %c2_43, %c0_44, %c1_45] : memref<1x16x3x576xf32, #tpu.memory_space<vmem>>, vector<1x1x3x551xf32>
    %38 = vector.shape_cast %37 : vector<1x1x3x551xf32> to vector<3x551xf32>
    %c6 = arith.constant 6 : index
    %c0_46 = arith.constant 0 : index
    %c0_47 = arith.constant 0 : index
    %39 = vector.load %arg2[%c6, %c0_46, %c0_47] : memref<64x8x3xf32, #tpu.memory_space<vmem>>, vector<1x8x3xf32>
    %40 = vector.shape_cast %39 : vector<1x8x3xf32> to vector<8x3xf32>
    %cst_48 = arith.constant dense<0.000000e+00> : vector<8x551xf32>
    %41 = tpu.matmul %40, %38, %cst_48 {dimension_numbers = #tpu.dot_dimension_numbers<[1], [0], [0], [1], [0, 0, 1, 1], [], []>} : vector<8x3xf32>, vector<3x551xf32>, vector<8x551xf32> -> vector<8x551xf32>
    %42 = arith.addf %36, %41 : vector<8x551xf32>
    %c0_49 = arith.constant 0 : index
    %c3_50 = arith.constant 3 : index
    %c0_51 = arith.constant 0 : index
    %c1_52 = arith.constant 1 : index
    %43 = vector.load %arg1[%c0_49, %c3_50, %c0_51, %c1_52] : memref<1x16x3x576xf32, #tpu.memory_space<vmem>>, vector<1x1x3x551xf32>
    %44 = vector.shape_cast %43 : vector<1x1x3x551xf32> to vector<3x551xf32>
    %c7 = arith.constant 7 : index
    %c0_53 = arith.constant 0 : index
    %c0_54 = arith.constant 0 : index
    %45 = vector.load %arg2[%c7, %c0_53, %c0_54] : memref<64x8x3xf32, #tpu.memory_space<vmem>>, vector<1x8x3xf32>
    %46 = vector.shape_cast %45 : vector<1x8x3xf32> to vector<8x3xf32>
    %cst_55 = arith.constant dense<0.000000e+00> : vector<8x551xf32>
    %47 = tpu.matmul %46, %44, %cst_55 {dimension_numbers = #tpu.dot_dimension_numbers<[1], [0], [0], [1], [0, 0, 1, 1], [], []>} : vector<8x3xf32>, vector<3x551xf32>, vector<8x551xf32> -> vector<8x551xf32>
    %48 = arith.addf %42, %47 : vector<8x551xf32>
    %c0_56 = arith.constant 0 : index
    %c4_57 = arith.constant 4 : index
    %c0_58 = arith.constant 0 : index
    %c0_59 = arith.constant 0 : index
    %49 = vector.load %arg1[%c0_56, %c4_57, %c0_58, %c0_59] : memref<1x16x3x576xf32, #tpu.memory_space<vmem>>, vector<1x1x3x551xf32>
    %50 = vector.shape_cast %49 : vector<1x1x3x551xf32> to vector<3x551xf32>
    %c8 = arith.constant 8 : index
    %c0_60 = arith.constant 0 : index
    %c0_61 = arith.constant 0 : index
    %51 = vector.load %arg2[%c8, %c0_60, %c0_61] : memref<64x8x3xf32, #tpu.memory_space<vmem>>, vector<1x8x3xf32>
    %52 = vector.shape_cast %51 : vector<1x8x3xf32> to vector<8x3xf32>
    %cst_62 = arith.constant dense<0.000000e+00> : vector<8x551xf32>
    %53 = tpu.matmul %52, %50, %cst_62 {dimension_numbers = #tpu.dot_dimension_numbers<[1], [0], [0], [1], [0, 0, 1, 1], [], []>} : vector<8x3xf32>, vector<3x551xf32>, vector<8x551xf32> -> vector<8x551xf32>
    %54 = arith.addf %48, %53 : vector<8x551xf32>
    %c0_63 = arith.constant 0 : index
    %c5_64 = arith.constant 5 : index
    %c0_65 = arith.constant 0 : index
    %c0_66 = arith.constant 0 : index
    %55 = vector.load %arg1[%c0_63, %c5_64, %c0_65, %c0_66] : memref<1x16x3x576xf32, #tpu.memory_space<vmem>>, vector<1x1x3x551xf32>
    %56 = vector.shape_cast %55 : vector<1x1x3x551xf32> to vector<3x551xf32>
    %c9 = arith.constant 9 : index
    %c0_67 = arith.constant 0 : index
    %c0_68 = arith.constant 0 : index
    %57 = vector.load %arg2[%c9, %c0_67, %c0_68] : memref<64x8x3xf32, #tpu.memory_space<vmem>>, vector<1x8x3xf32>
    %58 = vector.shape_cast %57 : vector<1x8x3xf32> to vector<8x3xf32>
    %cst_69 = arith.constant dense<0.000000e+00> : vector<8x551xf32>
    %59 = tpu.matmul %58, %56, %cst_69 {dimension_numbers = #tpu.dot_dimension_numbers<[1], [0], [0], [1], [0, 0, 1, 1], [], []>} : vector<8x3xf32>, vector<3x551xf32>, vector<8x551xf32> -> vector<8x551xf32>
    %60 = arith.addf %54, %59 : vector<8x551xf32>
    %c0_70 = arith.constant 0 : index
    %c6_71 = arith.constant 6 : index
    %c0_72 = arith.constant 0 : index
    %c0_73 = arith.constant 0 : index
    %61 = vector.load %arg1[%c0_70, %c6_71, %c0_72, %c0_73] : memref<1x16x3x576xf32, #tpu.memory_space<vmem>>, vector<1x1x3x551xf32>
    %62 = vector.shape_cast %61 : vector<1x1x3x551xf32> to vector<3x551xf32>
    %c10 = arith.constant 10 : index
    %c0_74 = arith.constant 0 : index
    %c0_75 = arith.constant 0 : index
    %63 = vector.load %arg2[%c10, %c0_74, %c0_75] : memref<64x8x3xf32, #tpu.memory_space<vmem>>, vector<1x8x3xf32>
    %64 = vector.shape_cast %63 : vector<1x8x3xf32> to vector<8x3xf32>
    %cst_76 = arith.constant dense<0.000000e+00> : vector<8x551xf32>
    %65 = tpu.matmul %64, %62, %cst_76 {dimension_numbers = #tpu.dot_dimension_numbers<[1], [0], [0], [1], [0, 0, 1, 1], [], []>} : vector<8x3xf32>, vector<3x551xf32>, vector<8x551xf32> -> vector<8x551xf32>
    %66 = arith.addf %60, %65 : vector<8x551xf32>
    %c0_77 = arith.constant 0 : index
    %c7_78 = arith.constant 7 : index
    %c0_79 = arith.constant 0 : index
    %c0_80 = arith.constant 0 : index
    %67 = vector.load %arg1[%c0_77, %c7_78, %c0_79, %c0_80] : memref<1x16x3x576xf32, #tpu.memory_space<vmem>>, vector<1x1x3x551xf32>
    %68 = vector.shape_cast %67 : vector<1x1x3x551xf32> to vector<3x551xf32>
    %c11 = arith.constant 11 : index
    %c0_81 = arith.constant 0 : index
    %c0_82 = arith.constant 0 : index
    %69 = vector.load %arg2[%c11, %c0_81, %c0_82] : memref<64x8x3xf32, #tpu.memory_space<vmem>>, vector<1x8x3xf32>
    %70 = vector.shape_cast %69 : vector<1x8x3xf32> to vector<8x3xf32>
    %cst_83 = arith.constant dense<0.000000e+00> : vector<8x551xf32>
    %71 = tpu.matmul %70, %68, %cst_83 {dimension_numbers = #tpu.dot_dimension_numbers<[1], [0], [0], [1], [0, 0, 1, 1], [], []>} : vector<8x3xf32>, vector<3x551xf32>, vector<8x551xf32> -> vector<8x551xf32>
    %72 = arith.addf %66, %71 : vector<8x551xf32>
    %c0_84 = arith.constant 0 : index
    %c4_85 = arith.constant 4 : index
    %c0_86 = arith.constant 0 : index
    %c1_87 = arith.constant 1 : index
    %73 = vector.load %arg1[%c0_84, %c4_85, %c0_86, %c1_87] : memref<1x16x3x576xf32, #tpu.memory_space<vmem>>, vector<1x1x3x551xf32>
    %74 = vector.shape_cast %73 : vector<1x1x3x551xf32> to vector<3x551xf32>
    %c12 = arith.constant 12 : index
    %c0_88 = arith.constant 0 : index
    %c0_89 = arith.constant 0 : index
    %75 = vector.load %arg2[%c12, %c0_88, %c0_89] : memref<64x8x3xf32, #tpu.memory_space<vmem>>, vector<1x8x3xf32>
    %76 = vector.shape_cast %75 : vector<1x8x3xf32> to vector<8x3xf32>
    %cst_90 = arith.constant dense<0.000000e+00> : vector<8x551xf32>
    %77 = tpu.matmul %76, %74, %cst_90 {dimension_numbers = #tpu.dot_dimension_numbers<[1], [0], [0], [1], [0, 0, 1, 1], [], []>} : vector<8x3xf32>, vector<3x551xf32>, vector<8x551xf32> -> vector<8x551xf32>
    %78 = arith.addf %72, %77 : vector<8x551xf32>
    %c0_91 = arith.constant 0 : index
    %c5_92 = arith.constant 5 : index
    %c0_93 = arith.constant 0 : index
    %c1_94 = arith.constant 1 : index
    %79 = vector.load %arg1[%c0_91, %c5_92, %c0_93, %c1_94] : memref<1x16x3x576xf32, #tpu.memory_space<vmem>>, vector<1x1x3x551xf32>
    %80 = vector.shape_cast %79 : vector<1x1x3x551xf32> to vector<3x551xf32>
    %c13 = arith.constant 13 : index
    %c0_95 = arith.constant 0 : index
    %c0_96 = arith.constant 0 : index
    %81 = vector.load %arg2[%c13, %c0_95, %c0_96] : memref<64x8x3xf32, #tpu.memory_space<vmem>>, vector<1x8x3xf32>
    %82 = vector.shape_cast %81 : vector<1x8x3xf32> to vector<8x3xf32>
    %cst_97 = arith.constant dense<0.000000e+00> : vector<8x551xf32>
    %83 = tpu.matmul %82, %80, %cst_97 {dimension_numbers = #tpu.dot_dimension_numbers<[1], [0], [0], [1], [0, 0, 1, 1], [], []>} : vector<8x3xf32>, vector<3x551xf32>, vector<8x551xf32> -> vector<8x551xf32>
    %84 = arith.addf %78, %83 : vector<8x551xf32>
    %c0_98 = arith.constant 0 : index
    %c6_99 = arith.constant 6 : index
    %c0_100 = arith.constant 0 : index
    %c1_101 = arith.constant 1 : index
    %85 = vector.load %arg1[%c0_98, %c6_99, %c0_100, %c1_101] : memref<1x16x3x576xf32, #tpu.memory_space<vmem>>, vector<1x1x3x551xf32>
    %86 = vector.shape_cast %85 : vector<1x1x3x551xf32> to vector<3x551xf32>
    %c14 = arith.constant 14 : index
    %c0_102 = arith.constant 0 : index
    %c0_103 = arith.constant 0 : index
    %87 = vector.load %arg2[%c14, %c0_102, %c0_103] : memref<64x8x3xf32, #tpu.memory_space<vmem>>, vector<1x8x3xf32>
    %88 = vector.shape_cast %87 : vector<1x8x3xf32> to vector<8x3xf32>
    %cst_104 = arith.constant dense<0.000000e+00> : vector<8x551xf32>
    %89 = tpu.matmul %88, %86, %cst_104 {dimension_numbers = #tpu.dot_dimension_numbers<[1], [0], [0], [1], [0, 0, 1, 1], [], []>} : vector<8x3xf32>, vector<3x551xf32>, vector<8x551xf32> -> vector<8x551xf32>
    %90 = arith.addf %84, %89 : vector<8x551xf32>
    %c0_105 = arith.constant 0 : index
    %c7_106 = arith.constant 7 : index
    %c0_107 = arith.constant 0 : index
    %c1_108 = arith.constant 1 : index
    %91 = vector.load %arg1[%c0_105, %c7_106, %c0_107, %c1_108] : memref<1x16x3x576xf32, #tpu.memory_space<vmem>>, vector<1x1x3x551xf32>
    %92 = vector.shape_cast %91 : vector<1x1x3x551xf32> to vector<3x551xf32>
    %c15 = arith.constant 15 : index
    %c0_109 = arith.constant 0 : index
    %c0_110 = arith.constant 0 : index
    %93 = vector.load %arg2[%c15, %c0_109, %c0_110] : memref<64x8x3xf32, #tpu.memory_space<vmem>>, vector<1x8x3xf32>
    %94 = vector.shape_cast %93 : vector<1x8x3xf32> to vector<8x3xf32>
    %cst_111 = arith.constant dense<0.000000e+00> : vector<8x551xf32>
    %95 = tpu.matmul %94, %92, %cst_111 {dimension_numbers = #tpu.dot_dimension_numbers<[1], [0], [0], [1], [0, 0, 1, 1], [], []>} : vector<8x3xf32>, vector<3x551xf32>, vector<8x551xf32> -> vector<8x551xf32>
    %96 = arith.addf %90, %95 : vector<8x551xf32>
    %c0_112 = arith.constant 0 : index
    %c8_113 = arith.constant 8 : index
    %c0_114 = arith.constant 0 : index
    %c0_115 = arith.constant 0 : index
    %97 = vector.load %arg1[%c0_112, %c8_113, %c0_114, %c0_115] : memref<1x16x3x576xf32, #tpu.memory_space<vmem>>, vector<1x1x3x551xf32>
    %98 = vector.shape_cast %97 : vector<1x1x3x551xf32> to vector<3x551xf32>
    %c16 = arith.constant 16 : index
    %c0_116 = arith.constant 0 : index
    %c0_117 = arith.constant 0 : index
    %99 = vector.load %arg2[%c16, %c0_116, %c0_117] : memref<64x8x3xf32, #tpu.memory_space<vmem>>, vector<1x8x3xf32>
    %100 = vector.shape_cast %99 : vector<1x8x3xf32> to vector<8x3xf32>
    %cst_118 = arith.constant dense<0.000000e+00> : vector<8x551xf32>
    %101 = tpu.matmul %100, %98, %cst_118 {dimension_numbers = #tpu.dot_dimension_numbers<[1], [0], [0], [1], [0, 0, 1, 1], [], []>} : vector<8x3xf32>, vector<3x551xf32>, vector<8x551xf32> -> vector<8x551xf32>
    %102 = arith.addf %96, %101 : vector<8x551xf32>
    %c0_119 = arith.constant 0 : index
    %c9_120 = arith.constant 9 : index
    %c0_121 = arith.constant 0 : index
    %c0_122 = arith.constant 0 : index
    %103 = vector.load %arg1[%c0_119, %c9_120, %c0_121, %c0_122] : memref<1x16x3x576xf32, #tpu.memory_space<vmem>>, vector<1x1x3x551xf32>
    %104 = vector.shape_cast %103 : vector<1x1x3x551xf32> to vector<3x551xf32>
    %c17 = arith.constant 17 : index
    %c0_123 = arith.constant 0 : index
    %c0_124 = arith.constant 0 : index
    %105 = vector.load %arg2[%c17, %c0_123, %c0_124] : memref<64x8x3xf32, #tpu.memory_space<vmem>>, vector<1x8x3xf32>
    %106 = vector.shape_cast %105 : vector<1x8x3xf32> to vector<8x3xf32>
    %cst_125 = arith.constant dense<0.000000e+00> : vector<8x551xf32>
    %107 = tpu.matmul %106, %104, %cst_125 {dimension_numbers = #tpu.dot_dimension_numbers<[1], [0], [0], [1], [0, 0, 1, 1], [], []>} : vector<8x3xf32>, vector<3x551xf32>, vector<8x551xf32> -> vector<8x551xf32>
    %108 = arith.addf %102, %107 : vector<8x551xf32>
    %c0_126 = arith.constant 0 : index
    %c10_127 = arith.constant 10 : index
    %c0_128 = arith.constant 0 : index
    %c0_129 = arith.constant 0 : index
    %109 = vector.load %arg1[%c0_126, %c10_127, %c0_128, %c0_129] : memref<1x16x3x576xf32, #tpu.memory_space<vmem>>, vector<1x1x3x551xf32>
    %110 = vector.shape_cast %109 : vector<1x1x3x551xf32> to vector<3x551xf32>
    %c18 = arith.constant 18 : index
    %c0_130 = arith.constant 0 : index
    %c0_131 = arith.constant 0 : index
    %111 = vector.load %arg2[%c18, %c0_130, %c0_131] : memref<64x8x3xf32, #tpu.memory_space<vmem>>, vector<1x8x3xf32>
    %112 = vector.shape_cast %111 : vector<1x8x3xf32> to vector<8x3xf32>
    %cst_132 = arith.constant dense<0.000000e+00> : vector<8x551xf32>
    %113 = tpu.matmul %112, %110, %cst_132 {dimension_numbers = #tpu.dot_dimension_numbers<[1], [0], [0], [1], [0, 0, 1, 1], [], []>} : vector<8x3xf32>, vector<3x551xf32>, vector<8x551xf32> -> vector<8x551xf32>
    %114 = arith.addf %108, %113 : vector<8x551xf32>
    %c0_133 = arith.constant 0 : index
    %c11_134 = arith.constant 11 : index
    %c0_135 = arith.constant 0 : index
    %c0_136 = arith.constant 0 : index
    %115 = vector.load %arg1[%c0_133, %c11_134, %c0_135, %c0_136] : memref<1x16x3x576xf32, #tpu.memory_space<vmem>>, vector<1x1x3x551xf32>
    %116 = vector.shape_cast %115 : vector<1x1x3x551xf32> to vector<3x551xf32>
    %c19 = arith.constant 19 : index
    %c0_137 = arith.constant 0 : index
    %c0_138 = arith.constant 0 : index
    %117 = vector.load %arg2[%c19, %c0_137, %c0_138] : memref<64x8x3xf32, #tpu.memory_space<vmem>>, vector<1x8x3xf32>
    %118 = vector.shape_cast %117 : vector<1x8x3xf32> to vector<8x3xf32>
    %cst_139 = arith.constant dense<0.000000e+00> : vector<8x551xf32>
    %119 = tpu.matmul %118, %116, %cst_139 {dimension_numbers = #tpu.dot_dimension_numbers<[1], [0], [0], [1], [0, 0, 1, 1], [], []>} : vector<8x3xf32>, vector<3x551xf32>, vector<8x551xf32> -> vector<8x551xf32>
    %120 = arith.addf %114, %119 : vector<8x551xf32>
    %c0_140 = arith.constant 0 : index
    %c8_141 = arith.constant 8 : index
    %c0_142 = arith.constant 0 : index
    %c1_143 = arith.constant 1 : index
    %121 = vector.load %arg1[%c0_140, %c8_141, %c0_142, %c1_143] : memref<1x16x3x576xf32, #tpu.memory_space<vmem>>, vector<1x1x3x551xf32>
    %122 = vector.shape_cast %121 : vector<1x1x3x551xf32> to vector<3x551xf32>
    %c20 = arith.constant 20 : index
    %c0_144 = arith.constant 0 : index
    %c0_145 = arith.constant 0 : index
    %123 = vector.load %arg2[%c20, %c0_144, %c0_145] : memref<64x8x3xf32, #tpu.memory_space<vmem>>, vector<1x8x3xf32>
    %124 = vector.shape_cast %123 : vector<1x8x3xf32> to vector<8x3xf32>
    %cst_146 = arith.constant dense<0.000000e+00> : vector<8x551xf32>
    %125 = tpu.matmul %124, %122, %cst_146 {dimension_numbers = #tpu.dot_dimension_numbers<[1], [0], [0], [1], [0, 0, 1, 1], [], []>} : vector<8x3xf32>, vector<3x551xf32>, vector<8x551xf32> -> vector<8x551xf32>
    %126 = arith.addf %120, %125 : vector<8x551xf32>
    %c0_147 = arith.constant 0 : index
    %c9_148 = arith.constant 9 : index
    %c0_149 = arith.constant 0 : index
    %c1_150 = arith.constant 1 : index
    %127 = vector.load %arg1[%c0_147, %c9_148, %c0_149, %c1_150] : memref<1x16x3x576xf32, #tpu.memory_space<vmem>>, vector<1x1x3x551xf32>
    %128 = vector.shape_cast %127 : vector<1x1x3x551xf32> to vector<3x551xf32>
    %c21 = arith.constant 21 : index
    %c0_151 = arith.constant 0 : index
    %c0_152 = arith.constant 0 : index
    %129 = vector.load %arg2[%c21, %c0_151, %c0_152] : memref<64x8x3xf32, #tpu.memory_space<vmem>>, vector<1x8x3xf32>
    %130 = vector.shape_cast %129 : vector<1x8x3xf32> to vector<8x3xf32>
    %cst_153 = arith.constant dense<0.000000e+00> : vector<8x551xf32>
    %131 = tpu.matmul %130, %128, %cst_153 {dimension_numbers = #tpu.dot_dimension_numbers<[1], [0], [0], [1], [0, 0, 1, 1], [], []>} : vector<8x3xf32>, vector<3x551xf32>, vector<8x551xf32> -> vector<8x551xf32>
    %132 = arith.addf %126, %131 : vector<8x551xf32>
    %c0_154 = arith.constant 0 : index
    %c10_155 = arith.constant 10 : index
    %c0_156 = arith.constant 0 : index
    %c1_157 = arith.constant 1 : index
    %133 = vector.load %arg1[%c0_154, %c10_155, %c0_156, %c1_157] : memref<1x16x3x576xf32, #tpu.memory_space<vmem>>, vector<1x1x3x551xf32>
    %134 = vector.shape_cast %133 : vector<1x1x3x551xf32> to vector<3x551xf32>
    %c22 = arith.constant 22 : index
    %c0_158 = arith.constant 0 : index
    %c0_159 = arith.constant 0 : index
    %135 = vector.load %arg2[%c22, %c0_158, %c0_159] : memref<64x8x3xf32, #tpu.memory_space<vmem>>, vector<1x8x3xf32>
    %136 = vector.shape_cast %135 : vector<1x8x3xf32> to vector<8x3xf32>
    %cst_160 = arith.constant dense<0.000000e+00> : vector<8x551xf32>
    %137 = tpu.matmul %136, %134, %cst_160 {dimension_numbers = #tpu.dot_dimension_numbers<[1], [0], [0], [1], [0, 0, 1, 1], [], []>} : vector<8x3xf32>, vector<3x551xf32>, vector<8x551xf32> -> vector<8x551xf32>
    %138 = arith.addf %132, %137 : vector<8x551xf32>
    %c0_161 = arith.constant 0 : index
    %c11_162 = arith.constant 11 : index
    %c0_163 = arith.constant 0 : index
    %c1_164 = arith.constant 1 : index
    %139 = vector.load %arg1[%c0_161, %c11_162, %c0_163, %c1_164] : memref<1x16x3x576xf32, #tpu.memory_space<vmem>>, vector<1x1x3x551xf32>
    %140 = vector.shape_cast %139 : vector<1x1x3x551xf32> to vector<3x551xf32>
    %c23 = arith.constant 23 : index
    %c0_165 = arith.constant 0 : index
    %c0_166 = arith.constant 0 : index
    %141 = vector.load %arg2[%c23, %c0_165, %c0_166] : memref<64x8x3xf32, #tpu.memory_space<vmem>>, vector<1x8x3xf32>
    %142 = vector.shape_cast %141 : vector<1x8x3xf32> to vector<8x3xf32>
    %cst_167 = arith.constant dense<0.000000e+00> : vector<8x551xf32>
    %143 = tpu.matmul %142, %140, %cst_167 {dimension_numbers = #tpu.dot_dimension_numbers<[1], [0], [0], [1], [0, 0, 1, 1], [], []>} : vector<8x3xf32>, vector<3x551xf32>, vector<8x551xf32> -> vector<8x551xf32>
    %144 = arith.addf %138, %143 : vector<8x551xf32>
    %c0_168 = arith.constant 0 : index
    %c12_169 = arith.constant 12 : index
    %c0_170 = arith.constant 0 : index
    %c0_171 = arith.constant 0 : index
    %145 = vector.load %arg1[%c0_168, %c12_169, %c0_170, %c0_171] : memref<1x16x3x576xf32, #tpu.memory_space<vmem>>, vector<1x1x3x551xf32>
    %146 = vector.shape_cast %145 : vector<1x1x3x551xf32> to vector<3x551xf32>
    %c24 = arith.constant 24 : index
    %c0_172 = arith.constant 0 : index
    %c0_173 = arith.constant 0 : index
    %147 = vector.load %arg2[%c24, %c0_172, %c0_173] : memref<64x8x3xf32, #tpu.memory_space<vmem>>, vector<1x8x3xf32>
    %148 = vector.shape_cast %147 : vector<1x8x3xf32> to vector<8x3xf32>
    %cst_174 = arith.constant dense<0.000000e+00> : vector<8x551xf32>
    %149 = tpu.matmul %148, %146, %cst_174 {dimension_numbers = #tpu.dot_dimension_numbers<[1], [0], [0], [1], [0, 0, 1, 1], [], []>} : vector<8x3xf32>, vector<3x551xf32>, vector<8x551xf32> -> vector<8x551xf32>
    %150 = arith.addf %144, %149 : vector<8x551xf32>
    %c0_175 = arith.constant 0 : index
    %c13_176 = arith.constant 13 : index
    %c0_177 = arith.constant 0 : index
    %c0_178 = arith.constant 0 : index
    %151 = vector.load %arg1[%c0_175, %c13_176, %c0_177, %c0_178] : memref<1x16x3x576xf32, #tpu.memory_space<vmem>>, vector<1x1x3x551xf32>
    %152 = vector.shape_cast %151 : vector<1x1x3x551xf32> to vector<3x551xf32>
    %c25 = arith.constant 25 : index
    %c0_179 = arith.constant 0 : index
    %c0_180 = arith.constant 0 : index
    %153 = vector.load %arg2[%c25, %c0_179, %c0_180] : memref<64x8x3xf32, #tpu.memory_space<vmem>>, vector<1x8x3xf32>
    %154 = vector.shape_cast %153 : vector<1x8x3xf32> to vector<8x3xf32>
    %cst_181 = arith.constant dense<0.000000e+00> : vector<8x551xf32>
    %155 = tpu.matmul %154, %152, %cst_181 {dimension_numbers = #tpu.dot_dimension_numbers<[1], [0], [0], [1], [0, 0, 1, 1], [], []>} : vector<8x3xf32>, vector<3x551xf32>, vector<8x551xf32> -> vector<8x551xf32>
    %156 = arith.addf %150, %155 : vector<8x551xf32>
    %c0_182 = arith.constant 0 : index
    %c14_183 = arith.constant 14 : index
    %c0_184 = arith.constant 0 : index
    %c0_185 = arith.constant 0 : index
    %157 = vector.load %arg1[%c0_182, %c14_183, %c0_184, %c0_185] : memref<1x16x3x576xf32, #tpu.memory_space<vmem>>, vector<1x1x3x551xf32>
    %158 = vector.shape_cast %157 : vector<1x1x3x551xf32> to vector<3x551xf32>
    %c26 = arith.constant 26 : index
    %c0_186 = arith.constant 0 : index
    %c0_187 = arith.constant 0 : index
    %159 = vector.load %arg2[%c26, %c0_186, %c0_187] : memref<64x8x3xf32, #tpu.memory_space<vmem>>, vector<1x8x3xf32>
    %160 = vector.shape_cast %159 : vector<1x8x3xf32> to vector<8x3xf32>
    %cst_188 = arith.constant dense<0.000000e+00> : vector<8x551xf32>
    %161 = tpu.matmul %160, %158, %cst_188 {dimension_numbers = #tpu.dot_dimension_numbers<[1], [0], [0], [1], [0, 0, 1, 1], [], []>} : vector<8x3xf32>, vector<3x551xf32>, vector<8x551xf32> -> vector<8x551xf32>
    %162 = arith.addf %156, %161 : vector<8x551xf32>
    %c0_189 = arith.constant 0 : index
    %c15_190 = arith.constant 15 : index
    %c0_191 = arith.constant 0 : index
    %c0_192 = arith.constant 0 : index
    %163 = vector.load %arg1[%c0_189, %c15_190, %c0_191, %c0_192] : memref<1x16x3x576xf32, #tpu.memory_space<vmem>>, vector<1x1x3x551xf32>
    %164 = vector.shape_cast %163 : vector<1x1x3x551xf32> to vector<3x551xf32>
    %c27 = arith.constant 27 : index
    %c0_193 = arith.constant 0 : index
    %c0_194 = arith.constant 0 : index
    %165 = vector.load %arg2[%c27, %c0_193, %c0_194] : memref<64x8x3xf32, #tpu.memory_space<vmem>>, vector<1x8x3xf32>
    %166 = vector.shape_cast %165 : vector<1x8x3xf32> to vector<8x3xf32>
    %cst_195 = arith.constant dense<0.000000e+00> : vector<8x551xf32>
    %167 = tpu.matmul %166, %164, %cst_195 {dimension_numbers = #tpu.dot_dimension_numbers<[1], [0], [0], [1], [0, 0, 1, 1], [], []>} : vector<8x3xf32>, vector<3x551xf32>, vector<8x551xf32> -> vector<8x551xf32>
    %168 = arith.addf %162, %167 : vector<8x551xf32>
    %c0_196 = arith.constant 0 : index
    %c12_197 = arith.constant 12 : index
    %c0_198 = arith.constant 0 : index
    %c1_199 = arith.constant 1 : index
    %169 = vector.load %arg1[%c0_196, %c12_197, %c0_198, %c1_199] : memref<1x16x3x576xf32, #tpu.memory_space<vmem>>, vector<1x1x3x551xf32>
    %170 = vector.shape_cast %169 : vector<1x1x3x551xf32> to vector<3x551xf32>
    %c28 = arith.constant 28 : index
    %c0_200 = arith.constant 0 : index
    %c0_201 = arith.constant 0 : index
    %171 = vector.load %arg2[%c28, %c0_200, %c0_201] : memref<64x8x3xf32, #tpu.memory_space<vmem>>, vector<1x8x3xf32>
    %172 = vector.shape_cast %171 : vector<1x8x3xf32> to vector<8x3xf32>
    %cst_202 = arith.constant dense<0.000000e+00> : vector<8x551xf32>
    %173 = tpu.matmul %172, %170, %cst_202 {dimension_numbers = #tpu.dot_dimension_numbers<[1], [0], [0], [1], [0, 0, 1, 1], [], []>} : vector<8x3xf32>, vector<3x551xf32>, vector<8x551xf32> -> vector<8x551xf32>
    %174 = arith.addf %168, %173 : vector<8x551xf32>
    %c0_203 = arith.constant 0 : index
    %c13_204 = arith.constant 13 : index
    %c0_205 = arith.constant 0 : index
    %c1_206 = arith.constant 1 : index
    %175 = vector.load %arg1[%c0_203, %c13_204, %c0_205, %c1_206] : memref<1x16x3x576xf32, #tpu.memory_space<vmem>>, vector<1x1x3x551xf32>
    %176 = vector.shape_cast %175 : vector<1x1x3x551xf32> to vector<3x551xf32>
    %c29 = arith.constant 29 : index
    %c0_207 = arith.constant 0 : index
    %c0_208 = arith.constant 0 : index
    %177 = vector.load %arg2[%c29, %c0_207, %c0_208] : memref<64x8x3xf32, #tpu.memory_space<vmem>>, vector<1x8x3xf32>
    %178 = vector.shape_cast %177 : vector<1x8x3xf32> to vector<8x3xf32>
    %cst_209 = arith.constant dense<0.000000e+00> : vector<8x551xf32>
    %179 = tpu.matmul %178, %176, %cst_209 {dimension_numbers = #tpu.dot_dimension_numbers<[1], [0], [0], [1], [0, 0, 1, 1], [], []>} : vector<8x3xf32>, vector<3x551xf32>, vector<8x551xf32> -> vector<8x551xf32>
    %180 = arith.addf %174, %179 : vector<8x551xf32>
    %c0_210 = arith.constant 0 : index
    %c14_211 = arith.constant 14 : index
    %c0_212 = arith.constant 0 : index
    %c1_213 = arith.constant 1 : index
    %181 = vector.load %arg1[%c0_210, %c14_211, %c0_212, %c1_213] : memref<1x16x3x576xf32, #tpu.memory_space<vmem>>, vector<1x1x3x551xf32>
    %182 = vector.shape_cast %181 : vector<1x1x3x551xf32> to vector<3x551xf32>
    %c30 = arith.constant 30 : index
    %c0_214 = arith.constant 0 : index
    %c0_215 = arith.constant 0 : index
    %183 = vector.load %arg2[%c30, %c0_214, %c0_215] : memref<64x8x3xf32, #tpu.memory_space<vmem>>, vector<1x8x3xf32>
    %184 = vector.shape_cast %183 : vector<1x8x3xf32> to vector<8x3xf32>
    %cst_216 = arith.constant dense<0.000000e+00> : vector<8x551xf32>
    %185 = tpu.matmul %184, %182, %cst_216 {dimension_numbers = #tpu.dot_dimension_numbers<[1], [0], [0], [1], [0, 0, 1, 1], [], []>} : vector<8x3xf32>, vector<3x551xf32>, vector<8x551xf32> -> vector<8x551xf32>
    %186 = arith.addf %180, %185 : vector<8x551xf32>
    %c0_217 = arith.constant 0 : index
    %c15_218 = arith.constant 15 : index
    %c0_219 = arith.constant 0 : index
    %c1_220 = arith.constant 1 : index
    %187 = vector.load %arg1[%c0_217, %c15_218, %c0_219, %c1_220] : memref<1x16x3x576xf32, #tpu.memory_space<vmem>>, vector<1x1x3x551xf32>
    %188 = vector.shape_cast %187 : vector<1x1x3x551xf32> to vector<3x551xf32>
    %c31 = arith.constant 31 : index
    %c0_221 = arith.constant 0 : index
    %c0_222 = arith.constant 0 : index
    %189 = vector.load %arg2[%c31, %c0_221, %c0_222] : memref<64x8x3xf32, #tpu.memory_space<vmem>>, vector<1x8x3xf32>
    %190 = vector.shape_cast %189 : vector<1x8x3xf32> to vector<8x3xf32>
    %cst_223 = arith.constant dense<0.000000e+00> : vector<8x551xf32>
    %191 = tpu.matmul %190, %188, %cst_223 {dimension_numbers = #tpu.dot_dimension_numbers<[1], [0], [0], [1], [0, 0, 1, 1], [], []>} : vector<8x3xf32>, vector<3x551xf32>, vector<8x551xf32> -> vector<8x551xf32>
    %192 = arith.addf %186, %191 : vector<8x551xf32>
    %c0_224 = arith.constant 0 : index
    %c0_225 = arith.constant 0 : index
    %c0_226 = arith.constant 0 : index
    %c24_227 = arith.constant 24 : index
    %193 = vector.load %arg1[%c0_224, %c0_225, %c0_226, %c24_227] : memref<1x16x3x576xf32, #tpu.memory_space<vmem>>, vector<1x1x3x551xf32>
    %194 = vector.shape_cast %193 : vector<1x1x3x551xf32> to vector<3x551xf32>
    %c32 = arith.constant 32 : index
    %c0_228 = arith.constant 0 : index
    %c0_229 = arith.constant 0 : index
    %195 = vector.load %arg2[%c32, %c0_228, %c0_229] : memref<64x8x3xf32, #tpu.memory_space<vmem>>, vector<1x8x3xf32>
    %196 = vector.shape_cast %195 : vector<1x8x3xf32> to vector<8x3xf32>
    %cst_230 = arith.constant dense<0.000000e+00> : vector<8x551xf32>
    %197 = tpu.matmul %196, %194, %cst_230 {dimension_numbers = #tpu.dot_dimension_numbers<[1], [0], [0], [1], [0, 0, 1, 1], [], []>} : vector<8x3xf32>, vector<3x551xf32>, vector<8x551xf32> -> vector<8x551xf32>
    %198 = arith.addf %192, %197 : vector<8x551xf32>
    %c0_231 = arith.constant 0 : index
    %c1_232 = arith.constant 1 : index
    %c0_233 = arith.constant 0 : index
    %c24_234 = arith.constant 24 : index
    %199 = vector.load %arg1[%c0_231, %c1_232, %c0_233, %c24_234] : memref<1x16x3x576xf32, #tpu.memory_space<vmem>>, vector<1x1x3x551xf32>
    %200 = vector.shape_cast %199 : vector<1x1x3x551xf32> to vector<3x551xf32>
    %c33 = arith.constant 33 : index
    %c0_235 = arith.constant 0 : index
    %c0_236 = arith.constant 0 : index
    %201 = vector.load %arg2[%c33, %c0_235, %c0_236] : memref<64x8x3xf32, #tpu.memory_space<vmem>>, vector<1x8x3xf32>
    %202 = vector.shape_cast %201 : vector<1x8x3xf32> to vector<8x3xf32>
    %cst_237 = arith.constant dense<0.000000e+00> : vector<8x551xf32>
    %203 = tpu.matmul %202, %200, %cst_237 {dimension_numbers = #tpu.dot_dimension_numbers<[1], [0], [0], [1], [0, 0, 1, 1], [], []>} : vector<8x3xf32>, vector<3x551xf32>, vector<8x551xf32> -> vector<8x551xf32>
    %204 = arith.addf %198, %203 : vector<8x551xf32>
    %c0_238 = arith.constant 0 : index
    %c2_239 = arith.constant 2 : index
    %c0_240 = arith.constant 0 : index
    %c24_241 = arith.constant 24 : index
    %205 = vector.load %arg1[%c0_238, %c2_239, %c0_240, %c24_241] : memref<1x16x3x576xf32, #tpu.memory_space<vmem>>, vector<1x1x3x551xf32>
    %206 = vector.shape_cast %205 : vector<1x1x3x551xf32> to vector<3x551xf32>
    %c34 = arith.constant 34 : index
    %c0_242 = arith.constant 0 : index
    %c0_243 = arith.constant 0 : index
    %207 = vector.load %arg2[%c34, %c0_242, %c0_243] : memref<64x8x3xf32, #tpu.memory_space<vmem>>, vector<1x8x3xf32>
    %208 = vector.shape_cast %207 : vector<1x8x3xf32> to vector<8x3xf32>
    %cst_244 = arith.constant dense<0.000000e+00> : vector<8x551xf32>
    %209 = tpu.matmul %208, %206, %cst_244 {dimension_numbers = #tpu.dot_dimension_numbers<[1], [0], [0], [1], [0, 0, 1, 1], [], []>} : vector<8x3xf32>, vector<3x551xf32>, vector<8x551xf32> -> vector<8x551xf32>
    %210 = arith.addf %204, %209 : vector<8x551xf32>
    %c0_245 = arith.constant 0 : index
    %c3_246 = arith.constant 3 : index
    %c0_247 = arith.constant 0 : index
    %c24_248 = arith.constant 24 : index
    %211 = vector.load %arg1[%c0_245, %c3_246, %c0_247, %c24_248] : memref<1x16x3x576xf32, #tpu.memory_space<vmem>>, vector<1x1x3x551xf32>
    %212 = vector.shape_cast %211 : vector<1x1x3x551xf32> to vector<3x551xf32>
    %c35 = arith.constant 35 : index
    %c0_249 = arith.constant 0 : index
    %c0_250 = arith.constant 0 : index
    %213 = vector.load %arg2[%c35, %c0_249, %c0_250] : memref<64x8x3xf32, #tpu.memory_space<vmem>>, vector<1x8x3xf32>
    %214 = vector.shape_cast %213 : vector<1x8x3xf32> to vector<8x3xf32>
    %cst_251 = arith.constant dense<0.000000e+00> : vector<8x551xf32>
    %215 = tpu.matmul %214, %212, %cst_251 {dimension_numbers = #tpu.dot_dimension_numbers<[1], [0], [0], [1], [0, 0, 1, 1], [], []>} : vector<8x3xf32>, vector<3x551xf32>, vector<8x551xf32> -> vector<8x551xf32>
    %216 = arith.addf %210, %215 : vector<8x551xf32>
    %c0_252 = arith.constant 0 : index
    %c0_253 = arith.constant 0 : index
    %c0_254 = arith.constant 0 : index
    %c25_255 = arith.constant 25 : index
    %217 = vector.load %arg1[%c0_252, %c0_253, %c0_254, %c25_255] : memref<1x16x3x576xf32, #tpu.memory_space<vmem>>, vector<1x1x3x551xf32>
    %218 = vector.shape_cast %217 : vector<1x1x3x551xf32> to vector<3x551xf32>
    %c36 = arith.constant 36 : index
    %c0_256 = arith.constant 0 : index
    %c0_257 = arith.constant 0 : index
    %219 = vector.load %arg2[%c36, %c0_256, %c0_257] : memref<64x8x3xf32, #tpu.memory_space<vmem>>, vector<1x8x3xf32>
    %220 = vector.shape_cast %219 : vector<1x8x3xf32> to vector<8x3xf32>
    %cst_258 = arith.constant dense<0.000000e+00> : vector<8x551xf32>
    %221 = tpu.matmul %220, %218, %cst_258 {dimension_numbers = #tpu.dot_dimension_numbers<[1], [0], [0], [1], [0, 0, 1, 1], [], []>} : vector<8x3xf32>, vector<3x551xf32>, vector<8x551xf32> -> vector<8x551xf32>
    %222 = arith.addf %216, %221 : vector<8x551xf32>
    %c0_259 = arith.constant 0 : index
    %c1_260 = arith.constant 1 : index
    %c0_261 = arith.constant 0 : index
    %c25_262 = arith.constant 25 : index
    %223 = vector.load %arg1[%c0_259, %c1_260, %c0_261, %c25_262] : memref<1x16x3x576xf32, #tpu.memory_space<vmem>>, vector<1x1x3x551xf32>
    %224 = vector.shape_cast %223 : vector<1x1x3x551xf32> to vector<3x551xf32>
    %c37 = arith.constant 37 : index
    %c0_263 = arith.constant 0 : index
    %c0_264 = arith.constant 0 : index
    %225 = vector.load %arg2[%c37, %c0_263, %c0_264] : memref<64x8x3xf32, #tpu.memory_space<vmem>>, vector<1x8x3xf32>
    %226 = vector.shape_cast %225 : vector<1x8x3xf32> to vector<8x3xf32>
    %cst_265 = arith.constant dense<0.000000e+00> : vector<8x551xf32>
    %227 = tpu.matmul %226, %224, %cst_265 {dimension_numbers = #tpu.dot_dimension_numbers<[1], [0], [0], [1], [0, 0, 1, 1], [], []>} : vector<8x3xf32>, vector<3x551xf32>, vector<8x551xf32> -> vector<8x551xf32>
    %228 = arith.addf %222, %227 : vector<8x551xf32>
    %c0_266 = arith.constant 0 : index
    %c2_267 = arith.constant 2 : index
    %c0_268 = arith.constant 0 : index
    %c25_269 = arith.constant 25 : index
    %229 = vector.load %arg1[%c0_266, %c2_267, %c0_268, %c25_269] : memref<1x16x3x576xf32, #tpu.memory_space<vmem>>, vector<1x1x3x551xf32>
    %230 = vector.shape_cast %229 : vector<1x1x3x551xf32> to vector<3x551xf32>
    %c38 = arith.constant 38 : index
    %c0_270 = arith.constant 0 : index
    %c0_271 = arith.constant 0 : index
    %231 = vector.load %arg2[%c38, %c0_270, %c0_271] : memref<64x8x3xf32, #tpu.memory_space<vmem>>, vector<1x8x3xf32>
    %232 = vector.shape_cast %231 : vector<1x8x3xf32> to vector<8x3xf32>
    %cst_272 = arith.constant dense<0.000000e+00> : vector<8x551xf32>
    %233 = tpu.matmul %232, %230, %cst_272 {dimension_numbers = #tpu.dot_dimension_numbers<[1], [0], [0], [1], [0, 0, 1, 1], [], []>} : vector<8x3xf32>, vector<3x551xf32>, vector<8x551xf32> -> vector<8x551xf32>
    %234 = arith.addf %228, %233 : vector<8x551xf32>
    %c0_273 = arith.constant 0 : index
    %c3_274 = arith.constant 3 : index
    %c0_275 = arith.constant 0 : index
    %c25_276 = arith.constant 25 : index
    %235 = vector.load %arg1[%c0_273, %c3_274, %c0_275, %c25_276] : memref<1x16x3x576xf32, #tpu.memory_space<vmem>>, vector<1x1x3x551xf32>
    %236 = vector.shape_cast %235 : vector<1x1x3x551xf32> to vector<3x551xf32>
    %c39 = arith.constant 39 : index
    %c0_277 = arith.constant 0 : index
    %c0_278 = arith.constant 0 : index
    %237 = vector.load %arg2[%c39, %c0_277, %c0_278] : memref<64x8x3xf32, #tpu.memory_space<vmem>>, vector<1x8x3xf32>
    %238 = vector.shape_cast %237 : vector<1x8x3xf32> to vector<8x3xf32>
    %cst_279 = arith.constant dense<0.000000e+00> : vector<8x551xf32>
    %239 = tpu.matmul %238, %236, %cst_279 {dimension_numbers = #tpu.dot_dimension_numbers<[1], [0], [0], [1], [0, 0, 1, 1], [], []>} : vector<8x3xf32>, vector<3x551xf32>, vector<8x551xf32> -> vector<8x551xf32>
    %240 = arith.addf %234, %239 : vector<8x551xf32>
    %c0_280 = arith.constant 0 : index
    %c4_281 = arith.constant 4 : index
    %c0_282 = arith.constant 0 : index
    %c24_283 = arith.constant 24 : index
    %241 = vector.load %arg1[%c0_280, %c4_281, %c0_282, %c24_283] : memref<1x16x3x576xf32, #tpu.memory_space<vmem>>, vector<1x1x3x551xf32>
    %242 = vector.shape_cast %241 : vector<1x1x3x551xf32> to vector<3x551xf32>
    %c40 = arith.constant 40 : index
    %c0_284 = arith.constant 0 : index
    %c0_285 = arith.constant 0 : index
    %243 = vector.load %arg2[%c40, %c0_284, %c0_285] : memref<64x8x3xf32, #tpu.memory_space<vmem>>, vector<1x8x3xf32>
    %244 = vector.shape_cast %243 : vector<1x8x3xf32> to vector<8x3xf32>
    %cst_286 = arith.constant dense<0.000000e+00> : vector<8x551xf32>
    %245 = tpu.matmul %244, %242, %cst_286 {dimension_numbers = #tpu.dot_dimension_numbers<[1], [0], [0], [1], [0, 0, 1, 1], [], []>} : vector<8x3xf32>, vector<3x551xf32>, vector<8x551xf32> -> vector<8x551xf32>
    %246 = arith.addf %240, %245 : vector<8x551xf32>
    %c0_287 = arith.constant 0 : index
    %c5_288 = arith.constant 5 : index
    %c0_289 = arith.constant 0 : index
    %c24_290 = arith.constant 24 : index
    %247 = vector.load %arg1[%c0_287, %c5_288, %c0_289, %c24_290] : memref<1x16x3x576xf32, #tpu.memory_space<vmem>>, vector<1x1x3x551xf32>
    %248 = vector.shape_cast %247 : vector<1x1x3x551xf32> to vector<3x551xf32>
    %c41 = arith.constant 41 : index
    %c0_291 = arith.constant 0 : index
    %c0_292 = arith.constant 0 : index
    %249 = vector.load %arg2[%c41, %c0_291, %c0_292] : memref<64x8x3xf32, #tpu.memory_space<vmem>>, vector<1x8x3xf32>
    %250 = vector.shape_cast %249 : vector<1x8x3xf32> to vector<8x3xf32>
    %cst_293 = arith.constant dense<0.000000e+00> : vector<8x551xf32>
    %251 = tpu.matmul %250, %248, %cst_293 {dimension_numbers = #tpu.dot_dimension_numbers<[1], [0], [0], [1], [0, 0, 1, 1], [], []>} : vector<8x3xf32>, vector<3x551xf32>, vector<8x551xf32> -> vector<8x551xf32>
    %252 = arith.addf %246, %251 : vector<8x551xf32>
    %c0_294 = arith.constant 0 : index
    %c6_295 = arith.constant 6 : index
    %c0_296 = arith.constant 0 : index
    %c24_297 = arith.constant 24 : index
    %253 = vector.load %arg1[%c0_294, %c6_295, %c0_296, %c24_297] : memref<1x16x3x576xf32, #tpu.memory_space<vmem>>, vector<1x1x3x551xf32>
    %254 = vector.shape_cast %253 : vector<1x1x3x551xf32> to vector<3x551xf32>
    %c42 = arith.constant 42 : index
    %c0_298 = arith.constant 0 : index
    %c0_299 = arith.constant 0 : index
    %255 = vector.load %arg2[%c42, %c0_298, %c0_299] : memref<64x8x3xf32, #tpu.memory_space<vmem>>, vector<1x8x3xf32>
    %256 = vector.shape_cast %255 : vector<1x8x3xf32> to vector<8x3xf32>
    %cst_300 = arith.constant dense<0.000000e+00> : vector<8x551xf32>
    %257 = tpu.matmul %256, %254, %cst_300 {dimension_numbers = #tpu.dot_dimension_numbers<[1], [0], [0], [1], [0, 0, 1, 1], [], []>} : vector<8x3xf32>, vector<3x551xf32>, vector<8x551xf32> -> vector<8x551xf32>
    %258 = arith.addf %252, %257 : vector<8x551xf32>
    %c0_301 = arith.constant 0 : index
    %c7_302 = arith.constant 7 : index
    %c0_303 = arith.constant 0 : index
    %c24_304 = arith.constant 24 : index
    %259 = vector.load %arg1[%c0_301, %c7_302, %c0_303, %c24_304] : memref<1x16x3x576xf32, #tpu.memory_space<vmem>>, vector<1x1x3x551xf32>
    %260 = vector.shape_cast %259 : vector<1x1x3x551xf32> to vector<3x551xf32>
    %c43 = arith.constant 43 : index
    %c0_305 = arith.constant 0 : index
    %c0_306 = arith.constant 0 : index
    %261 = vector.load %arg2[%c43, %c0_305, %c0_306] : memref<64x8x3xf32, #tpu.memory_space<vmem>>, vector<1x8x3xf32>
    %262 = vector.shape_cast %261 : vector<1x8x3xf32> to vector<8x3xf32>
    %cst_307 = arith.constant dense<0.000000e+00> : vector<8x551xf32>
    %263 = tpu.matmul %262, %260, %cst_307 {dimension_numbers = #tpu.dot_dimension_numbers<[1], [0], [0], [1], [0, 0, 1, 1], [], []>} : vector<8x3xf32>, vector<3x551xf32>, vector<8x551xf32> -> vector<8x551xf32>
    %264 = arith.addf %258, %263 : vector<8x551xf32>
    %c0_308 = arith.constant 0 : index
    %c4_309 = arith.constant 4 : index
    %c0_310 = arith.constant 0 : index
    %c25_311 = arith.constant 25 : index
    %265 = vector.load %arg1[%c0_308, %c4_309, %c0_310, %c25_311] : memref<1x16x3x576xf32, #tpu.memory_space<vmem>>, vector<1x1x3x551xf32>
    %266 = vector.shape_cast %265 : vector<1x1x3x551xf32> to vector<3x551xf32>
    %c44 = arith.constant 44 : index
    %c0_312 = arith.constant 0 : index
    %c0_313 = arith.constant 0 : index
    %267 = vector.load %arg2[%c44, %c0_312, %c0_313] : memref<64x8x3xf32, #tpu.memory_space<vmem>>, vector<1x8x3xf32>
    %268 = vector.shape_cast %267 : vector<1x8x3xf32> to vector<8x3xf32>
    %cst_314 = arith.constant dense<0.000000e+00> : vector<8x551xf32>
    %269 = tpu.matmul %268, %266, %cst_314 {dimension_numbers = #tpu.dot_dimension_numbers<[1], [0], [0], [1], [0, 0, 1, 1], [], []>} : vector<8x3xf32>, vector<3x551xf32>, vector<8x551xf32> -> vector<8x551xf32>
    %270 = arith.addf %264, %269 : vector<8x551xf32>
    %c0_315 = arith.constant 0 : index
    %c5_316 = arith.constant 5 : index
    %c0_317 = arith.constant 0 : index
    %c25_318 = arith.constant 25 : index
    %271 = vector.load %arg1[%c0_315, %c5_316, %c0_317, %c25_318] : memref<1x16x3x576xf32, #tpu.memory_space<vmem>>, vector<1x1x3x551xf32>
    %272 = vector.shape_cast %271 : vector<1x1x3x551xf32> to vector<3x551xf32>
    %c45 = arith.constant 45 : index
    %c0_319 = arith.constant 0 : index
    %c0_320 = arith.constant 0 : index
    %273 = vector.load %arg2[%c45, %c0_319, %c0_320] : memref<64x8x3xf32, #tpu.memory_space<vmem>>, vector<1x8x3xf32>
    %274 = vector.shape_cast %273 : vector<1x8x3xf32> to vector<8x3xf32>
    %cst_321 = arith.constant dense<0.000000e+00> : vector<8x551xf32>
    %275 = tpu.matmul %274, %272, %cst_321 {dimension_numbers = #tpu.dot_dimension_numbers<[1], [0], [0], [1], [0, 0, 1, 1], [], []>} : vector<8x3xf32>, vector<3x551xf32>, vector<8x551xf32> -> vector<8x551xf32>
    %276 = arith.addf %270, %275 : vector<8x551xf32>
    %c0_322 = arith.constant 0 : index
    %c6_323 = arith.constant 6 : index
    %c0_324 = arith.constant 0 : index
    %c25_325 = arith.constant 25 : index
    %277 = vector.load %arg1[%c0_322, %c6_323, %c0_324, %c25_325] : memref<1x16x3x576xf32, #tpu.memory_space<vmem>>, vector<1x1x3x551xf32>
    %278 = vector.shape_cast %277 : vector<1x1x3x551xf32> to vector<3x551xf32>
    %c46 = arith.constant 46 : index
    %c0_326 = arith.constant 0 : index
    %c0_327 = arith.constant 0 : index
    %279 = vector.load %arg2[%c46, %c0_326, %c0_327] : memref<64x8x3xf32, #tpu.memory_space<vmem>>, vector<1x8x3xf32>
    %280 = vector.shape_cast %279 : vector<1x8x3xf32> to vector<8x3xf32>
    %cst_328 = arith.constant dense<0.000000e+00> : vector<8x551xf32>
    %281 = tpu.matmul %280, %278, %cst_328 {dimension_numbers = #tpu.dot_dimension_numbers<[1], [0], [0], [1], [0, 0, 1, 1], [], []>} : vector<8x3xf32>, vector<3x551xf32>, vector<8x551xf32> -> vector<8x551xf32>
    %282 = arith.addf %276, %281 : vector<8x551xf32>
    %c0_329 = arith.constant 0 : index
    %c7_330 = arith.constant 7 : index
    %c0_331 = arith.constant 0 : index
    %c25_332 = arith.constant 25 : index
    %283 = vector.load %arg1[%c0_329, %c7_330, %c0_331, %c25_332] : memref<1x16x3x576xf32, #tpu.memory_space<vmem>>, vector<1x1x3x551xf32>
    %284 = vector.shape_cast %283 : vector<1x1x3x551xf32> to vector<3x551xf32>
    %c47 = arith.constant 47 : index
    %c0_333 = arith.constant 0 : index
    %c0_334 = arith.constant 0 : index
    %285 = vector.load %arg2[%c47, %c0_333, %c0_334] : memref<64x8x3xf32, #tpu.memory_space<vmem>>, vector<1x8x3xf32>
    %286 = vector.shape_cast %285 : vector<1x8x3xf32> to vector<8x3xf32>
    %cst_335 = arith.constant dense<0.000000e+00> : vector<8x551xf32>
    %287 = tpu.matmul %286, %284, %cst_335 {dimension_numbers = #tpu.dot_dimension_numbers<[1], [0], [0], [1], [0, 0, 1, 1], [], []>} : vector<8x3xf32>, vector<3x551xf32>, vector<8x551xf32> -> vector<8x551xf32>
    %288 = arith.addf %282, %287 : vector<8x551xf32>
    %c0_336 = arith.constant 0 : index
    %c8_337 = arith.constant 8 : index
    %c0_338 = arith.constant 0 : index
    %c24_339 = arith.constant 24 : index
    %289 = vector.load %arg1[%c0_336, %c8_337, %c0_338, %c24_339] : memref<1x16x3x576xf32, #tpu.memory_space<vmem>>, vector<1x1x3x551xf32>
    %290 = vector.shape_cast %289 : vector<1x1x3x551xf32> to vector<3x551xf32>
    %c48 = arith.constant 48 : index
    %c0_340 = arith.constant 0 : index
    %c0_341 = arith.constant 0 : index
    %291 = vector.load %arg2[%c48, %c0_340, %c0_341] : memref<64x8x3xf32, #tpu.memory_space<vmem>>, vector<1x8x3xf32>
    %292 = vector.shape_cast %291 : vector<1x8x3xf32> to vector<8x3xf32>
    %cst_342 = arith.constant dense<0.000000e+00> : vector<8x551xf32>
    %293 = tpu.matmul %292, %290, %cst_342 {dimension_numbers = #tpu.dot_dimension_numbers<[1], [0], [0], [1], [0, 0, 1, 1], [], []>} : vector<8x3xf32>, vector<3x551xf32>, vector<8x551xf32> -> vector<8x551xf32>
    %294 = arith.addf %288, %293 : vector<8x551xf32>
    %c0_343 = arith.constant 0 : index
    %c9_344 = arith.constant 9 : index
    %c0_345 = arith.constant 0 : index
    %c24_346 = arith.constant 24 : index
    %295 = vector.load %arg1[%c0_343, %c9_344, %c0_345, %c24_346] : memref<1x16x3x576xf32, #tpu.memory_space<vmem>>, vector<1x1x3x551xf32>
    %296 = vector.shape_cast %295 : vector<1x1x3x551xf32> to vector<3x551xf32>
    %c49 = arith.constant 49 : index
    %c0_347 = arith.constant 0 : index
    %c0_348 = arith.constant 0 : index
    %297 = vector.load %arg2[%c49, %c0_347, %c0_348] : memref<64x8x3xf32, #tpu.memory_space<vmem>>, vector<1x8x3xf32>
    %298 = vector.shape_cast %297 : vector<1x8x3xf32> to vector<8x3xf32>
    %cst_349 = arith.constant dense<0.000000e+00> : vector<8x551xf32>
    %299 = tpu.matmul %298, %296, %cst_349 {dimension_numbers = #tpu.dot_dimension_numbers<[1], [0], [0], [1], [0, 0, 1, 1], [], []>} : vector<8x3xf32>, vector<3x551xf32>, vector<8x551xf32> -> vector<8x551xf32>
    %300 = arith.addf %294, %299 : vector<8x551xf32>
    %c0_350 = arith.constant 0 : index
    %c10_351 = arith.constant 10 : index
    %c0_352 = arith.constant 0 : index
    %c24_353 = arith.constant 24 : index
    %301 = vector.load %arg1[%c0_350, %c10_351, %c0_352, %c24_353] : memref<1x16x3x576xf32, #tpu.memory_space<vmem>>, vector<1x1x3x551xf32>
    %302 = vector.shape_cast %301 : vector<1x1x3x551xf32> to vector<3x551xf32>
    %c50 = arith.constant 50 : index
    %c0_354 = arith.constant 0 : index
    %c0_355 = arith.constant 0 : index
    %303 = vector.load %arg2[%c50, %c0_354, %c0_355] : memref<64x8x3xf32, #tpu.memory_space<vmem>>, vector<1x8x3xf32>
    %304 = vector.shape_cast %303 : vector<1x8x3xf32> to vector<8x3xf32>
    %cst_356 = arith.constant dense<0.000000e+00> : vector<8x551xf32>
    %305 = tpu.matmul %304, %302, %cst_356 {dimension_numbers = #tpu.dot_dimension_numbers<[1], [0], [0], [1], [0, 0, 1, 1], [], []>} : vector<8x3xf32>, vector<3x551xf32>, vector<8x551xf32> -> vector<8x551xf32>
    %306 = arith.addf %300, %305 : vector<8x551xf32>
    %c0_357 = arith.constant 0 : index
    %c11_358 = arith.constant 11 : index
    %c0_359 = arith.constant 0 : index
    %c24_360 = arith.constant 24 : index
    %307 = vector.load %arg1[%c0_357, %c11_358, %c0_359, %c24_360] : memref<1x16x3x576xf32, #tpu.memory_space<vmem>>, vector<1x1x3x551xf32>
    %308 = vector.shape_cast %307 : vector<1x1x3x551xf32> to vector<3x551xf32>
    %c51 = arith.constant 51 : index
    %c0_361 = arith.constant 0 : index
    %c0_362 = arith.constant 0 : index
    %309 = vector.load %arg2[%c51, %c0_361, %c0_362] : memref<64x8x3xf32, #tpu.memory_space<vmem>>, vector<1x8x3xf32>
    %310 = vector.shape_cast %309 : vector<1x8x3xf32> to vector<8x3xf32>
    %cst_363 = arith.constant dense<0.000000e+00> : vector<8x551xf32>
    %311 = tpu.matmul %310, %308, %cst_363 {dimension_numbers = #tpu.dot_dimension_numbers<[1], [0], [0], [1], [0, 0, 1, 1], [], []>} : vector<8x3xf32>, vector<3x551xf32>, vector<8x551xf32> -> vector<8x551xf32>
    %312 = arith.addf %306, %311 : vector<8x551xf32>
    %c0_364 = arith.constant 0 : index
    %c8_365 = arith.constant 8 : index
    %c0_366 = arith.constant 0 : index
    %c25_367 = arith.constant 25 : index
    %313 = vector.load %arg1[%c0_364, %c8_365, %c0_366, %c25_367] : memref<1x16x3x576xf32, #tpu.memory_space<vmem>>, vector<1x1x3x551xf32>
    %314 = vector.shape_cast %313 : vector<1x1x3x551xf32> to vector<3x551xf32>
    %c52 = arith.constant 52 : index
    %c0_368 = arith.constant 0 : index
    %c0_369 = arith.constant 0 : index
    %315 = vector.load %arg2[%c52, %c0_368, %c0_369] : memref<64x8x3xf32, #tpu.memory_space<vmem>>, vector<1x8x3xf32>
    %316 = vector.shape_cast %315 : vector<1x8x3xf32> to vector<8x3xf32>
    %cst_370 = arith.constant dense<0.000000e+00> : vector<8x551xf32>
    %317 = tpu.matmul %316, %314, %cst_370 {dimension_numbers = #tpu.dot_dimension_numbers<[1], [0], [0], [1], [0, 0, 1, 1], [], []>} : vector<8x3xf32>, vector<3x551xf32>, vector<8x551xf32> -> vector<8x551xf32>
    %318 = arith.addf %312, %317 : vector<8x551xf32>
    %c0_371 = arith.constant 0 : index
    %c9_372 = arith.constant 9 : index
    %c0_373 = arith.constant 0 : index
    %c25_374 = arith.constant 25 : index
    %319 = vector.load %arg1[%c0_371, %c9_372, %c0_373, %c25_374] : memref<1x16x3x576xf32, #tpu.memory_space<vmem>>, vector<1x1x3x551xf32>
    %320 = vector.shape_cast %319 : vector<1x1x3x551xf32> to vector<3x551xf32>
    %c53 = arith.constant 53 : index
    %c0_375 = arith.constant 0 : index
    %c0_376 = arith.constant 0 : index
    %321 = vector.load %arg2[%c53, %c0_375, %c0_376] : memref<64x8x3xf32, #tpu.memory_space<vmem>>, vector<1x8x3xf32>
    %322 = vector.shape_cast %321 : vector<1x8x3xf32> to vector<8x3xf32>
    %cst_377 = arith.constant dense<0.000000e+00> : vector<8x551xf32>
    %323 = tpu.matmul %322, %320, %cst_377 {dimension_numbers = #tpu.dot_dimension_numbers<[1], [0], [0], [1], [0, 0, 1, 1], [], []>} : vector<8x3xf32>, vector<3x551xf32>, vector<8x551xf32> -> vector<8x551xf32>
    %324 = arith.addf %318, %323 : vector<8x551xf32>
    %c0_378 = arith.constant 0 : index
    %c10_379 = arith.constant 10 : index
    %c0_380 = arith.constant 0 : index
    %c25_381 = arith.constant 25 : index
    %325 = vector.load %arg1[%c0_378, %c10_379, %c0_380, %c25_381] : memref<1x16x3x576xf32, #tpu.memory_space<vmem>>, vector<1x1x3x551xf32>
    %326 = vector.shape_cast %325 : vector<1x1x3x551xf32> to vector<3x551xf32>
    %c54 = arith.constant 54 : index
    %c0_382 = arith.constant 0 : index
    %c0_383 = arith.constant 0 : index
    %327 = vector.load %arg2[%c54, %c0_382, %c0_383] : memref<64x8x3xf32, #tpu.memory_space<vmem>>, vector<1x8x3xf32>
    %328 = vector.shape_cast %327 : vector<1x8x3xf32> to vector<8x3xf32>
    %cst_384 = arith.constant dense<0.000000e+00> : vector<8x551xf32>
    %329 = tpu.matmul %328, %326, %cst_384 {dimension_numbers = #tpu.dot_dimension_numbers<[1], [0], [0], [1], [0, 0, 1, 1], [], []>} : vector<8x3xf32>, vector<3x551xf32>, vector<8x551xf32> -> vector<8x551xf32>
    %330 = arith.addf %324, %329 : vector<8x551xf32>
    %c0_385 = arith.constant 0 : index
    %c11_386 = arith.constant 11 : index
    %c0_387 = arith.constant 0 : index
    %c25_388 = arith.constant 25 : index
    %331 = vector.load %arg1[%c0_385, %c11_386, %c0_387, %c25_388] : memref<1x16x3x576xf32, #tpu.memory_space<vmem>>, vector<1x1x3x551xf32>
    %332 = vector.shape_cast %331 : vector<1x1x3x551xf32> to vector<3x551xf32>
    %c55 = arith.constant 55 : index
    %c0_389 = arith.constant 0 : index
    %c0_390 = arith.constant 0 : index
    %333 = vector.load %arg2[%c55, %c0_389, %c0_390] : memref<64x8x3xf32, #tpu.memory_space<vmem>>, vector<1x8x3xf32>
    %334 = vector.shape_cast %333 : vector<1x8x3xf32> to vector<8x3xf32>
    %cst_391 = arith.constant dense<0.000000e+00> : vector<8x551xf32>
    %335 = tpu.matmul %334, %332, %cst_391 {dimension_numbers = #tpu.dot_dimension_numbers<[1], [0], [0], [1], [0, 0, 1, 1], [], []>} : vector<8x3xf32>, vector<3x551xf32>, vector<8x551xf32> -> vector<8x551xf32>
    %336 = arith.addf %330, %335 : vector<8x551xf32>
    %c0_392 = arith.constant 0 : index
    %c12_393 = arith.constant 12 : index
    %c0_394 = arith.constant 0 : index
    %c24_395 = arith.constant 24 : index
    %337 = vector.load %arg1[%c0_392, %c12_393, %c0_394, %c24_395] : memref<1x16x3x576xf32, #tpu.memory_space<vmem>>, vector<1x1x3x551xf32>
    %338 = vector.shape_cast %337 : vector<1x1x3x551xf32> to vector<3x551xf32>
    %c56 = arith.constant 56 : index
    %c0_396 = arith.constant 0 : index
    %c0_397 = arith.constant 0 : index
    %339 = vector.load %arg2[%c56, %c0_396, %c0_397] : memref<64x8x3xf32, #tpu.memory_space<vmem>>, vector<1x8x3xf32>
    %340 = vector.shape_cast %339 : vector<1x8x3xf32> to vector<8x3xf32>
    %cst_398 = arith.constant dense<0.000000e+00> : vector<8x551xf32>
    %341 = tpu.matmul %340, %338, %cst_398 {dimension_numbers = #tpu.dot_dimension_numbers<[1], [0], [0], [1], [0, 0, 1, 1], [], []>} : vector<8x3xf32>, vector<3x551xf32>, vector<8x551xf32> -> vector<8x551xf32>
    %342 = arith.addf %336, %341 : vector<8x551xf32>
    %c0_399 = arith.constant 0 : index
    %c13_400 = arith.constant 13 : index
    %c0_401 = arith.constant 0 : index
    %c24_402 = arith.constant 24 : index
    %343 = vector.load %arg1[%c0_399, %c13_400, %c0_401, %c24_402] : memref<1x16x3x576xf32, #tpu.memory_space<vmem>>, vector<1x1x3x551xf32>
    %344 = vector.shape_cast %343 : vector<1x1x3x551xf32> to vector<3x551xf32>
    %c57 = arith.constant 57 : index
    %c0_403 = arith.constant 0 : index
    %c0_404 = arith.constant 0 : index
    %345 = vector.load %arg2[%c57, %c0_403, %c0_404] : memref<64x8x3xf32, #tpu.memory_space<vmem>>, vector<1x8x3xf32>
    %346 = vector.shape_cast %345 : vector<1x8x3xf32> to vector<8x3xf32>
    %cst_405 = arith.constant dense<0.000000e+00> : vector<8x551xf32>
    %347 = tpu.matmul %346, %344, %cst_405 {dimension_numbers = #tpu.dot_dimension_numbers<[1], [0], [0], [1], [0, 0, 1, 1], [], []>} : vector<8x3xf32>, vector<3x551xf32>, vector<8x551xf32> -> vector<8x551xf32>
    %348 = arith.addf %342, %347 : vector<8x551xf32>
    %c0_406 = arith.constant 0 : index
    %c14_407 = arith.constant 14 : index
    %c0_408 = arith.constant 0 : index
    %c24_409 = arith.constant 24 : index
    %349 = vector.load %arg1[%c0_406, %c14_407, %c0_408, %c24_409] : memref<1x16x3x576xf32, #tpu.memory_space<vmem>>, vector<1x1x3x551xf32>
    %350 = vector.shape_cast %349 : vector<1x1x3x551xf32> to vector<3x551xf32>
    %c58 = arith.constant 58 : index
    %c0_410 = arith.constant 0 : index
    %c0_411 = arith.constant 0 : index
    %351 = vector.load %arg2[%c58, %c0_410, %c0_411] : memref<64x8x3xf32, #tpu.memory_space<vmem>>, vector<1x8x3xf32>
    %352 = vector.shape_cast %351 : vector<1x8x3xf32> to vector<8x3xf32>
    %cst_412 = arith.constant dense<0.000000e+00> : vector<8x551xf32>
    %353 = tpu.matmul %352, %350, %cst_412 {dimension_numbers = #tpu.dot_dimension_numbers<[1], [0], [0], [1], [0, 0, 1, 1], [], []>} : vector<8x3xf32>, vector<3x551xf32>, vector<8x551xf32> -> vector<8x551xf32>
    %354 = arith.addf %348, %353 : vector<8x551xf32>
    %c0_413 = arith.constant 0 : index
    %c15_414 = arith.constant 15 : index
    %c0_415 = arith.constant 0 : index
    %c24_416 = arith.constant 24 : index
    %355 = vector.load %arg1[%c0_413, %c15_414, %c0_415, %c24_416] : memref<1x16x3x576xf32, #tpu.memory_space<vmem>>, vector<1x1x3x551xf32>
    %356 = vector.shape_cast %355 : vector<1x1x3x551xf32> to vector<3x551xf32>
    %c59 = arith.constant 59 : index
    %c0_417 = arith.constant 0 : index
    %c0_418 = arith.constant 0 : index
    %357 = vector.load %arg2[%c59, %c0_417, %c0_418] : memref<64x8x3xf32, #tpu.memory_space<vmem>>, vector<1x8x3xf32>
    %358 = vector.shape_cast %357 : vector<1x8x3xf32> to vector<8x3xf32>
    %cst_419 = arith.constant dense<0.000000e+00> : vector<8x551xf32>
    %359 = tpu.matmul %358, %356, %cst_419 {dimension_numbers = #tpu.dot_dimension_numbers<[1], [0], [0], [1], [0, 0, 1, 1], [], []>} : vector<8x3xf32>, vector<3x551xf32>, vector<8x551xf32> -> vector<8x551xf32>
    %360 = arith.addf %354, %359 : vector<8x551xf32>
    %c0_420 = arith.constant 0 : index
    %c12_421 = arith.constant 12 : index
    %c0_422 = arith.constant 0 : index
    %c25_423 = arith.constant 25 : index
    %361 = vector.load %arg1[%c0_420, %c12_421, %c0_422, %c25_423] : memref<1x16x3x576xf32, #tpu.memory_space<vmem>>, vector<1x1x3x551xf32>
    %362 = vector.shape_cast %361 : vector<1x1x3x551xf32> to vector<3x551xf32>
    %c60 = arith.constant 60 : index
    %c0_424 = arith.constant 0 : index
    %c0_425 = arith.constant 0 : index
    %363 = vector.load %arg2[%c60, %c0_424, %c0_425] : memref<64x8x3xf32, #tpu.memory_space<vmem>>, vector<1x8x3xf32>
    %364 = vector.shape_cast %363 : vector<1x8x3xf32> to vector<8x3xf32>
    %cst_426 = arith.constant dense<0.000000e+00> : vector<8x551xf32>
    %365 = tpu.matmul %364, %362, %cst_426 {dimension_numbers = #tpu.dot_dimension_numbers<[1], [0], [0], [1], [0, 0, 1, 1], [], []>} : vector<8x3xf32>, vector<3x551xf32>, vector<8x551xf32> -> vector<8x551xf32>
    %366 = arith.addf %360, %365 : vector<8x551xf32>
    %c0_427 = arith.constant 0 : index
    %c13_428 = arith.constant 13 : index
    %c0_429 = arith.constant 0 : index
    %c25_430 = arith.constant 25 : index
    %367 = vector.load %arg1[%c0_427, %c13_428, %c0_429, %c25_430] : memref<1x16x3x576xf32, #tpu.memory_space<vmem>>, vector<1x1x3x551xf32>
    %368 = vector.shape_cast %367 : vector<1x1x3x551xf32> to vector<3x551xf32>
    %c61 = arith.constant 61 : index
    %c0_431 = arith.constant 0 : index
    %c0_432 = arith.constant 0 : index
    %369 = vector.load %arg2[%c61, %c0_431, %c0_432] : memref<64x8x3xf32, #tpu.memory_space<vmem>>, vector<1x8x3xf32>
    %370 = vector.shape_cast %369 : vector<1x8x3xf32> to vector<8x3xf32>
    %cst_433 = arith.constant dense<0.000000e+00> : vector<8x551xf32>
    %371 = tpu.matmul %370, %368, %cst_433 {dimension_numbers = #tpu.dot_dimension_numbers<[1], [0], [0], [1], [0, 0, 1, 1], [], []>} : vector<8x3xf32>, vector<3x551xf32>, vector<8x551xf32> -> vector<8x551xf32>
    %372 = arith.addf %366, %371 : vector<8x551xf32>
    %c0_434 = arith.constant 0 : index
    %c14_435 = arith.constant 14 : index
    %c0_436 = arith.constant 0 : index
    %c25_437 = arith.constant 25 : index
    %373 = vector.load %arg1[%c0_434, %c14_435, %c0_436, %c25_437] : memref<1x16x3x576xf32, #tpu.memory_space<vmem>>, vector<1x1x3x551xf32>
    %374 = vector.shape_cast %373 : vector<1x1x3x551xf32> to vector<3x551xf32>
    %c62 = arith.constant 62 : index
    %c0_438 = arith.constant 0 : index
    %c0_439 = arith.constant 0 : index
    %375 = vector.load %arg2[%c62, %c0_438, %c0_439] : memref<64x8x3xf32, #tpu.memory_space<vmem>>, vector<1x8x3xf32>
    %376 = vector.shape_cast %375 : vector<1x8x3xf32> to vector<8x3xf32>
    %cst_440 = arith.constant dense<0.000000e+00> : vector<8x551xf32>
    %377 = tpu.matmul %376, %374, %cst_440 {dimension_numbers = #tpu.dot_dimension_numbers<[1], [0], [0], [1], [0, 0, 1, 1], [], []>} : vector<8x3xf32>, vector<3x551xf32>, vector<8x551xf32> -> vector<8x551xf32>
    %378 = arith.addf %372, %377 : vector<8x551xf32>
    %c0_441 = arith.constant 0 : index
    %c15_442 = arith.constant 15 : index
    %c0_443 = arith.constant 0 : index
    %c25_444 = arith.constant 25 : index
    %379 = vector.load %arg1[%c0_441, %c15_442, %c0_443, %c25_444] : memref<1x16x3x576xf32, #tpu.memory_space<vmem>>, vector<1x1x3x551xf32>
    %380 = vector.shape_cast %379 : vector<1x1x3x551xf32> to vector<3x551xf32>
    %c63 = arith.constant 63 : index
    %c0_445 = arith.constant 0 : index
    %c0_446 = arith.constant 0 : index
    %381 = vector.load %arg2[%c63, %c0_445, %c0_446] : memref<64x8x3xf32, #tpu.memory_space<vmem>>, vector<1x8x3xf32>
    %382 = vector.shape_cast %381 : vector<1x8x3xf32> to vector<8x3xf32>
    %cst_447 = arith.constant dense<0.000000e+00> : vector<8x551xf32>
    %383 = tpu.matmul %382, %380, %cst_447 {dimension_numbers = #tpu.dot_dimension_numbers<[1], [0], [0], [1], [0, 0, 1, 1], [], []>} : vector<8x3xf32>, vector<3x551xf32>, vector<8x551xf32> -> vector<8x551xf32>
    %384 = arith.addf %378, %383 : vector<8x551xf32>
    %c0_448 = arith.constant 0 : index
    %c0_449 = arith.constant 0 : index
    %385 = vector.load %arg3[%c0_448, %c0_449] : memref<8x1xf32, #tpu.memory_space<vmem>>, vector<8x1xf32>
    %386 = vector.broadcast %385 : vector<8x1xf32> to vector<8x551xf32>
    %387 = arith.addf %384, %386 : vector<8x551xf32>
    %cst_450 = arith.constant 0.00999999977 : f32
    %388 = vector.broadcast %cst_450 : f32 to vector<8x551xf32>
    %389 = arith.mulf %388, %387 : vector<8x551xf32>
    %390 = arith.maximumf %387, %389 : vector<8x551xf32>
    %cst_451 = arith.constant 0.000000e+00 : f32
    %391 = vector.broadcast %cst_451 : f32 to vector<16x451xf32>
    %c0_452 = arith.constant 0 : index
    %c0_453 = arith.constant 0 : index
    %c0_454 = arith.constant 0 : index
    %392 = vector.load %arg4[%c0_452, %c0_453, %c0_454] : memref<16x16x8xf32, #tpu.memory_space<vmem>>, vector<1x16x8xf32>
    %393 = vector.shape_cast %392 : vector<1x16x8xf32> to vector<16x8xf32>
    %394 = vector.extract_strided_slice %390 {offsets = [0, 0], sizes = [8, 451], strides = [1, 1]} : vector<8x551xf32> to vector<8x451xf32>
    %cst_455 = arith.constant dense<0.000000e+00> : vector<16x451xf32>
    %395 = tpu.matmul %393, %394, %cst_455 {dimension_numbers = #tpu.dot_dimension_numbers<[1], [0], [0], [1], [0, 0, 1, 1], [], []>} : vector<16x8xf32>, vector<8x451xf32>, vector<16x451xf32> -> vector<16x451xf32>
    %396 = arith.addf %391, %395 : vector<16x451xf32>
    %c1_456 = arith.constant 1 : index
    %c0_457 = arith.constant 0 : index
    %c0_458 = arith.constant 0 : index
    %397 = vector.load %arg4[%c1_456, %c0_457, %c0_458] : memref<16x16x8xf32, #tpu.memory_space<vmem>>, vector<1x16x8xf32>
    %398 = vector.shape_cast %397 : vector<1x16x8xf32> to vector<16x8xf32>
    %399 = vector.extract_strided_slice %390 {offsets = [0, 1], sizes = [8, 451], strides = [1, 1]} : vector<8x551xf32> to vector<8x451xf32>
    %cst_459 = arith.constant dense<0.000000e+00> : vector<16x451xf32>
    %400 = tpu.matmul %398, %399, %cst_459 {dimension_numbers = #tpu.dot_dimension_numbers<[1], [0], [0], [1], [0, 0, 1, 1], [], []>} : vector<16x8xf32>, vector<8x451xf32>, vector<16x451xf32> -> vector<16x451xf32>
    %401 = arith.addf %396, %400 : vector<16x451xf32>
    %c2_460 = arith.constant 2 : index
    %c0_461 = arith.constant 0 : index
    %c0_462 = arith.constant 0 : index
    %402 = vector.load %arg4[%c2_460, %c0_461, %c0_462] : memref<16x16x8xf32, #tpu.memory_space<vmem>>, vector<1x16x8xf32>
    %403 = vector.shape_cast %402 : vector<1x16x8xf32> to vector<16x8xf32>
    %404 = vector.extract_strided_slice %390 {offsets = [0, 2], sizes = [8, 451], strides = [1, 1]} : vector<8x551xf32> to vector<8x451xf32>
    %cst_463 = arith.constant dense<0.000000e+00> : vector<16x451xf32>
    %405 = tpu.matmul %403, %404, %cst_463 {dimension_numbers = #tpu.dot_dimension_numbers<[1], [0], [0], [1], [0, 0, 1, 1], [], []>} : vector<16x8xf32>, vector<8x451xf32>, vector<16x451xf32> -> vector<16x451xf32>
    %406 = arith.addf %401, %405 : vector<16x451xf32>
    %c3_464 = arith.constant 3 : index
    %c0_465 = arith.constant 0 : index
    %c0_466 = arith.constant 0 : index
    %407 = vector.load %arg4[%c3_464, %c0_465, %c0_466] : memref<16x16x8xf32, #tpu.memory_space<vmem>>, vector<1x16x8xf32>
    %408 = vector.shape_cast %407 : vector<1x16x8xf32> to vector<16x8xf32>
    %409 = vector.extract_strided_slice %390 {offsets = [0, 3], sizes = [8, 451], strides = [1, 1]} : vector<8x551xf32> to vector<8x451xf32>
    %cst_467 = arith.constant dense<0.000000e+00> : vector<16x451xf32>
    %410 = tpu.matmul %408, %409, %cst_467 {dimension_numbers = #tpu.dot_dimension_numbers<[1], [0], [0], [1], [0, 0, 1, 1], [], []>} : vector<16x8xf32>, vector<8x451xf32>, vector<16x451xf32> -> vector<16x451xf32>
    %411 = arith.addf %406, %410 : vector<16x451xf32>
    %c4_468 = arith.constant 4 : index
    %c0_469 = arith.constant 0 : index
    %c0_470 = arith.constant 0 : index
    %412 = vector.load %arg4[%c4_468, %c0_469, %c0_470] : memref<16x16x8xf32, #tpu.memory_space<vmem>>, vector<1x16x8xf32>
    %413 = vector.shape_cast %412 : vector<1x16x8xf32> to vector<16x8xf32>
    %414 = vector.extract_strided_slice %390 {offsets = [0, 24], sizes = [8, 451], strides = [1, 1]} : vector<8x551xf32> to vector<8x451xf32>
    %cst_471 = arith.constant dense<0.000000e+00> : vector<16x451xf32>
    %415 = tpu.matmul %413, %414, %cst_471 {dimension_numbers = #tpu.dot_dimension_numbers<[1], [0], [0], [1], [0, 0, 1, 1], [], []>} : vector<16x8xf32>, vector<8x451xf32>, vector<16x451xf32> -> vector<16x451xf32>
    %416 = arith.addf %411, %415 : vector<16x451xf32>
    %c5_472 = arith.constant 5 : index
    %c0_473 = arith.constant 0 : index
    %c0_474 = arith.constant 0 : index
    %417 = vector.load %arg4[%c5_472, %c0_473, %c0_474] : memref<16x16x8xf32, #tpu.memory_space<vmem>>, vector<1x16x8xf32>
    %418 = vector.shape_cast %417 : vector<1x16x8xf32> to vector<16x8xf32>
    %419 = vector.extract_strided_slice %390 {offsets = [0, 25], sizes = [8, 451], strides = [1, 1]} : vector<8x551xf32> to vector<8x451xf32>
    %cst_475 = arith.constant dense<0.000000e+00> : vector<16x451xf32>
    %420 = tpu.matmul %418, %419, %cst_475 {dimension_numbers = #tpu.dot_dimension_numbers<[1], [0], [0], [1], [0, 0, 1, 1], [], []>} : vector<16x8xf32>, vector<8x451xf32>, vector<16x451xf32> -> vector<16x451xf32>
    %421 = arith.addf %416, %420 : vector<16x451xf32>
    %c6_476 = arith.constant 6 : index
    %c0_477 = arith.constant 0 : index
    %c0_478 = arith.constant 0 : index
    %422 = vector.load %arg4[%c6_476, %c0_477, %c0_478] : memref<16x16x8xf32, #tpu.memory_space<vmem>>, vector<1x16x8xf32>
    %423 = vector.shape_cast %422 : vector<1x16x8xf32> to vector<16x8xf32>
    %424 = vector.extract_strided_slice %390 {offsets = [0, 26], sizes = [8, 451], strides = [1, 1]} : vector<8x551xf32> to vector<8x451xf32>
    %cst_479 = arith.constant dense<0.000000e+00> : vector<16x451xf32>
    %425 = tpu.matmul %423, %424, %cst_479 {dimension_numbers = #tpu.dot_dimension_numbers<[1], [0], [0], [1], [0, 0, 1, 1], [], []>} : vector<16x8xf32>, vector<8x451xf32>, vector<16x451xf32> -> vector<16x451xf32>
    %426 = arith.addf %421, %425 : vector<16x451xf32>
    %c7_480 = arith.constant 7 : index
    %c0_481 = arith.constant 0 : index
    %c0_482 = arith.constant 0 : index
    %427 = vector.load %arg4[%c7_480, %c0_481, %c0_482] : memref<16x16x8xf32, #tpu.memory_space<vmem>>, vector<1x16x8xf32>
    %428 = vector.shape_cast %427 : vector<1x16x8xf32> to vector<16x8xf32>
    %429 = vector.extract_strided_slice %390 {offsets = [0, 27], sizes = [8, 451], strides = [1, 1]} : vector<8x551xf32> to vector<8x451xf32>
    %cst_483 = arith.constant dense<0.000000e+00> : vector<16x451xf32>
    %430 = tpu.matmul %428, %429, %cst_483 {dimension_numbers = #tpu.dot_dimension_numbers<[1], [0], [0], [1], [0, 0, 1, 1], [], []>} : vector<16x8xf32>, vector<8x451xf32>, vector<16x451xf32> -> vector<16x451xf32>
    %431 = arith.addf %426, %430 : vector<16x451xf32>
    %c8_484 = arith.constant 8 : index
    %c0_485 = arith.constant 0 : index
    %c0_486 = arith.constant 0 : index
    %432 = vector.load %arg4[%c8_484, %c0_485, %c0_486] : memref<16x16x8xf32, #tpu.memory_space<vmem>>, vector<1x16x8xf32>
    %433 = vector.shape_cast %432 : vector<1x16x8xf32> to vector<16x8xf32>
    %434 = vector.extract_strided_slice %390 {offsets = [0, 48], sizes = [8, 451], strides = [1, 1]} : vector<8x551xf32> to vector<8x451xf32>
    %cst_487 = arith.constant dense<0.000000e+00> : vector<16x451xf32>
    %435 = tpu.matmul %433, %434, %cst_487 {dimension_numbers = #tpu.dot_dimension_numbers<[1], [0], [0], [1], [0, 0, 1, 1], [], []>} : vector<16x8xf32>, vector<8x451xf32>, vector<16x451xf32> -> vector<16x451xf32>
    %436 = arith.addf %431, %435 : vector<16x451xf32>
    %c9_488 = arith.constant 9 : index
    %c0_489 = arith.constant 0 : index
    %c0_490 = arith.constant 0 : index
    %437 = vector.load %arg4[%c9_488, %c0_489, %c0_490] : memref<16x16x8xf32, #tpu.memory_space<vmem>>, vector<1x16x8xf32>
    %438 = vector.shape_cast %437 : vector<1x16x8xf32> to vector<16x8xf32>
    %439 = vector.extract_strided_slice %390 {offsets = [0, 49], sizes = [8, 451], strides = [1, 1]} : vector<8x551xf32> to vector<8x451xf32>
    %cst_491 = arith.constant dense<0.000000e+00> : vector<16x451xf32>
    %440 = tpu.matmul %438, %439, %cst_491 {dimension_numbers = #tpu.dot_dimension_numbers<[1], [0], [0], [1], [0, 0, 1, 1], [], []>} : vector<16x8xf32>, vector<8x451xf32>, vector<16x451xf32> -> vector<16x451xf32>
    %441 = arith.addf %436, %440 : vector<16x451xf32>
    %c10_492 = arith.constant 10 : index
    %c0_493 = arith.constant 0 : index
    %c0_494 = arith.constant 0 : index
    %442 = vector.load %arg4[%c10_492, %c0_493, %c0_494] : memref<16x16x8xf32, #tpu.memory_space<vmem>>, vector<1x16x8xf32>
    %443 = vector.shape_cast %442 : vector<1x16x8xf32> to vector<16x8xf32>
    %444 = vector.extract_strided_slice %390 {offsets = [0, 50], sizes = [8, 451], strides = [1, 1]} : vector<8x551xf32> to vector<8x451xf32>
    %cst_495 = arith.constant dense<0.000000e+00> : vector<16x451xf32>
    %445 = tpu.matmul %443, %444, %cst_495 {dimension_numbers = #tpu.dot_dimension_numbers<[1], [0], [0], [1], [0, 0, 1, 1], [], []>} : vector<16x8xf32>, vector<8x451xf32>, vector<16x451xf32> -> vector<16x451xf32>
    %446 = arith.addf %441, %445 : vector<16x451xf32>
    %c11_496 = arith.constant 11 : index
    %c0_497 = arith.constant 0 : index
    %c0_498 = arith.constant 0 : index
    %447 = vector.load %arg4[%c11_496, %c0_497, %c0_498] : memref<16x16x8xf32, #tpu.memory_space<vmem>>, vector<1x16x8xf32>
    %448 = vector.shape_cast %447 : vector<1x16x8xf32> to vector<16x8xf32>
    %449 = vector.extract_strided_slice %390 {offsets = [0, 51], sizes = [8, 451], strides = [1, 1]} : vector<8x551xf32> to vector<8x451xf32>
    %cst_499 = arith.constant dense<0.000000e+00> : vector<16x451xf32>
    %450 = tpu.matmul %448, %449, %cst_499 {dimension_numbers = #tpu.dot_dimension_numbers<[1], [0], [0], [1], [0, 0, 1, 1], [], []>} : vector<16x8xf32>, vector<8x451xf32>, vector<16x451xf32> -> vector<16x451xf32>
    %451 = arith.addf %446, %450 : vector<16x451xf32>
    %c12_500 = arith.constant 12 : index
    %c0_501 = arith.constant 0 : index
    %c0_502 = arith.constant 0 : index
    %452 = vector.load %arg4[%c12_500, %c0_501, %c0_502] : memref<16x16x8xf32, #tpu.memory_space<vmem>>, vector<1x16x8xf32>
    %453 = vector.shape_cast %452 : vector<1x16x8xf32> to vector<16x8xf32>
    %454 = vector.extract_strided_slice %390 {offsets = [0, 72], sizes = [8, 451], strides = [1, 1]} : vector<8x551xf32> to vector<8x451xf32>
    %cst_503 = arith.constant dense<0.000000e+00> : vector<16x451xf32>
    %455 = tpu.matmul %453, %454, %cst_503 {dimension_numbers = #tpu.dot_dimension_numbers<[1], [0], [0], [1], [0, 0, 1, 1], [], []>} : vector<16x8xf32>, vector<8x451xf32>, vector<16x451xf32> -> vector<16x451xf32>
    %456 = arith.addf %451, %455 : vector<16x451xf32>
    %c13_504 = arith.constant 13 : index
    %c0_505 = arith.constant 0 : index
    %c0_506 = arith.constant 0 : index
    %457 = vector.load %arg4[%c13_504, %c0_505, %c0_506] : memref<16x16x8xf32, #tpu.memory_space<vmem>>, vector<1x16x8xf32>
    %458 = vector.shape_cast %457 : vector<1x16x8xf32> to vector<16x8xf32>
    %459 = vector.extract_strided_slice %390 {offsets = [0, 73], sizes = [8, 451], strides = [1, 1]} : vector<8x551xf32> to vector<8x451xf32>
    %cst_507 = arith.constant dense<0.000000e+00> : vector<16x451xf32>
    %460 = tpu.matmul %458, %459, %cst_507 {dimension_numbers = #tpu.dot_dimension_numbers<[1], [0], [0], [1], [0, 0, 1, 1], [], []>} : vector<16x8xf32>, vector<8x451xf32>, vector<16x451xf32> -> vector<16x451xf32>
    %461 = arith.addf %456, %460 : vector<16x451xf32>
    %c14_508 = arith.constant 14 : index
    %c0_509 = arith.constant 0 : index
    %c0_510 = arith.constant 0 : index
    %462 = vector.load %arg4[%c14_508, %c0_509, %c0_510] : memref<16x16x8xf32, #tpu.memory_space<vmem>>, vector<1x16x8xf32>
    %463 = vector.shape_cast %462 : vector<1x16x8xf32> to vector<16x8xf32>
    %464 = vector.extract_strided_slice %390 {offsets = [0, 74], sizes = [8, 451], strides = [1, 1]} : vector<8x551xf32> to vector<8x451xf32>
    %cst_511 = arith.constant dense<0.000000e+00> : vector<16x451xf32>
    %465 = tpu.matmul %463, %464, %cst_511 {dimension_numbers = #tpu.dot_dimension_numbers<[1], [0], [0], [1], [0, 0, 1, 1], [], []>} : vector<16x8xf32>, vector<8x451xf32>, vector<16x451xf32> -> vector<16x451xf32>
    %466 = arith.addf %461, %465 : vector<16x451xf32>
    %c15_512 = arith.constant 15 : index
    %c0_513 = arith.constant 0 : index
    %c0_514 = arith.constant 0 : index
    %467 = vector.load %arg4[%c15_512, %c0_513, %c0_514] : memref<16x16x8xf32, #tpu.memory_space<vmem>>, vector<1x16x8xf32>
    %468 = vector.shape_cast %467 : vector<1x16x8xf32> to vector<16x8xf32>
    %469 = vector.extract_strided_slice %390 {offsets = [0, 75], sizes = [8, 451], strides = [1, 1]} : vector<8x551xf32> to vector<8x451xf32>
    %cst_515 = arith.constant dense<0.000000e+00> : vector<16x451xf32>
    %470 = tpu.matmul %468, %469, %cst_515 {dimension_numbers = #tpu.dot_dimension_numbers<[1], [0], [0], [1], [0, 0, 1, 1], [], []>} : vector<16x8xf32>, vector<8x451xf32>, vector<16x451xf32> -> vector<16x451xf32>
    %471 = arith.addf %466, %470 : vector<16x451xf32>
    %c0_516 = arith.constant 0 : index
    %c0_517 = arith.constant 0 : index
    %472 = vector.load %arg5[%c0_516, %c0_517] : memref<16x1xf32, #tpu.memory_space<vmem>>, vector<16x1xf32>
    %473 = vector.broadcast %472 : vector<16x1xf32> to vector<16x451xf32>
    %474 = arith.addf %471, %473 : vector<16x451xf32>
    %cst_518 = arith.constant 0.00999999977 : f32
    %475 = vector.broadcast %cst_518 : f32 to vector<16x451xf32>
    %476 = arith.mulf %475, %474 : vector<16x451xf32>
    %477 = arith.maximumf %474, %476 : vector<16x451xf32>
    %cst_519 = arith.constant 0.000000e+00 : f32
    %478 = vector.broadcast %cst_519 : f32 to vector<16x401xf32>
    %c0_520 = arith.constant 0 : index
    %c0_521 = arith.constant 0 : index
    %c0_522 = arith.constant 0 : index
    %479 = vector.load %arg6[%c0_520, %c0_521, %c0_522] : memref<4x16x16xf32, #tpu.memory_space<vmem>>, vector<1x16x16xf32>
    %480 = vector.shape_cast %479 : vector<1x16x16xf32> to vector<16x16xf32>
    %481 = vector.extract_strided_slice %477 {offsets = [0, 0], sizes = [16, 401], strides = [1, 1]} : vector<16x451xf32> to vector<16x401xf32>
    %cst_523 = arith.constant dense<0.000000e+00> : vector<16x401xf32>
    %482 = tpu.matmul %480, %481, %cst_523 {dimension_numbers = #tpu.dot_dimension_numbers<[1], [0], [0], [1], [0, 0, 1, 1], [], []>} : vector<16x16xf32>, vector<16x401xf32>, vector<16x401xf32> -> vector<16x401xf32>
    %483 = arith.addf %478, %482 : vector<16x401xf32>
    %c1_524 = arith.constant 1 : index
    %c0_525 = arith.constant 0 : index
    %c0_526 = arith.constant 0 : index
    %484 = vector.load %arg6[%c1_524, %c0_525, %c0_526] : memref<4x16x16xf32, #tpu.memory_space<vmem>>, vector<1x16x16xf32>
    %485 = vector.shape_cast %484 : vector<1x16x16xf32> to vector<16x16xf32>
    %486 = vector.extract_strided_slice %477 {offsets = [0, 2], sizes = [16, 401], strides = [1, 1]} : vector<16x451xf32> to vector<16x401xf32>
    %cst_527 = arith.constant dense<0.000000e+00> : vector<16x401xf32>
    %487 = tpu.matmul %485, %486, %cst_527 {dimension_numbers = #tpu.dot_dimension_numbers<[1], [0], [0], [1], [0, 0, 1, 1], [], []>} : vector<16x16xf32>, vector<16x401xf32>, vector<16x401xf32> -> vector<16x401xf32>
    %488 = arith.addf %483, %487 : vector<16x401xf32>
    %c2_528 = arith.constant 2 : index
    %c0_529 = arith.constant 0 : index
    %c0_530 = arith.constant 0 : index
    %489 = vector.load %arg6[%c2_528, %c0_529, %c0_530] : memref<4x16x16xf32, #tpu.memory_space<vmem>>, vector<1x16x16xf32>
    %490 = vector.shape_cast %489 : vector<1x16x16xf32> to vector<16x16xf32>
    %491 = vector.extract_strided_slice %477 {offsets = [0, 48], sizes = [16, 401], strides = [1, 1]} : vector<16x451xf32> to vector<16x401xf32>
    %cst_531 = arith.constant dense<0.000000e+00> : vector<16x401xf32>
    %492 = tpu.matmul %490, %491, %cst_531 {dimension_numbers = #tpu.dot_dimension_numbers<[1], [0], [0], [1], [0, 0, 1, 1], [], []>} : vector<16x16xf32>, vector<16x401xf32>, vector<16x401xf32> -> vector<16x401xf32>
    %493 = arith.addf %488, %492 : vector<16x401xf32>
    %c3_532 = arith.constant 3 : index
    %c0_533 = arith.constant 0 : index
    %c0_534 = arith.constant 0 : index
    %494 = vector.load %arg6[%c3_532, %c0_533, %c0_534] : memref<4x16x16xf32, #tpu.memory_space<vmem>>, vector<1x16x16xf32>
    %495 = vector.shape_cast %494 : vector<1x16x16xf32> to vector<16x16xf32>
    %496 = vector.extract_strided_slice %477 {offsets = [0, 50], sizes = [16, 401], strides = [1, 1]} : vector<16x451xf32> to vector<16x401xf32>
    %cst_535 = arith.constant dense<0.000000e+00> : vector<16x401xf32>
    %497 = tpu.matmul %495, %496, %cst_535 {dimension_numbers = #tpu.dot_dimension_numbers<[1], [0], [0], [1], [0, 0, 1, 1], [], []>} : vector<16x16xf32>, vector<16x401xf32>, vector<16x401xf32> -> vector<16x401xf32>
    %498 = arith.addf %493, %497 : vector<16x401xf32>
    %c0_536 = arith.constant 0 : index
    %c0_537 = arith.constant 0 : index
    %499 = vector.load %arg7[%c0_536, %c0_537] : memref<16x1xf32, #tpu.memory_space<vmem>>, vector<16x1xf32>
    %500 = vector.broadcast %499 : vector<16x1xf32> to vector<16x401xf32>
    %501 = arith.addf %498, %500 : vector<16x401xf32>
    %cst_538 = arith.constant 0.00999999977 : f32
    %502 = vector.broadcast %cst_538 : f32 to vector<16x401xf32>
    %503 = arith.mulf %502, %501 : vector<16x401xf32>
    %504 = arith.maximumf %501, %503 : vector<16x401xf32>
    %c0_539 = arith.constant 0 : index
    %c0_540 = arith.constant 0 : index
    %505 = vector.load %arg9[%c0_539, %c0_540] : memref<1x16xf32, #tpu.memory_space<vmem>>, vector<1x16xf32>
    %506 = vector.extract_strided_slice %504 {offsets = [0, 0], sizes = [1, 401], strides = [1, 1]} : vector<16x401xf32> to vector<1x401xf32>
    %c0_541 = arith.constant 0 : index
    %c0_542 = arith.constant 0 : index
    %c0_543 = arith.constant 0 : index
    %507 = vector.load %arg8[%c0_541, %c0_542, %c0_543] : memref<16x401x16xf32, #tpu.memory_space<vmem>>, vector<1x401x16xf32>
    %508 = vector.shape_cast %507 : vector<1x401x16xf32> to vector<401x16xf32>
    %cst_544 = arith.constant dense<0.000000e+00> : vector<1x16xf32>
    %509 = tpu.matmul %506, %508, %cst_544 {dimension_numbers = #tpu.dot_dimension_numbers<[1], [0], [0], [1], [0, 0, 1, 1], [], []>} : vector<1x401xf32>, vector<401x16xf32>, vector<1x16xf32> -> vector<1x16xf32>
    %510 = arith.addf %505, %509 : vector<1x16xf32>
    %511 = vector.extract_strided_slice %504 {offsets = [1, 0], sizes = [1, 401], strides = [1, 1]} : vector<16x401xf32> to vector<1x401xf32>
    %c1_545 = arith.constant 1 : index
    %c0_546 = arith.constant 0 : index
    %c0_547 = arith.constant 0 : index
    %512 = vector.load %arg8[%c1_545, %c0_546, %c0_547] : memref<16x401x16xf32, #tpu.memory_space<vmem>>, vector<1x401x16xf32>
    %513 = vector.shape_cast %512 : vector<1x401x16xf32> to vector<401x16xf32>
    %cst_548 = arith.constant dense<0.000000e+00> : vector<1x16xf32>
    %514 = tpu.matmul %511, %513, %cst_548 {dimension_numbers = #tpu.dot_dimension_numbers<[1], [0], [0], [1], [0, 0, 1, 1], [], []>} : vector<1x401xf32>, vector<401x16xf32>, vector<1x16xf32> -> vector<1x16xf32>
    %515 = arith.addf %510, %514 : vector<1x16xf32>
    %516 = vector.extract_strided_slice %504 {offsets = [2, 0], sizes = [1, 401], strides = [1, 1]} : vector<16x401xf32> to vector<1x401xf32>
    %c2_549 = arith.constant 2 : index
    %c0_550 = arith.constant 0 : index
    %c0_551 = arith.constant 0 : index
    %517 = vector.load %arg8[%c2_549, %c0_550, %c0_551] : memref<16x401x16xf32, #tpu.memory_space<vmem>>, vector<1x401x16xf32>
    %518 = vector.shape_cast %517 : vector<1x401x16xf32> to vector<401x16xf32>
    %cst_552 = arith.constant dense<0.000000e+00> : vector<1x16xf32>
    %519 = tpu.matmul %516, %518, %cst_552 {dimension_numbers = #tpu.dot_dimension_numbers<[1], [0], [0], [1], [0, 0, 1, 1], [], []>} : vector<1x401xf32>, vector<401x16xf32>, vector<1x16xf32> -> vector<1x16xf32>
    %520 = arith.addf %515, %519 : vector<1x16xf32>
    %521 = vector.extract_strided_slice %504 {offsets = [3, 0], sizes = [1, 401], strides = [1, 1]} : vector<16x401xf32> to vector<1x401xf32>
    %c3_553 = arith.constant 3 : index
    %c0_554 = arith.constant 0 : index
    %c0_555 = arith.constant 0 : index
    %522 = vector.load %arg8[%c3_553, %c0_554, %c0_555] : memref<16x401x16xf32, #tpu.memory_space<vmem>>, vector<1x401x16xf32>
    %523 = vector.shape_cast %522 : vector<1x401x16xf32> to vector<401x16xf32>
    %cst_556 = arith.constant dense<0.000000e+00> : vector<1x16xf32>
    %524 = tpu.matmul %521, %523, %cst_556 {dimension_numbers = #tpu.dot_dimension_numbers<[1], [0], [0], [1], [0, 0, 1, 1], [], []>} : vector<1x401xf32>, vector<401x16xf32>, vector<1x16xf32> -> vector<1x16xf32>
    %525 = arith.addf %520, %524 : vector<1x16xf32>
    %526 = vector.extract_strided_slice %504 {offsets = [4, 0], sizes = [1, 401], strides = [1, 1]} : vector<16x401xf32> to vector<1x401xf32>
    %c4_557 = arith.constant 4 : index
    %c0_558 = arith.constant 0 : index
    %c0_559 = arith.constant 0 : index
    %527 = vector.load %arg8[%c4_557, %c0_558, %c0_559] : memref<16x401x16xf32, #tpu.memory_space<vmem>>, vector<1x401x16xf32>
    %528 = vector.shape_cast %527 : vector<1x401x16xf32> to vector<401x16xf32>
    %cst_560 = arith.constant dense<0.000000e+00> : vector<1x16xf32>
    %529 = tpu.matmul %526, %528, %cst_560 {dimension_numbers = #tpu.dot_dimension_numbers<[1], [0], [0], [1], [0, 0, 1, 1], [], []>} : vector<1x401xf32>, vector<401x16xf32>, vector<1x16xf32> -> vector<1x16xf32>
    %530 = arith.addf %525, %529 : vector<1x16xf32>
    %531 = vector.extract_strided_slice %504 {offsets = [5, 0], sizes = [1, 401], strides = [1, 1]} : vector<16x401xf32> to vector<1x401xf32>
    %c5_561 = arith.constant 5 : index
    %c0_562 = arith.constant 0 : index
    %c0_563 = arith.constant 0 : index
    %532 = vector.load %arg8[%c5_561, %c0_562, %c0_563] : memref<16x401x16xf32, #tpu.memory_space<vmem>>, vector<1x401x16xf32>
    %533 = vector.shape_cast %532 : vector<1x401x16xf32> to vector<401x16xf32>
    %cst_564 = arith.constant dense<0.000000e+00> : vector<1x16xf32>
    %534 = tpu.matmul %531, %533, %cst_564 {dimension_numbers = #tpu.dot_dimension_numbers<[1], [0], [0], [1], [0, 0, 1, 1], [], []>} : vector<1x401xf32>, vector<401x16xf32>, vector<1x16xf32> -> vector<1x16xf32>
    %535 = arith.addf %530, %534 : vector<1x16xf32>
    %536 = vector.extract_strided_slice %504 {offsets = [6, 0], sizes = [1, 401], strides = [1, 1]} : vector<16x401xf32> to vector<1x401xf32>
    %c6_565 = arith.constant 6 : index
    %c0_566 = arith.constant 0 : index
    %c0_567 = arith.constant 0 : index
    %537 = vector.load %arg8[%c6_565, %c0_566, %c0_567] : memref<16x401x16xf32, #tpu.memory_space<vmem>>, vector<1x401x16xf32>
    %538 = vector.shape_cast %537 : vector<1x401x16xf32> to vector<401x16xf32>
    %cst_568 = arith.constant dense<0.000000e+00> : vector<1x16xf32>
    %539 = tpu.matmul %536, %538, %cst_568 {dimension_numbers = #tpu.dot_dimension_numbers<[1], [0], [0], [1], [0, 0, 1, 1], [], []>} : vector<1x401xf32>, vector<401x16xf32>, vector<1x16xf32> -> vector<1x16xf32>
    %540 = arith.addf %535, %539 : vector<1x16xf32>
    %541 = vector.extract_strided_slice %504 {offsets = [7, 0], sizes = [1, 401], strides = [1, 1]} : vector<16x401xf32> to vector<1x401xf32>
    %c7_569 = arith.constant 7 : index
    %c0_570 = arith.constant 0 : index
    %c0_571 = arith.constant 0 : index
    %542 = vector.load %arg8[%c7_569, %c0_570, %c0_571] : memref<16x401x16xf32, #tpu.memory_space<vmem>>, vector<1x401x16xf32>
    %543 = vector.shape_cast %542 : vector<1x401x16xf32> to vector<401x16xf32>
    %cst_572 = arith.constant dense<0.000000e+00> : vector<1x16xf32>
    %544 = tpu.matmul %541, %543, %cst_572 {dimension_numbers = #tpu.dot_dimension_numbers<[1], [0], [0], [1], [0, 0, 1, 1], [], []>} : vector<1x401xf32>, vector<401x16xf32>, vector<1x16xf32> -> vector<1x16xf32>
    %545 = arith.addf %540, %544 : vector<1x16xf32>
    %546 = vector.extract_strided_slice %504 {offsets = [8, 0], sizes = [1, 401], strides = [1, 1]} : vector<16x401xf32> to vector<1x401xf32>
    %c8_573 = arith.constant 8 : index
    %c0_574 = arith.constant 0 : index
    %c0_575 = arith.constant 0 : index
    %547 = vector.load %arg8[%c8_573, %c0_574, %c0_575] : memref<16x401x16xf32, #tpu.memory_space<vmem>>, vector<1x401x16xf32>
    %548 = vector.shape_cast %547 : vector<1x401x16xf32> to vector<401x16xf32>
    %cst_576 = arith.constant dense<0.000000e+00> : vector<1x16xf32>
    %549 = tpu.matmul %546, %548, %cst_576 {dimension_numbers = #tpu.dot_dimension_numbers<[1], [0], [0], [1], [0, 0, 1, 1], [], []>} : vector<1x401xf32>, vector<401x16xf32>, vector<1x16xf32> -> vector<1x16xf32>
    %550 = arith.addf %545, %549 : vector<1x16xf32>
    %551 = vector.extract_strided_slice %504 {offsets = [9, 0], sizes = [1, 401], strides = [1, 1]} : vector<16x401xf32> to vector<1x401xf32>
    %c9_577 = arith.constant 9 : index
    %c0_578 = arith.constant 0 : index
    %c0_579 = arith.constant 0 : index
    %552 = vector.load %arg8[%c9_577, %c0_578, %c0_579] : memref<16x401x16xf32, #tpu.memory_space<vmem>>, vector<1x401x16xf32>
    %553 = vector.shape_cast %552 : vector<1x401x16xf32> to vector<401x16xf32>
    %cst_580 = arith.constant dense<0.000000e+00> : vector<1x16xf32>
    %554 = tpu.matmul %551, %553, %cst_580 {dimension_numbers = #tpu.dot_dimension_numbers<[1], [0], [0], [1], [0, 0, 1, 1], [], []>} : vector<1x401xf32>, vector<401x16xf32>, vector<1x16xf32> -> vector<1x16xf32>
    %555 = arith.addf %550, %554 : vector<1x16xf32>
    %556 = vector.extract_strided_slice %504 {offsets = [10, 0], sizes = [1, 401], strides = [1, 1]} : vector<16x401xf32> to vector<1x401xf32>
    %c10_581 = arith.constant 10 : index
    %c0_582 = arith.constant 0 : index
    %c0_583 = arith.constant 0 : index
    %557 = vector.load %arg8[%c10_581, %c0_582, %c0_583] : memref<16x401x16xf32, #tpu.memory_space<vmem>>, vector<1x401x16xf32>
    %558 = vector.shape_cast %557 : vector<1x401x16xf32> to vector<401x16xf32>
    %cst_584 = arith.constant dense<0.000000e+00> : vector<1x16xf32>
    %559 = tpu.matmul %556, %558, %cst_584 {dimension_numbers = #tpu.dot_dimension_numbers<[1], [0], [0], [1], [0, 0, 1, 1], [], []>} : vector<1x401xf32>, vector<401x16xf32>, vector<1x16xf32> -> vector<1x16xf32>
    %560 = arith.addf %555, %559 : vector<1x16xf32>
    %561 = vector.extract_strided_slice %504 {offsets = [11, 0], sizes = [1, 401], strides = [1, 1]} : vector<16x401xf32> to vector<1x401xf32>
    %c11_585 = arith.constant 11 : index
    %c0_586 = arith.constant 0 : index
    %c0_587 = arith.constant 0 : index
    %562 = vector.load %arg8[%c11_585, %c0_586, %c0_587] : memref<16x401x16xf32, #tpu.memory_space<vmem>>, vector<1x401x16xf32>
    %563 = vector.shape_cast %562 : vector<1x401x16xf32> to vector<401x16xf32>
    %cst_588 = arith.constant dense<0.000000e+00> : vector<1x16xf32>
    %564 = tpu.matmul %561, %563, %cst_588 {dimension_numbers = #tpu.dot_dimension_numbers<[1], [0], [0], [1], [0, 0, 1, 1], [], []>} : vector<1x401xf32>, vector<401x16xf32>, vector<1x16xf32> -> vector<1x16xf32>
    %565 = arith.addf %560, %564 : vector<1x16xf32>
    %566 = vector.extract_strided_slice %504 {offsets = [12, 0], sizes = [1, 401], strides = [1, 1]} : vector<16x401xf32> to vector<1x401xf32>
    %c12_589 = arith.constant 12 : index
    %c0_590 = arith.constant 0 : index
    %c0_591 = arith.constant 0 : index
    %567 = vector.load %arg8[%c12_589, %c0_590, %c0_591] : memref<16x401x16xf32, #tpu.memory_space<vmem>>, vector<1x401x16xf32>
    %568 = vector.shape_cast %567 : vector<1x401x16xf32> to vector<401x16xf32>
    %cst_592 = arith.constant dense<0.000000e+00> : vector<1x16xf32>
    %569 = tpu.matmul %566, %568, %cst_592 {dimension_numbers = #tpu.dot_dimension_numbers<[1], [0], [0], [1], [0, 0, 1, 1], [], []>} : vector<1x401xf32>, vector<401x16xf32>, vector<1x16xf32> -> vector<1x16xf32>
    %570 = arith.addf %565, %569 : vector<1x16xf32>
    %571 = vector.extract_strided_slice %504 {offsets = [13, 0], sizes = [1, 401], strides = [1, 1]} : vector<16x401xf32> to vector<1x401xf32>
    %c13_593 = arith.constant 13 : index
    %c0_594 = arith.constant 0 : index
    %c0_595 = arith.constant 0 : index
    %572 = vector.load %arg8[%c13_593, %c0_594, %c0_595] : memref<16x401x16xf32, #tpu.memory_space<vmem>>, vector<1x401x16xf32>
    %573 = vector.shape_cast %572 : vector<1x401x16xf32> to vector<401x16xf32>
    %cst_596 = arith.constant dense<0.000000e+00> : vector<1x16xf32>
    %574 = tpu.matmul %571, %573, %cst_596 {dimension_numbers = #tpu.dot_dimension_numbers<[1], [0], [0], [1], [0, 0, 1, 1], [], []>} : vector<1x401xf32>, vector<401x16xf32>, vector<1x16xf32> -> vector<1x16xf32>
    %575 = arith.addf %570, %574 : vector<1x16xf32>
    %576 = vector.extract_strided_slice %504 {offsets = [14, 0], sizes = [1, 401], strides = [1, 1]} : vector<16x401xf32> to vector<1x401xf32>
    %c14_597 = arith.constant 14 : index
    %c0_598 = arith.constant 0 : index
    %c0_599 = arith.constant 0 : index
    %577 = vector.load %arg8[%c14_597, %c0_598, %c0_599] : memref<16x401x16xf32, #tpu.memory_space<vmem>>, vector<1x401x16xf32>
    %578 = vector.shape_cast %577 : vector<1x401x16xf32> to vector<401x16xf32>
    %cst_600 = arith.constant dense<0.000000e+00> : vector<1x16xf32>
    %579 = tpu.matmul %576, %578, %cst_600 {dimension_numbers = #tpu.dot_dimension_numbers<[1], [0], [0], [1], [0, 0, 1, 1], [], []>} : vector<1x401xf32>, vector<401x16xf32>, vector<1x16xf32> -> vector<1x16xf32>
    %580 = arith.addf %575, %579 : vector<1x16xf32>
    %581 = vector.extract_strided_slice %504 {offsets = [15, 0], sizes = [1, 401], strides = [1, 1]} : vector<16x401xf32> to vector<1x401xf32>
    %c15_601 = arith.constant 15 : index
    %c0_602 = arith.constant 0 : index
    %c0_603 = arith.constant 0 : index
    %582 = vector.load %arg8[%c15_601, %c0_602, %c0_603] : memref<16x401x16xf32, #tpu.memory_space<vmem>>, vector<1x401x16xf32>
    %583 = vector.shape_cast %582 : vector<1x401x16xf32> to vector<401x16xf32>
    %cst_604 = arith.constant dense<0.000000e+00> : vector<1x16xf32>
    %584 = tpu.matmul %581, %583, %cst_604 {dimension_numbers = #tpu.dot_dimension_numbers<[1], [0], [0], [1], [0, 0, 1, 1], [], []>} : vector<1x401xf32>, vector<401x16xf32>, vector<1x16xf32> -> vector<1x16xf32>
    %585 = arith.addf %580, %584 : vector<1x16xf32>
    %586 = math.absf %585 : vector<1x16xf32>
    %cst_605 = arith.constant 0.000000e+00 : f32
    %587 = vector.broadcast %cst_605 : f32 to vector<1x16xf32>
    %588 = arith.subf %587, %586 : vector<1x16xf32>
    %589 = math.exp %588 : vector<1x16xf32>
    %cst_606 = arith.constant 1.000000e+00 : f32
    %590 = vector.broadcast %cst_606 : f32 to vector<1x16xf32>
    %591 = arith.addf %590, %589 : vector<1x16xf32>
    %cst_607 = arith.constant 1.000000e+00 : f32
    %592 = vector.broadcast %cst_607 : f32 to vector<1x16xf32>
    %593 = arith.divf %592, %591 : vector<1x16xf32>
    %cst_608 = arith.constant 0.000000e+00 : f32
    %594 = vector.broadcast %cst_608 : f32 to vector<1x16xf32>
    %595 = arith.cmpf oge, %585, %594 : vector<1x16xf32>
    %596 = arith.mulf %589, %593 : vector<1x16xf32>
    %597 = arith.select %595, %593, %596 : vector<1x16xi1>, vector<1x16xf32>
    %c0_609 = arith.constant 0 : index
    %c0_610 = arith.constant 0 : index
    %598 = vector.load %arg10[%c0_609, %c0_610] : memref<16x64xf32, #tpu.memory_space<vmem>>, vector<16x64xf32>
    %cst_611 = arith.constant dense<0.000000e+00> : vector<1x64xf32>
    %599 = tpu.matmul %597, %598, %cst_611 {dimension_numbers = #tpu.dot_dimension_numbers<[1], [0], [0], [1], [0, 0, 1, 1], [], []>} : vector<1x16xf32>, vector<16x64xf32>, vector<1x64xf32> -> vector<1x64xf32>
    %c0_612 = arith.constant 0 : index
    %c0_613 = arith.constant 0 : index
    %600 = vector.load %arg11[%c0_612, %c0_613] : memref<1x64xf32, #tpu.memory_space<vmem>>, vector<1x64xf32>
    %601 = arith.addf %599, %600 : vector<1x64xf32>
    %cst_614 = arith.constant 0.00999999977 : f32
    %602 = vector.broadcast %cst_614 : f32 to vector<1x64xf32>
    %603 = arith.mulf %602, %601 : vector<1x64xf32>
    %604 = arith.maximumf %601, %603 : vector<1x64xf32>
    %c0_615 = arith.constant 0 : index
    %c0_616 = arith.constant 0 : index
    %605 = vector.load %arg12[%c0_615, %c0_616] : memref<64x2xf32, #tpu.memory_space<vmem>>, vector<64x2xf32>
    %cst_617 = arith.constant dense<0.000000e+00> : vector<1x2xf32>
    %606 = tpu.matmul %604, %605, %cst_617 {dimension_numbers = #tpu.dot_dimension_numbers<[1], [0], [0], [1], [0, 0, 1, 1], [], []>} : vector<1x64xf32>, vector<64x2xf32>, vector<1x2xf32> -> vector<1x2xf32>
    %c0_618 = arith.constant 0 : index
    %c0_619 = arith.constant 0 : index
    %607 = vector.load %arg13[%c0_618, %c0_619] : memref<1x2xf32, #tpu.memory_space<vmem>>, vector<1x2xf32>
    %608 = arith.addf %606, %607 : vector<1x2xf32>
    %609 = math.tanh %608 : vector<1x2xf32>
    %c0_620 = arith.constant 0 : index
    %c0_621 = arith.constant 0 : index
    %610 = vector.load %arg14[%c0_620, %c0_621] : memref<16x64xf32, #tpu.memory_space<vmem>>, vector<16x64xf32>
    %cst_622 = arith.constant dense<0.000000e+00> : vector<1x64xf32>
    %611 = tpu.matmul %597, %610, %cst_622 {dimension_numbers = #tpu.dot_dimension_numbers<[1], [0], [0], [1], [0, 0, 1, 1], [], []>} : vector<1x16xf32>, vector<16x64xf32>, vector<1x64xf32> -> vector<1x64xf32>
    %c0_623 = arith.constant 0 : index
    %c0_624 = arith.constant 0 : index
    %612 = vector.load %arg15[%c0_623, %c0_624] : memref<2x64xf32, #tpu.memory_space<vmem>>, vector<2x64xf32>
    %cst_625 = arith.constant dense<0.000000e+00> : vector<1x64xf32>
    %613 = tpu.matmul %609, %612, %cst_625 {dimension_numbers = #tpu.dot_dimension_numbers<[1], [0], [0], [1], [0, 0, 1, 1], [], []>} : vector<1x2xf32>, vector<2x64xf32>, vector<1x64xf32> -> vector<1x64xf32>
    %614 = arith.addf %611, %613 : vector<1x64xf32>
    %c0_626 = arith.constant 0 : index
    %c0_627 = arith.constant 0 : index
    %615 = vector.load %arg16[%c0_626, %c0_627] : memref<1x64xf32, #tpu.memory_space<vmem>>, vector<1x64xf32>
    %616 = arith.addf %614, %615 : vector<1x64xf32>
    %cst_628 = arith.constant 0.00999999977 : f32
    %617 = vector.broadcast %cst_628 : f32 to vector<1x64xf32>
    %618 = arith.mulf %617, %616 : vector<1x64xf32>
    %619 = arith.maximumf %616, %618 : vector<1x64xf32>
    %c0_629 = arith.constant 0 : index
    %c0_630 = arith.constant 0 : index
    %620 = vector.load %arg17[%c0_629, %c0_630] : memref<64x1xf32, #tpu.memory_space<vmem>>, vector<64x1xf32>
    %cst_631 = arith.constant dense<0.000000e+00> : vector<1x1xf32>
    %621 = tpu.matmul %619, %620, %cst_631 {dimension_numbers = #tpu.dot_dimension_numbers<[1], [0], [0], [1], [0, 0, 1, 1], [], []>} : vector<1x64xf32>, vector<64x1xf32>, vector<1x1xf32> -> vector<1x1xf32>
    %c0_632 = arith.constant 0 : index
    %c0_633 = arith.constant 0 : index
    %622 = vector.load %arg18[%c0_632, %c0_633] : memref<1x1xf32, #tpu.memory_space<vmem>>, vector<1x1xf32>
    %623 = arith.addf %621, %622 : vector<1x1xf32>
    %c0_634 = arith.constant 0 : index
    %c0_635 = arith.constant 0 : index
    %c0_636 = arith.constant 0 : index
    %624 = vector.load %arg19[%c0_634, %c0_635, %c0_636] : memref<1x1x1xf32, #tpu.memory_space<vmem>>, vector<1x1x1xf32>
    %625 = vector.shape_cast %624 : vector<1x1x1xf32> to vector<1x1xf32>
    %626 = vector.shape_cast %623 : vector<1x1xf32> to vector<1x1x1xf32>
    tpu.vector_store %arg19[%c0_634, %c0_635, %c0_636], %626 {strides = array<i32>} : memref<1x1x1xf32, #tpu.memory_space<vmem>>, vector<1x1x1xf32>,
    return
  }
  func.func @transform_0(%arg0: i32) -> (i32, i32, i32, i32) {
    %c0_i32 = arith.constant 0 : i32
    %c0_i32_0 = arith.constant 0 : i32
    %c0_i32_1 = arith.constant 0 : i32
    %c0_i32_2 = arith.constant 0 : i32
    return %arg0, %c0_i32, %c0_i32_0, %c0_i32_1 : i32, i32, i32, i32
  }
  func.func @transform_1(%arg0: i32) -> (i32, i32, i32) {
    %c0_i32 = arith.constant 0 : i32
    %c0_i32_0 = arith.constant 0 : i32
    %c0_i32_1 = arith.constant 0 : i32
    %c0_i32_2 = arith.constant 0 : i32
    return %c0_i32, %c0_i32_0, %c0_i32_1 : i32, i32, i32
  }
  func.func @transform_2(%arg0: i32) -> (i32, i32) {
    %c0_i32 = arith.constant 0 : i32
    %c0_i32_0 = arith.constant 0 : i32
    %c0_i32_1 = arith.constant 0 : i32
    return %c0_i32, %c0_i32_0 : i32, i32
  }
  func.func @transform_3(%arg0: i32) -> (i32, i32, i32) {
    %c0_i32 = arith.constant 0 : i32
    %c0_i32_0 = arith.constant 0 : i32
    %c0_i32_1 = arith.constant 0 : i32
    %c0_i32_2 = arith.constant 0 : i32
    return %c0_i32, %c0_i32_0, %c0_i32_1 : i32, i32, i32
  }
  func.func @transform_4(%arg0: i32) -> (i32, i32) {
    %c0_i32 = arith.constant 0 : i32
    %c0_i32_0 = arith.constant 0 : i32
    %c0_i32_1 = arith.constant 0 : i32
    return %c0_i32, %c0_i32_0 : i32, i32
  }
  func.func @transform_5(%arg0: i32) -> (i32, i32, i32) {
    %c0_i32 = arith.constant 0 : i32
    %c0_i32_0 = arith.constant 0 : i32
    %c0_i32_1 = arith.constant 0 : i32
    %c0_i32_2 = arith.constant 0 : i32
    return %c0_i32, %c0_i32_0, %c0_i32_1 : i32, i32, i32
  }
  func.func @transform_6(%arg0: i32) -> (i32, i32) {
    %c0_i32 = arith.constant 0 : i32
    %c0_i32_0 = arith.constant 0 : i32
    %c0_i32_1 = arith.constant 0 : i32
    return %c0_i32, %c0_i32_0 : i32, i32
  }
  func.func @transform_7(%arg0: i32) -> (i32, i32, i32) {
    %c0_i32 = arith.constant 0 : i32
    %c0_i32_0 = arith.constant 0 : i32
    %c0_i32_1 = arith.constant 0 : i32
    %c0_i32_2 = arith.constant 0 : i32
    return %c0_i32, %c0_i32_0, %c0_i32_1 : i32, i32, i32
  }
  func.func @transform_8(%arg0: i32) -> (i32, i32) {
    %c0_i32 = arith.constant 0 : i32
    %c0_i32_0 = arith.constant 0 : i32
    %c0_i32_1 = arith.constant 0 : i32
    return %c0_i32, %c0_i32_0 : i32, i32
  }
  func.func @transform_9(%arg0: i32) -> (i32, i32) {
    %c0_i32 = arith.constant 0 : i32
    %c0_i32_0 = arith.constant 0 : i32
    %c0_i32_1 = arith.constant 0 : i32
    return %c0_i32, %c0_i32_0 : i32, i32
  }
  func.func @transform_10(%arg0: i32) -> (i32, i32) {
    %c0_i32 = arith.constant 0 : i32
    %c0_i32_0 = arith.constant 0 : i32
    %c0_i32_1 = arith.constant 0 : i32
    return %c0_i32, %c0_i32_0 : i32, i32
  }
  func.func @transform_11(%arg0: i32) -> (i32, i32) {
    %c0_i32 = arith.constant 0 : i32
    %c0_i32_0 = arith.constant 0 : i32
    %c0_i32_1 = arith.constant 0 : i32
    return %c0_i32, %c0_i32_0 : i32, i32
  }
  func.func @transform_12(%arg0: i32) -> (i32, i32) {
    %c0_i32 = arith.constant 0 : i32
    %c0_i32_0 = arith.constant 0 : i32
    %c0_i32_1 = arith.constant 0 : i32
    return %c0_i32, %c0_i32_0 : i32, i32
  }
  func.func @transform_13(%arg0: i32) -> (i32, i32) {
    %c0_i32 = arith.constant 0 : i32
    %c0_i32_0 = arith.constant 0 : i32
    %c0_i32_1 = arith.constant 0 : i32
    return %c0_i32, %c0_i32_0 : i32, i32
  }
  func.func @transform_14(%arg0: i32) -> (i32, i32) {
    %c0_i32 = arith.constant 0 : i32
    %c0_i32_0 = arith.constant 0 : i32
    %c0_i32_1 = arith.constant 0 : i32
    return %c0_i32, %c0_i32_0 : i32, i32
  }
  func.func @transform_15(%arg0: i32) -> (i32, i32) {
    %c0_i32 = arith.constant 0 : i32
    %c0_i32_0 = arith.constant 0 : i32
    %c0_i32_1 = arith.constant 0 : i32
    return %c0_i32, %c0_i32_0 : i32, i32
  }
  func.func @transform_16(%arg0: i32) -> (i32, i32) {
    %c0_i32 = arith.constant 0 : i32
    %c0_i32_0 = arith.constant 0 : i32
    %c0_i32_1 = arith.constant 0 : i32
    return %c0_i32, %c0_i32_0 : i32, i32
  }
  func.func @transform_17(%arg0: i32) -> (i32, i32) {
    %c0_i32 = arith.constant 0 : i32
    %c0_i32_0 = arith.constant 0 : i32
    %c0_i32_1 = arith.constant 0 : i32
    return %c0_i32, %c0_i32_0 : i32, i32
  }
  func.func @transform_18(%arg0: i32) -> (i32, i32, i32) {
    %c0_i32 = arith.constant 0 : i32
    %c0_i32_0 = arith.constant 0 : i32
    %c0_i32_1 = arith.constant 0 : i32
    return %arg0, %c0_i32, %c0_i32_0 : i32, i32, i32
  }
}

</mosaic_0001>

<bundles_post_ra>
// kernel: actor_critic_forward.1
= control target key start
LH: loop header
LB: loop body
LE: loop exit
PB: predicated region body
PF: predicated region fallthrough
CT: control target
= control target key end

     0   :  { %s28752_s29 = smov 0   ;;  %s34566_s0 = inlined_call_operand.vmem [shape: f32[2,16,3,576], index: 0, kind: input, shape index: {}]   ;;  %s34567_s1 = inlined_call_operand.vmem [shape: f32[64,8,3], index: 1, kind: input, shape index: {}]   ;;  %s34568_s2 = inlined_call_operand.vmem [shape: f32[8,1], index: 2, kind: input, shape index: {}]   ;;  %s34569_s3 = inlined_call_operand.vmem [shape: f32[16,16,8], index: 3, kind: input, shape index: {}]   ;;  %s34570_s4 = inlined_call_operand.vmem [shape: f32[16,1], index: 4, kind: input, shape index: {}]   ;;  %s34571_s5 = inlined_call_operand.vmem [shape: f32[4,16,16], index: 5, kind: input, shape index: {}]   ;;  %s34572_s6 = inlined_call_operand.vmem [shape: f32[16,1], index: 6, kind: input, shape index: {}]   ;;  %s34573_s7 = inlined_call_operand.vmem [shape: f32[16,401,16], index: 7, kind: input, shape index: {}]   ;;  %s34574_s8 = inlined_call_operand.vmem [shape: f32[1,16], index: 8, kind: input, shape index: {}]   ;;  %s34575_s9 = inlined_call_operand.vmem [shape: f32[16,64], index: 9, kind: input, shape index: {}]   ;;  %s34576_s10 = inlined_call_operand.vmem [shape: f32[1,64], index: 10, kind: input, shape index: {}]   ;;  %s34577_s11 = inlined_call_operand.vmem [shape: f32[64,2], index: 11, kind: input, shape index: {}]   ;;  %s34578_s12 = inlined_call_operand.vmem [shape: f32[1,2], index: 12, kind: input, shape index: {}]   ;;  %s34579_s13 = inlined_call_operand.vmem [shape: f32[16,64], index: 13, kind: input, shape index: {}]   ;;  %s34580_s14 = inlined_call_operand.vmem [shape: f32[2,64], index: 14, kind: input, shape index: {}]   ;;  %s34581_s15 = inlined_call_operand.vmem [shape: f32[1,64], index: 15, kind: input, shape index: {}]   ;;  %s34582_s16 = inlined_call_operand.vmem [shape: f32[64,1], index: 16, kind: input, shape index: {}]   ;;  %s34583_s17 = inlined_call_operand.<no memory space> [shape: f32[1,1], index: 17, kind: input, shape index: {}]   ;;  %s34584_s18 = inlined_call_operand.vmem [shape: f32[2,1,1], index: 18, kind: output, shape index: {}]  }
   0x1   :  { %34586 = sst [smem:[#allocation3_spill]] %s34566_s0  ;;  %v23_v0 = vstv %s34583_s17 }
   0x2   :  { %34587 = sst [smem:[#allocation4_spill]] %s34567_s1  ;;  %24 = vst [vmem:[#allocation2] sm:$0x1] %v23_v0 }
   0x3   :  { %34588 = sst [smem:[#allocation5_spill]] %s34568_s2 }
   0x4 LB: > { %s24182_s30 = sadd.s32 4294967295, %s28633_s29   ;;  %p24186_p0 = scmp.ge.s32.totalorder %s28633_s29, 1  ;;  %s28633_s29 = sphi %s28752_s29, %s30_s29  }
   0x5   : > { %p514_p1 = scmp.lt.s32.totalorder %s28633_s29, 3 }
   0x7   : > { %p515_p2 = pnand %p24186_p0, %p514_p1 }
   0x8   : > { %p566_p3 = scmp.lt.s32.totalorder (!%p515_p2), %s24182_s30, 1  ;;  %v28635_v1 = vmov (!%p515_p2), 0.0   ;;  %vm28636_vm0 = vmmov (!%p515_p2), 0   ;;  %s34589_s1 = sld [smem:[#allocation3_spill]] (!%p515_p2)  ;;  %vm593_vm1 = vcmask (!%p515_p2), 1042432   ;;  %vm589_vm2 = vcmask (!%p515_p2), 23552  }
   0x9   : > { %518 = sbr.rel (%p515_p2) target bundleno = 3368 (0xd28), region = 92  ;;  %668 = vmatprep.mubr.f32.mxu1 (!%p515_p2), %v28635_v1  ;;  %26578 = vmatprep.subr.mxu0 (!%p515_p2), %v28635_v1  ;;  %s28637_s21 = smov (!%p515_p2), 127   ;;  %vm1548_vm3 = vcmask (!%p515_p2), 1039360   ;;  %vm8505_vm4 = vcmask (!%p515_p2), 850944   ;;  %vm9522_vm5 = vcmask (!%p515_p2), 842752   ;;  %vm16660_vm6 = vcmask (!%p515_p2), 64512  }
   0xa   : > { %26580 = vmatprep.mubr.msk.f32.mxu0 (!%p515_p2), %vm28636_vm0, %v28635_v1  ;;  %s34590_s23 = sld [smem:[#allocation4_spill]] (!%p515_p2)  ;;  %s28639_s0 = smov (!%p515_p2), 103   ;;  %vm16992_vm7 = vcmask (!%p515_p2), 1031168   ;;  %vm17179_vm8 = vcmask (!%p515_p2), 1022976   ;;  %vm17738_vm9 = vcmask (!%p515_p2), 834560   ;;  %vm17925_vm10 = vcmask (!%p515_p2), 826368  }
   0xb   : > { %s28641_s19 = smov (!%p515_p2), 126   ;;  %s28642_s2 = smov (!%p515_p2), 125   ;;  %vm18112_vm11 = vcmask (!%p515_p2), 654336   ;;  %vm18299_vm12 = vcmask (!%p515_p2), 646144   ;;  %vm18486_vm13 = vcmask (!%p515_p2), 637952   ;;  %vm18673_vm14 = vcmask (!%p515_p2), 629760  }
   0xc   : > { %s28644_s26 = smov (!%p515_p2), 101   ;;  %s28648_s27 = smov (!%p515_p2), 77   ;;  %vm18863_vm15 = vcmask (!%p515_p2), 457728  }
   0xd   : > { %s28649_s28 = smov (!%p515_p2), 56   ;;  %s28651_s22 = smov (!%p515_p2), 54  }
  0x10   : > { %s34593_s30 = smov (!%p566_p3, %s24182_s30), 1  ;;  %v24191_v12 = vld [vmem:[%s34590_s23 + $0x8] sm:$0xff]  ;;  %v577_v29 = vld [vmem:[%s34590_s23] sm:$0xff]  ;;  %v24211_v37 = vld [vmem:[%s34590_s23 + $0x10] sm:$0xff] }
  0x11   : > { %s28403_s17 = smul.u32 320, %s34593_s30  ;;  %v24223_v46 = vld [vmem:[%s34590_s23 + $0x18] sm:$0xff] }
  0x13   : > { %s28770_s20 = scalar_lea.vmem %s34589_s1, %s28403_s17  ;;  %s28638_s17 = smov 104  }
  0x14   : > { %v1529_v2 = vld [vmem:[%s28770_s20 + $0x8] sm:$0x77]  ;;  %v1528_v3 = vld [vmem:[%s28770_s20] sm:$0x77]  ;;  %v1530_v5 = vld [vmem:[%s28770_s20 + $0x10] sm:$0x7] }
  0x15   : > { %1542 = vrot.lane.b32.xlu0 %v1529_v2, %s28637_s21  ;;  %v1537_v4 = vcombine.high %v1529_v2, %v1529_v2  ;;  %1538 = vrot.lane.b32.xlu1 %v1528_v3, %s28637_s21  ;;  %v24241_v6 = vld [vmem:[%s28770_s20 + $0x14] sm:$0x77]  ;;  %v1536_v7 = vcombine.high %v1528_v3, %v1528_v3  ;;  %v24189_v11 = vld [vmem:[%s28770_s20 + $0x1c] sm:$0x77]  ;;  %s28650_s1 = smov 55  }
  0x16   : > { %v1791_v8 = vcombine.high %v24241_v6, %v24241_v6  ;;  %v24188_v9 = vld [vmem:[%s28770_s20 + $0x14] sm:$0x77]  ;;  %v588_v13 = vcombine.high %v24189_v11, %v24189_v11  ;;  %v575_v14 = vld [vmem:[%s28770_s20 + $0x8] sm:$0x77]  ;;  %v24242_v15 = vld [vmem:[%s28770_s20 + $0x1c] sm:$0x77] }
  0x17   : > { %v587_v10 = vcombine.high %v24188_v9, %v24188_v9  ;;  %v24190_v16 = vld [vmem:[%s28770_s20 + $0x24] sm:$0x7]  ;;  %v820_v17 = vcombine.high %v575_v14, %v575_v14  ;;  %v1792_v20 = vcombine.high %v24242_v15, %v24242_v15  ;;  %v24208_v21 = vld [vmem:[%s28770_s20 + $0x28] sm:$0x77]  ;;  %v24254_v26 = vld [vmem:[%s28770_s20 + $0x30] sm:$0x77] }
  0x18   : > { %26579 = vmatpush3.msk.msra.mxu0 %vm593_vm1, %v24190_v16  ;;  %v574_v18 = vld [vmem:[%s28770_s20] sm:$0x77]  ;;  %v24253_v23 = vld [vmem:[%s28770_s20 + $0x28] sm:$0x77]  ;;  %v1055_v24 = vcombine.high %v24208_v21, %v24208_v21  ;;  %v24209_v27 = vld [vmem:[%s28770_s20 + $0x30] sm:$0x77]  ;;  %v2046_v28 = vcombine.high %v24254_v26, %v24254_v26 }
  0x19   : > { %1546 = vrot.lane.b32.xlu0 %v1530_v5, %s28637_s21  ;;  %1544 = vrot.lane.b32.xlu1 %v1537_v4, %s28637_s21  ;;  %v819_v19 = vcombine.high %v574_v18, %v574_v18  ;;  %v24243_v22 = vld [vmem:[%s28770_s20 + $0x24] sm:$0x7]  ;;  %v2045_v25 = vcombine.high %v24253_v23, %v24253_v23  ;;  %v24265_v30 = vld [vmem:[%s28770_s20 + $0x3c] sm:$0x77]  ;;  %v1056_v32 = vcombine.high %v24209_v27, %v24209_v27 }
  0x1a   : > { %24192 = vmatprep.subr.msk.mxu1 %vm593_vm1, %v587_v10  ;;  %26581 = vmatmul.mubr.msk.f32.vlgmr.msra.gmra.mrb[0].mxu0 %vm589_vm2, %v24191_v12  ;;  %v576_v31 = vld [vmem:[%s28770_s20 + $0x10] sm:$0x7]  ;;  %v24221_v33 = vld [vmem:[%s28770_s20 + $0x44] sm:$0x77]  ;;  %v2299_v34 = vcombine.high %v24265_v30, %v24265_v30  ;;  %v24255_v35 = vld [vmem:[%s28770_s20 + $0x38] sm:$0x7] }
  0x1b   : > { %24193 = vmatpush1.msk.msra.mxu1 %vm593_vm1, %v24188_v9  ;;  %24200 = vmatprep.subr.msk.mxu0 %vm593_vm1, %v819_v19  ;;  %v1297_v36 = vcombine.high %v24221_v33, %v24221_v33  ;;  %v24210_v38 = vld [vmem:[%s28770_s20 + $0x38] sm:$0x7]  ;;  %v24220_v39 = vld [vmem:[%s28770_s20 + $0x3c] sm:$0x77]  ;;  %v24266_v40 = vld [vmem:[%s28770_s20 + $0x44] sm:$0x77] }
  0x1c   : > { %24194 = vmatmul.mubr.msk.f32.vlgmr.msra.gmra.mrb[0].mxu1 %vm589_vm2, %v24191_v12  ;;  %24195 = vmatprep.subr.msk.mxu1 %vm593_vm1, %v588_v13  ;;  %v1296_v41 = vcombine.high %v24220_v39, %v24220_v39  ;;  %v2300_v42 = vcombine.high %v24266_v40, %v24266_v40  ;;  %v24267_v43 = vld [vmem:[%s28770_s20 + $0x4c] sm:$0x7]  ;;  %v24325_v44 = vld [vmem:[%s28770_s20 + $0x50] sm:$0x77]  ;;  %v24326_v47 = vld [vmem:[%s28770_s20 + $0x58] sm:$0x77] }
  0x1d   : > { %1795 = vrot.lane.b32.xlu1 %v1791_v8, %s28637_s21  ;;  %1540 = vrot.lane.b32.xlu0 %v1536_v7, %s28637_s21  ;;  %v3517_v45 = vcombine.high %v24325_v44, %v24325_v44  ;;  %v24222_v48 = vld [vmem:[%s28770_s20 + $0x4c] sm:$0x7]  ;;  %v3518_v49 = vcombine.high %v24326_v47, %v24326_v47  ;;  %v24337_v50 = vld [vmem:[%s28770_s20 + $0x64] sm:$0x77] }
  0x1e   : > { %24196 = vmatpush1.msk.msra.mxu1 %vm593_vm1, %v24189_v11  ;;  %739 = vmatprep.mubr.f32.mxu1 %v28635_v1  ;;  %v3771_v51 = vcombine.high %v24337_v50, %v24337_v50  ;;  %v24327_v52 = vld [vmem:[%s28770_s20 + $0x60] sm:$0x7]  ;;  %v24338_v53 = vld [vmem:[%s28770_s20 + $0x6c] sm:$0x77]  ;;  %v24339_v55 = vld [vmem:[%s28770_s20 + $0x74] sm:$0x7] }
  0x1f   : > { %24203 = vmatprep.subr.msk.mxu1 %vm593_vm1, %v820_v17  ;;  %24201 = vmatpush1.msk.msra.mxu0 %vm593_vm1, %v574_v18  ;;  %v3772_v54 = vcombine.high %v24338_v53, %v24338_v53  ;;  %v24349_v56 = vld [vmem:[%s28770_s20 + $0x78] sm:$0x77]  ;;  %v24350_v58 = vld [vmem:[%s28770_s20 + $0x80] sm:$0x77]  ;;  %v24361_v60 = vld [vmem:[%s28770_s20 + $0x8c] sm:$0x77] }
  0x20   : > { %24197 = vmatmul.mubr.msk.f32.vlgmr.msra.gmra.mrb[2].mxu1 %vm589_vm2, %v24191_v12  ;;  %898 = vmatprep.mubr.f32.mxu0 %v28635_v1  ;;  %v4025_v57 = vcombine.high %v24349_v56, %v24349_v56  ;;  %v4026_v59 = vcombine.high %v24350_v58, %v24350_v58  ;;  %v4279_v61 = vcombine.high %v24361_v60, %v24361_v60  ;;  %v24351_v62 = vld [vmem:[%s28770_s20 + $0x88] sm:$0x7]  ;;  %v24362_v63 = vld [vmem:[%s28770_s20 + $0x94] sm:$0x77]  ;;  %v24363_v2 = vld [vmem:[%s28770_s20 + $0x9c] sm:$0x7] }
  0x21   : > { %1793 = vrot.lane.b32.xlu1 %v24241_v6, %s28637_s21  ;;  %1797 = vrot.lane.b32.xlu0 %v24242_v15, %s28637_s21  ;;  %v4280_v0 = vcombine.high %v24362_v63, %v24362_v63  ;;  %v24421_v3 = vld [vmem:[%s28770_s20 + $0xa0] sm:$0x77]  ;;  %v24422_v5 = vld [vmem:[%s28770_s20 + $0xa8] sm:$0x77] }
  0x22   : > { %24204 = vmatpush1.msk.msra.mxu1 %vm593_vm1, %v575_v14  ;;  %969 = vmatprep.mubr.f32.mxu1 %v28635_v1  ;;  %v5497_v4 = vcombine.high %v24421_v3, %v24421_v3  ;;  %v5498_v6 = vcombine.high %v24422_v5, %v24422_v5  ;;  %v24433_v7 = vld [vmem:[%s28770_s20 + $0xb4] sm:$0x77]  ;;  %v24423_v9 = vld [vmem:[%s28770_s20 + $0xb0] sm:$0x7]  ;;  %v24434_v10 = vld [vmem:[%s28770_s20 + $0xbc] sm:$0x77] }
  0x23   : > { %26583 = vmatprep.subr.mxu1 %v28635_v1  ;;  %24212 = vmatprep.subr.msk.mxu0 %vm593_vm1, %v1055_v24  ;;  %v5751_v8 = vcombine.high %v24433_v7, %v24433_v7  ;;  %v5752_v11 = vcombine.high %v24434_v10, %v24434_v10  ;;  %v24435_v12 = vld [vmem:[%s28770_s20 + $0xc4] sm:$0x7]  ;;  %v24445_v13 = vld [vmem:[%s28770_s20 + $0xc8] sm:$0x77]  ;;  %v24446_v15 = vld [vmem:[%s28770_s20 + $0xd0] sm:$0x77] }
  0x24   : > { %24202 = vmatmul.mubr.msk.f32.vlgmr.msra.gmra.mrb[2].mxu0 %vm589_vm2, %v577_v29  ;;  %v6005_v14 = vcombine.high %v24445_v13, %v24445_v13  ;;  %v6006_v16 = vcombine.high %v24446_v15, %v24446_v15  ;;  %v24457_v17 = vld [vmem:[%s28770_s20 + $0xdc] sm:$0x77]  ;;  %v24447_v19 = vld [vmem:[%s28770_s20 + $0xd8] sm:$0x7] }
  0x25   : > { %1801 = vrot.lane.b32.xlu1 %v24243_v22, %s28637_s21  ;;  %1799 = vrot.lane.b32.xlu0 %v1792_v20, %s28637_s21  ;;  %v6259_v18 = vcombine.high %v24457_v17, %v24457_v17  ;;  %v24458_v20 = vld [vmem:[%s28770_s20 + $0xe4] sm:$0x77]  ;;  %v24459_v22 = vld [vmem:[%s28770_s20 + $0xec] sm:$0x7] }
  0x26   : > { %24213 = vmatpush1.msk.msra.mxu0 %vm593_vm1, %v24208_v21  ;;  %1134 = vmatprep.mubr.f32.mxu0 %v28635_v1  ;;  %v6260_v21 = vcombine.high %v24458_v20, %v24458_v20 }
  0x27   : > { %26588 = vmatprep.subr.mxu0 %v28635_v1 }
  0x28   : > { %24205 = vmatmul.mubr.msk.f32.vlgmr.msra.gmra.mrb[2].mxu1 %vm589_vm2, %v577_v29 }
  0x29   : > { %2051 = vrot.lane.b32.xlu1 %v24254_v26, %s28637_s21  ;;  %2049 = vrot.lane.b32.xlu0 %v2045_v25, %s28637_s21  ;;  %v24517_v25 = vld [vmem:[%s28770_s20 + $0xf0] sm:$0x77]  ;;  %v24518_v26 = vld [vmem:[%s28770_s20 + $0xf8] sm:$0x77] }
  0x2a   : > { %26584 = vmatpush3.msk.msra.mxu1 %vm593_vm1, %v576_v31  ;;  %26585 = vmatprep.mubr.msk.f32.mxu1 %vm28636_vm0, %v28635_v1 }
  0x2b   : > { %24215 = vmatprep.subr.msk.mxu1 %vm593_vm1, %v1056_v32  ;;  %v24232_v32 = vld [vmem:[%s34590_s23 + $0x20] sm:$0xff] }
  0x2c   : > { %26586 = vmatmul.mubr.msk.f32.vlgmr.msra.gmra.mrb[4].mxu1 %vm589_vm2, %v577_v29  ;;  %24214 = vmatmul.mubr.msk.f32.vlgmr.msra.gmra.mrb[2].mxu0 %vm589_vm2, %v24211_v37 }
  0x2d   : > { %2053 = vrot.lane.b32.xlu1 %v2046_v28, %s28637_s21  ;;  %2047 = vrot.lane.b32.xlu0 %v24253_v23, %s28637_s21 }
  0x2e   : > { %24216 = vmatpush1.msk.msra.mxu1 %vm593_vm1, %v24209_v27  ;;  %1205 = vmatprep.mubr.f32.mxu1 %v28635_v1  ;;  %v7477_v27 = vcombine.high %v24517_v25, %v24517_v25 }
  0x2f   : > { %24227 = vmatprep.subr.msk.mxu1 %vm593_vm1, %v1297_v36  ;;  %26589 = vmatpush3.msk.msra.mxu0 %vm593_vm1, %v24210_v38 }
  0x30   : > { %24217 = vmatmul.mubr.msk.f32.vlgmr.msra.gmra.mrb[2].mxu1 %vm589_vm2, %v24211_v37  ;;  %26590 = vmatprep.mubr.msk.f32.mxu0 %vm28636_vm0, %v28635_v1 }
  0x31   : > { %2303 = vrot.lane.b32.xlu1 %v2299_v34, %s28637_s21  ;;  %2055 = vrot.lane.b32.xlu0 %v24255_v35, %s28637_s21  ;;  %v24529_v34 = vld [vmem:[%s28770_s20 + $0x104] sm:$0x77] }
  0x32   : > { %24228 = vmatpush1.msk.msra.mxu1 %vm593_vm1, %v24221_v33  ;;  %1446 = vmatprep.mubr.f32.mxu1 %v28635_v1  ;;  %v7478_v33 = vcombine.high %v24518_v26, %v24518_v26 }
  0x33   : > { %26593 = vmatprep.subr.mxu1 %v28635_v1  ;;  %26591 = vmatmul.mubr.msk.f32.vlgmr.msra.gmra.mrb[4].mxu0 %vm589_vm2, %v24211_v37 }
  0x34   : > { %24224 = vmatprep.subr.msk.mxu0 %vm593_vm1, %v1296_v41  ;;  %1375 = vmatprep.mubr.f32.mxu0 %v28635_v1 }
  0x35   : > { %2301 = vrot.lane.b32.xlu1 %v24265_v30, %s28637_s21  ;;  %2305 = vrot.lane.b32.xlu0 %v24266_v40, %s28637_s21 }
  0x36   : > { %24225 = vmatpush1.msk.msra.mxu0 %vm593_vm1, %v24220_v39  ;;  %v7731_v39 = vcombine.high %v24529_v34, %v24529_v34 }
  0x37   : > { %24226 = vmatmul.mubr.msk.f32.vlgmr.msra.gmra.mrb[2].mxu0 %vm589_vm2, %v24223_v46 }
  0x38   : > { %24229 = vmatmul.mubr.msk.f32.vlgmr.msra.gmra.mrb[2].mxu1 %vm589_vm2, %v24223_v46  ;;  %1630 = vmatprep.mubr.f32.mxu0 %v28635_v1 }
  0x39   : > { %2309 = vrot.lane.b32.xlu1 %v24267_v43, %s28637_s21  ;;  %2307 = vrot.lane.b32.xlu0 %v2300_v42, %s28637_s21  ;;  %v24519_v42 = vld [vmem:[%s28770_s20 + $0x100] sm:$0x7] }
  0x3a   : > { %26594 = vmatpush3.msk.msra.mxu1 %vm593_vm1, %v24222_v48  ;;  %26595 = vmatprep.mubr.msk.f32.mxu1 %vm28636_vm0, %v28635_v1 }
  0x3c   : > { %26596 = vmatmul.mubr.msk.f32.vlgmr.msra.gmra.mrb[6].mxu1 %vm589_vm2, %v24223_v46 }
  0x3d   : > { %3523 = vrot.lane.b32.xlu1 %v24326_v47, %s28637_s21  ;;  %3521 = vrot.lane.b32.xlu0 %v3517_v45, %s28637_s21  ;;  %v24530_v47 = vld [vmem:[%s28770_s20 + $0x10c] sm:$0x77] }
  0x3e   : > { %1701 = vmatprep.mubr.f32.mxu1 %v28635_v1 }
  0x41   : > { %3525 = vrot.lane.b32.xlu1 %v3518_v49, %s28637_s21  ;;  %3519 = vrot.lane.b32.xlu0 %v24325_v44, %s28637_s21 }
  0x45   : > { %3775 = vrot.lane.b32.xlu1 %v3771_v51, %s28637_s21  ;;  %3527 = vrot.lane.b32.xlu0 %v24327_v52, %s28637_s21  ;;  %v7732_v51 = vcombine.high %v24530_v47, %v24530_v47 }
  0x49   : > { %3773 = vrot.lane.b32.xlu1 %v24337_v50, %s28637_s21  ;;  %3777 = vrot.lane.b32.xlu0 %v24338_v53, %s28637_s21  ;;  %v24244_v50 = vld [vmem:[%s34590_s23 + $0x28] sm:$0xff] }
  0x4d   : > { %3781 = vrot.lane.b32.xlu1 %v24339_v55, %s28637_s21  ;;  %3779 = vrot.lane.b32.xlu0 %v3772_v54, %s28637_s21  ;;  %v24531_v54 = vld [vmem:[%s28770_s20 + $0x114] sm:$0x7] }
  0x51   : > { %4031 = vrot.lane.b32.xlu1 %v24350_v58, %s28637_s21  ;;  %4029 = vrot.lane.b32.xlu0 %v4025_v57, %s28637_s21 }
  0x55   : > { %4033 = vrot.lane.b32.xlu1 %v4026_v59, %s28637_s21  ;;  %4027 = vrot.lane.b32.xlu0 %v24349_v56, %s28637_s21  ;;  %v24541_v56 = vld [vmem:[%s28770_s20 + $0x118] sm:$0x77]  ;;  %v24542_v59 = vld [vmem:[%s28770_s20 + $0x120] sm:$0x77] }
  0x59   : > { %4283 = vrot.lane.b32.xlu1 %v4279_v61, %s28637_s21  ;;  %4035 = vrot.lane.b32.xlu0 %v24351_v62, %s28637_s21  ;;  %v24256_v62 = vld [vmem:[%s34590_s23 + $0x30] sm:$0xff] }
  0x5d   : > { %4281 = vrot.lane.b32.xlu1 %v24361_v60, %s28637_s21  ;;  %4285 = vrot.lane.b32.xlu0 %v24362_v63, %s28637_s21  ;;  %v7985_v60 = vcombine.high %v24541_v56, %v24541_v56  ;;  %v7986_v63 = vcombine.high %v24542_v59, %v24542_v59 }
  0x61   : > { %4289 = vrot.lane.b32.xlu1 %v24363_v2, %s28637_s21  ;;  %4287 = vrot.lane.b32.xlu0 %v4280_v0, %s28637_s21 }
  0x65   : > { %5503 = vrot.lane.b32.xlu1 %v24422_v5, %s28637_s21  ;;  %5501 = vrot.lane.b32.xlu0 %v5497_v4, %s28637_s21  ;;  %v24277_v5 = vld [vmem:[%s28770_s20 + $0x50] sm:$0x77] }
  0x69   : > { %5505 = vrot.lane.b32.xlu1 %v5498_v6, %s28637_s21  ;;  %5499 = vrot.lane.b32.xlu0 %v24421_v3, %s28637_s21  ;;  %v24553_v3 = vld [vmem:[%s28770_s20 + $0x12c] sm:$0x77] }
  0x6d   : > { %5755 = vrot.lane.b32.xlu1 %v5751_v8, %s28637_s21  ;;  %5507 = vrot.lane.b32.xlu0 %v24423_v9, %s28637_s21 }
  0x71   : > { %5753 = vrot.lane.b32.xlu1 %v24433_v7, %s28637_s21  ;;  %5757 = vrot.lane.b32.xlu0 %v24434_v10, %s28637_s21  ;;  %v8239_v7 = vcombine.high %v24553_v3, %v24553_v3  ;;  %v2554_v10 = vcombine.high %v24277_v5, %v24277_v5 }
  0x75   : > { %5761 = vrot.lane.b32.xlu1 %v24435_v12, %s28637_s21  ;;  %5759 = vrot.lane.b32.xlu0 %v5752_v11, %s28637_s21 }
  0x79   : > { %6011 = vrot.lane.b32.xlu1 %v24446_v15, %s28637_s21  ;;  %6009 = vrot.lane.b32.xlu0 %v6005_v14, %s28637_s21  ;;  %v24543_v14 = vld [vmem:[%s28770_s20 + $0x128] sm:$0x7]  ;;  %v24278_v15 = vld [vmem:[%s28770_s20 + $0x58] sm:$0x77] }
  0x7d   : > { %6013 = vrot.lane.b32.xlu1 %v6006_v16, %s28637_s21  ;;  %6007 = vrot.lane.b32.xlu0 %v24445_v13, %s28637_s21  ;;  %v24268_v13 = vld [vmem:[%s34590_s23 + $0x38] sm:$0xff] }
  0x81   : > { %6263 = vrot.lane.b32.xlu1 %v6259_v18, %s28637_s21  ;;  %6015 = vrot.lane.b32.xlu0 %v24447_v19, %s28637_s21 }
  0x85   : > { %6261 = vrot.lane.b32.xlu1 %v24457_v17, %s28637_s21  ;;  %6265 = vrot.lane.b32.xlu0 %v24458_v20, %s28637_s21  ;;  %v24554_v20 = vld [vmem:[%s28770_s20 + $0x134] sm:$0x77] }
  0x87   : > { %v1543_v23 = vpop.permute.xlu0 %1542  ;;  %v1539_v24 = vpop.permute.xlu1 %1538 }
  0x89   : > { %6269 = vrot.lane.b32.xlu1 %v24459_v22, %s28637_s21  ;;  %6267 = vrot.lane.b32.xlu0 %v6260_v21, %s28637_s21  ;;  %v2555_v21 = vcombine.high %v24278_v15, %v24278_v15 }
  0x8b   : > { %v1547_v28 = vpop.permute.xlu0 %1546  ;;  %v1545_v29 = vpop.permute.xlu1 %1544 }
  0x8c   : > { %v1551_v30 = vsel %vm1548_vm3, %v1543_v23, %v1545_v29  ;;  %v1552_v31 = vsel %vm1548_vm3, %v1545_v29, %v1547_v28  ;;  %v24279_v29 = vld [vmem:[%s28770_s20 + $0x60] sm:$0x7] }
  0x8d   : > { %24236 = vmatprep.subr.msk.mxu1 %vm593_vm1, %v1552_v31  ;;  %7483 = vrot.lane.b32.xlu1 %v24518_v26, %s28637_s21  ;;  %v8240_v26 = vcombine.high %v24554_v20, %v24554_v20 }
  0x8e   : > { %24237 = vmatpush1.msk.msra.mxu1 %vm593_vm1, %v1551_v30  ;;  %7481 = vrot.lane.b32.xlu0 %v7477_v27, %s28637_s21  ;;  %v24280_v27 = vld [vmem:[%s34590_s23 + $0x40] sm:$0xff] }
  0x8f   : > { %v1796_v35 = vpop.permute.xlu1 %1795  ;;  %v1541_v36 = vpop.permute.xlu0 %1540  ;;  %24238 = vmatmul.mubr.msk.f32.vlgmr.msra.gmra.mrb[2].mxu1 %vm589_vm2, %v24232_v32 }
  0x90   : > { %v1549_v37 = vsel %vm1548_vm3, %v1539_v24, %v1541_v36  ;;  %v1550_v38 = vsel %vm1548_vm3, %v1541_v36, %v1543_v23  ;;  %1955 = vmatprep.mubr.f32.mxu1 %v28635_v1  ;;  %v24555_v24 = vld [vmem:[%s28770_s20 + $0x13c] sm:$0x7] }
  0x91   : > { %24233 = vmatprep.subr.msk.mxu0 %vm593_vm1, %v1550_v38  ;;  %7485 = vrot.lane.b32.xlu1 %v7478_v33, %s28637_s21  ;;  %v24290_v33 = vld [vmem:[%s28770_s20 + $0x6c] sm:$0x77] }
  0x92   : > { %24234 = vmatpush1.msk.msra.mxu0 %vm593_vm1, %v1549_v37  ;;  %7479 = vrot.lane.b32.xlu0 %v24517_v25, %s28637_s21  ;;  %v24289_v25 = vld [vmem:[%s28770_s20 + $0x64] sm:$0x77]  ;;  %v2796_v36 = vcombine.high %v24290_v33, %v24290_v33  ;;  %v24301_v37 = vld [vmem:[%s28770_s20 + $0x78] sm:$0x77] }
  0x93   : > { %v1794_v40 = vpop.permute.xlu1 %1793  ;;  %v1798_v41 = vpop.permute.xlu0 %1797  ;;  %24235 = vmatmul.mubr.msk.f32.vlgmr.msra.gmra.mrb[2].mxu0 %vm589_vm2, %v24232_v32  ;;  %26598 = vmatprep.subr.mxu0 %v28635_v1  ;;  %v2795_v30 = vcombine.high %v24289_v25, %v24289_v25 }
  0x94   : > { %26599 = vmatpush3.msk.msra.mxu0 %vm593_vm1, %v1547_v28  ;;  %v1804_v43 = vsel %vm1548_vm3, %v1796_v35, %v1798_v41  ;;  %26600 = vmatprep.mubr.msk.f32.mxu0 %vm28636_vm0, %v28635_v1  ;;  %v1803_v44 = vsel %vm1548_vm3, %v1794_v40, %v1796_v35  ;;  %v8485_v28 = vld [vmem:[%s28770_s20] sm:$0x77]  ;;  %v8486_v35 = vld [vmem:[%s28770_s20 + $0x8] sm:$0x77] }
  0x95   : > { %24245 = vmatprep.subr.msk.mxu0 %vm593_vm1, %v1804_v43  ;;  %7735 = vrot.lane.b32.xlu1 %v7731_v39, %s28637_s21  ;;  %v8494_v40 = vcombine.high %v8486_v35, %v8486_v35  ;;  %v24574_v43 = vld [vmem:[%s28770_s20 + $0x14] sm:$0x77] }
  0x96   : > { %7487 = vrot.lane.b32.xlu0 %v24519_v42, %s28637_s21  ;;  %v3036_v42 = vcombine.high %v24301_v37, %v24301_v37 }
  0x97   : > { %v1802_v45 = vpop.permute.xlu1 %1801  ;;  %v1800_v46 = vpop.permute.xlu0 %1799  ;;  %26601 = vmatmul.mubr.msk.f32.vlgmr.msra.gmra.mrb[6].mxu0 %vm589_vm2, %v24232_v32 }
  0x98   : > { %v1805_v48 = vsel %vm1548_vm3, %v1798_v41, %v1800_v46  ;;  %24246 = vmatpush1.msk.msra.mxu0 %vm593_vm1, %v1803_v44  ;;  %v1806_v49 = vsel %vm1548_vm3, %v1800_v46, %v1802_v45  ;;  %1884 = vmatprep.mubr.f32.mxu0 %v28635_v1  ;;  %v24292_v41 = vld [vmem:[%s34590_s23 + $0x48] sm:$0xff]  ;;  %v24302_v46 = vld [vmem:[%s28770_s20 + $0x80] sm:$0x77] }
  0x99   : > { %24248 = vmatprep.subr.msk.mxu1 %vm593_vm1, %v1806_v49  ;;  %7733 = vrot.lane.b32.xlu1 %v24529_v34, %s28637_s21  ;;  %v8493_v34 = vcombine.high %v8485_v28, %v8485_v28  ;;  %v24291_v49 = vld [vmem:[%s28770_s20 + $0x74] sm:$0x7] }
  0x9a   : > { %24249 = vmatpush1.msk.msra.mxu1 %vm593_vm1, %v1805_v48  ;;  %7737 = vrot.lane.b32.xlu0 %v24530_v47, %s28637_s21  ;;  %v8748_v47 = vcombine.high %v24574_v43, %v24574_v43  ;;  %v8487_v48 = vld [vmem:[%s28770_s20 + $0x10] sm:$0x7] }
  0x9b   : > { %v2052_v52 = vpop.permute.xlu1 %2051  ;;  %v2050_v53 = vpop.permute.xlu0 %2049  ;;  %24247 = vmatmul.mubr.msk.f32.vlgmr.msra.gmra.mrb[2].mxu0 %vm589_vm2, %v24244_v50  ;;  %24250 = vmatmul.mubr.msk.f32.vlgmr.msra.gmra.mrb[2].mxu1 %vm589_vm2, %v24244_v50 }
  0x9c   : > { %26603 = vmatprep.subr.mxu1 %v28635_v1  ;;  %26605 = vmatprep.mubr.msk.f32.mxu1 %vm28636_vm0, %v28635_v1  ;;  %v2058_v55 = vsel %vm1548_vm3, %v2050_v53, %v2052_v52 }
  0x9d   : > { %26604 = vmatpush3.msk.msra.mxu1 %vm593_vm1, %v1802_v45  ;;  %24257 = vmatprep.subr.msk.mxu0 %vm593_vm1, %v2058_v55  ;;  %v24303_v55 = vld [vmem:[%s28770_s20 + $0x88] sm:$0x7] }
  0x9e   : > { %7741 = vrot.lane.b32.xlu1 %v24531_v54, %s28637_s21  ;;  %7739 = vrot.lane.b32.xlu0 %v7732_v51, %s28637_s21  ;;  %v24313_v54 = vld [vmem:[%s28770_s20 + $0x8c] sm:$0x77] }
  0x9f   : > { %v2054_v57 = vpop.permute.xlu1 %2053  ;;  %v2048_v58 = vpop.permute.xlu0 %2047  ;;  %26606 = vmatmul.mubr.msk.f32.vlgmr.msra.gmra.mrb[8].mxu1 %vm589_vm2, %v24244_v50  ;;  %2138 = vmatprep.mubr.f32.mxu0 %v28635_v1  ;;  %v3037_v50 = vcombine.high %v24302_v46, %v24302_v46 }
  0xa0   : > { %v2057_v61 = vsel %vm1548_vm3, %v2048_v58, %v2050_v53  ;;  %2209 = vmatprep.mubr.f32.mxu1 %v28635_v1  ;;  %v2059_v6 = vsel %vm1548_vm3, %v2052_v52, %v2054_v57  ;;  %v24304_v53 = vld [vmem:[%s34590_s23 + $0x50] sm:$0xff] }
  0xa1   : > { %24258 = vmatpush1.msk.msra.mxu0 %vm593_vm1, %v2057_v61 }
  0xa2   : > { %26608 = vmatprep.subr.mxu0 %v28635_v1  ;;  %7991 = vrot.lane.b32.xlu1 %v24542_v59, %s28637_s21 }
  0xa3   : > { %v2304_v0 = vpop.permute.xlu1 %2303  ;;  %v2056_v2 = vpop.permute.xlu0 %2055  ;;  %24259 = vmatmul.mubr.msk.f32.vlgmr.msra.gmra.mrb[2].mxu0 %vm589_vm2, %v24256_v62  ;;  %7989 = vrot.lane.b32.xlu0 %v7985_v60, %s28637_s21  ;;  %v24314_v60 = vld [vmem:[%s28770_s20 + $0x94] sm:$0x77] }
  0xa4   : > { %v2060_v4 = vsel %vm1548_vm3, %v2054_v57, %v2056_v2  ;;  %26609 = vmatpush3.msk.msra.mxu0 %vm593_vm1, %v2056_v2  ;;  %26610 = vmatprep.mubr.msk.f32.mxu0 %vm28636_vm0, %v28635_v1  ;;  %v3277_v57 = vcombine.high %v24313_v54, %v24313_v54  ;;  %v3278_v2 = vcombine.high %v24314_v60, %v24314_v60 }
  0xa5   : > { %24260 = vmatprep.subr.msk.mxu1 %vm593_vm1, %v2060_v4 }
  0xa6   : > { %24261 = vmatpush1.msk.msra.mxu1 %vm593_vm1, %v2059_v6  ;;  %7993 = vrot.lane.b32.xlu1 %v7986_v63, %s28637_s21  ;;  %v24587_v6 = vld [vmem:[%s28770_s20 + $0x30] sm:$0x77] }
  0xa7   : > { %v2302_v8 = vpop.permute.xlu1 %2301  ;;  %v2306_v9 = vpop.permute.xlu0 %2305  ;;  %24262 = vmatmul.mubr.msk.f32.vlgmr.msra.gmra.mrb[2].mxu1 %vm589_vm2, %v24256_v62  ;;  %26611 = vmatmul.mubr.msk.f32.vlgmr.msra.gmra.mrb[8].mxu0 %vm589_vm2, %v24256_v62  ;;  %v24576_v62 = vld [vmem:[%s28770_s20 + $0x24] sm:$0x7] }
  0xa8   : > { %v2311_v11 = vsel %vm1548_vm3, %v2302_v8, %v2304_v0  ;;  %v2312_v12 = vsel %vm1548_vm3, %v2304_v0, %v2306_v9  ;;  %7987 = vrot.lane.b32.xlu0 %v24541_v56, %s28637_s21  ;;  %2392 = vmatprep.mubr.f32.mxu0 %v28635_v1  ;;  %v24575_v56 = vld [vmem:[%s28770_s20 + $0x1c] sm:$0x77] }
  0xa9   : > { %24269 = vmatprep.subr.msk.mxu0 %vm593_vm1, %v2312_v12  ;;  %2463 = vmatprep.mubr.f32.mxu1 %v28635_v1  ;;  %v8749_v61 = vcombine.high %v24575_v56, %v24575_v56  ;;  %v24315_v12 = vld [vmem:[%s28770_s20 + $0x9c] sm:$0x7] }
  0xaa   : > { %24270 = vmatpush1.msk.msra.mxu0 %vm593_vm1, %v2311_v11  ;;  %8243 = vrot.lane.b32.xlu1 %v8239_v7, %s28637_s21  ;;  %v9003_v11 = vcombine.high %v24587_v6, %v24587_v6 }
  0xab   : > { %v2310_v16 = vpop.permute.xlu1 %2309  ;;  %v2308_v17 = vpop.permute.xlu0 %2307  ;;  %24271 = vmatmul.mubr.msk.f32.vlgmr.msra.gmra.mrb[2].mxu0 %vm589_vm2, %v24268_v13  ;;  %24281 = vmatprep.subr.msk.mxu0 %vm593_vm1, %v2554_v10 }
  0xac   : > { %v2313_v18 = vsel %vm1548_vm3, %v2306_v9, %v2308_v17  ;;  %v2314_v19 = vsel %vm1548_vm3, %v2308_v17, %v2310_v16  ;;  %7995 = vrot.lane.b32.xlu0 %v24543_v14, %s28637_s21  ;;  %24282 = vmatpush1.msk.msra.mxu0 %vm593_vm1, %v24277_v5  ;;  %v24316_v5 = vld [vmem:[%s34590_s23 + $0x58] sm:$0xff]  ;;  %v24328_v17 = vld [vmem:[%s34590_s23 + $0x60] sm:$0xff] }
  0xad   : > { %24272 = vmatprep.subr.msk.mxu1 %vm593_vm1, %v2314_v19  ;;  %2633 = vmatprep.mubr.f32.mxu0 %v28635_v1 }
  0xae   : > { %24273 = vmatpush1.msk.msra.mxu1 %vm593_vm1, %v2313_v18  ;;  %8241 = vrot.lane.b32.xlu1 %v24553_v3, %s28637_s21  ;;  %v24586_v3 = vld [vmem:[%s28770_s20 + $0x28] sm:$0x77] }
  0xaf   : > { %24274 = vmatmul.mubr.msk.f32.vlgmr.msra.gmra.mrb[2].mxu1 %vm589_vm2, %v24268_v13  ;;  %26613 = vmatprep.subr.mxu1 %v28635_v1  ;;  %v29049_v22 = vpop.permute.xlu1 %3523  ;;  %v29051_v23 = vpop.permute.xlu0 %3521  ;;  %v9002_v7 = vcombine.high %v24586_v3, %v24586_v3 }
  0xb0   : > { %26614 = vmatpush3.msk.msra.mxu1 %vm593_vm1, %v2310_v16  ;;  %8245 = vrot.lane.b32.xlu0 %v24554_v20, %s28637_s21  ;;  %v3530_v4 = vsel %vm1548_vm3, %v29051_v23, %v29049_v22 }
  0xb1   : > { %26615 = vmatprep.mubr.msk.f32.mxu1 %vm28636_vm0, %v28635_v1  ;;  %24284 = vmatprep.subr.msk.mxu1 %vm593_vm1, %v2555_v21 }
  0xb2   : > { %26618 = vmatprep.subr.mxu0 %v28635_v1  ;;  %8249 = vrot.lane.b32.xlu1 %v24555_v24, %s28637_s21  ;;  %v24588_v24 = vld [vmem:[%s28770_s20 + $0x38] sm:$0x7] }
  0xb3   : > { %26616 = vmatmul.mubr.msk.f32.vlgmr.msra.gmra.mrb[10].mxu1 %vm589_vm2, %v24268_v13  ;;  %24283 = vmatmul.mubr.msk.f32.vlgmr.msra.gmra.mrb[2].mxu0 %vm589_vm2, %v24280_v27  ;;  %v29069_v31 = vpop.permute.xlu1 %3525  ;;  %v29071_v32 = vpop.permute.xlu0 %3519 }
  0xb4   : > { %8247 = vrot.lane.b32.xlu0 %v8240_v26, %s28637_s21  ;;  %24285 = vmatpush1.msk.msra.mxu1 %vm593_vm1, %v24278_v15  ;;  %v3529_v10 = vsel %vm1548_vm3, %v29071_v32, %v29051_v23  ;;  %v24598_v15 = vld [vmem:[%s28770_s20 + $0x3c] sm:$0x77]  ;;  %v3531_v19 = vsel %vm1548_vm3, %v29049_v22, %v29069_v31 }
  0xb5   : > { %2704 = vmatprep.mubr.f32.mxu1 %v28635_v1  ;;  %26619 = vmatpush3.msk.msra.mxu0 %vm593_vm1, %v24279_v29  ;;  %v9256_v18 = vcombine.high %v24598_v15, %v24598_v15 }
  0xb6   : > { %26620 = vmatprep.mubr.msk.f32.mxu0 %vm28636_vm0, %v28635_v1  ;;  %24293 = vmatprep.subr.msk.mxu0 %vm593_vm1, %v2795_v30 }
  0xb7   : > { %24286 = vmatmul.mubr.msk.f32.vlgmr.msra.gmra.mrb[2].mxu1 %vm589_vm2, %v24280_v27  ;;  %26621 = vmatmul.mubr.msk.f32.vlgmr.msra.gmra.mrb[10].mxu0 %vm589_vm2, %v24280_v27  ;;  %v29085_v38 = vpop.permute.xlu1 %3775  ;;  %v29087_v39 = vpop.permute.xlu0 %3527 }
  0xb8   : > { %8499 = vrot.lane.b32.xlu1 %v8486_v35, %s28638_s17  ;;  %8497 = vrot.lane.b32.xlu0 %v8493_v34, %s28638_s17  ;;  %v3532_v16 = vsel %vm1548_vm3, %v29069_v31, %v29087_v39  ;;  %v24340_v31 = vld [vmem:[%s34590_s23 + $0x68] sm:$0xff] }
  0xb9   : > { %24294 = vmatpush1.msk.msra.mxu0 %vm593_vm1, %v24289_v25  ;;  %2874 = vmatprep.mubr.f32.mxu0 %v28635_v1 }
  0xba   : > { %24296 = vmatprep.subr.msk.mxu1 %vm593_vm1, %v2796_v36  ;;  %2945 = vmatprep.mubr.f32.mxu1 %v28635_v1  ;;  %v9502_v36 = vld [vmem:[%s28770_s20] sm:$0x77] }
  0xbb   : > { %24295 = vmatmul.mubr.msk.f32.vlgmr.msra.gmra.mrb[2].mxu0 %vm589_vm2, %v24292_v41  ;;  %24297 = vmatpush1.msk.msra.mxu1 %vm593_vm1, %v24290_v33  ;;  %v29101_v44 = vpop.permute.xlu1 %3773  ;;  %v29103_v45 = vpop.permute.xlu0 %3777  ;;  %v24600_v33 = vld [vmem:[%s28770_s20 + $0x4c] sm:$0x7] }
  0xbc   : > { %8501 = vrot.lane.b32.xlu1 %v8494_v40, %s28638_s17  ;;  %8495 = vrot.lane.b32.xlu0 %v8485_v28, %s28638_s17  ;;  %v3784_v22 = vsel %vm1548_vm3, %v29085_v38, %v29103_v45  ;;  %v24599_v28 = vld [vmem:[%s28770_s20 + $0x44] sm:$0x77]  ;;  %v3783_v29 = vsel %vm1548_vm3, %v29101_v44, %v29085_v38 }
  0xbd   : > { %26623 = vmatprep.subr.mxu1 %v28635_v1  ;;  %24305 = vmatprep.subr.msk.mxu0 %vm593_vm1, %v3036_v42  ;;  %v9257_v32 = vcombine.high %v24599_v28, %v24599_v28  ;;  %v9503_v38 = vld [vmem:[%s28770_s20 + $0x8] sm:$0x77] }
  0xbe   : > { %24306 = vmatpush1.msk.msra.mxu0 %vm593_vm1, %v24301_v37  ;;  %3115 = vmatprep.mubr.f32.mxu0 %v28635_v1  ;;  %v9511_v44 = vcombine.high %v9503_v38, %v9503_v38 }
  0xbf   : > { %24298 = vmatmul.mubr.msk.f32.vlgmr.msra.gmra.mrb[2].mxu1 %vm589_vm2, %v24292_v41  ;;  %v29115_v51 = vpop.permute.xlu1 %3781  ;;  %v29117_v52 = vpop.permute.xlu0 %3779  ;;  %26628 = vmatprep.subr.mxu0 %v28635_v1 }
  0xc0   : > { %8752 = vrot.lane.b32.xlu1 %v8748_v47, %s28638_s17  ;;  %8503 = vrot.lane.b32.xlu0 %v8487_v48, %s28638_s17  ;;  %v3786_v23 = vsel %vm1548_vm3, %v29117_v52, %v29115_v51  ;;  %v3785_v27 = vsel %vm1548_vm3, %v29103_v45, %v29117_v52  ;;  %v24619_v48 = vld [vmem:[%s28770_s20 + $0x14] sm:$0x77] }
  0xc1   : > { %26624 = vmatpush3.msk.msra.mxu1 %vm593_vm1, %v24291_v49  ;;  %26625 = vmatprep.mubr.msk.f32.mxu1 %vm28636_vm0, %v28635_v1 }
  0xc2   : > { %24308 = vmatprep.subr.msk.mxu1 %vm593_vm1, %v3037_v50 }
  0xc3   : > { %26626 = vmatmul.mubr.msk.f32.vlgmr.msra.gmra.mrb[12].mxu1 %vm589_vm2, %v24292_v41  ;;  %24307 = vmatmul.mubr.msk.f32.vlgmr.msra.gmra.mrb[2].mxu0 %vm589_vm2, %v24304_v53  ;;  %v29134_v58 = vpop.permute.xlu1 %4031  ;;  %v29136_v59 = vpop.permute.xlu0 %4029 }
  0xc4   : > { %26629 = vmatpush3.msk.msra.mxu0 %vm593_vm1, %v24303_v55  ;;  %8750 = vrot.lane.b32.xlu1 %v24574_v43, %s28638_s17  ;;  %v4038_v30 = vsel %vm1548_vm3, %v29136_v59, %v29134_v58  ;;  %v24352_v43 = vld [vmem:[%s34590_s23 + $0x70] sm:$0xff] }
  0xc5   : > { %8754 = vrot.lane.b32.xlu0 %v24575_v56, %s28638_s17  ;;  %24309 = vmatpush1.msk.msra.mxu1 %vm593_vm1, %v24302_v46  ;;  %v9504_v56 = vld [vmem:[%s28770_s20 + $0x10] sm:$0x7] }
  0xc6   : > { %3186 = vmatprep.mubr.f32.mxu1 %v28635_v1  ;;  %26630 = vmatprep.mubr.msk.f32.mxu0 %vm28636_vm0, %v28635_v1 }
  0xc7   : > { %24317 = vmatprep.subr.msk.mxu0 %vm593_vm1, %v3277_v57  ;;  %24310 = vmatmul.mubr.msk.f32.vlgmr.msra.gmra.mrb[2].mxu1 %vm589_vm2, %v24304_v53  ;;  %v29149_v63 = vpop.permute.xlu1 %4033  ;;  %v29151_v0 = vpop.permute.xlu0 %4027 }
  0xc8   : > { %26631 = vmatmul.mubr.msk.f32.vlgmr.msra.gmra.mrb[12].mxu0 %vm589_vm2, %v24304_v53  ;;  %8758 = vrot.lane.b32.xlu1 %v24576_v62, %s28638_s17  ;;  %v4037_v37 = vsel %vm1548_vm3, %v29151_v0, %v29136_v59  ;;  %v4039_v47 = vsel %vm1548_vm3, %v29134_v58, %v29149_v63  ;;  %v24364_v59 = vld [vmem:[%s34590_s23 + $0x78] sm:$0xff]  ;;  %v24374_v62 = vld [vmem:[%s28770_s20 + $0xa8] sm:$0x77] }
  0xc9   : > { %24318 = vmatpush1.msk.msra.mxu0 %vm593_vm1, %v24313_v54  ;;  %8756 = vrot.lane.b32.xlu0 %v8749_v61, %s28638_s17  ;;  %v24373_v54 = vld [vmem:[%s28770_s20 + $0xa0] sm:$0x77] }
  0xca   : > { %24329 = vmatprep.subr.msk.mxu0 %vm593_vm1, %v3530_v4  ;;  %3356 = vmatprep.mubr.f32.mxu0 %v28635_v1  ;;  %v4534_v58 = vcombine.high %v24373_v54, %v24373_v54 }
  0xcb   : > { %24320 = vmatprep.subr.msk.mxu1 %vm593_vm1, %v3278_v2  ;;  %3427 = vmatprep.mubr.f32.mxu1 %v28635_v1  ;;  %v29169_v8 = vpop.permute.xlu1 %4283  ;;  %v29171_v9 = vpop.permute.xlu0 %4035 }
  0xcc   : > { %24319 = vmatmul.mubr.msk.f32.vlgmr.msra.gmra.mrb[2].mxu0 %vm589_vm2, %v24316_v5  ;;  %24321 = vmatpush1.msk.msra.mxu1 %vm593_vm1, %v24314_v60  ;;  %v4040_v42 = vsel %vm1548_vm3, %v29149_v63, %v29171_v9  ;;  %v24620_v63 = vld [vmem:[%s28770_s20 + $0x1c] sm:$0x77] }
  0xcd   : > { %24330 = vmatpush1.msk.msra.mxu0 %vm593_vm1, %v3529_v10  ;;  %9008 = vrot.lane.b32.xlu1 %v24587_v6, %s28638_s17  ;;  %v9766_v4 = vcombine.high %v24620_v63, %v24620_v63  ;;  %v24631_v6 = vld [vmem:[%s28770_s20 + $0x28] sm:$0x77]  ;;  %v24385_v10 = vld [vmem:[%s28770_s20 + $0xb4] sm:$0x77] }
  0xce   : > { %9006 = vrot.lane.b32.xlu0 %v9002_v7, %s28638_s17  ;;  %26633 = vmatprep.subr.mxu1 %v28635_v1  ;;  %v24376_v7 = vld [vmem:[%s34590_s23 + $0x80] sm:$0xff] }
  0xcf   : > { %24322 = vmatmul.mubr.msk.f32.vlgmr.msra.gmra.mrb[2].mxu1 %vm589_vm2, %v24316_v5  ;;  %3610 = vmatprep.mubr.f32.mxu0 %v28635_v1  ;;  %v29185_v13 = vpop.permute.xlu1 %4281  ;;  %v29187_v14 = vpop.permute.xlu0 %4285 }
  0xd0   : > { %26634 = vmatpush3.msk.msra.mxu1 %vm593_vm1, %v24315_v12  ;;  %26635 = vmatprep.mubr.msk.f32.mxu1 %vm28636_vm0, %v28635_v1  ;;  %v4292_v50 = vsel %vm1548_vm3, %v29169_v8, %v29187_v14  ;;  %v4291_v57 = vsel %vm1548_vm3, %v29185_v13, %v29169_v8  ;;  %v10019_v12 = vcombine.high %v24631_v6, %v24631_v6 }
  0xd1   : > { %24332 = vmatprep.subr.msk.mxu1 %vm593_vm1, %v3532_v16  ;;  %9010 = vrot.lane.b32.xlu1 %v9003_v11, %s28638_s17  ;;  %v24632_v11 = vld [vmem:[%s28770_s20 + $0x30] sm:$0x77]  ;;  %v4775_v16 = vcombine.high %v24385_v10, %v24385_v10 }
  0xd2   : > { %9004 = vrot.lane.b32.xlu0 %v24586_v3, %s28638_s17  ;;  %26638 = vmatprep.subr.mxu0 %v28635_v1  ;;  %v4535_v3 = vcombine.high %v24374_v62, %v24374_v62 }
  0xd3   : > { %26636 = vmatmul.mubr.msk.f32.vlgmr.msra.gmra.mrb[14].mxu1 %vm589_vm2, %v24316_v5  ;;  %v29207_v20 = vpop.permute.xlu1 %4289  ;;  %v29209_v21 = vpop.permute.xlu0 %4287  ;;  %v24621_v5 = vld [vmem:[%s28770_s20 + $0x24] sm:$0x7] }
  0xd4   : > { %24331 = vmatmul.mubr.msk.f32.vlgmr.msra.gmra.mrb[2].mxu0 %vm589_vm2, %v24328_v17  ;;  %24333 = vmatpush1.msk.msra.mxu1 %vm593_vm1, %v3531_v19  ;;  %v4294_v49 = vsel %vm1548_vm3, %v29209_v21, %v29207_v20  ;;  %v4293_v55 = vsel %vm1548_vm3, %v29187_v14, %v29209_v21  ;;  %v24375_v14 = vld [vmem:[%s28770_s20 + $0xb0] sm:$0x7]  ;;  %v10020_v19 = vcombine.high %v24632_v11, %v24632_v11 }
  0xd5   : > { %26639 = vmatpush3.msk.msra.mxu0 %vm593_vm1, %v29087_v39  ;;  %24344 = vmatprep.subr.msk.mxu1 %vm593_vm1, %v3786_v23  ;;  %v9510_v39 = vcombine.high %v9502_v36, %v9502_v36  ;;  %v24643_v23 = vld [vmem:[%s28770_s20 + $0x3c] sm:$0x77] }
  0xd6   : > { %24341 = vmatprep.subr.msk.mxu0 %vm593_vm1, %v3784_v22  ;;  %9260 = vrot.lane.b32.xlu1 %v9256_v18, %s28638_s17 }
  0xd7   : > { %9012 = vrot.lane.b32.xlu0 %v24588_v24, %s28638_s17  ;;  %3681 = vmatprep.mubr.f32.mxu1 %v28635_v1  ;;  %v29227_v25 = vpop.permute.xlu1 %5503  ;;  %v29229_v26 = vpop.permute.xlu0 %5501 }
  0xd8   : > { %26640 = vmatprep.mubr.msk.f32.mxu0 %vm28636_vm0, %v28635_v1  ;;  %24334 = vmatmul.mubr.msk.f32.vlgmr.msra.gmra.mrb[2].mxu1 %vm589_vm2, %v24328_v17 }
  0xd9   : > { %26641 = vmatmul.mubr.msk.f32.vlgmr.msra.gmra.mrb[14].mxu0 %vm589_vm2, %v24328_v17  ;;  %24345 = vmatpush1.msk.msra.mxu1 %vm593_vm1, %v3785_v27  ;;  %v24386_v17 = vld [vmem:[%s28770_s20 + $0xbc] sm:$0x77]  ;;  %v24397_v27 = vld [vmem:[%s28770_s20 + $0xc8] sm:$0x77] }
  0xda   : > { %24342 = vmatpush1.msk.msra.mxu0 %vm593_vm1, %v3783_v29  ;;  %9258 = vrot.lane.b32.xlu1 %v24598_v15, %s28638_s17  ;;  %v4776_v22 = vcombine.high %v24386_v17, %v24386_v17  ;;  %v10273_v29 = vcombine.high %v24643_v23, %v24643_v23 }
  0xdb   : > { %24353 = vmatprep.subr.msk.mxu0 %vm593_vm1, %v4038_v30  ;;  %9262 = vrot.lane.b32.xlu0 %v24599_v28, %s28638_s17  ;;  %v29254_v34 = vpop.permute.xlu1 %5505  ;;  %v29256_v35 = vpop.permute.xlu0 %5499  ;;  %v24388_v28 = vld [vmem:[%s34590_s23 + $0x88] sm:$0xff] }
  0xdc   : > { %3864 = vmatprep.mubr.f32.mxu0 %v28635_v1  ;;  %3935 = vmatprep.mubr.f32.mxu1 %v28635_v1 }
  0xdd   : > { %24343 = vmatmul.mubr.msk.f32.vlgmr.msra.gmra.mrb[2].mxu0 %vm589_vm2, %v24340_v31  ;;  %26643 = vmatprep.subr.mxu1 %v28635_v1 }
  0xde   : > { %24354 = vmatpush1.msk.msra.mxu0 %vm593_vm1, %v4037_v37  ;;  %9266 = vrot.lane.b32.xlu1 %v24600_v33, %s28638_s17  ;;  %v24633_v33 = vld [vmem:[%s28770_s20 + $0x38] sm:$0x7]  ;;  %v24387_v37 = vld [vmem:[%s28770_s20 + $0xc4] sm:$0x7] }
  0xdf   : > { %9264 = vrot.lane.b32.xlu0 %v9257_v32, %s28638_s17  ;;  %4118 = vmatprep.mubr.f32.mxu0 %v28635_v1  ;;  %v29271_v40 = vpop.permute.xlu1 %5755  ;;  %v29273_v41 = vpop.permute.xlu0 %5507  ;;  %v5016_v32 = vcombine.high %v24397_v27, %v24397_v27 }
  0xe0   : > { %24346 = vmatmul.mubr.msk.f32.vlgmr.msra.gmra.mrb[2].mxu1 %vm589_vm2, %v24340_v31  ;;  %26648 = vmatprep.subr.mxu0 %v28635_v1 }
  0xe1   : > { %26644 = vmatpush3.msk.msra.mxu1 %vm593_vm1, %v29115_v51  ;;  %26645 = vmatprep.mubr.msk.f32.mxu1 %vm28636_vm0, %v28635_v1  ;;  %v9765_v51 = vcombine.high %v24619_v48, %v24619_v48 }
  0xe2   : > { %24356 = vmatprep.subr.msk.mxu1 %vm593_vm1, %v4040_v42  ;;  %9516 = vrot.lane.b32.xlu1 %v9503_v38, %s28639_s0  ;;  %v24644_v42 = vld [vmem:[%s28770_s20 + $0x44] sm:$0x77] }
  0xe3   : > { %9514 = vrot.lane.b32.xlu0 %v9510_v39, %s28639_s0  ;;  %v29290_v45 = vpop.permute.xlu1 %5753  ;;  %v29292_v46 = vpop.permute.xlu0 %5757 }
  0xe4   : > { %26646 = vmatmul.mubr.msk.f32.vlgmr.msra.gmra.mrb[16].mxu1 %vm589_vm2, %v24340_v31 }
  0xe5   : > { %24355 = vmatmul.mubr.msk.f32.vlgmr.msra.gmra.mrb[2].mxu0 %vm589_vm2, %v24352_v43  ;;  %24357 = vmatpush1.msk.msra.mxu1 %vm593_vm1, %v4039_v47  ;;  %v24400_v47 = vld [vmem:[%s34590_s23 + $0x90] sm:$0xff] }
  0xe6   : > { %26649 = vmatpush3.msk.msra.mxu0 %vm593_vm1, %v29171_v9  ;;  %24368 = vmatprep.subr.msk.mxu1 %vm593_vm1, %v4294_v49 }
  0xe7   : > { %24365 = vmatprep.subr.msk.mxu0 %vm593_vm1, %v4292_v50  ;;  %9518 = vrot.lane.b32.xlu1 %v9511_v44, %s28639_s0  ;;  %v29312_v52 = vpop.permute.xlu1 %5761  ;;  %v29314_v53 = vpop.permute.xlu0 %5759  ;;  %v24409_v44 = vld [vmem:[%s28770_s20 + $0xdc] sm:$0x77]  ;;  %v10274_v50 = vcombine.high %v24644_v42, %v24644_v42 }
  0xe8   : > { %9512 = vrot.lane.b32.xlu0 %v9502_v36, %s28639_s0  ;;  %4189 = vmatprep.mubr.f32.mxu1 %v28635_v1  ;;  %v24398_v36 = vld [vmem:[%s28770_s20 + $0xd0] sm:$0x77] }
  0xe9   : > { %26650 = vmatprep.mubr.msk.f32.mxu0 %vm28636_vm0, %v28635_v1  ;;  %24358 = vmatmul.mubr.msk.f32.vlgmr.msra.gmra.mrb[2].mxu1 %vm589_vm2, %v24352_v43 }
  0xea   : > { %26651 = vmatmul.mubr.msk.f32.vlgmr.msra.gmra.mrb[16].mxu0 %vm589_vm2, %v24352_v43  ;;  %24369 = vmatpush1.msk.msra.mxu1 %vm593_vm1, %v4293_v55  ;;  %v5017_v43 = vcombine.high %v24398_v36, %v24398_v36 }
  0xeb   : > { %24366 = vmatpush1.msk.msra.mxu0 %vm593_vm1, %v4291_v57  ;;  %9769 = vrot.lane.b32.xlu1 %v9765_v51, %s28639_s0  ;;  %v29336_v60 = vpop.permute.xlu1 %6011  ;;  %v29338_v61 = vpop.permute.xlu0 %6009  ;;  %v24399_v51 = vld [vmem:[%s28770_s20 + $0xd8] sm:$0x7] }
  0xec   : > { %9520 = vrot.lane.b32.xlu0 %v9504_v56, %s28639_s0  ;;  %4372 = vmatprep.mubr.f32.mxu0 %v28635_v1 }
  0xed   : > { %4443 = vmatprep.mubr.f32.mxu1 %v28635_v1  ;;  %26653 = vmatprep.subr.mxu1 %v28635_v1  ;;  %v812_v18 = vpop.f32.mrb[0].mxu0 }
  0xee   : > { %24367 = vmatmul.mubr.msk.f32.vlgmr.msra.gmra.mrb[2].mxu0 %vm589_vm2, %v24364_v59  ;;  %24377 = vmatprep.subr.msk.mxu0 %vm593_vm1, %v4534_v58  ;;  %v26582_v24 = vpop.f32.mrb[1].mxu0  ;;  %v5257_v58 = vcombine.high %v24409_v44, %v24409_v44 }
  0xef   : > { %9767 = vrot.lane.b32.xlu1 %v24619_v48, %s28639_s0  ;;  %24378 = vmatpush1.msk.msra.mxu0 %vm593_vm1, %v24373_v54  ;;  %v29350_v0 = vpop.permute.xlu1 %6013  ;;  %v29352_v2 = vpop.permute.xlu0 %6007  ;;  %v24645_v54 = vld [vmem:[%s28770_s20 + $0x4c] sm:$0x7] }
  0xf0   : > { %9771 = vrot.lane.b32.xlu0 %v24620_v63, %s28639_s0  ;;  %4613 = vmatprep.mubr.f32.mxu0 %v28635_v1  ;;  %v29376_v13 = vpop.f32.mrb[0].mxu1 }
  0xf1   : > { %24370 = vmatmul.mubr.msk.f32.vlgmr.msra.gmra.mrb[2].mxu1 %vm589_vm2, %v24364_v59  ;;  %26658 = vmatprep.subr.mxu0 %v28635_v1  ;;  %v29380_v15 = vpop.f32.mrb[1].mxu1 }
  0xf2   : > { %26654 = vmatpush3.msk.msra.mxu1 %vm593_vm1, %v29207_v20  ;;  %26655 = vmatprep.mubr.msk.f32.mxu1 %vm28636_vm0, %v28635_v1 }
  0xf3   : > { %9775 = vrot.lane.b32.xlu1 %v24621_v5, %s28639_s0  ;;  %24380 = vmatprep.subr.msk.mxu1 %vm593_vm1, %v4535_v3  ;;  %v29369_v8 = vpop.permute.xlu1 %6263  ;;  %v29371_v9 = vpop.permute.xlu0 %6015  ;;  %v24656_v3 = vld [vmem:[%s28770_s20 + $0x58] sm:$0x77] }
  0xf4   : > { %9773 = vrot.lane.b32.xlu0 %v9766_v4, %s28639_s0 }
  0xf5   : > { %26656 = vmatmul.mubr.msk.f32.vlgmr.msra.gmra.mrb[18].mxu1 %vm589_vm2, %v24364_v59  ;;  %v24655_v59 = vld [vmem:[%s28770_s20 + $0x50] sm:$0x77] }
  0xf6   : > { %24379 = vmatmul.mubr.msk.f32.vlgmr.msra.gmra.mrb[2].mxu0 %vm589_vm2, %v24376_v7  ;;  %24381 = vmatpush1.msk.msra.mxu1 %vm593_vm1, %v24374_v62  ;;  %v24410_v62 = vld [vmem:[%s28770_s20 + $0xe4] sm:$0x77]  ;;  %v10527_v4 = vcombine.high %v24655_v59, %v24655_v59 }
  0xf7   : > { %10025 = vrot.lane.b32.xlu1 %v24632_v11, %s28639_s0  ;;  %4684 = vmatprep.mubr.f32.mxu1 %v28635_v1  ;;  %v29387_v20 = vpop.permute.xlu1 %6261  ;;  %v29389_v21 = vpop.permute.xlu0 %6265  ;;  %v24412_v11 = vld [vmem:[%s34590_s23 + $0x98] sm:$0xff] }
  0xf8   : > { %10023 = vrot.lane.b32.xlu0 %v10019_v12, %s28639_s0  ;;  %26659 = vmatpush3.msk.msra.mxu0 %vm593_vm1, %v24375_v14 }
  0xf9   : > { %26660 = vmatprep.mubr.msk.f32.mxu0 %vm28636_vm0, %v28635_v1  ;;  %24382 = vmatmul.mubr.msk.f32.vlgmr.msra.gmra.mrb[2].mxu1 %vm589_vm2, %v24376_v7 }
  0xfa   : > { %26661 = vmatmul.mubr.msk.f32.vlgmr.msra.gmra.mrb[18].mxu0 %vm589_vm2, %v24376_v7  ;;  %24389 = vmatprep.subr.msk.mxu0 %vm593_vm1, %v4775_v16  ;;  %v5510_v7 = vsel %vm1548_vm3, %v29229_v26, %v29227_v25 }
  0xfb   : > { %10027 = vrot.lane.b32.xlu1 %v10020_v19, %s28639_s0  ;;  %24390 = vmatpush1.msk.msra.mxu0 %vm593_vm1, %v24385_v10  ;;  %v29405_v30 = vpop.permute.xlu1 %6269  ;;  %v29407_v31 = vpop.permute.xlu0 %6267  ;;  %v10528_v10 = vcombine.high %v24656_v3, %v24656_v3 }
  0xfc   : > { %10021 = vrot.lane.b32.xlu0 %v24631_v6, %s28639_s0  ;;  %4854 = vmatprep.mubr.f32.mxu0 %v28635_v1  ;;  %v5258_v6 = vcombine.high %v24410_v62, %v24410_v62 }
  0xfd   : > { %24392 = vmatprep.subr.msk.mxu1 %vm593_vm1, %v4776_v22  ;;  %4925 = vmatprep.mubr.f32.mxu1 %v28635_v1  ;;  %v24411_v22 = vld [vmem:[%s28770_s20 + $0xec] sm:$0x7] }
  0xfe   : > { %24391 = vmatmul.mubr.msk.f32.vlgmr.msra.gmra.mrb[2].mxu0 %vm589_vm2, %v24388_v28  ;;  %24393 = vmatpush1.msk.msra.mxu1 %vm593_vm1, %v24386_v17  ;;  %v24667_v17 = vld [vmem:[%s28770_s20 + $0x64] sm:$0x77] }
  0xff   : > { %10277 = vrot.lane.b32.xlu1 %v10273_v29, %s28639_s0  ;;  %26663 = vmatprep.subr.mxu1 %v28635_v1  ;;  %v29420_v38 = vpop.permute.xlu1 %7483  ;;  %v1042_v49 = vpop.f32.mrb[4].mxu1  ;;  %v10781_v24 = vcombine.high %v24667_v17, %v24667_v17  ;;  %v24424_v29 = vld [vmem:[%s34590_s23 + $0xa0] sm:$0xff] }
 0x100   : > { %10029 = vrot.lane.b32.xlu0 %v24633_v33, %s28639_s0  ;;  %24401 = vmatprep.subr.msk.mxu0 %vm593_vm1, %v5016_v32  ;;  %v29424_v39 = vpop.permute.xlu0 %7481  ;;  %v1043_v56 = vadd.f32 %v1042_v49, %v812_v18  ;;  %v26587_v57 = vpop.f32.mrb[5].mxu1  ;;  %v24669_v49 = vld [vmem:[%s28770_s20 + $0x74] sm:$0x7] }
 0x101   : > { %24394 = vmatmul.mubr.msk.f32.vlgmr.msra.gmra.mrb[2].mxu1 %vm589_vm2, %v24388_v28  ;;  %24402 = vmatpush1.msk.msra.mxu0 %vm593_vm1, %v24397_v27  ;;  %v6018_v57 = vsel %vm1548_vm3, %v29338_v61, %v29336_v60 }
 0x102   : > { %26664 = vmatpush3.msk.msra.mxu1 %vm593_vm1, %v24387_v37  ;;  %26665 = vmatprep.mubr.msk.f32.mxu1 %vm28636_vm0, %v28635_v1 }
 0x103   : > { %10275 = vrot.lane.b32.xlu1 %v24643_v23, %s28639_s0  ;;  %5095 = vmatprep.mubr.f32.mxu0 %v28635_v1  ;;  %v29438_v48 = vpop.permute.xlu1 %7485  ;;  %v5509_v23 = vsel %vm1548_vm3, %v29256_v35, %v29229_v26  ;;  %v24657_v26 = vld [vmem:[%s28770_s20 + $0x60] sm:$0x7]  ;;  %v5512_v35 = vsel %vm1548_vm3, %v29254_v34, %v29273_v41 }
 0x104   : > { %10279 = vrot.lane.b32.xlu0 %v24644_v42, %s28639_s0  ;;  %26668 = vmatprep.subr.mxu0 %v28635_v1  ;;  %v29444_v55 = vpop.permute.xlu0 %7479 }
 0x105   : > { %26666 = vmatmul.mubr.msk.f32.vlgmr.msra.gmra.mrb[20].mxu1 %vm589_vm2, %v24388_v28  ;;  %24404 = vmatprep.subr.msk.mxu1 %vm593_vm1, %v5017_v43  ;;  %v5511_v43 = vsel %vm1548_vm3, %v29227_v25, %v29254_v34  ;;  %v5766_v25 = vsel %vm1548_vm3, %v29314_v53, %v29312_v52 }
 0x106   : > { %24403 = vmatmul.mubr.msk.f32.vlgmr.msra.gmra.mrb[2].mxu0 %vm589_vm2, %v24400_v47  ;;  %24405 = vmatpush1.msk.msra.mxu1 %vm593_vm1, %v24398_v36  ;;  %v1278_v14 = vpop.f32.mrb[4].mxu0 }
 0x107   : > { %26669 = vmatpush3.msk.msra.mxu0 %vm593_vm1, %v24399_v51  ;;  %10283 = vrot.lane.b32.xlu1 %v24645_v54, %s28639_s0  ;;  %v29454_v63 = vpop.permute.xlu1 %7735  ;;  %v1286_v18 = vadd.f32 %v1278_v14, %v1043_v56  ;;  %v26592_v19 = vpop.f32.mrb[5].mxu0  ;;  %v5763_v51 = vsel %vm1548_vm3, %v29290_v45, %v29271_v40  ;;  %v5765_v54 = vsel %vm1548_vm3, %v29292_v46, %v29314_v53  ;;  %v24679_v56 = vld [vmem:[%s28770_s20 + $0x78] sm:$0x77]  ;;  %v24681_v14 = vld [vmem:[%s28770_s20 + $0x88] sm:$0x7] }
 0x108   : > { %10281 = vrot.lane.b32.xlu0 %v10274_v50, %s28639_s0  ;;  %5166 = vmatprep.mubr.f32.mxu1 %v28635_v1  ;;  %v29459_v5 = vpop.permute.xlu0 %7487  ;;  %v11035_v53 = vcombine.high %v24679_v56, %v24679_v56  ;;  %v24692_v19 = vld [vmem:[%s28770_s20 + $0x94] sm:$0x77] }
 0x109   : > { %26670 = vmatprep.mubr.msk.f32.mxu0 %vm28636_vm0, %v28635_v1  ;;  %24413 = vmatprep.subr.msk.mxu0 %vm593_vm1, %v5257_v58 }
 0x10a   : > { %24406 = vmatmul.mubr.msk.f32.vlgmr.msra.gmra.mrb[2].mxu1 %vm589_vm2, %v24400_v47  ;;  %26671 = vmatmul.mubr.msk.f32.vlgmr.msra.gmra.mrb[20].mxu0 %vm589_vm2, %v24400_v47  ;;  %v5764_v47 = vsel %vm1548_vm3, %v29271_v40, %v29292_v46  ;;  %v24436_v40 = vld [vmem:[%s34590_s23 + $0xa8] sm:$0xff]  ;;  %v24680_v46 = vld [vmem:[%s28770_s20 + $0x80] sm:$0x77] }
 0x10b   : > { %24414 = vmatpush1.msk.msra.mxu0 %vm593_vm1, %v24409_v44  ;;  %10533 = vrot.lane.b32.xlu1 %v24656_v3, %s28638_s17  ;;  %v29474_v12 = vpop.permute.xlu1 %7733  ;;  %v24668_v44 = vld [vmem:[%s28770_s20 + $0x6c] sm:$0x77]  ;;  %v11036_v3 = vcombine.high %v24680_v46, %v24680_v46 }
 0x10c   : > { %24425 = vmatprep.subr.msk.mxu0 %vm593_vm1, %v5510_v7  ;;  %10531 = vrot.lane.b32.xlu0 %v10527_v4, %s28638_s17  ;;  %v29478_v16 = vpop.permute.xlu0 %7737  ;;  %v6020_v4 = vsel %vm1548_vm3, %v29350_v0, %v29371_v9 }
 0x10d   : > { %5336 = vmatprep.mubr.f32.mxu0 %v28635_v1  ;;  %24416 = vmatprep.subr.msk.mxu1 %vm593_vm1, %v5258_v6  ;;  %v24448_v6 = vld [vmem:[%s34590_s23 + $0xb0] sm:$0xff] }
 0x10e   : > { %24415 = vmatmul.mubr.msk.f32.vlgmr.msra.gmra.mrb[2].mxu0 %vm589_vm2, %v24412_v11  ;;  %24417 = vmatpush1.msk.msra.mxu1 %vm593_vm1, %v24410_v62 }
 0x10f   : > { %24426 = vmatpush1.msk.msra.mxu0 %vm593_vm1, %v5509_v23  ;;  %10535 = vrot.lane.b32.xlu1 %v10528_v10, %s28638_s17  ;;  %v1519_v32 = vpop.f32.mrb[6].mxu1  ;;  %v6271_v23 = vsel %vm1548_vm3, %v29387_v20, %v29369_v8 }
 0x110   : > { %10529 = vrot.lane.b32.xlu0 %v24655_v59, %s28638_s17  ;;  %5407 = vmatprep.mubr.f32.mxu1 %v28635_v1  ;;  %v29493_v27 = vpop.permute.xlu1 %7741  ;;  %v29495_v28 = vpop.permute.xlu0 %7739  ;;  %v29514_v36 = vadd.f32 %v1519_v32, %v1286_v18  ;;  %v6017_v59 = vsel %vm1548_vm3, %v29352_v2, %v29338_v61  ;;  %v24691_v2 = vld [vmem:[%s28770_s20 + $0x8c] sm:$0x77]  ;;  %v6274_v18 = vsel %vm1548_vm3, %v29407_v31, %v29405_v30 }
 0x111   : > { %26673 = vmatprep.subr.mxu1 %v28635_v1  ;;  %5590 = vmatprep.mubr.f32.mxu0 %v28635_v1  ;;  %v26597_v37 = vpop.f32.mrb[7].mxu1 }
 0x112   : > { %24418 = vmatmul.mubr.msk.f32.vlgmr.msra.gmra.mrb[2].mxu1 %vm589_vm2, %v24412_v11  ;;  %26678 = vmatprep.subr.mxu0 %v28635_v1 }
 0x113   : > { %26674 = vmatpush3.msk.msra.mxu1 %vm593_vm1, %v24411_v22  ;;  %10785 = vrot.lane.b32.xlu1 %v10781_v24, %s28638_s17  ;;  %v6273_v24 = vsel %vm1548_vm3, %v29389_v21, %v29407_v31  ;;  %v24460_v22 = vld [vmem:[%s34590_s23 + $0xb8] sm:$0xff] }
 0x114   : > { %24428 = vmatprep.subr.msk.mxu1 %vm593_vm1, %v5512_v35  ;;  %10537 = vrot.lane.b32.xlu0 %v24657_v26, %s28638_s17  ;;  %v29512_v33 = vpop.permute.xlu1 %7991  ;;  %v24693_v31 = vld [vmem:[%s28770_s20 + $0x9c] sm:$0x7]  ;;  %v24703_v35 = vld [vmem:[%s28770_s20 + $0x50] sm:$0x77] }
 0x115   : > { %26675 = vmatprep.mubr.msk.f32.mxu1 %vm28636_vm0, %v28635_v1  ;;  %v29518_v42 = vpop.permute.xlu0 %7989  ;;  %v11543_v32 = vcombine.high %v24703_v35, %v24703_v35 }
 0x116   : > { %26676 = vmatmul.mubr.msk.f32.vlgmr.msra.gmra.mrb[22].mxu1 %vm589_vm2, %v24412_v11  ;;  %24427 = vmatmul.mubr.msk.f32.vlgmr.msra.gmra.mrb[2].mxu0 %vm589_vm2, %v24424_v29  ;;  %v6019_v11 = vsel %vm1548_vm3, %v29336_v60, %v29350_v0 }
 0x117   : > { %24429 = vmatpush1.msk.msra.mxu1 %vm593_vm1, %v5511_v43  ;;  %26679 = vmatpush3.msk.msra.mxu0 %vm593_vm1, %v29273_v41  ;;  %v10782_v41 = vcombine.high %v24668_v44, %v24668_v44 }
 0x118   : > { %24437 = vmatprep.subr.msk.mxu0 %vm593_vm1, %v5764_v47  ;;  %24440 = vmatprep.subr.msk.mxu1 %vm593_vm1, %v5766_v25  ;;  %v29537_v34 = vpop.permute.xlu1 %7993  ;;  %v24472_v25 = vld [vmem:[%s34590_s23 + $0xc0] sm:$0xff] }
 0x119   : > { %10783 = vrot.lane.b32.xlu1 %v24667_v17, %s28638_s17  ;;  %10787 = vrot.lane.b32.xlu0 %v24668_v44, %s28638_s17  ;;  %v6272_v17 = vsel %vm1548_vm3, %v29369_v8, %v29389_v21  ;;  %v11290_v8 = vcombine.high %v24692_v19, %v24692_v19  ;;  %v24704_v44 = vld [vmem:[%s28770_s20 + $0x58] sm:$0x77] }
 0x11a   : > { %5661 = vmatprep.mubr.f32.mxu1 %v28635_v1  ;;  %26680 = vmatprep.mubr.msk.f32.mxu0 %vm28636_vm0, %v28635_v1  ;;  %v29545_v50 = vpop.permute.xlu0 %7987 }
 0x11b   : > { %24430 = vmatmul.mubr.msk.f32.vlgmr.msra.gmra.mrb[2].mxu1 %vm589_vm2, %v24424_v29  ;;  %26681 = vmatmul.mubr.msk.f32.vlgmr.msra.gmra.mrb[22].mxu0 %vm589_vm2, %v24424_v29  ;;  %v24470_v29 = vld [vmem:[%s28770_s20 + $0xf8] sm:$0x77] }
 0x11c   : > { %24438 = vmatpush1.msk.msra.mxu0 %vm593_vm1, %v5763_v51  ;;  %24441 = vmatpush1.msk.msra.mxu1 %vm593_vm1, %v5765_v54  ;;  %v29564_v45 = vpop.permute.xlu1 %8243  ;;  %v6515_v47 = vcombine.high %v24470_v29, %v24470_v29  ;;  %v24481_v51 = vld [vmem:[%s28770_s20 + $0x104] sm:$0x77] }
 0x11d   : > { %24449 = vmatprep.subr.msk.mxu0 %vm593_vm1, %v6018_v57  ;;  %10791 = vrot.lane.b32.xlu1 %v24669_v49, %s28638_s17  ;;  %v24482_v57 = vld [vmem:[%s28770_s20 + $0x10c] sm:$0x77] }
 0x11e   : > { %10789 = vrot.lane.b32.xlu0 %v10782_v41, %s28638_s17  ;;  %5844 = vmatprep.mubr.f32.mxu0 %v28635_v1  ;;  %v29571_v58 = vpop.permute.xlu0 %7995  ;;  %v11544_v41 = vcombine.high %v24704_v44, %v24704_v44 }
 0x11f   : > { %24439 = vmatmul.mubr.msk.f32.vlgmr.msra.gmra.mrb[2].mxu0 %vm589_vm2, %v24436_v40  ;;  %5915 = vmatprep.mubr.f32.mxu1 %v28635_v1 }
 0x120   : > { %24450 = vmatpush1.msk.msra.mxu0 %vm593_vm1, %v6017_v59  ;;  %26683 = vmatprep.subr.mxu1 %v28635_v1  ;;  %v29580_v62 = vpop.permute.xlu1 %8241  ;;  %v24705_v59 = vld [vmem:[%s28770_s20 + $0x60] sm:$0x7] }
 0x121   : > { %11041 = vrot.lane.b32.xlu1 %v24680_v46, %s28638_s17  ;;  %6098 = vmatprep.mubr.f32.mxu0 %v28635_v1 }
 0x122   : > { %11039 = vrot.lane.b32.xlu0 %v11035_v53, %s28638_s17  ;;  %26688 = vmatprep.subr.mxu0 %v28635_v1  ;;  %v29586_v61 = vpop.permute.xlu0 %8245 }
 0x123   : > { %24442 = vmatmul.mubr.msk.f32.vlgmr.msra.gmra.mrb[2].mxu1 %vm589_vm2, %v24436_v40 }
 0x124   : > { %26684 = vmatpush3.msk.msra.mxu1 %vm593_vm1, %v29312_v52  ;;  %26685 = vmatprep.mubr.msk.f32.mxu1 %vm28636_vm0, %v28635_v1  ;;  %v29600_v7 = vpop.permute.xlu1 %8249  ;;  %v11289_v52 = vcombine.high %v24691_v2, %v24691_v2 }
 0x125   : > { %24452 = vmatprep.subr.msk.mxu1 %vm593_vm1, %v6020_v4  ;;  %11043 = vrot.lane.b32.xlu1 %v11036_v3, %s28638_s17  ;;  %v24493_v4 = vld [vmem:[%s28770_s20 + $0x118] sm:$0x77] }
 0x126   : > { %11037 = vrot.lane.b32.xlu0 %v24679_v56, %s28638_s17  ;;  %v29605_v10 = vpop.permute.xlu0 %8247  ;;  %v24471_v56 = vld [vmem:[%s28770_s20 + $0x100] sm:$0x7] }
 0x127   : > { %26686 = vmatmul.mubr.msk.f32.vlgmr.msra.gmra.mrb[24].mxu1 %vm589_vm2, %v24436_v40  ;;  %24451 = vmatmul.mubr.msk.f32.vlgmr.msra.gmra.mrb[2].mxu0 %vm589_vm2, %v24448_v6  ;;  %v6755_v40 = vcombine.high %v24481_v51, %v24481_v51 }
 0x128   : > { %24453 = vmatpush1.msk.msra.mxu1 %vm593_vm1, %v6019_v11  ;;  %26689 = vmatpush3.msk.msra.mxu0 %vm593_vm1, %v29371_v9  ;;  %v24469_v9 = vld [vmem:[%s28770_s20 + $0xf0] sm:$0x77] }
 0x129   : > { %24461 = vmatprep.subr.msk.mxu0 %vm593_vm1, %v6272_v17  ;;  %24464 = vmatprep.subr.msk.mxu1 %vm593_vm1, %v6274_v18  ;;  %v6514_v26 = vcombine.high %v24469_v9, %v24469_v9  ;;  %v24494_v18 = vld [vmem:[%s28770_s20 + $0x120] sm:$0x77] }
 0x12a   : > { %11293 = vrot.lane.b32.xlu1 %v11289_v52, %s28638_s17  ;;  %11045 = vrot.lane.b32.xlu0 %v24681_v14, %s28638_s17  ;;  %v29626_v60 = vpop.permute.xlu1 %8499  ;;  %v29628_v0 = vpop.permute.xlu0 %8497  ;;  %v24716_v52 = vld [vmem:[%s28770_s20 + $0x6c] sm:$0x77]  ;;  %v6996_v14 = vcombine.high %v24493_v4, %v24493_v4 }
 0x12b   : > { %6169 = vmatprep.mubr.f32.mxu1 %v28635_v1  ;;  %26690 = vmatprep.mubr.msk.f32.mxu0 %vm28636_vm0, %v28635_v1 }
 0x12c   : > { %24454 = vmatmul.mubr.msk.f32.vlgmr.msra.gmra.mrb[2].mxu1 %vm589_vm2, %v24448_v6  ;;  %26691 = vmatmul.mubr.msk.f32.vlgmr.msra.gmra.mrb[24].mxu0 %vm589_vm2, %v24448_v6  ;;  %v24484_v6 = vld [vmem:[%s34590_s23 + $0xc8] sm:$0xff] }
 0x12d   : > { %24462 = vmatpush1.msk.msra.mxu0 %vm593_vm1, %v6271_v23  ;;  %24465 = vmatpush1.msk.msra.mxu1 %vm593_vm1, %v6273_v24  ;;  %v24717_v23 = vld [vmem:[%s28770_s20 + $0x74] sm:$0x7] }
 0x12e   : > { %11291 = vrot.lane.b32.xlu1 %v24691_v2, %s28638_s17  ;;  %11295 = vrot.lane.b32.xlu0 %v24692_v19, %s28638_s17  ;;  %v29650_v20 = vpop.permute.xlu1 %8501  ;;  %v29652_v21 = vpop.permute.xlu0 %8495  ;;  %v6756_v2 = vcombine.high %v24482_v57, %v24482_v57  ;;  %v24483_v19 = vld [vmem:[%s28770_s20 + $0x114] sm:$0x7] }
 0x12f   : > { %6352 = vmatprep.mubr.f32.mxu0 %v28635_v1  ;;  %6423 = vmatprep.mubr.f32.mxu1 %v28635_v1 }
 0x130   : > { %24463 = vmatmul.mubr.msk.f32.vlgmr.msra.gmra.mrb[2].mxu0 %vm589_vm2, %v24460_v22  ;;  %26693 = vmatprep.subr.mxu1 %v28635_v1 }
 0x131   : > { %24473 = vmatprep.subr.msk.mxu0 %vm593_vm1, %v6514_v26  ;;  %6593 = vmatprep.mubr.f32.mxu0 %v28635_v1  ;;  %v24727_v26 = vld [vmem:[%s28770_s20 + $0x78] sm:$0x77] }
 0x132   : > { %11299 = vrot.lane.b32.xlu1 %v24693_v31, %s28638_s17  ;;  %11297 = vrot.lane.b32.xlu0 %v11290_v8, %s28638_s17  ;;  %v29665_v37 = vpop.permute.xlu1 %8752  ;;  %v29667_v43 = vpop.permute.xlu0 %8503  ;;  %v24496_v31 = vld [vmem:[%s34590_s23 + $0xd0] sm:$0xff] }
 0x133   : > { %24474 = vmatpush1.msk.msra.mxu0 %vm593_vm1, %v24469_v9  ;;  %v11798_v9 = vcombine.high %v24716_v52, %v24716_v52 }
 0x134   : > { %24466 = vmatmul.mubr.msk.f32.vlgmr.msra.gmra.mrb[2].mxu1 %vm589_vm2, %v24460_v22  ;;  %26698 = vmatprep.subr.mxu0 %v28635_v1 }
 0x135   : > { %26694 = vmatpush3.msk.msra.mxu1 %vm593_vm1, %v29405_v30  ;;  %26695 = vmatprep.mubr.msk.f32.mxu1 %vm28636_vm0, %v28635_v1  ;;  %v24715_v30 = vld [vmem:[%s28770_s20 + $0x64] sm:$0x77] }
 0x136   : > { %11549 = vrot.lane.b32.xlu1 %v24704_v44, %s28639_s0  ;;  %11547 = vrot.lane.b32.xlu0 %v11543_v32, %s28639_s0  ;;  %v29682_v49 = vpop.permute.xlu1 %8750  ;;  %v11797_v46 = vcombine.high %v24715_v30, %v24715_v30  ;;  %v12051_v32 = vcombine.high %v24727_v26, %v24727_v26  ;;  %v24506_v44 = vld [vmem:[%s28770_s20 + $0x134] sm:$0x77] }
 0x137   : > { %24476 = vmatprep.subr.msk.mxu1 %vm593_vm1, %v6515_v47  ;;  %v29686_v54 = vpop.permute.xlu0 %8754  ;;  %v24728_v47 = vld [vmem:[%s28770_s20 + $0x80] sm:$0x77] }
 0x138   : > { %26696 = vmatmul.mubr.msk.f32.vlgmr.msra.gmra.mrb[26].mxu1 %vm589_vm2, %v24460_v22  ;;  %24475 = vmatmul.mubr.msk.f32.vlgmr.msra.gmra.mrb[2].mxu0 %vm589_vm2, %v24472_v25  ;;  %v6997_v22 = vcombine.high %v24494_v18, %v24494_v18 }
 0x139   : > { %24477 = vmatpush1.msk.msra.mxu1 %vm593_vm1, %v24470_v29  ;;  %6664 = vmatprep.mubr.f32.mxu1 %v28635_v1  ;;  %v24495_v29 = vld [vmem:[%s28770_s20 + $0x128] sm:$0x7] }
 0x13a   : > { %11551 = vrot.lane.b32.xlu1 %v11544_v41, %s28639_s0  ;;  %11545 = vrot.lane.b32.xlu0 %v24703_v35, %s28639_s0  ;;  %v29697_v53 = vpop.permute.xlu1 %8758  ;;  %v24505_v35 = vld [vmem:[%s28770_s20 + $0x12c] sm:$0x77] }
 0x13b   : > { %26699 = vmatpush3.msk.msra.mxu0 %vm593_vm1, %v24471_v56  ;;  %26700 = vmatprep.mubr.msk.f32.mxu0 %vm28636_vm0, %v28635_v1  ;;  %v29703_v3 = vpop.permute.xlu0 %8756  ;;  %v12052_v56 = vcombine.high %v24728_v47, %v24728_v47 }
 0x13c   : > { %24478 = vmatmul.mubr.msk.f32.vlgmr.msra.gmra.mrb[2].mxu1 %vm589_vm2, %v24472_v25  ;;  %26701 = vmatmul.mubr.msk.f32.vlgmr.msra.gmra.mrb[26].mxu0 %vm589_vm2, %v24472_v25  ;;  %v7237_v25 = vcombine.high %v24505_v35, %v24505_v35 }
 0x13d   : > { %24485 = vmatprep.subr.msk.mxu0 %vm593_vm1, %v6755_v40  ;;  %6834 = vmatprep.mubr.f32.mxu0 %v28635_v1 }
 0x13e   : > { %11801 = vrot.lane.b32.xlu1 %v11797_v46, %s28639_s0  ;;  %11553 = vrot.lane.b32.xlu0 %v24705_v59, %s28639_s0  ;;  %v7490_v59 = vsel %vm1548_vm3, %v29424_v39, %v29420_v38 }
 0x13f   : > { %24486 = vmatpush1.msk.msra.mxu0 %vm593_vm1, %v24481_v51  ;;  %24488 = vmatprep.subr.msk.mxu1 %vm593_vm1, %v6756_v2  ;;  %v29718_v11 = vpop.permute.xlu1 %9008  ;;  %v24508_v2 = vld [vmem:[%s34590_s23 + $0xd8] sm:$0xff] }
 0x140   : > { %24487 = vmatmul.mubr.msk.f32.vlgmr.msra.gmra.mrb[2].mxu0 %vm589_vm2, %v24484_v6  ;;  %24489 = vmatpush1.msk.msra.mxu1 %vm593_vm1, %v24482_v57  ;;  %v29722_v17 = vpop.permute.xlu0 %9006  ;;  %v24739_v57 = vld [vmem:[%s28770_s20 + $0x8c] sm:$0x77] }
 0x141   : > { %6905 = vmatprep.mubr.f32.mxu1 %v28635_v1  ;;  %26703 = vmatprep.subr.mxu1 %v28635_v1 }
 0x142   : > { %11799 = vrot.lane.b32.xlu1 %v24715_v30, %s28639_s0  ;;  %11803 = vrot.lane.b32.xlu0 %v24716_v52, %s28639_s0  ;;  %v7238_v30 = vcombine.high %v24506_v44, %v24506_v44 }
 0x143   : > { %24497 = vmatprep.subr.msk.mxu0 %vm593_vm1, %v6996_v14  ;;  %7075 = vmatprep.mubr.f32.mxu0 %v28635_v1  ;;  %v29733_v24 = vpop.permute.xlu1 %9010  ;;  %v7489_v14 = vsel %vm1548_vm3, %v29444_v55, %v29424_v39  ;;  %v7492_v55 = vsel %vm1548_vm3, %v29438_v48, %v29459_v5 }
 0x144   : > { %24490 = vmatmul.mubr.msk.f32.vlgmr.msra.gmra.mrb[2].mxu1 %vm589_vm2, %v24484_v6  ;;  %24498 = vmatpush1.msk.msra.mxu0 %vm593_vm1, %v24493_v4  ;;  %v29738_v8 = vpop.permute.xlu0 %9004  ;;  %v12305_v4 = vcombine.high %v24739_v57, %v24739_v57 }
 0x145   : > { %26704 = vmatpush3.msk.msra.mxu1 %vm593_vm1, %v24483_v19  ;;  %26705 = vmatprep.mubr.msk.f32.mxu1 %vm28636_vm0, %v28635_v1  ;;  %v24740_v19 = vld [vmem:[%s28770_s20 + $0x94] sm:$0x77] }
 0x146   : > { %11807 = vrot.lane.b32.xlu1 %v24717_v23, %s28639_s0  ;;  %11805 = vrot.lane.b32.xlu0 %v11798_v9, %s28639_s0  ;;  %v24507_v9 = vld [vmem:[%s28770_s20 + $0x13c] sm:$0x7] }
 0x147   : > { %26708 = vmatprep.subr.mxu0 %v28635_v1  ;;  %24500 = vmatprep.subr.msk.mxu1 %vm593_vm1, %v6997_v22  ;;  %v24520_v22 = vld [vmem:[%s34590_s23 + $0xe0] sm:$0xff] }
 0x148   : > { %26706 = vmatmul.mubr.msk.f32.vlgmr.msra.gmra.mrb[28].mxu1 %vm589_vm2, %v24484_v6  ;;  %24499 = vmatmul.mubr.msk.f32.vlgmr.msra.gmra.mrb[2].mxu0 %vm589_vm2, %v24496_v31  ;;  %v29756_v41 = vpop.permute.xlu1 %9260  ;;  %v24729_v6 = vld [vmem:[%s28770_s20 + $0x88] sm:$0x7] }
 0x149   : > { %26709 = vmatpush3.msk.msra.mxu0 %vm593_vm1, %v24495_v29  ;;  %24501 = vmatpush1.msk.msra.mxu1 %vm593_vm1, %v24494_v18  ;;  %v29760_v51 = vpop.permute.xlu0 %9012  ;;  %v7746_v29 = vsel %vm1548_vm3, %v29495_v28, %v29493_v27 }
 0x14a   : > { %12057 = vrot.lane.b32.xlu1 %v24728_v47, %s28639_s0  ;;  %12055 = vrot.lane.b32.xlu0 %v12051_v32, %s28639_s0  ;;  %v24752_v47 = vld [vmem:[%s28770_s20 + $0xa8] sm:$0x77] }
 0x14b   : > { %7146 = vmatprep.mubr.f32.mxu1 %v28635_v1  ;;  %26710 = vmatprep.mubr.msk.f32.mxu0 %vm28636_vm0, %v28635_v1 }
 0x14c   : > { %24509 = vmatprep.subr.msk.mxu0 %vm593_vm1, %v7237_v25  ;;  %24502 = vmatmul.mubr.msk.f32.vlgmr.msra.gmra.mrb[2].mxu1 %vm589_vm2, %v24496_v31  ;;  %v29770_v40 = vpop.permute.xlu1 %9258 }
 0x14d   : > { %26711 = vmatmul.mubr.msk.f32.vlgmr.msra.gmra.mrb[28].mxu0 %vm589_vm2, %v24496_v31  ;;  %v29773_v46 = vpop.permute.xlu0 %9262  ;;  %24512 = vmatprep.subr.msk.mxu1 %vm593_vm1, %v7238_v30  ;;  %v12306_v31 = vcombine.high %v24740_v19, %v24740_v19 }
 0x14e   : > { %24510 = vmatpush1.msk.msra.mxu0 %vm593_vm1, %v24505_v35  ;;  %12059 = vrot.lane.b32.xlu1 %v12052_v56, %s28639_s0  ;;  %v24741_v35 = vld [vmem:[%s28770_s20 + $0x9c] sm:$0x7]  ;;  %v7743_v56 = vsel %vm1548_vm3, %v29474_v12, %v29454_v63 }
 0x14f   : > { %24521 = vmatprep.subr.msk.mxu0 %vm593_vm1, %v7490_v59  ;;  %12053 = vrot.lane.b32.xlu0 %v24727_v26, %s28639_s0  ;;  %v7491_v26 = vsel %vm1548_vm3, %v29420_v38, %v29438_v48  ;;  %v7744_v38 = vsel %vm1548_vm3, %v29454_v63, %v29478_v16  ;;  %v24532_v59 = vld [vmem:[%s34590_s23 + $0xe8] sm:$0xff]  ;;  %v24763_v63 = vld [vmem:[%s28770_s20 + $0xb4] sm:$0x77] }
 0x150   : > { %7316 = vmatprep.mubr.f32.mxu0 %v28635_v1  ;;  %24513 = vmatpush1.msk.msra.mxu1 %vm593_vm1, %v24506_v44  ;;  %v29789_v52 = vpop.permute.xlu1 %9266  ;;  %v24751_v44 = vld [vmem:[%s28770_s20 + $0xa0] sm:$0x77] }
 0x151   : > { %24511 = vmatmul.mubr.msk.f32.vlgmr.msra.gmra.mrb[2].mxu0 %vm589_vm2, %v24508_v2  ;;  %7387 = vmatprep.mubr.f32.mxu1 %v28635_v1  ;;  %v29796_v18 = vpop.permute.xlu0 %9264  ;;  %v12559_v25 = vcombine.high %v24751_v44, %v24751_v44 }
 0x152   : > { %24522 = vmatpush1.msk.msra.mxu0 %vm593_vm1, %v7489_v14  ;;  %12309 = vrot.lane.b32.xlu1 %v12305_v4, %s28639_s0  ;;  %v24753_v14 = vld [vmem:[%s28770_s20 + $0xb0] sm:$0x7] }
 0x153   : > { %12061 = vrot.lane.b32.xlu0 %v24729_v6, %s28639_s0  ;;  %26713 = vmatprep.subr.mxu1 %v28635_v1  ;;  %v12813_v6 = vcombine.high %v24763_v63, %v24763_v63 }
 0x154   : > { %24514 = vmatmul.mubr.msk.f32.vlgmr.msra.gmra.mrb[2].mxu1 %vm589_vm2, %v24508_v2  ;;  %7570 = vmatprep.mubr.f32.mxu0 %v28635_v1  ;;  %v29806_v39 = vpop.permute.xlu1 %9516 }
 0x155   : > { %26714 = vmatpush3.msk.msra.mxu1 %vm593_vm1, %v24507_v9  ;;  %26715 = vmatprep.mubr.msk.f32.mxu1 %vm28636_vm0, %v28635_v1  ;;  %v29814_v23 = vpop.permute.xlu0 %9514 }
 0x156   : > { %24524 = vmatprep.subr.msk.mxu1 %vm593_vm1, %v7492_v55  ;;  %12307 = vrot.lane.b32.xlu1 %v24739_v57, %s28639_s0 }
 0x157   : > { %12311 = vrot.lane.b32.xlu0 %v24740_v19, %s28639_s0  ;;  %26718 = vmatprep.subr.mxu0 %v28635_v1  ;;  %v24544_v19 = vld [vmem:[%s34590_s23 + $0xf0] sm:$0xff] }
 0x158   : > { %26716 = vmatmul.mubr.msk.f32.vlgmr.msra.gmra.mrb[30].mxu1 %vm589_vm2, %v24508_v2  ;;  %v7997_v2 = vsel %vm1548_vm3, %v29545_v50, %v29518_v42  ;;  %v8000_v50 = vsel %vm1548_vm3, %v29537_v34, %v29571_v58 }
 0x159   : > { %24523 = vmatmul.mubr.msk.f32.vlgmr.msra.gmra.mrb[2].mxu0 %vm589_vm2, %v24520_v22  ;;  %24525 = vmatpush1.msk.msra.mxu1 %vm593_vm1, %v7491_v26  ;;  %v29833_v32 = vpop.permute.xlu1 %9518  ;;  %v24764_v26 = vld [vmem:[%s28770_s20 + $0xbc] sm:$0x77] }
 0x15a   : > { %26719 = vmatpush3.msk.msra.mxu0 %vm593_vm1, %v29459_v5  ;;  %24536 = vmatprep.subr.msk.mxu1 %vm593_vm1, %v7746_v29  ;;  %v29842_v48 = vpop.permute.xlu0 %9512  ;;  %v7745_v5 = vsel %vm1548_vm3, %v29478_v16, %v29495_v28  ;;  %v7998_v16 = vsel %vm1548_vm3, %v29518_v42, %v29512_v33  ;;  %v12560_v28 = vcombine.high %v24752_v47, %v24752_v47 }
 0x15b   : > { %24533 = vmatprep.subr.msk.mxu0 %vm593_vm1, %v7744_v38  ;;  %12315 = vrot.lane.b32.xlu1 %v24741_v35, %s28639_s0 }
 0x15c   : > { %12313 = vrot.lane.b32.xlu0 %v12306_v31, %s28639_s0  ;;  %7641 = vmatprep.mubr.f32.mxu1 %v28635_v1 }
 0x15d   : > { %26720 = vmatprep.mubr.msk.f32.mxu0 %vm28636_vm0, %v28635_v1  ;;  %24526 = vmatmul.mubr.msk.f32.vlgmr.msra.gmra.mrb[2].mxu1 %vm589_vm2, %v24520_v22  ;;  %v29855_v30 = vpop.permute.xlu1 %9769 }
 0x15e   : > { %26721 = vmatmul.mubr.msk.f32.vlgmr.msra.gmra.mrb[30].mxu0 %vm589_vm2, %v24520_v22  ;;  %24537 = vmatpush1.msk.msra.mxu1 %vm593_vm1, %v7745_v5  ;;  %v29862_v57 = vpop.permute.xlu0 %9520  ;;  %v8254_v22 = vsel %vm1548_vm3, %v29605_v10, %v29600_v7  ;;  %v8251_v5 = vsel %vm1548_vm3, %v29580_v62, %v29564_v45 }
 0x15f   : > { %24534 = vmatpush1.msk.msra.mxu0 %vm593_vm1, %v7743_v56  ;;  %12565 = vrot.lane.b32.xlu1 %v24752_v47, %s28638_s17  ;;  %v8253_v47 = vsel %vm1548_vm3, %v29586_v61, %v29605_v10  ;;  %v24556_v10 = vld [vmem:[%s34590_s23 + $0xf8] sm:$0xff] }
 0x160   : > { %24545 = vmatprep.subr.msk.mxu0 %vm593_vm1, %v7998_v16  ;;  %12563 = vrot.lane.b32.xlu0 %v12559_v25, %s28638_s17  ;;  %v24775_v25 = vld [vmem:[%s28770_s20 + $0xc8] sm:$0x77] }
 0x161   : > { %7824 = vmatprep.mubr.f32.mxu0 %v28635_v1  ;;  %7895 = vmatprep.mubr.f32.mxu1 %v28635_v1  ;;  %v29877_v12 = vpop.permute.xlu1 %9767  ;;  %v13067_v62 = vcombine.high %v24775_v25, %v24775_v25 }
 0x162   : > { %24535 = vmatmul.mubr.msk.f32.vlgmr.msra.gmra.mrb[2].mxu0 %vm589_vm2, %v24532_v59  ;;  %26723 = vmatprep.subr.mxu1 %v28635_v1  ;;  %v29884_v4 = vpop.permute.xlu0 %9771 }
 0x163   : > { %24546 = vmatpush1.msk.msra.mxu0 %vm593_vm1, %v7997_v2  ;;  %12567 = vrot.lane.b32.xlu1 %v12560_v28, %s28638_s17 }
 0x164   : > { %12561 = vrot.lane.b32.xlu0 %v24751_v44, %s28638_s17  ;;  %8078 = vmatprep.mubr.f32.mxu0 %v28635_v1  ;;  %v12814_v44 = vcombine.high %v24764_v26, %v24764_v26 }
 0x165   : > { %24538 = vmatmul.mubr.msk.f32.vlgmr.msra.gmra.mrb[2].mxu1 %vm589_vm2, %v24532_v59  ;;  %26728 = vmatprep.subr.mxu0 %v28635_v1  ;;  %v29893_v42 = vpop.permute.xlu1 %9775 }
 0x166   : > { %26724 = vmatpush3.msk.msra.mxu1 %vm593_vm1, %v29493_v27  ;;  %26725 = vmatprep.mubr.msk.f32.mxu1 %vm28636_vm0, %v28635_v1  ;;  %v29902_v9 = vpop.permute.xlu0 %9773  ;;  %v7999_v27 = vsel %vm1548_vm3, %v29512_v33, %v29537_v34  ;;  %v8252_v33 = vsel %vm1548_vm3, %v29564_v45, %v29586_v61  ;;  %v8507_v61 = vsel %vm8505_vm4, %v29628_v0, %v29626_v60  ;;  %v24776_v45 = vld [vmem:[%s28770_s20 + $0xd0] sm:$0x77] }
 0x167   : > { %24548 = vmatprep.subr.msk.mxu1 %vm593_vm1, %v8000_v50  ;;  %12817 = vrot.lane.b32.xlu1 %v12813_v6, %s28638_s17  ;;  %v13068_v6 = vcombine.high %v24776_v45, %v24776_v45  ;;  %v8509_v50 = vsel %vm8505_vm4, %v29650_v20, %v29667_v43 }
 0x168   : > { %12569 = vrot.lane.b32.xlu0 %v24753_v14, %s28638_s17 }
 0x169   : > { %26726 = vmatmul.mubr.msk.f32.vlgmr.msra.gmra.mrb[32].mxu1 %vm589_vm2, %v24532_v59  ;;  %v29914_v55 = vpop.permute.xlu1 %10025  ;;  %v8506_v59 = vsel %vm8505_vm4, %v29652_v21, %v29628_v0  ;;  %v24787_v21 = vld [vmem:[%s28770_s20 + $0xdc] sm:$0x77] }
 0x16a   : > { %24547 = vmatmul.mubr.msk.f32.vlgmr.msra.gmra.mrb[2].mxu0 %vm589_vm2, %v24544_v19  ;;  %24549 = vmatpush1.msk.msra.mxu1 %vm593_vm1, %v7999_v27  ;;  %v29922_v31 = vpop.permute.xlu0 %10023  ;;  %v1774_v35 = vpop.f32.mrb[6].mxu0  ;;  %v13321_v27 = vcombine.high %v24787_v21, %v24787_v21 }
 0x16b   : > { %26729 = vmatpush3.msk.msra.mxu0 %vm593_vm1, %v29571_v58  ;;  %24560 = vmatprep.subr.msk.mxu1 %vm593_vm1, %v8254_v22  ;;  %v1782_v34 = vadd.f32 %v1774_v35, %v29514_v36  ;;  %v26602_v29 = vpop.f32.mrb[7].mxu0  ;;  %v24765_v58 = vld [vmem:[%s28770_s20 + $0xc4] sm:$0x7]  ;;  %v8508_v22 = vsel %vm8505_vm4, %v29626_v60, %v29650_v20  ;;  %v8761_v60 = vsel %vm8505_vm4, %v29665_v37, %v29686_v54 }
 0x16c   : > { %24557 = vmatprep.subr.msk.mxu0 %vm593_vm1, %v8252_v33  ;;  %12815 = vrot.lane.b32.xlu1 %v24763_v63, %s28638_s17  ;;  %v8763_v33 = vsel %vm8505_vm4, %v29703_v3, %v29697_v53 }
 0x16d   : > { %12819 = vrot.lane.b32.xlu0 %v24764_v26, %s28638_s17  ;;  %8149 = vmatprep.mubr.f32.mxu1 %v28635_v1  ;;  %v29936_v38 = vpop.permute.xlu1 %10027 }
 0x16e   : > { %26730 = vmatprep.mubr.msk.f32.mxu0 %vm28636_vm0, %v28635_v1  ;;  %24550 = vmatmul.mubr.msk.f32.vlgmr.msra.gmra.mrb[2].mxu1 %vm589_vm2, %v24544_v19  ;;  %v29944_v36 = vpop.permute.xlu0 %10021 }
 0x16f   : > { %26731 = vmatmul.mubr.msk.f32.vlgmr.msra.gmra.mrb[32].mxu0 %vm589_vm2, %v24544_v19  ;;  %24561 = vmatpush1.msk.msra.mxu1 %vm593_vm1, %v8253_v47  ;;  %v24565_v19 = vld [vmem:[%s34590_s23 + $0x100] sm:$0xff] }
 0x170   : > { %24558 = vmatpush1.msk.msra.mxu0 %vm593_vm1, %v8251_v5  ;;  %12823 = vrot.lane.b32.xlu1 %v24765_v58, %s28638_s17  ;;  %v24788_v47 = vld [vmem:[%s28770_s20 + $0xe4] sm:$0x77] }
 0x171   : > { %24566 = vmatprep.subr.msk.mxu0 %vm593_vm1, %v8507_v61  ;;  %12821 = vrot.lane.b32.xlu0 %v12814_v44, %s28638_s17  ;;  %v29963_v56 = vpop.permute.xlu1 %10277 }
 0x172   : > { %8332 = vmatprep.mubr.f32.mxu0 %v28635_v1  ;;  %8403 = vmatprep.mubr.f32.mxu1 %v28635_v1  ;;  %v29967_v16 = vpop.permute.xlu0 %10029  ;;  %v2028_v28 = vpop.f32.mrb[8].mxu1 }
 0x173   : > { %24559 = vmatmul.mubr.msk.f32.vlgmr.msra.gmra.mrb[2].mxu0 %vm589_vm2, %v24556_v10  ;;  %26733 = vmatprep.subr.mxu1 %v28635_v1  ;;  %v2036_v63 = vadd.f32 %v2028_v28, %v1782_v34  ;;  %v26607_v2 = vpop.f32.mrb[9].mxu1  ;;  %v24777_v34 = vld [vmem:[%s28770_s20 + $0xd8] sm:$0x7]  ;;  %v24800_v28 = vld [vmem:[%s28770_s20 + $0xa8] sm:$0x77] }
 0x174   : > { %24567 = vmatpush1.msk.msra.mxu0 %vm593_vm1, %v8506_v59  ;;  %13073 = vrot.lane.b32.xlu1 %v24776_v45, %s28638_s17  ;;  %v9014_v45 = vsel %vm8505_vm4, %v29738_v8, %v29722_v17 }
 0x175   : > { %13071 = vrot.lane.b32.xlu0 %v13067_v62, %s28638_s17  ;;  %8587 = vmatprep.mubr.f32.mxu0 %v28635_v1  ;;  %v29978_v14 = vpop.permute.xlu1 %10275 }
 0x176   : > { %24562 = vmatmul.mubr.msk.f32.vlgmr.msra.gmra.mrb[2].mxu1 %vm589_vm2, %v24556_v10  ;;  %26738 = vmatprep.subr.mxu0 %v28635_v1  ;;  %v29982_v0 = vpop.permute.xlu0 %10279 }
 0x177   : > { %26734 = vmatpush3.msk.msra.mxu1 %vm593_vm1, %v29600_v7  ;;  %26735 = vmatprep.mubr.msk.f32.mxu1 %vm28636_vm0, %v28635_v1 }
 0x178   : > { %24569 = vmatprep.subr.msk.mxu1 %vm593_vm1, %v8509_v50  ;;  %13075 = vrot.lane.b32.xlu1 %v13068_v6, %s28638_s17  ;;  %v9017_v6 = vsel %vm8505_vm4, %v29733_v24, %v29760_v51  ;;  %v13576_v50 = vcombine.high %v24800_v28, %v24800_v28 }
 0x179   : > { %13069 = vrot.lane.b32.xlu0 %v24775_v25, %s28638_s17  ;;  %v29998_v7 = vpop.permute.xlu1 %10283  ;;  %v8760_v25 = vsel %vm8505_vm4, %v29682_v49, %v29665_v37  ;;  %v13322_v37 = vcombine.high %v24788_v47, %v24788_v47  ;;  %v24789_v49 = vld [vmem:[%s28770_s20 + $0xec] sm:$0x7] }
 0x17a   : > { %26736 = vmatmul.mubr.msk.f32.vlgmr.msra.gmra.mrb[34].mxu1 %vm589_vm2, %v24556_v10  ;;  %v30004_v26 = vpop.permute.xlu0 %10281  ;;  %v2282_v35 = vpop.f32.mrb[8].mxu0  ;;  %v24799_v10 = vld [vmem:[%s28770_s20 + $0xa0] sm:$0x77] }
 0x17b   : > { %24568 = vmatmul.mubr.msk.f32.vlgmr.msra.gmra.mrb[2].mxu0 %vm589_vm2, %v24565_v19  ;;  %24570 = vmatpush1.msk.msra.mxu1 %vm593_vm1, %v8508_v22  ;;  %v2290_v29 = vadd.f32 %v2282_v35, %v2036_v63  ;;  %v26612_v44 = vpop.f32.mrb[9].mxu0  ;;  %v13575_v59 = vcombine.high %v24799_v10, %v24799_v10  ;;  %v24811_v35 = vld [vmem:[%s28770_s20 + $0xb4] sm:$0x77] }
 0x17c   : > { %26739 = vmatpush3.msk.msra.mxu0 %vm593_vm1, %v29667_v43  ;;  %24581 = vmatprep.subr.msk.mxu1 %vm593_vm1, %v8763_v33  ;;  %v8762_v43 = vsel %vm8505_vm4, %v29686_v54, %v29703_v3  ;;  %v9015_v54 = vsel %vm8505_vm4, %v29722_v17, %v29718_v11  ;;  %v24577_v3 = vld [vmem:[%s34590_s23 + $0x108] sm:$0xff] }
 0x17d   : > { %24578 = vmatprep.subr.msk.mxu0 %vm593_vm1, %v8761_v60  ;;  %13325 = vrot.lane.b32.xlu1 %v13321_v27, %s28638_s17  ;;  %v30020_v20 = vpop.permute.xlu1 %10533  ;;  %v24801_v60 = vld [vmem:[%s28770_s20 + $0xb0] sm:$0x7] }
 0x17e   : > { %13077 = vrot.lane.b32.xlu0 %v24777_v34, %s28638_s17  ;;  %8658 = vmatprep.mubr.f32.mxu1 %v28635_v1  ;;  %v30024_v58 = vpop.permute.xlu0 %10531  ;;  %v9271_v34 = vsel %vm8505_vm4, %v29796_v18, %v29789_v52 }
 0x17f   : > { %26740 = vmatprep.mubr.msk.f32.mxu0 %vm28636_vm0, %v28635_v1  ;;  %24571 = vmatmul.mubr.msk.f32.vlgmr.msra.gmra.mrb[2].mxu1 %vm589_vm2, %v24565_v19 }
 0x180   : > { %26741 = vmatmul.mubr.msk.f32.vlgmr.msra.gmra.mrb[34].mxu0 %vm589_vm2, %v24565_v19  ;;  %24582 = vmatpush1.msk.msra.mxu1 %vm593_vm1, %v8762_v43 }
 0x181   : > { %24579 = vmatpush1.msk.msra.mxu0 %vm593_vm1, %v8760_v25  ;;  %13323 = vrot.lane.b32.xlu1 %v24787_v21, %s28638_s17  ;;  %v30046_v5 = vpop.permute.xlu1 %10535  ;;  %v24589_v21 = vld [vmem:[%s34590_s23 + $0x110] sm:$0xff] }
 0x182   : > { %24590 = vmatprep.subr.msk.mxu0 %vm593_vm1, %v9015_v54  ;;  %13327 = vrot.lane.b32.xlu0 %v24788_v47, %s28638_s17  ;;  %v30051_v61 = vpop.permute.xlu0 %10529  ;;  %v9268_v47 = vsel %vm8505_vm4, %v29770_v40, %v29756_v41  ;;  %v24812_v40 = vld [vmem:[%s28770_s20 + $0xbc] sm:$0x77]  ;;  %v9523_v54 = vsel %vm9522_vm5, %v29842_v48, %v29814_v23 }
 0x183   : > { %8841 = vmatprep.mubr.f32.mxu0 %v28635_v1  ;;  %8912 = vmatprep.mubr.f32.mxu1 %v28635_v1 }
 0x184   : > { %24580 = vmatmul.mubr.msk.f32.vlgmr.msra.gmra.mrb[2].mxu0 %vm589_vm2, %v24577_v3  ;;  %26743 = vmatprep.subr.mxu1 %v28635_v1 }
 0x185   : > { %24591 = vmatpush1.msk.msra.mxu0 %vm593_vm1, %v9014_v45  ;;  %13331 = vrot.lane.b32.xlu1 %v24789_v49, %s28638_s17  ;;  %v30063_v62 = vpop.permute.xlu1 %10785  ;;  %v24813_v49 = vld [vmem:[%s28770_s20 + $0xc4] sm:$0x7] }
 0x186   : > { %13329 = vrot.lane.b32.xlu0 %v13322_v37, %s28638_s17  ;;  %9095 = vmatprep.mubr.f32.mxu0 %v28635_v1  ;;  %v30068_v63 = vpop.permute.xlu0 %10537  ;;  %v2536_v2 = vpop.f32.mrb[10].mxu1  ;;  %v13830_v37 = vcombine.high %v24812_v40, %v24812_v40 }
 0x187   : > { %24583 = vmatmul.mubr.msk.f32.vlgmr.msra.gmra.mrb[2].mxu1 %vm589_vm2, %v24577_v3  ;;  %26748 = vmatprep.subr.mxu0 %v28635_v1  ;;  %v2544_v17 = vadd.f32 %v2536_v2, %v2290_v29  ;;  %v26617_v8 = vpop.f32.mrb[11].mxu1  ;;  %v24610_v2 = vld [vmem:[%s34590_s23 + $0x120] sm:$0xff] }
 0x188   : > { %26744 = vmatpush3.msk.msra.mxu1 %vm593_vm1, %v29697_v53  ;;  %26745 = vmatprep.mubr.msk.f32.mxu1 %vm28636_vm0, %v28635_v1  ;;  %v9016_v53 = vsel %vm8505_vm4, %v29718_v11, %v29733_v24  ;;  %v9269_v11 = vsel %vm8505_vm4, %v29756_v41, %v29773_v46  ;;  %v13829_v24 = vcombine.high %v24811_v35, %v24811_v35  ;;  %v24824_v8 = vld [vmem:[%s28770_s20 + $0xd0] sm:$0x77] }
 0x189   : > { %24593 = vmatprep.subr.msk.mxu1 %vm593_vm1, %v9017_v6  ;;  %13581 = vrot.lane.b32.xlu1 %v24800_v28, %s28639_s0  ;;  %v9526_v28 = vsel %vm9522_vm5, %v29833_v32, %v29862_v57 }
 0x18a   : > { %13579 = vrot.lane.b32.xlu0 %v13575_v59, %s28639_s0  ;;  %v2777_v19 = vpop.f32.mrb[10].mxu0  ;;  %v24823_v59 = vld [vmem:[%s28770_s20 + $0xc8] sm:$0x77] }
 0x18b   : > { %26746 = vmatmul.mubr.msk.f32.vlgmr.msra.gmra.mrb[36].mxu1 %vm589_vm2, %v24577_v3  ;;  %v30089_v27 = vpop.permute.xlu1 %10783  ;;  %v30091_v22 = vpop.permute.xlu0 %10787  ;;  %v2785_v33 = vadd.f32 %v2777_v19, %v2544_v17  ;;  %v14083_v6 = vcombine.high %v24823_v59, %v24823_v59 }
 0x18c   : > { %24592 = vmatmul.mubr.msk.f32.vlgmr.msra.gmra.mrb[2].mxu0 %vm589_vm2, %v24589_v21  ;;  %24594 = vmatpush1.msk.msra.mxu1 %vm593_vm1, %v9016_v53  ;;  %v26622_v29 = vpop.f32.mrb[11].mxu0  ;;  %v9780_v53 = vsel %vm9522_vm5, %v29902_v9, %v29893_v42 }
 0x18d   : > { %26749 = vmatpush3.msk.msra.mxu0 %vm593_vm1, %v29760_v51  ;;  %24605 = vmatprep.subr.msk.mxu1 %vm593_vm1, %v9271_v34  ;;  %v9270_v51 = vsel %vm8505_vm4, %v29773_v46, %v29796_v18  ;;  %v9524_v46 = vsel %vm9522_vm5, %v29814_v23, %v29806_v39  ;;  %v24601_v18 = vld [vmem:[%s34590_s23 + $0x118] sm:$0xff]  ;;  %v9779_v29 = vsel %vm9522_vm5, %v29884_v4, %v29902_v9  ;;  %v24622_v9 = vld [vmem:[%s34590_s23 + $0x128] sm:$0xff] }
 0x18e   : > { %24602 = vmatprep.subr.msk.mxu0 %vm593_vm1, %v9269_v11  ;;  %13583 = vrot.lane.b32.xlu1 %v13576_v50, %s28639_s0  ;;  %v9777_v11 = vsel %vm9522_vm5, %v29877_v12, %v29855_v30 }
 0x18f   : > { %13577 = vrot.lane.b32.xlu0 %v24799_v10, %s28639_s0  ;;  %9166 = vmatprep.mubr.f32.mxu1 %v28635_v1  ;;  %v30109_v44 = vpop.permute.xlu1 %10791 }
 0x190   : > { %26750 = vmatprep.mubr.msk.f32.mxu0 %vm28636_vm0, %v28635_v1  ;;  %24595 = vmatmul.mubr.msk.f32.vlgmr.msra.gmra.mrb[2].mxu1 %vm589_vm2, %v24589_v21  ;;  %v30118_v43 = vpop.permute.xlu0 %10789 }
 0x191   : > { %26751 = vmatmul.mubr.msk.f32.vlgmr.msra.gmra.mrb[36].mxu0 %vm589_vm2, %v24589_v21  ;;  %24606 = vmatpush1.msk.msra.mxu1 %vm593_vm1, %v9270_v51  ;;  %v24825_v51 = vld [vmem:[%s28770_s20 + $0xd8] sm:$0x7] }
 0x192   : > { %24603 = vmatpush1.msk.msra.mxu0 %vm593_vm1, %v9268_v47  ;;  %13833 = vrot.lane.b32.xlu1 %v13829_v24, %s28639_s0 }
 0x193   : > { %24611 = vmatprep.subr.msk.mxu0 %vm593_vm1, %v9524_v46  ;;  %13585 = vrot.lane.b32.xlu0 %v24801_v60, %s28639_s0  ;;  %v30135_v41 = vpop.permute.xlu1 %11041  ;;  %v10031_v60 = vsel %vm9522_vm5, %v29944_v36, %v29922_v31  ;;  %v10034_v36 = vsel %vm9522_vm5, %v29936_v38, %v29967_v16 }
 0x194   : > { %9349 = vmatprep.mubr.f32.mxu0 %v28635_v1  ;;  %9420 = vmatprep.mubr.f32.mxu1 %v28635_v1  ;;  %v30140_v25 = vpop.permute.xlu0 %11039 }
 0x195   : > { %24604 = vmatmul.mubr.msk.f32.vlgmr.msra.gmra.mrb[2].mxu0 %vm589_vm2, %v24601_v18  ;;  %26753 = vmatprep.subr.mxu1 %v28635_v1 }
 0x196   : > { %24612 = vmatpush1.msk.msra.mxu0 %vm593_vm1, %v9523_v54  ;;  %13831 = vrot.lane.b32.xlu1 %v24811_v35, %s28639_s0  ;;  %v3018_v3 = vpop.f32.mrb[12].mxu1 }
 0x197   : > { %13835 = vrot.lane.b32.xlu0 %v24812_v40, %s28639_s0  ;;  %9604 = vmatprep.mubr.f32.mxu0 %v28635_v1  ;;  %v30152_v10 = vpop.permute.xlu1 %11043  ;;  %v3026_v45 = vadd.f32 %v3018_v3, %v2785_v33  ;;  %v26627_v23 = vpop.f32.mrb[13].mxu1  ;;  %v24634_v3 = vld [vmem:[%s34590_s23 + $0x130] sm:$0xff] }
 0x198   : > { %24607 = vmatmul.mubr.msk.f32.vlgmr.msra.gmra.mrb[2].mxu1 %vm589_vm2, %v24601_v18  ;;  %26758 = vmatprep.subr.mxu0 %v28635_v1  ;;  %v30156_v48 = vpop.permute.xlu0 %11037  ;;  %v24837_v23 = vld [vmem:[%s28770_s20 + $0xec] sm:$0x7] }
 0x199   : > { %26754 = vmatpush3.msk.msra.mxu1 %vm593_vm1, %v29789_v52  ;;  %26755 = vmatprep.mubr.msk.f32.mxu1 %vm28636_vm0, %v28635_v1  ;;  %v9525_v52 = vsel %vm9522_vm5, %v29806_v39, %v29833_v32  ;;  %v9778_v39 = vsel %vm9522_vm5, %v29855_v30, %v29884_v4  ;;  %v14084_v32 = vcombine.high %v24824_v8, %v24824_v8 }
 0x19a   : > { %24614 = vmatprep.subr.msk.mxu1 %vm593_vm1, %v9526_v28  ;;  %13839 = vrot.lane.b32.xlu1 %v24813_v49, %s28639_s0  ;;  %v10032_v4 = vsel %vm9522_vm5, %v29922_v31, %v29914_v55  ;;  %v24836_v31 = vld [vmem:[%s28770_s20 + $0xe4] sm:$0x77]  ;;  %v10033_v49 = vsel %vm9522_vm5, %v29914_v55, %v29936_v38  ;;  %v10286_v55 = vsel %vm9522_vm5, %v29963_v56, %v29982_v0 }
 0x19b   : > { %13837 = vrot.lane.b32.xlu0 %v13830_v37, %s28639_s0  ;;  %v3259_v17 = vpop.f32.mrb[12].mxu0 }
 0x19c   : > { %26756 = vmatmul.mubr.msk.f32.vlgmr.msra.gmra.mrb[38].mxu1 %vm589_vm2, %v24601_v18  ;;  %v30177_v21 = vpop.permute.xlu1 %11293  ;;  %v30179_v50 = vpop.permute.xlu0 %11045  ;;  %v3267_v19 = vadd.f32 %v3259_v17, %v3026_v45  ;;  %v14338_v45 = vcombine.high %v24836_v31, %v24836_v31 }
 0x19d   : > { %24613 = vmatmul.mubr.msk.f32.vlgmr.msra.gmra.mrb[2].mxu0 %vm589_vm2, %v24610_v2  ;;  %24615 = vmatpush1.msk.msra.mxu1 %vm593_vm1, %v9525_v52  ;;  %v26632_v35 = vpop.f32.mrb[13].mxu0 }
 0x19e   : > { %26759 = vmatpush3.msk.msra.mxu0 %vm593_vm1, %v29862_v57  ;;  %24626 = vmatprep.subr.msk.mxu1 %vm593_vm1, %v9780_v53  ;;  %v24835_v57 = vld [vmem:[%s28770_s20 + $0xdc] sm:$0x77]  ;;  %v10285_v53 = vsel %vm9522_vm5, %v29978_v14, %v29963_v56  ;;  %v10540_v35 = vsel %vm8505_vm4, %v30024_v58, %v30020_v20  ;;  %v24859_v14 = vld [vmem:[%s28770_s20 + $0x104] sm:$0x77] }
 0x19f   : > { %24623 = vmatprep.subr.msk.mxu0 %vm593_vm1, %v9778_v39  ;;  %14089 = vrot.lane.b32.xlu1 %v24824_v8, %s28639_s0  ;;  %v14337_v24 = vcombine.high %v24835_v57, %v24835_v57 }
 0x1a0   : > { %14087 = vrot.lane.b32.xlu0 %v14083_v6, %s28639_s0  ;;  %9675 = vmatprep.mubr.f32.mxu1 %v28635_v1  ;;  %v30196_v33 = vpop.permute.xlu1 %11291  ;;  %v30198_v34 = vpop.permute.xlu0 %11295  ;;  %v24848_v6 = vld [vmem:[%s28770_s20 + $0xf8] sm:$0x77] }
 0x1a1   : > { %26760 = vmatprep.mubr.msk.f32.mxu0 %vm28636_vm0, %v28635_v1  ;;  %24616 = vmatmul.mubr.msk.f32.vlgmr.msra.gmra.mrb[2].mxu1 %vm589_vm2, %v24610_v2 }
 0x1a2   : > { %26761 = vmatmul.mubr.msk.f32.vlgmr.msra.gmra.mrb[38].mxu0 %vm589_vm2, %v24610_v2  ;;  %24627 = vmatpush1.msk.msra.mxu1 %vm593_vm1, %v9779_v29  ;;  %v24847_v2 = vld [vmem:[%s28770_s20 + $0xf0] sm:$0x77]  ;;  %v14845_v29 = vcombine.high %v24859_v14, %v24859_v14 }
 0x1a3   : > { %24624 = vmatpush1.msk.msra.mxu0 %vm593_vm1, %v9777_v11  ;;  %14091 = vrot.lane.b32.xlu1 %v14084_v32, %s28639_s0  ;;  %v10539_v32 = vsel %vm8505_vm4, %v30051_v61, %v30024_v58  ;;  %v24849_v61 = vld [vmem:[%s28770_s20 + $0x100] sm:$0x7] }
 0x1a4   : > { %24635 = vmatprep.subr.msk.mxu0 %vm593_vm1, %v10032_v4  ;;  %14085 = vrot.lane.b32.xlu0 %v24823_v59, %s28639_s0  ;;  %v30222_v30 = vpop.permute.xlu1 %11299  ;;  %v30224_v12 = vpop.permute.xlu0 %11297  ;;  %v10288_v59 = vsel %vm9522_vm5, %v30004_v26, %v29998_v7 }
 0x1a5   : > { %9858 = vmatprep.mubr.f32.mxu0 %v28635_v1  ;;  %9929 = vmatprep.mubr.f32.mxu1 %v28635_v1 }
 0x1a6   : > { %24625 = vmatmul.mubr.msk.f32.vlgmr.msra.gmra.mrb[2].mxu0 %vm589_vm2, %v24622_v9  ;;  %26763 = vmatprep.subr.mxu1 %v28635_v1  ;;  %v3500_v47 = vpop.f32.mrb[14].mxu1 }
 0x1a7   : > { %24636 = vmatpush1.msk.msra.mxu0 %vm593_vm1, %v10031_v60  ;;  %14341 = vrot.lane.b32.xlu1 %v14337_v24, %s28639_s0  ;;  %v3508_v46 = vadd.f32 %v3500_v47, %v3267_v19  ;;  %v26637_v18 = vpop.f32.mrb[15].mxu1  ;;  %v10287_v19 = vsel %vm9522_vm5, %v29982_v0, %v30004_v26  ;;  %v14592_v0 = vcombine.high %v24848_v6, %v24848_v6  ;;  %v24646_v26 = vld [vmem:[%s34590_s23 + $0x138] sm:$0xff] }
 0x1a8   : > { %14093 = vrot.lane.b32.xlu0 %v24825_v51, %s28639_s0  ;;  %10112 = vmatprep.mubr.f32.mxu0 %v28635_v1  ;;  %v30238_v40 = vpop.permute.xlu1 %11549  ;;  %v30240_v54 = vpop.permute.xlu0 %11547  ;;  %v10542_v24 = vsel %vm8505_vm4, %v30046_v5, %v30068_v63  ;;  %v24658_v51 = vld [vmem:[%s34590_s23 + $0x140] sm:$0xff] }
 0x1a9   : > { %24628 = vmatmul.mubr.msk.f32.vlgmr.msra.gmra.mrb[2].mxu1 %vm589_vm2, %v24622_v9  ;;  %26768 = vmatprep.subr.mxu0 %v28635_v1 }
 0x1aa   : > { %26764 = vmatpush3.msk.msra.mxu1 %vm593_vm1, %v29893_v42  ;;  %26765 = vmatprep.mubr.msk.f32.mxu1 %vm28636_vm0, %v28635_v1 }
 0x1ab   : > { %24638 = vmatprep.subr.msk.mxu1 %vm593_vm1, %v10034_v36  ;;  %14339 = vrot.lane.b32.xlu1 %v24835_v57, %s28639_s0  ;;  %v10796_v36 = vsel %vm8505_vm4, %v30118_v43, %v30109_v44 }
 0x1ac   : > { %14343 = vrot.lane.b32.xlu0 %v24836_v31, %s28639_s0  ;;  %v30258_v37 = vpop.permute.xlu1 %11551  ;;  %v30260_v42 = vpop.permute.xlu0 %11545 }
 0x1ad   : > { %26766 = vmatmul.mubr.msk.f32.vlgmr.msra.gmra.mrb[40].mxu1 %vm589_vm2, %v24622_v9  ;;  %v3754_v28 = vpop.f32.mrb[14].mxu0 }
 0x1ae   : > { %24637 = vmatmul.mubr.msk.f32.vlgmr.msra.gmra.mrb[2].mxu0 %vm589_vm2, %v24634_v3  ;;  %24639 = vmatpush1.msk.msra.mxu1 %vm593_vm1, %v10033_v49  ;;  %v3762_v17 = vadd.f32 %v3754_v28, %v3508_v46  ;;  %v26642_v52 = vpop.f32.mrb[15].mxu0  ;;  %v10541_v46 = vsel %vm8505_vm4, %v30020_v20, %v30046_v5  ;;  %v10794_v20 = vsel %vm8505_vm4, %v30063_v62, %v30091_v22  ;;  %v24871_v28 = vld [vmem:[%s28770_s20 + $0x118] sm:$0x77] }
 0x1af   : > { %26769 = vmatpush3.msk.msra.mxu0 %vm593_vm1, %v29967_v16  ;;  %24650 = vmatprep.subr.msk.mxu1 %vm593_vm1, %v10288_v59  ;;  %v14591_v16 = vcombine.high %v24847_v2, %v24847_v2  ;;  %v10793_v59 = vsel %vm8505_vm4, %v30089_v27, %v30063_v62  ;;  %v24872_v62 = vld [vmem:[%s28770_s20 + $0x120] sm:$0x77]  ;;  %v15099_v27 = vcombine.high %v24871_v28, %v24871_v28 }
 0x1b0   : > { %24647 = vmatprep.subr.msk.mxu0 %vm593_vm1, %v10286_v55  ;;  %14347 = vrot.lane.b32.xlu1 %v24837_v23, %s28639_s0  ;;  %v30281_v38 = vpop.permute.xlu1 %11801  ;;  %v30283_v8 = vpop.permute.xlu0 %11553  ;;  %v10795_v23 = vsel %vm8505_vm4, %v30091_v22, %v30118_v43  ;;  %v11048_v22 = vsel %vm8505_vm4, %v30140_v25, %v30135_v41  ;;  %v24670_v43 = vld [vmem:[%s34590_s23 + $0x148] sm:$0xff]  ;;  %v11047_v52 = vsel %vm8505_vm4, %v30156_v48, %v30140_v25 }
 0x1b1   : > { %14345 = vrot.lane.b32.xlu0 %v14338_v45, %s28639_s0  ;;  %10183 = vmatprep.mubr.f32.mxu1 %v28635_v1  ;;  %v24883_v25 = vld [vmem:[%s28770_s20 + $0x12c] sm:$0x77]  ;;  %v11050_v48 = vsel %vm8505_vm4, %v30152_v10, %v30179_v50 }
 0x1b2   : > { %26770 = vmatprep.mubr.msk.f32.mxu0 %vm28636_vm0, %v28635_v1  ;;  %24640 = vmatmul.mubr.msk.f32.vlgmr.msra.gmra.mrb[2].mxu1 %vm589_vm2, %v24634_v3 }
 0x1b3   : > { %26771 = vmatmul.mubr.msk.f32.vlgmr.msra.gmra.mrb[40].mxu0 %vm589_vm2, %v24634_v3  ;;  %24651 = vmatpush1.msk.msra.mxu1 %vm593_vm1, %v10287_v19  ;;  %v24860_v3 = vld [vmem:[%s28770_s20 + $0x10c] sm:$0x77] }
 0x1b4   : > { %24648 = vmatpush1.msk.msra.mxu0 %vm593_vm1, %v10285_v53  ;;  %14597 = vrot.lane.b32.xlu1 %v24848_v6, %s28638_s17  ;;  %v30307_v39 = vpop.permute.xlu1 %11799  ;;  %v30309_v56 = vpop.permute.xlu0 %11803  ;;  %v14846_v45 = vcombine.high %v24860_v3, %v24860_v3 }
 0x1b5   : > { %24659 = vmatprep.subr.msk.mxu0 %vm593_vm1, %v10540_v35  ;;  %14595 = vrot.lane.b32.xlu0 %v14591_v16, %s28638_s17  ;;  %v15100_v16 = vcombine.high %v24872_v62, %v24872_v62 }
 0x1b6   : > { %10366 = vmatprep.mubr.f32.mxu0 %v28635_v1  ;;  %10437 = vmatprep.mubr.f32.mxu1 %v28635_v1 }
 0x1b7   : > { %24649 = vmatmul.mubr.msk.f32.vlgmr.msra.gmra.mrb[2].mxu0 %vm589_vm2, %v24646_v26  ;;  %26773 = vmatprep.subr.mxu1 %v28635_v1  ;;  %v4008_v57 = vpop.f32.mrb[16].mxu1 }
 0x1b8   : > { %24660 = vmatpush1.msk.msra.mxu0 %vm593_vm1, %v10539_v32  ;;  %14599 = vrot.lane.b32.xlu1 %v14592_v0, %s28638_s17  ;;  %v30323_v11 = vpop.permute.xlu1 %11807  ;;  %v30325_v4 = vpop.permute.xlu0 %11805  ;;  %v4016_v9 = vadd.f32 %v4008_v57, %v3762_v17  ;;  %v24682_v0 = vld [vmem:[%s34590_s23 + $0x150] sm:$0xff] }
 0x1b9   : > { %14593 = vrot.lane.b32.xlu0 %v24847_v2, %s28638_s17  ;;  %10620 = vmatprep.mubr.f32.mxu0 %v28635_v1  ;;  %v26647_v58 = vpop.f32.mrb[17].mxu1 }
 0x1ba   : > { %24652 = vmatmul.mubr.msk.f32.vlgmr.msra.gmra.mrb[2].mxu1 %vm589_vm2, %v24646_v26  ;;  %26778 = vmatprep.subr.mxu0 %v28635_v1  ;;  %v11304_v58 = vsel %vm8505_vm4, %v30224_v12, %v30222_v30 }
 0x1bb   : > { %26774 = vmatpush3.msk.msra.mxu1 %vm593_vm1, %v29998_v7  ;;  %26775 = vmatprep.mubr.msk.f32.mxu1 %vm28636_vm0, %v28635_v1 }
 0x1bc   : > { %24662 = vmatprep.subr.msk.mxu1 %vm593_vm1, %v10542_v24  ;;  %14849 = vrot.lane.b32.xlu1 %v14845_v29, %s28638_s17  ;;  %v30344_v60 = vpop.permute.xlu1 %12057  ;;  %v30346_v47 = vpop.permute.xlu0 %12055  ;;  %v11302_v24 = vsel %vm8505_vm4, %v30177_v21, %v30198_v34 }
 0x1bd   : > { %14601 = vrot.lane.b32.xlu0 %v24849_v61, %s28638_s17  ;;  %v4262_v7 = vpop.f32.mrb[16].mxu0  ;;  %v24873_v61 = vld [vmem:[%s28770_s20 + $0x128] sm:$0x7] }
 0x1be   : > { %26776 = vmatmul.mubr.msk.f32.vlgmr.msra.gmra.mrb[42].mxu1 %vm589_vm2, %v24646_v26  ;;  %v4270_v18 = vadd.f32 %v4262_v7, %v4016_v9  ;;  %v26652_v31 = vpop.f32.mrb[17].mxu0  ;;  %v11049_v9 = vsel %vm8505_vm4, %v30135_v41, %v30152_v10  ;;  %v11301_v7 = vsel %vm8505_vm4, %v30196_v33, %v30177_v21  ;;  %v24885_v33 = vld [vmem:[%s28770_s20 + $0x13c] sm:$0x7] }
 0x1bf   : > { %24661 = vmatmul.mubr.msk.f32.vlgmr.msra.gmra.mrb[2].mxu0 %vm589_vm2, %v24658_v51  ;;  %24663 = vmatpush1.msk.msra.mxu1 %vm593_vm1, %v10541_v46  ;;  %v24895_v31 = vld [vmem:[%s28770_s20 + $0xf0] sm:$0x77] }
 0x1c0   : > { %26779 = vmatpush3.msk.msra.mxu0 %vm593_vm1, %v30068_v63  ;;  %24674 = vmatprep.subr.msk.mxu1 %vm593_vm1, %v10796_v36  ;;  %v30365_v5 = vpop.permute.xlu1 %12059  ;;  %v24861_v63 = vld [vmem:[%s28770_s20 + $0x114] sm:$0x7] }
 0x1c1   : > { %24671 = vmatprep.subr.msk.mxu0 %vm593_vm1, %v10794_v20  ;;  %14847 = vrot.lane.b32.xlu1 %v24859_v14, %s28638_s17  ;;  %v30369_v49 = vpop.permute.xlu0 %12053 }
 0x1c2   : > { %14851 = vrot.lane.b32.xlu0 %v24860_v3, %s28638_s17  ;;  %10691 = vmatprep.mubr.f32.mxu1 %v28635_v1  ;;  %v11555_v3 = vsel %vm9522_vm5, %v30260_v42, %v30240_v54 }
 0x1c3   : > { %26780 = vmatprep.mubr.msk.f32.mxu0 %vm28636_vm0, %v28635_v1  ;;  %24664 = vmatmul.mubr.msk.f32.vlgmr.msra.gmra.mrb[2].mxu1 %vm589_vm2, %v24658_v51 }
 0x1c4   : > { %26781 = vmatmul.mubr.msk.f32.vlgmr.msra.gmra.mrb[42].mxu0 %vm589_vm2, %v24658_v51  ;;  %24675 = vmatpush1.msk.msra.mxu1 %vm593_vm1, %v10795_v23  ;;  %v30386_v2 = vpop.permute.xlu1 %12309  ;;  %v24884_v51 = vld [vmem:[%s28770_s20 + $0x134] sm:$0x77] }
 0x1c5   : > { %24672 = vmatpush1.msk.msra.mxu0 %vm593_vm1, %v10793_v59  ;;  %14855 = vrot.lane.b32.xlu1 %v24861_v63, %s28638_s17  ;;  %v30396_v17 = vpop.permute.xlu0 %12061  ;;  %v15354_v21 = vcombine.high %v24884_v51, %v24884_v51  ;;  %v15607_v59 = vcombine.high %v24895_v31, %v24895_v31 }
 0x1c6   : > { %24683 = vmatprep.subr.msk.mxu0 %vm593_vm1, %v11048_v22  ;;  %14853 = vrot.lane.b32.xlu0 %v14846_v45, %s28638_s17  ;;  %v24706_v22 = vld [vmem:[%s34590_s23 + $0x160] sm:$0xff] }
 0x1c7   : > { %10874 = vmatprep.mubr.f32.mxu0 %v28635_v1  ;;  %10945 = vmatprep.mubr.f32.mxu1 %v28635_v1 }
 0x1c8   : > { %24673 = vmatmul.mubr.msk.f32.vlgmr.msra.gmra.mrb[2].mxu0 %vm589_vm2, %v24670_v43  ;;  %26783 = vmatprep.subr.mxu1 %v28635_v1  ;;  %v30408_v55 = vpop.permute.xlu1 %12307  ;;  %v4516_v6 = vpop.f32.mrb[18].mxu1 }
 0x1c9   : > { %24684 = vmatpush1.msk.msra.mxu0 %vm593_vm1, %v11047_v52  ;;  %15105 = vrot.lane.b32.xlu1 %v24872_v62, %s28638_s17  ;;  %v30412_v19 = vpop.permute.xlu0 %12311  ;;  %v4524_v53 = vadd.f32 %v4516_v6, %v4270_v18  ;;  %v26657_v35 = vpop.f32.mrb[19].mxu1  ;;  %v11557_v6 = vsel %vm9522_vm5, %v30238_v40, %v30258_v37 }
 0x1ca   : > { %15103 = vrot.lane.b32.xlu0 %v15099_v27, %s28638_s17  ;;  %11128 = vmatprep.mubr.f32.mxu0 %v28635_v1  ;;  %v11810_v35 = vsel %vm9522_vm5, %v30281_v38, %v30309_v56 }
 0x1cb   : > { %24676 = vmatmul.mubr.msk.f32.vlgmr.msra.gmra.mrb[2].mxu1 %vm589_vm2, %v24670_v43  ;;  %26788 = vmatprep.subr.mxu0 %v28635_v1 }
 0x1cc   : > { %26784 = vmatpush3.msk.msra.mxu1 %vm593_vm1, %v30109_v44  ;;  %26785 = vmatprep.mubr.msk.f32.mxu1 %vm28636_vm0, %v28635_v1  ;;  %v15353_v44 = vcombine.high %v24883_v25, %v24883_v25 }
 0x1cd   : > { %24686 = vmatprep.subr.msk.mxu1 %vm593_vm1, %v11050_v48  ;;  %15107 = vrot.lane.b32.xlu1 %v15100_v16, %s28638_s17  ;;  %v30431_v26 = vpop.permute.xlu1 %12315  ;;  %v4757_v14 = vpop.f32.mrb[18].mxu0  ;;  %v24907_v16 = vld [vmem:[%s28770_s20 + $0x104] sm:$0x77]  ;;  %v24897_v48 = vld [vmem:[%s28770_s20 + $0x100] sm:$0x7] }
 0x1ce   : > { %15101 = vrot.lane.b32.xlu0 %v24871_v28, %s28638_s17  ;;  %v30434_v32 = vpop.permute.xlu0 %12313  ;;  %v4765_v57 = vadd.f32 %v4757_v14, %v4524_v53  ;;  %v26662_v29 = vpop.f32.mrb[19].mxu0  ;;  %v24896_v28 = vld [vmem:[%s28770_s20 + $0xf8] sm:$0x77]  ;;  %v11812_v53 = vsel %vm9522_vm5, %v30325_v4, %v30323_v11 }
 0x1cf   : > { %26786 = vmatmul.mubr.msk.f32.vlgmr.msra.gmra.mrb[44].mxu1 %vm589_vm2, %v24670_v43  ;;  %v15608_v27 = vcombine.high %v24896_v28, %v24896_v28 }
 0x1d0   : > { %24685 = vmatmul.mubr.msk.f32.vlgmr.msra.gmra.mrb[2].mxu0 %vm589_vm2, %v24682_v0  ;;  %24687 = vmatpush1.msk.msra.mxu1 %vm593_vm1, %v11049_v9 }
 0x1d1   : > { %26789 = vmatpush3.msk.msra.mxu0 %vm593_vm1, %v30179_v50  ;;  %24698 = vmatprep.subr.msk.mxu1 %vm593_vm1, %v11304_v58  ;;  %v30452_v41 = vpop.permute.xlu1 %12565  ;;  %v11303_v50 = vsel %vm8505_vm4, %v30198_v34, %v30224_v12  ;;  %v11556_v34 = vsel %vm9522_vm5, %v30240_v54, %v30238_v40  ;;  %v24694_v12 = vld [vmem:[%s34590_s23 + $0x158] sm:$0xff]  ;;  %v11558_v54 = vsel %vm9522_vm5, %v30258_v37, %v30283_v8 }
 0x1d2   : > { %24695 = vmatprep.subr.msk.mxu0 %vm593_vm1, %v11302_v24  ;;  %15357 = vrot.lane.b32.xlu1 %v15353_v44, %s28638_s17  ;;  %v30456_v10 = vpop.permute.xlu0 %12563  ;;  %v15861_v37 = vcombine.high %v24907_v16, %v24907_v16 }
 0x1d3   : > { %15109 = vrot.lane.b32.xlu0 %v24873_v61, %s28638_s17  ;;  %11199 = vmatprep.mubr.f32.mxu1 %v28635_v1 }
 0x1d4   : > { %26790 = vmatprep.mubr.msk.f32.mxu0 %vm28636_vm0, %v28635_v1  ;;  %24688 = vmatmul.mubr.msk.f32.vlgmr.msra.gmra.mrb[2].mxu1 %vm589_vm2, %v24682_v0 }
 0x1d5   : > { %26791 = vmatmul.mubr.msk.f32.vlgmr.msra.gmra.mrb[44].mxu0 %vm589_vm2, %v24682_v0  ;;  %24699 = vmatpush1.msk.msra.mxu1 %vm593_vm1, %v11303_v50  ;;  %v30472_v46 = vpop.permute.xlu1 %12567  ;;  %v11809_v0 = vsel %vm9522_vm5, %v30307_v39, %v30281_v38  ;;  %v24908_v38 = vld [vmem:[%s28770_s20 + $0x10c] sm:$0x77]  ;;  %v24909_v50 = vld [vmem:[%s28770_s20 + $0x114] sm:$0x7] }
 0x1d6   : > { %24696 = vmatpush1.msk.msra.mxu0 %vm593_vm1, %v11301_v7  ;;  %15355 = vrot.lane.b32.xlu1 %v24883_v25, %s28638_s17  ;;  %v30482_v18 = vpop.permute.xlu0 %12561  ;;  %v15862_v24 = vcombine.high %v24908_v38, %v24908_v38  ;;  %v24730_v7 = vld [vmem:[%s34590_s23 + $0x170] sm:$0xff] }
 0x1d7   : > { %24707 = vmatprep.subr.msk.mxu0 %vm593_vm1, %v11556_v34  ;;  %15359 = vrot.lane.b32.xlu0 %v24884_v51, %s28638_s17 }
 0x1d8   : > { %11382 = vmatprep.mubr.f32.mxu0 %v28635_v1  ;;  %11453 = vmatprep.mubr.f32.mxu1 %v28635_v1  ;;  %v4998_v36 = vpop.f32.mrb[20].mxu1 }
 0x1d9   : > { %24697 = vmatmul.mubr.msk.f32.vlgmr.msra.gmra.mrb[2].mxu0 %vm589_vm2, %v24694_v12  ;;  %26793 = vmatprep.subr.mxu1 %v28635_v1  ;;  %v30495_v20 = vpop.permute.xlu1 %12817  ;;  %v5006_v45 = vadd.f32 %v4998_v36, %v4765_v57  ;;  %v26667_v63 = vpop.f32.mrb[21].mxu1  ;;  %v12063_v57 = vsel %vm9522_vm5, %v30369_v49, %v30346_v47  ;;  %v24919_v49 = vld [vmem:[%s28770_s20 + $0x118] sm:$0x77] }
 0x1da   : > { %24708 = vmatpush1.msk.msra.mxu0 %vm593_vm1, %v11555_v3  ;;  %15363 = vrot.lane.b32.xlu1 %v24885_v33, %s28638_s17  ;;  %v30499_v23 = vpop.permute.xlu0 %12569  ;;  %v12065_v33 = vsel %vm9522_vm5, %v30344_v60, %v30365_v5  ;;  %v16115_v36 = vcombine.high %v24919_v49, %v24919_v49  ;;  %v12320_v3 = vsel %vm9522_vm5, %v30434_v32, %v30431_v26 }
 0x1db   : > { %15361 = vrot.lane.b32.xlu0 %v15354_v21, %s28638_s17  ;;  %11636 = vmatprep.mubr.f32.mxu0 %v28635_v1 }
 0x1dc   : > { %24700 = vmatmul.mubr.msk.f32.vlgmr.msra.gmra.mrb[2].mxu1 %vm589_vm2, %v24694_v12  ;;  %26798 = vmatprep.subr.mxu0 %v28635_v1 }
 0x1dd   : > { %26794 = vmatpush3.msk.msra.mxu1 %vm593_vm1, %v30222_v30  ;;  %26795 = vmatprep.mubr.msk.f32.mxu1 %vm28636_vm0, %v28635_v1  ;;  %v5239_v42 = vpop.f32.mrb[20].mxu0 }
 0x1de   : > { %24710 = vmatprep.subr.msk.mxu1 %vm593_vm1, %v11558_v54  ;;  %15613 = vrot.lane.b32.xlu1 %v24896_v28, %s28639_s0  ;;  %v30518_v43 = vpop.permute.xlu1 %12815  ;;  %v5247_v62 = vadd.f32 %v5239_v42, %v5006_v45  ;;  %v26672_v30 = vpop.f32.mrb[21].mxu0  ;;  %v12319_v28 = vsel %vm9522_vm5, %v30412_v19, %v30434_v32  ;;  %v24742_v32 = vld [vmem:[%s34590_s23 + $0x178] sm:$0xff] }
 0x1df   : > { %15611 = vrot.lane.b32.xlu0 %v15607_v59, %s28639_s0  ;;  %v30521_v52 = vpop.permute.xlu0 %12819  ;;  %v12317_v59 = vsel %vm9522_vm5, %v30408_v55, %v30386_v2  ;;  %v24921_v55 = vld [vmem:[%s28770_s20 + $0x128] sm:$0x7] }
 0x1e0   : > { %26796 = vmatmul.mubr.msk.f32.vlgmr.msra.gmra.mrb[46].mxu1 %vm589_vm2, %v24694_v12 }
 0x1e1   : > { %24709 = vmatmul.mubr.msk.f32.vlgmr.msra.gmra.mrb[2].mxu0 %vm589_vm2, %v24706_v22  ;;  %24711 = vmatpush1.msk.msra.mxu1 %vm593_vm1, %v11557_v6 }
 0x1e2   : > { %26799 = vmatpush3.msk.msra.mxu0 %vm593_vm1, %v30283_v8  ;;  %24722 = vmatprep.subr.msk.mxu1 %vm593_vm1, %v11812_v53  ;;  %v30539_v40 = vpop.permute.xlu1 %12823  ;;  %v11811_v8 = vsel %vm9522_vm5, %v30309_v56, %v30325_v4  ;;  %v12064_v56 = vsel %vm9522_vm5, %v30346_v47, %v30344_v60  ;;  %v24718_v4 = vld [vmem:[%s34590_s23 + $0x168] sm:$0xff]  ;;  %v12066_v47 = vsel %vm9522_vm5, %v30365_v5, %v30396_v17 }
 0x1e3   : > { %24719 = vmatprep.subr.msk.mxu0 %vm593_vm1, %v11810_v35  ;;  %15615 = vrot.lane.b32.xlu1 %v15608_v27, %s28639_s0  ;;  %v30543_v25 = vpop.permute.xlu0 %12821  ;;  %v12318_v60 = vsel %vm9522_vm5, %v30386_v2, %v30412_v19  ;;  %v12572_v19 = vsel %vm8505_vm4, %v30456_v10, %v30452_v41  ;;  %v24754_v35 = vld [vmem:[%s34590_s23 + $0x180] sm:$0xff] }
 0x1e4   : > { %15609 = vrot.lane.b32.xlu0 %v24895_v31, %s28639_s0  ;;  %11707 = vmatprep.mubr.f32.mxu1 %v28635_v1  ;;  %v24920_v31 = vld [vmem:[%s28770_s20 + $0x120] sm:$0x77] }
 0x1e5   : > { %26800 = vmatprep.mubr.msk.f32.mxu0 %vm28636_vm0, %v28635_v1  ;;  %24712 = vmatmul.mubr.msk.f32.vlgmr.msra.gmra.mrb[2].mxu1 %vm589_vm2, %v24706_v22  ;;  %v16116_v45 = vcombine.high %v24920_v31, %v24920_v31 }
 0x1e6   : > { %26801 = vmatmul.mubr.msk.f32.vlgmr.msra.gmra.mrb[46].mxu0 %vm589_vm2, %v24706_v22  ;;  %24723 = vmatpush1.msk.msra.mxu1 %vm593_vm1, %v11811_v8  ;;  %v30559_v14 = vpop.permute.xlu1 %13073 }
 0x1e7   : > { %24720 = vmatpush1.msk.msra.mxu0 %vm593_vm1, %v11809_v0  ;;  %15865 = vrot.lane.b32.xlu1 %v15861_v37, %s28639_s0  ;;  %v30569_v44 = vpop.permute.xlu0 %13071  ;;  %v12573_v0 = vsel %vm8505_vm4, %v30452_v41, %v30472_v46 }
 0x1e8   : > { %24731 = vmatprep.subr.msk.mxu0 %vm593_vm1, %v12064_v56  ;;  %15617 = vrot.lane.b32.xlu0 %v24897_v48, %s28639_s0 }
 0x1e9   : > { %11890 = vmatprep.mubr.f32.mxu0 %v28635_v1  ;;  %11961 = vmatprep.mubr.f32.mxu1 %v28635_v1  ;;  %v5480_v39 = vpop.f32.mrb[22].mxu1 }
 0x1ea   : > { %24721 = vmatmul.mubr.msk.f32.vlgmr.msra.gmra.mrb[2].mxu0 %vm589_vm2, %v24718_v4  ;;  %26803 = vmatprep.subr.mxu1 %v28635_v1  ;;  %v30581_v29 = vpop.permute.xlu1 %13075  ;;  %v5488_v9 = vadd.f32 %v5480_v39, %v5247_v62  ;;  %v26677_v58 = vpop.f32.mrb[23].mxu1  ;;  %v12571_v62 = vsel %vm8505_vm4, %v30482_v18, %v30456_v10  ;;  %v24932_v10 = vld [vmem:[%s28770_s20 + $0x134] sm:$0x77]  ;;  %v12574_v18 = vsel %vm8505_vm4, %v30472_v46, %v30499_v23 }
 0x1eb   : > { %24732 = vmatpush1.msk.msra.mxu0 %vm593_vm1, %v12063_v57  ;;  %15863 = vrot.lane.b32.xlu1 %v24907_v16, %s28639_s0  ;;  %v30585_v61 = vpop.permute.xlu0 %13069  ;;  %v16370_v56 = vcombine.high %v24932_v10, %v24932_v10  ;;  %v12826_v39 = vsel %vm8505_vm4, %v30495_v20, %v30521_v52  ;;  %v12825_v57 = vsel %vm8505_vm4, %v30518_v43, %v30495_v20 }
 0x1ec   : > { %15867 = vrot.lane.b32.xlu0 %v24908_v38, %s28639_s0  ;;  %12144 = vmatprep.mubr.f32.mxu0 %v28635_v1  ;;  %v12828_v38 = vsel %vm8505_vm4, %v30543_v25, %v30539_v40  ;;  %v13079_v43 = vsel %vm8505_vm4, %v30585_v61, %v30569_v44 }
 0x1ed   : > { %24724 = vmatmul.mubr.msk.f32.vlgmr.msra.gmra.mrb[2].mxu1 %vm589_vm2, %v24718_v4  ;;  %26808 = vmatprep.subr.mxu0 %v28635_v1 }
 0x1ee   : > { %26804 = vmatpush3.msk.msra.mxu1 %vm593_vm1, %v30323_v11  ;;  %26805 = vmatprep.mubr.msk.f32.mxu1 %vm28636_vm0, %v28635_v1  ;;  %v5734_v51 = vpop.f32.mrb[22].mxu0 }
 0x1ef   : > { %24734 = vmatprep.subr.msk.mxu1 %vm593_vm1, %v12066_v47  ;;  %15871 = vrot.lane.b32.xlu1 %v24909_v50, %s28639_s0  ;;  %v30605_v34 = vpop.permute.xlu1 %13325  ;;  %v5742_v11 = vadd.f32 %v5734_v51, %v5488_v9  ;;  %v26682_v12 = vpop.f32.mrb[23].mxu0 }
 0x1f0   : > { %15869 = vrot.lane.b32.xlu0 %v15862_v24, %s28639_s0  ;;  %v30608_v21 = vpop.permute.xlu0 %13077 }
 0x1f1   : > { %26806 = vmatmul.mubr.msk.f32.vlgmr.msra.gmra.mrb[48].mxu1 %vm589_vm2, %v24718_v4  ;;  %v24933_v4 = vld [vmem:[%s28770_s20 + $0x13c] sm:$0x7] }
 0x1f2   : > { %24733 = vmatmul.mubr.msk.f32.vlgmr.msra.gmra.mrb[2].mxu0 %vm589_vm2, %v24730_v7  ;;  %24735 = vmatpush1.msk.msra.mxu1 %vm593_vm1, %v12065_v33 }
 0x1f3   : > { %26809 = vmatpush3.msk.msra.mxu0 %vm593_vm1, %v30396_v17  ;;  %24746 = vmatprep.subr.msk.mxu1 %vm593_vm1, %v12320_v3  ;;  %v30626_v5 = vpop.permute.xlu1 %13323  ;;  %v24931_v17 = vld [vmem:[%s28770_s20 + $0x12c] sm:$0x77]  ;;  %s34591_s20 = sld [smem:[#allocation5_spill]] }
 0x1f4   : > { %24743 = vmatprep.subr.msk.mxu0 %vm593_vm1, %v12318_v60  ;;  %16121 = vrot.lane.b32.xlu1 %v24920_v31, %s28639_s0  ;;  %v30630_v63 = vpop.permute.xlu0 %13327  ;;  %v16369_v42 = vcombine.high %v24931_v17, %v24931_v17 }
 0x1f5   : > { %16119 = vrot.lane.b32.xlu0 %v16115_v36, %s28639_s0  ;;  %12215 = vmatprep.mubr.f32.mxu1 %v28635_v1  ;;  %v13334_v36 = vsel %vm8505_vm4, %v30605_v34, %v30630_v63 }
 0x1f6   : > { %26810 = vmatprep.mubr.msk.f32.mxu0 %vm28636_vm0, %v28635_v1  ;;  %24736 = vmatmul.mubr.msk.f32.vlgmr.msra.gmra.mrb[2].mxu1 %vm589_vm2, %v24730_v7 }
 0x1f7   : > { %26811 = vmatmul.mubr.msk.f32.vlgmr.msra.gmra.mrb[48].mxu0 %vm589_vm2, %v24730_v7  ;;  %24747 = vmatpush1.msk.msra.mxu1 %vm593_vm1, %v12319_v28  ;;  %v30646_v54 = vpop.permute.xlu1 %13331 }
 0x1f8   : > { %24744 = vmatpush1.msk.msra.mxu0 %vm593_vm1, %v12317_v59  ;;  %16123 = vrot.lane.b32.xlu1 %v16116_v45, %s28639_s0  ;;  %v30656_v2 = vpop.permute.xlu0 %13329  ;;  %v24790_v45 = vld [vmem:[%s34590_s23 + $0x198] sm:$0xff] }
 0x1f9   : > { %24755 = vmatprep.subr.msk.mxu0 %vm593_vm1, %v12572_v19  ;;  %16117 = vrot.lane.b32.xlu0 %v24919_v49, %s28639_s0  ;;  %v13336_v31 = vsel %vm8505_vm4, %v30656_v2, %v30646_v54  ;;  %v13335_v3 = vsel %vm8505_vm4, %v30630_v63, %v30656_v2 }
 0x1fa   : > { %12398 = vmatprep.mubr.f32.mxu0 %v28635_v1  ;;  %12469 = vmatprep.mubr.f32.mxu1 %v28635_v1  ;;  %v5988_v22 = vpop.f32.mrb[24].mxu1 }
 0x1fb   : > { %24745 = vmatmul.mubr.msk.f32.vlgmr.msra.gmra.mrb[2].mxu0 %vm589_vm2, %v24742_v32  ;;  %26813 = vmatprep.subr.mxu1 %v28635_v1  ;;  %v30668_v30 = vpop.permute.xlu1 %13581  ;;  %v5996_v27 = vadd.f32 %v5988_v22, %v5742_v11  ;;  %v26687_v6 = vpop.f32.mrb[25].mxu1  ;;  %v24778_v11 = vld [vmem:[%s34590_s23 + $0x190] sm:$0xff] }
 0x1fc   : > { %24756 = vmatpush1.msk.msra.mxu0 %vm593_vm1, %v12571_v62  ;;  %16373 = vrot.lane.b32.xlu1 %v16369_v42, %s28639_s0  ;;  %v30672_v16 = vpop.permute.xlu0 %13579 }
 0x1fd   : > { %16125 = vrot.lane.b32.xlu0 %v24921_v55, %s28639_s0  ;;  %12652 = vmatprep.mubr.f32.mxu0 %v28635_v1  ;;  %v13588_v60 = vsel %vm9522_vm5, %v30672_v16, %v30668_v30  ;;  %v24802_v55 = vld [vmem:[%s34590_s23 + $0x1a0] sm:$0xff] }
 0x1fe   : > { %24748 = vmatmul.mubr.msk.f32.vlgmr.msra.gmra.mrb[2].mxu1 %vm589_vm2, %v24742_v32  ;;  %26818 = vmatprep.subr.mxu0 %v28635_v1 }
 0x1ff   : > { %26814 = vmatpush3.msk.msra.mxu1 %vm593_vm1, %v30431_v26  ;;  %26815 = vmatprep.mubr.msk.f32.mxu1 %vm28636_vm0, %v28635_v1  ;;  %v6242_v53 = vpop.f32.mrb[24].mxu0 }
 0x200   : > { %24758 = vmatprep.subr.msk.mxu1 %vm593_vm1, %v12574_v18  ;;  %16371 = vrot.lane.b32.xlu1 %v24931_v17, %s28639_s0  ;;  %v30691_v37 = vpop.permute.xlu1 %13583  ;;  %v6250_v8 = vadd.f32 %v6242_v53, %v5996_v27  ;;  %v26692_v26 = vpop.f32.mrb[25].mxu0 }
 0x201   : > { %16375 = vrot.lane.b32.xlu0 %v24932_v10, %s28639_s0  ;;  %v30694_v48 = vpop.permute.xlu0 %13577 }
 0x202   : > { %26816 = vmatmul.mubr.msk.f32.vlgmr.msra.gmra.mrb[50].mxu1 %vm589_vm2, %v24742_v32  ;;  %v13587_v17 = vsel %vm9522_vm5, %v30694_v48, %v30672_v16 }
 0x203   : > { %24757 = vmatmul.mubr.msk.f32.vlgmr.msra.gmra.mrb[2].mxu0 %vm589_vm2, %v24754_v35  ;;  %24759 = vmatpush1.msk.msra.mxu1 %vm593_vm1, %v12573_v0 }
 0x204   : > { %26819 = vmatpush3.msk.msra.mxu0 %vm593_vm1, %v30499_v23  ;;  %24770 = vmatprep.subr.msk.mxu1 %vm593_vm1, %v12828_v38  ;;  %v30712_v41 = vpop.permute.xlu1 %13833  ;;  %v12827_v23 = vsel %vm8505_vm4, %v30521_v52, %v30543_v25  ;;  %v13080_v52 = vsel %vm8505_vm4, %v30569_v44, %v30559_v14  ;;  %v24766_v25 = vld [vmem:[%s34590_s23 + $0x188] sm:$0xff]  ;;  %v13082_v44 = vsel %vm8505_vm4, %v30581_v29, %v30608_v21 }
 0x205   : > { %24767 = vmatprep.subr.msk.mxu0 %vm593_vm1, %v12826_v39  ;;  %16379 = vrot.lane.b32.xlu1 %v24933_v4, %s28639_s0  ;;  %v30716_v46 = vpop.permute.xlu0 %13585 }
 0x206   : > { %16377 = vrot.lane.b32.xlu0 %v16370_v56, %s28639_s0  ;;  %12723 = vmatprep.mubr.f32.mxu1 %v28635_v1  ;;  %v13590_v42 = vsel %vm9522_vm5, %v30691_v37, %v30716_v46 }
 0x207   : > { %26820 = vmatprep.mubr.msk.f32.mxu0 %vm28636_vm0, %v28635_v1  ;;  %24760 = vmatmul.mubr.msk.f32.vlgmr.msra.gmra.mrb[2].mxu1 %vm589_vm2, %v24754_v35 }
 0x208   : > { %26821 = vmatmul.mubr.msk.f32.vlgmr.msra.gmra.mrb[50].mxu0 %vm589_vm2, %v24754_v35  ;;  %24771 = vmatpush1.msk.msra.mxu1 %vm593_vm1, %v12827_v23  ;;  %v30731_v9 = vpop.permute.xlu1 %13831  ;;  %v24826_v23 = vld [vmem:[%s34590_s23 + $0x1b0] sm:$0xff] }
 0x209   : > { %24768 = vmatpush1.msk.msra.mxu0 %vm593_vm1, %v12825_v57  ;;  %12906 = vmatprep.mubr.f32.mxu0 %v28635_v1  ;;  %v30741_v58 = vpop.permute.xlu0 %13835  ;;  %v13841_v35 = vsel %vm9522_vm5, %v30731_v9, %v30712_v41 }
 0x20a   : > { %24779 = vmatprep.subr.msk.mxu0 %vm593_vm1, %v13080_v52  ;;  %12977 = vmatprep.mubr.f32.mxu1 %v28635_v1  ;;  %v13842_v10 = vsel %vm9522_vm5, %v30712_v41, %v30741_v58 }
 0x20b   : > { %26823 = vmatprep.subr.mxu1 %v28635_v1  ;;  %v6496_v20 = vpop.f32.mrb[26].mxu1 }
 0x20c   : > { %24769 = vmatmul.mubr.msk.f32.vlgmr.msra.gmra.mrb[2].mxu0 %vm589_vm2, %v24766_v25  ;;  %v30750_v24 = vpop.permute.xlu1 %13839  ;;  %v6504_v50 = vadd.f32 %v6496_v20, %v6250_v8  ;;  %v26697_v47 = vpop.f32.mrb[27].mxu1  ;;  %v24814_v8 = vld [vmem:[%s34590_s23 + $0x1a8] sm:$0xff] }
 0x20d   : > { %24780 = vmatpush1.msk.msra.mxu0 %vm593_vm1, %v13079_v43  ;;  %13160 = vmatprep.mubr.f32.mxu0 %v28635_v1  ;;  %v30754_v49 = vpop.permute.xlu0 %13837 }
 0x20e   : > { %26828 = vmatprep.subr.mxu0 %v28635_v1  ;;  %v13844_v16 = vsel %vm9522_vm5, %v30754_v49, %v30750_v24  ;;  %v13843_v18 = vsel %vm9522_vm5, %v30741_v58, %v30754_v49 }
 0x20f   : > { %24772 = vmatmul.mubr.msk.f32.vlgmr.msra.gmra.mrb[2].mxu1 %vm589_vm2, %v24766_v25  ;;  %v6737_v51 = vpop.f32.mrb[26].mxu0 }
 0x210   : > { %26824 = vmatpush3.msk.msra.mxu1 %vm593_vm1, %v30539_v40  ;;  %26825 = vmatprep.mubr.msk.f32.mxu1 %vm28636_vm0, %v28635_v1  ;;  %v6745_v61 = vadd.f32 %v6737_v51, %v6504_v50  ;;  %v26702_v7 = vpop.f32.mrb[27].mxu0  ;;  %v13081_v40 = vsel %vm8505_vm4, %v30559_v14, %v30581_v29 }
 0x211   : > { %24782 = vmatprep.subr.msk.mxu1 %vm593_vm1, %v13082_v44  ;;  %v30769_v12 = vpop.permute.xlu1 %14089 }
 0x212   : > { %v30771_v33 = vpop.permute.xlu0 %14087 }
 0x213   : > { %26826 = vmatmul.mubr.msk.f32.vlgmr.msra.gmra.mrb[52].mxu1 %vm589_vm2, %v24766_v25 }
 0x214   : > { %24781 = vmatmul.mubr.msk.f32.vlgmr.msra.gmra.mrb[2].mxu0 %vm589_vm2, %v24778_v11  ;;  %24783 = vmatpush1.msk.msra.mxu1 %vm593_vm1, %v13081_v40 }
 0x215   : > { %26829 = vmatpush3.msk.msra.mxu0 %vm593_vm1, %v30608_v21  ;;  %24794 = vmatprep.subr.msk.mxu1 %vm593_vm1, %v13336_v31  ;;  %v30788_v14 = vpop.permute.xlu1 %14091  ;;  %v13333_v21 = vsel %vm8505_vm4, %v30626_v5, %v30605_v34 }
 0x216   : > { %24791 = vmatprep.subr.msk.mxu0 %vm593_vm1, %v13334_v36  ;;  %13231 = vmatprep.mubr.f32.mxu1 %v28635_v1  ;;  %v30792_v29 = vpop.permute.xlu0 %14085  ;;  %v14097_v25 = vsel %vm9522_vm5, %v30769_v12, %v30788_v14 }
 0x217   : > { %26830 = vmatprep.mubr.msk.f32.mxu0 %vm28636_vm0, %v28635_v1  ;;  %24784 = vmatmul.mubr.msk.f32.vlgmr.msra.gmra.mrb[2].mxu1 %vm589_vm2, %v24778_v11  ;;  %v14095_v56 = vsel %vm9522_vm5, %v30792_v29, %v30771_v33 }
 0x218   : > { %26831 = vmatmul.mubr.msk.f32.vlgmr.msra.gmra.mrb[52].mxu0 %vm589_vm2, %v24778_v11  ;;  %24795 = vmatpush1.msk.msra.mxu1 %vm593_vm1, %v13335_v3  ;;  %v24850_v3 = vld [vmem:[%s34590_s23 + $0x1c0] sm:$0xff] }
 0x219   : > { %24792 = vmatpush1.msk.msra.mxu0 %vm593_vm1, %v13333_v21  ;;  %13414 = vmatprep.mubr.f32.mxu0 %v28635_v1  ;;  %v30813_v63 = vpop.permute.xlu1 %14341 }
 0x21a   : > { %24803 = vmatprep.subr.msk.mxu0 %vm593_vm1, %v13588_v60  ;;  %13485 = vmatprep.mubr.f32.mxu1 %v28635_v1  ;;  %v30817_v34 = vpop.permute.xlu0 %14093 }
 0x21b   : > { %26833 = vmatprep.subr.mxu1 %v28635_v1  ;;  %v6978_v5 = vpop.f32.mrb[28].mxu1 }
 0x21c   : > { %24793 = vmatmul.mubr.msk.f32.vlgmr.msra.gmra.mrb[2].mxu0 %vm589_vm2, %v24790_v45  ;;  %v6986_v28 = vadd.f32 %v6978_v5, %v6745_v61  ;;  %v26707_v59 = vpop.f32.mrb[29].mxu1  ;;  %v24838_v61 = vld [vmem:[%s34590_s23 + $0x1b8] sm:$0xff] }
 0x21d   : > { %24804 = vmatpush1.msk.msra.mxu0 %vm593_vm1, %v13587_v17  ;;  %13668 = vmatprep.mubr.f32.mxu0 %v28635_v1  ;;  %v30826_v19 = vpop.permute.xlu1 %14339 }
 0x21e   : > { %26838 = vmatprep.subr.mxu0 %v28635_v1  ;;  %v30829_v32 = vpop.permute.xlu0 %14343  ;;  %v14349_v49 = vsel %vm9522_vm5, %v30826_v19, %v30813_v63 }
 0x21f   : > { %24796 = vmatmul.mubr.msk.f32.vlgmr.msra.gmra.mrb[2].mxu1 %vm589_vm2, %v24790_v45 }
 0x220   : > { %26834 = vmatpush3.msk.msra.mxu1 %vm593_vm1, %v30646_v54  ;;  %26835 = vmatprep.mubr.msk.f32.mxu1 %vm28636_vm0, %v28635_v1  ;;  %v7219_v2 = vpop.f32.mrb[28].mxu0  ;;  %v13589_v54 = vsel %vm9522_vm5, %v30668_v30, %v30691_v37  ;;  %v14096_v37 = vsel %vm9522_vm5, %v30771_v33, %v30769_v12 }
 0x221   : > { %24806 = vmatprep.subr.msk.mxu1 %vm593_vm1, %v13590_v42  ;;  %v7227_v22 = vadd.f32 %v7219_v2, %v6986_v28  ;;  %v26712_v62 = vpop.f32.mrb[29].mxu0  ;;  %v24862_v2 = vld [vmem:[%s34590_s23 + $0x1c8] sm:$0xff] }
 0x222   : > { %v30843_v27 = vpop.permute.xlu1 %14347 }
 0x223   : > { %26836 = vmatmul.mubr.msk.f32.vlgmr.msra.gmra.mrb[54].mxu1 %vm589_vm2, %v24790_v45  ;;  %v14346_v6 = vpop.permute.xlu0 %14345 }
 0x224   : > { %24805 = vmatmul.mubr.msk.f32.vlgmr.msra.gmra.mrb[2].mxu0 %vm589_vm2, %v24802_v55  ;;  %24807 = vmatpush1.msk.msra.mxu1 %vm593_vm1, %v13589_v54  ;;  %v14352_v20 = vsel %vm9522_vm5, %v14346_v6, %v30843_v27  ;;  %v14351_v50 = vsel %vm9522_vm5, %v30829_v32, %v14346_v6  ;;  %v28640_v54 = vmov 0  }
 0x225   : > { %26839 = vmatpush3.msk.msra.mxu0 %vm593_vm1, %v30716_v46  ;;  %24818 = vmatprep.subr.msk.mxu1 %vm593_vm1, %v13844_v16  ;;  %v14098_v46 = vsel %vm9522_vm5, %v30788_v14, %v30817_v34 }
 0x226   : > { %24815 = vmatprep.subr.msk.mxu0 %vm593_vm1, %v13842_v10  ;;  %13739 = vmatprep.mubr.f32.mxu1 %v28635_v1  ;;  %v30862_v30 = vpop.permute.xlu1 %14597 }
 0x227   : > { %26840 = vmatprep.mubr.msk.f32.mxu0 %vm28636_vm0, %v28635_v1  ;;  %24808 = vmatmul.mubr.msk.f32.vlgmr.msra.gmra.mrb[2].mxu1 %vm589_vm2, %v24802_v55  ;;  %v14596_v53 = vpop.permute.xlu0 %14595 }
 0x228   : > { %26841 = vmatmul.mubr.msk.f32.vlgmr.msra.gmra.mrb[54].mxu0 %vm589_vm2, %v24802_v55  ;;  %24819 = vmatpush1.msk.msra.mxu1 %vm593_vm1, %v13843_v18  ;;  %v14604_v44 = vsel %vm8505_vm4, %v14596_v53, %v30862_v30 }
 0x229   : > { %24816 = vmatpush1.msk.msra.mxu0 %vm593_vm1, %v13841_v35  ;;  %13922 = vmatprep.mubr.f32.mxu0 %v28635_v1  ;;  %v24874_v35 = vld [vmem:[%s34590_s23 + $0x1d0] sm:$0xff] }
 0x22a   : > { %24827 = vmatprep.subr.msk.mxu0 %vm593_vm1, %v14096_v37  ;;  %13993 = vmatprep.mubr.f32.mxu1 %v28635_v1  ;;  %v30885_v26 = vpop.permute.xlu1 %14599 }
 0x22b   : > { %26843 = vmatprep.subr.mxu1 %v28635_v1  ;;  %v14594_v48 = vpop.permute.xlu0 %14593  ;;  %v7460_v0 = vpop.f32.mrb[30].mxu1  ;;  %v14605_v60 = vsel %vm8505_vm4, %v30862_v30, %v30885_v26  ;;  %28431 = vset.pattern.permute.xlu0 %v28640_v54 }
 0x22c   : > { %24817 = vmatmul.mubr.msk.f32.vlgmr.msra.gmra.mrb[2].mxu0 %vm589_vm2, %v24814_v8  ;;  %v7468_v4 = vadd.f32 %v7460_v0, %v7227_v22  ;;  %v26717_v38 = vpop.f32.mrb[31].mxu1  ;;  %v14603_v11 = vsel %vm8505_vm4, %v14594_v48, %v14596_v53  ;;  %v16615_v22 = vld [vmem:[%s34591_s20] sm:$0xff]  ;;  %28432 = vset.pattern.permute.xlu1 %v28640_v54  ;;  %s28645_s20 = smov 80  }
 0x22d   : > { %24828 = vmatpush1.msk.msra.mxu0 %vm593_vm1, %v14095_v56  ;;  %14176 = vmatprep.mubr.f32.mxu0 %v28635_v1 }
 0x22e   : > { %26848 = vmatprep.subr.mxu0 %v28635_v1  ;;  %v30895_v39 = vpop.permute.xlu1 %14849  ;;  %16618 = vperm.xlu0 %28431, %v16615_v22  }
 0x22f   : > { %24820 = vmatmul.mubr.msk.f32.vlgmr.msra.gmra.mrb[2].mxu1 %vm589_vm2, %v24814_v8  ;;  %v30898_v41 = vpop.permute.xlu0 %14601 }
 0x230   : > { %26844 = vmatpush3.msk.msra.mxu1 %vm593_vm1, %v30750_v24  ;;  %26845 = vmatprep.mubr.msk.f32.mxu1 %vm28636_vm0, %v28635_v1  ;;  %v14350_v24 = vsel %vm9522_vm5, %v30813_v63, %v30829_v32  ;;  %v14606_v14 = vsel %vm8505_vm4, %v30885_v26, %v30898_v41 }
 0x231   : > { %24830 = vmatprep.subr.msk.mxu1 %vm593_vm1, %v14098_v46  ;;  %v7714_v57 = vpop.f32.mrb[30].mxu0 }
 0x232   : > { %v7722_v9 = vadd.f32 %v7714_v57, %v7468_v4  ;;  %v26722_v52 = vpop.f32.mrb[31].mxu0  ;;  %v24886_v57 = vld [vmem:[%s34590_s23 + $0x1d8] sm:$0xff] }
 0x233   : > { %26846 = vmatmul.mubr.msk.f32.vlgmr.msra.gmra.mrb[56].mxu1 %vm589_vm2, %v24814_v8  ;;  %v14848_v58 = vpop.permute.xlu1 %14847 }
 0x234   : > { %24829 = vmatmul.mubr.msk.f32.vlgmr.msra.gmra.mrb[2].mxu0 %vm589_vm2, %v24826_v23  ;;  %24831 = vmatpush1.msk.msra.mxu1 %vm593_vm1, %v14097_v25  ;;  %v14852_v43 = vpop.permute.xlu0 %14851  ;;  %v14857_v19 = vsel %vm8505_vm4, %v14848_v58, %v30895_v39 }
 0x235   : > { %26849 = vmatpush3.msk.msra.mxu0 %vm593_vm1, %v30817_v34  ;;  %24842 = vmatprep.subr.msk.mxu1 %vm593_vm1, %v14352_v20  ;;  %v14858_v17 = vsel %vm8505_vm4, %v30895_v39, %v14852_v43 }
 0x236   : > { %24839 = vmatprep.subr.msk.mxu0 %vm593_vm1, %v14350_v24  ;;  %14247 = vmatprep.mubr.f32.mxu1 %v28635_v1 }
 0x237   : > { %26850 = vmatprep.mubr.msk.f32.mxu0 %vm28636_vm0, %v28635_v1  ;;  %24832 = vmatmul.mubr.msk.f32.vlgmr.msra.gmra.mrb[2].mxu1 %vm589_vm2, %v24826_v23  ;;  %v30932_v47 = vpop.permute.xlu1 %14855 }
 0x238   : > { %26851 = vmatmul.mubr.msk.f32.vlgmr.msra.gmra.mrb[56].mxu0 %vm589_vm2, %v24826_v23  ;;  %24843 = vmatpush1.msk.msra.mxu1 %vm593_vm1, %v14351_v50  ;;  %v14854_v51 = vpop.permute.xlu0 %14853 }
 0x239   : > { %24840 = vmatpush1.msk.msra.mxu0 %vm593_vm1, %v14349_v49  ;;  %14430 = vmatprep.mubr.f32.mxu0 %v28635_v1  ;;  %v14860_v34 = vsel %vm8505_vm4, %v14854_v51, %v30932_v47  ;;  %v14859_v59 = vsel %vm8505_vm4, %v14852_v43, %v14854_v51  ;;  %v24898_v49 = vld [vmem:[%s34590_s23 + $0x1e0] sm:$0xff] }
 0x23a   : > { %24851 = vmatprep.subr.msk.mxu0 %vm593_vm1, %v14604_v44  ;;  %14501 = vmatprep.mubr.f32.mxu1 %v28635_v1 }
 0x23b   : > { %26853 = vmatprep.subr.mxu1 %v28635_v1  ;;  %v30949_v7 = vpop.permute.xlu1 %15105 }
 0x23c   : > { %24841 = vmatmul.mubr.msk.f32.vlgmr.msra.gmra.mrb[2].mxu0 %vm589_vm2, %v24838_v61  ;;  %v15104_v12 = vpop.permute.xlu0 %15103  ;;  %v7968_v33 = vpop.f32.mrb[32].mxu1 }
 0x23d   : > { %24852 = vmatpush1.msk.msra.mxu0 %vm593_vm1, %v14603_v11  ;;  %14684 = vmatprep.mubr.f32.mxu0 %v28635_v1  ;;  %v7976_v40 = vadd.f32 %v7968_v33, %v7722_v9  ;;  %v26727_v31 = vpop.f32.mrb[33].mxu1  ;;  %v15112_v42 = vsel %vm8505_vm4, %v15104_v12, %v30949_v7 }
 0x23e   : > { %26858 = vmatprep.subr.mxu0 %v28635_v1 }
 0x23f   : > { %24844 = vmatmul.mubr.msk.f32.vlgmr.msra.gmra.mrb[2].mxu1 %vm589_vm2, %v24838_v61  ;;  %v15108_v36 = vpop.permute.xlu1 %15107 }
 0x240   : > { %26854 = vmatpush3.msk.msra.mxu1 %vm593_vm1, %v30843_v27  ;;  %26855 = vmatprep.mubr.msk.f32.mxu1 %vm28636_vm0, %v28635_v1  ;;  %v15102_v29 = vpop.permute.xlu0 %15101  ;;  %v15113_v8 = vsel %vm8505_vm4, %v30949_v7, %v15108_v36 }
 0x241   : > { %24854 = vmatprep.subr.msk.mxu1 %vm593_vm1, %v14606_v14  ;;  %v15111_v62 = vsel %vm8505_vm4, %v15102_v29, %v15104_v12 }
 0x242   : > { %v8222_v21 = vpop.f32.mrb[32].mxu0 }
 0x243   : > { %26856 = vmatmul.mubr.msk.f32.vlgmr.msra.gmra.mrb[58].mxu1 %vm589_vm2, %v24838_v61  ;;  %v8230_v45 = vadd.f32 %v8222_v21, %v7976_v40  ;;  %v26732_v63 = vpop.f32.mrb[33].mxu0  ;;  %v24910_v21 = vld [vmem:[%s34590_s23 + $0x1e8] sm:$0xff] }
 0x244   : > { %24853 = vmatmul.mubr.msk.f32.vlgmr.msra.gmra.mrb[2].mxu0 %vm589_vm2, %v24850_v3  ;;  %24855 = vmatpush1.msk.msra.mxu1 %vm593_vm1, %v14605_v60  ;;  %v30976_v5 = vpop.permute.xlu1 %15357 }
 0x245   : > { %26859 = vmatpush3.msk.msra.mxu0 %vm593_vm1, %v30898_v41  ;;  %24866 = vmatprep.subr.msk.mxu1 %vm593_vm1, %v14860_v34  ;;  %v15110_v28 = vpop.permute.xlu0 %15109 }
 0x246   : > { %24863 = vmatprep.subr.msk.mxu0 %vm593_vm1, %v14858_v17  ;;  %14755 = vmatprep.mubr.f32.mxu1 %v28635_v1  ;;  %v15114_v18 = vsel %vm8505_vm4, %v15108_v36, %v15110_v28 }
 0x247   : > { %26860 = vmatprep.mubr.msk.f32.mxu0 %vm28636_vm0, %v28635_v1  ;;  %24856 = vmatmul.mubr.msk.f32.vlgmr.msra.gmra.mrb[2].mxu1 %vm589_vm2, %v24850_v3 }
 0x248   : > { %26861 = vmatmul.mubr.msk.f32.vlgmr.msra.gmra.mrb[58].mxu0 %vm589_vm2, %v24850_v3  ;;  %24867 = vmatpush1.msk.msra.mxu1 %vm593_vm1, %v14859_v59  ;;  %v15356_v32 = vpop.permute.xlu1 %15355 }
 0x249   : > { %24864 = vmatpush1.msk.msra.mxu0 %vm593_vm1, %v14857_v19  ;;  %14938 = vmatprep.mubr.f32.mxu0 %v28635_v1  ;;  %v15360_v55 = vpop.permute.xlu0 %15359  ;;  %v15365_v23 = vsel %vm8505_vm4, %v15356_v32, %v30976_v5  ;;  %v24922_v32 = vld [vmem:[%s34590_s23 + $0x1f0] sm:$0xff] }
 0x24a   : > { %24875 = vmatprep.subr.msk.mxu0 %vm593_vm1, %v15112_v42  ;;  %15009 = vmatprep.mubr.f32.mxu1 %v28635_v1  ;;  %v15366_v4 = vsel %vm8505_vm4, %v30976_v5, %v15360_v55 }
 0x24b   : > { %26863 = vmatprep.subr.mxu1 %v28635_v1 }
 0x24c   : > { %24865 = vmatmul.mubr.msk.f32.vlgmr.msra.gmra.mrb[2].mxu0 %vm589_vm2, %v24862_v2  ;;  %v31008_v27 = vpop.permute.xlu1 %15363 }
 0x24d   : > { %24876 = vmatpush1.msk.msra.mxu0 %vm593_vm1, %v15111_v62  ;;  %v15362_v6 = vpop.permute.xlu0 %15361  ;;  %15192 = vmatprep.mubr.f32.mxu0 %v28635_v1  ;;  %v8476_v16 = vpop.f32.mrb[34].mxu1 }
 0x24e   : > { %26868 = vmatprep.subr.mxu0 %v28635_v1  ;;  %v8484_v10 = vadd.f32 %v8476_v16, %v8230_v45  ;;  %v26737_v30 = vpop.f32.mrb[35].mxu1  ;;  %v15368_v48 = vsel %vm8505_vm4, %v15362_v6, %v31008_v27  ;;  %v15367_v41 = vsel %vm8505_vm4, %v15360_v55, %v15362_v6 }
 0x24f   : > { %24868 = vmatmul.mubr.msk.f32.vlgmr.msra.gmra.mrb[2].mxu1 %vm589_vm2, %v24862_v2 }
 0x250   : > { %26864 = vmatpush3.msk.msra.mxu1 %vm593_vm1, %v30932_v47  ;;  %26865 = vmatprep.mubr.msk.f32.mxu1 %vm28636_vm0, %v28635_v1  ;;  %v15614_v53 = vpop.permute.xlu1 %15613 }
 0x251   : > { %24878 = vmatprep.subr.msk.mxu1 %vm593_vm1, %v15114_v18  ;;  %v15612_v37 = vpop.permute.xlu0 %15611 }
 0x252   : > { %v15620_v46 = vsel %vm9522_vm5, %v15612_v37, %v15614_v53 }
 0x253   : > { %26866 = vmatmul.mubr.msk.f32.vlgmr.msra.gmra.mrb[60].mxu1 %vm589_vm2, %v24862_v2  ;;  %v8731_v26 = vpop.f32.mrb[34].mxu0 }
 0x254   : > { %24877 = vmatmul.mubr.msk.f32.vlgmr.msra.gmra.mrb[2].mxu0 %vm589_vm2, %v24874_v35  ;;  %24879 = vmatpush1.msk.msra.mxu1 %vm593_vm1, %v15113_v8  ;;  %v8739_v0 = vadd.f32 %v8731_v26, %v8484_v10  ;;  %v26742_v56 = vpop.f32.mrb[35].mxu0 }
 0x255   : > { %26869 = vmatpush3.msk.msra.mxu0 %vm593_vm1, %v15110_v28  ;;  %15263 = vmatprep.mubr.f32.mxu1 %v28635_v1  ;;  %v15616_v38 = vpop.permute.xlu1 %15615 }
 0x256   : > { %24887 = vmatprep.subr.msk.mxu0 %vm593_vm1, %v15366_v4  ;;  %26870 = vmatprep.mubr.msk.f32.mxu0 %vm28636_vm0, %v28635_v1  ;;  %v15610_v39 = vpop.permute.xlu0 %15609  ;;  %v15621_v61 = vsel %vm9522_vm5, %v15614_v53, %v15616_v38  ;;  %v24934_v53 = vld [vmem:[%s34590_s23 + $0x1f8] sm:$0xff] }
 0x257   : > { %24890 = vmatprep.subr.msk.mxu1 %vm593_vm1, %v15368_v48  ;;  %24880 = vmatmul.mubr.msk.f32.vlgmr.msra.gmra.mrb[2].mxu1 %vm589_vm2, %v24874_v35  ;;  %v15619_v25 = vsel %vm9522_vm5, %v15610_v39, %v15612_v37 }
 0x258   : > { %26871 = vmatmul.mubr.msk.f32.vlgmr.msra.gmra.mrb[60].mxu0 %vm589_vm2, %v24874_v35  ;;  %24891 = vmatpush1.msk.msra.mxu1 %vm593_vm1, %v15367_v41 }
 0x259   : > { %24888 = vmatpush1.msk.msra.mxu0 %vm593_vm1, %v15365_v23  ;;  %15446 = vmatprep.mubr.f32.mxu0 %v28635_v1  ;;  %v15866_v9 = vpop.permute.xlu1 %15865 }
 0x25a   : > { %24899 = vmatprep.subr.msk.mxu0 %vm593_vm1, %v15620_v46  ;;  %v15618_v52 = vpop.permute.xlu0 %15617  ;;  %15517 = vmatprep.mubr.f32.mxu1 %v28635_v1 }
 0x25b   : > { %26873 = vmatprep.subr.mxu1 %v28635_v1  ;;  %v15622_v47 = vsel %vm9522_vm5, %v15616_v38, %v15618_v52 }
 0x25c   : > { %24889 = vmatmul.mubr.msk.f32.vlgmr.msra.gmra.mrb[2].mxu0 %vm589_vm2, %v24886_v57 }
 0x25d   : > { %24900 = vmatpush1.msk.msra.mxu0 %vm593_vm1, %v15619_v25  ;;  %v15864_v58 = vpop.permute.xlu1 %15863  ;;  %15700 = vmatprep.mubr.f32.mxu0 %v28635_v1 }
 0x25e   : > { %v15868_v20 = vpop.permute.xlu0 %15867  ;;  %26878 = vmatprep.subr.mxu0 %v28635_v1  ;;  %v8985_v43 = vpop.f32.mrb[36].mxu1  ;;  %v15873_v29 = vsel %vm9522_vm5, %v15864_v58, %v15866_v9 }
 0x25f   : > { %24892 = vmatmul.mubr.msk.f32.vlgmr.msra.gmra.mrb[2].mxu1 %vm589_vm2, %v24886_v57  ;;  %v8993_v24 = vadd.f32 %v8985_v43, %v8739_v0  ;;  %v26747_v50 = vpop.f32.mrb[37].mxu1  ;;  %v15874_v12 = vsel %vm9522_vm5, %v15866_v9, %v15868_v20 }
 0x260   : > { %26874 = vmatpush3.msk.msra.mxu1 %vm593_vm1, %v31008_v27  ;;  %26875 = vmatprep.mubr.msk.f32.mxu1 %vm28636_vm0, %v28635_v1 }
 0x261   : > { %24902 = vmatprep.subr.msk.mxu1 %vm593_vm1, %v15622_v47  ;;  %v15872_v51 = vpop.permute.xlu1 %15871 }
 0x262   : > { %v15870_v44 = vpop.permute.xlu0 %15869 }
 0x263   : > { %26876 = vmatmul.mubr.msk.f32.vlgmr.msra.gmra.mrb[62].mxu1 %vm589_vm2, %v24886_v57  ;;  %v15876_v7 = vsel %vm9522_vm5, %v15870_v44, %v15872_v51  ;;  %v15875_v36 = vsel %vm9522_vm5, %v15868_v20, %v15870_v44 }
 0x264   : > { %24901 = vmatmul.mubr.msk.f32.vlgmr.msra.gmra.mrb[2].mxu0 %vm589_vm2, %v24898_v49  ;;  %24903 = vmatpush1.msk.msra.mxu1 %vm593_vm1, %v15621_v61  ;;  %v9239_v11 = vpop.f32.mrb[36].mxu0 }
 0x265   : > { %26879 = vmatpush3.msk.msra.mxu0 %vm593_vm1, %v15618_v52  ;;  %15771 = vmatprep.mubr.f32.mxu1 %v28635_v1  ;;  %v9247_v33 = vadd.f32 %v9239_v11, %v8993_v24  ;;  %v26752_v40 = vpop.f32.mrb[37].mxu0 }
 0x266   : > { %24911 = vmatprep.subr.msk.mxu0 %vm593_vm1, %v15874_v12  ;;  %26880 = vmatprep.mubr.msk.f32.mxu0 %vm28636_vm0, %v28635_v1  ;;  %v16122_v31 = vpop.permute.xlu1 %16121 }
 0x267   : > { %24914 = vmatprep.subr.msk.mxu1 %vm593_vm1, %v15876_v7  ;;  %24904 = vmatmul.mubr.msk.f32.vlgmr.msra.gmra.mrb[2].mxu1 %vm589_vm2, %v24898_v49  ;;  %v16120_v14 = vpop.permute.xlu0 %16119 }
 0x268   : > { %26881 = vmatmul.mubr.msk.f32.vlgmr.msra.gmra.mrb[62].mxu0 %vm589_vm2, %v24898_v49  ;;  %24915 = vmatpush1.msk.msra.mxu1 %vm593_vm1, %v15875_v36  ;;  %v16128_v3 = vsel %vm9522_vm5, %v16120_v14, %v16122_v31 }
 0x269   : > { %24912 = vmatpush1.msk.msra.mxu0 %vm593_vm1, %v15873_v29  ;;  %15954 = vmatprep.mubr.f32.mxu0 %v28635_v1 }
 0x26a   : > { %v16124_v60 = vpop.permute.xlu1 %16123  ;;  %24923 = vmatprep.subr.msk.mxu0 %vm593_vm1, %v16128_v3  ;;  %16025 = vmatprep.mubr.f32.mxu1 %v28635_v1 }
 0x26b   : > { %v16118_v45 = vpop.permute.xlu0 %16117  ;;  %26883 = vmatprep.subr.mxu1 %v28635_v1  ;;  %v16129_v2 = vsel %vm9522_vm5, %v16122_v31, %v16124_v60 }
 0x26c   : > { %24913 = vmatmul.mubr.msk.f32.vlgmr.msra.gmra.mrb[2].mxu0 %vm589_vm2, %v24910_v21  ;;  %v16127_v63 = vsel %vm9522_vm5, %v16118_v45, %v16120_v14 }
 0x26d   : > { %24924 = vmatpush1.msk.msra.mxu0 %vm593_vm1, %v16127_v63  ;;  %16208 = vmatprep.mubr.f32.mxu0 %v28635_v1 }
 0x26e   : > { %v16374_v34 = vpop.permute.xlu1 %16373  ;;  %26888 = vmatprep.subr.mxu0 %v28635_v1 }
 0x26f   : > { %24916 = vmatmul.mubr.msk.f32.vlgmr.msra.gmra.mrb[2].mxu1 %vm589_vm2, %v24910_v21  ;;  %v16126_v5 = vpop.permute.xlu0 %16125  ;;  %v9493_v17 = vpop.f32.mrb[38].mxu1 }
 0x270   : > { %26884 = vmatpush3.msk.msra.mxu1 %vm593_vm1, %v15872_v51  ;;  %v16130_v28 = vsel %vm9522_vm5, %v16124_v60, %v16126_v5  ;;  %26885 = vmatprep.mubr.msk.f32.mxu1 %vm28636_vm0, %v28635_v1  ;;  %v9501_v59 = vadd.f32 %v9493_v17, %v9247_v33  ;;  %v26757_v19 = vpop.f32.mrb[39].mxu1 }
 0x271   : > { %24926 = vmatprep.subr.msk.mxu1 %vm593_vm1, %v16130_v28 }
 0x272   : > { %v16372_v42 = vpop.permute.xlu1 %16371 }
 0x273   : > { %26886 = vmatmul.mubr.msk.f32.vlgmr.msra.gmra.mrb[64].mxu1 %vm589_vm2, %v24910_v21  ;;  %v16376_v55 = vpop.permute.xlu0 %16375  ;;  %v16381_v27 = vsel %vm9522_vm5, %v16372_v42, %v16374_v34 }
 0x274   : > { %24925 = vmatmul.mubr.msk.f32.vlgmr.msra.gmra.mrb[2].mxu0 %vm589_vm2, %v24922_v32  ;;  %24927 = vmatpush1.msk.msra.mxu1 %vm593_vm1, %v16129_v2  ;;  %v16382_v22 = vsel %vm9522_vm5, %v16374_v34, %v16376_v55 }
 0x275   : > { %16279 = vmatprep.mubr.f32.mxu1 %v28635_v1  ;;  %26889 = vmatpush3.msk.msra.mxu0 %vm593_vm1, %v16126_v5  ;;  %v9748_v62 = vpop.f32.mrb[38].mxu0 }
 0x276   : > { %26890 = vmatprep.mubr.msk.f32.mxu0 %vm28636_vm0, %v28635_v1  ;;  %24935 = vmatprep.subr.msk.mxu0 %vm593_vm1, %v16382_v22  ;;  %v9756_v54 = vadd.f32 %v9748_v62, %v9501_v59  ;;  %v26762_v6 = vpop.f32.mrb[39].mxu0 }
 0x277   : > { %24928 = vmatmul.mubr.msk.f32.vlgmr.msra.gmra.mrb[2].mxu1 %vm589_vm2, %v24922_v32  ;;  %v16380_v16 = vpop.permute.xlu1 %16379 }
 0x278   : > { %26891 = vmatmul.mubr.msk.f32.vlgmr.msra.gmra.mrb[64].mxu0 %vm589_vm2, %v24922_v32  ;;  %v16378_v10 = vpop.permute.xlu0 %16377  ;;  %16533 = vmatprep.mubr.f32.mxu1 %v28635_v1 }
 0x279   : > { %v16383_v30 = vsel %vm9522_vm5, %v16376_v55, %v16378_v10  ;;  %v16384_v18 = vsel %vm9522_vm5, %v16378_v10, %v16380_v16  ;;  %24936 = vmatpush1.msk.msra.mxu0 %vm593_vm1, %v16381_v27  ;;  %16462 = vmatprep.mubr.f32.mxu0 %v28635_v1 }
 0x27a   : > { %24938 = vmatprep.subr.msk.mxu1 %vm593_vm1, %v16384_v18 }
 0x27b   : > { %24939 = vmatpush1.msk.msra.mxu1 %vm593_vm1, %v16383_v30 }
 0x27c   : > { %24937 = vmatmul.mubr.msk.f32.vlgmr.msra.gmra.mrb[2].mxu0 %vm589_vm2, %v24934_v53  ;;  %26893 = vmatprep.subr.mxu1 %v28635_v1 }
 0x27d   : > { %16891 = vmatprep.mubr.f32.mxu0 %v28635_v1 }
 0x27f   : > { %24940 = vmatmul.mubr.msk.f32.vlgmr.msra.gmra.mrb[2].mxu1 %vm589_vm2, %v24934_v53 }
 0x280   : > { %26894 = vmatpush3.msk.msra.mxu1 %vm593_vm1, %v16380_v16  ;;  %26895 = vmatprep.mubr.msk.f32.mxu1 %vm28636_vm0, %v28635_v1  ;;  %v10002_v35 = vpop.f32.mrb[40].mxu1  ;;  %vm19053_vm1 = vcmask 449536  }
 0x281   : > { %v10010_v37 = vadd.f32 %v10002_v35, %v9756_v54  ;;  %v26767_v8 = vpop.f32.mrb[41].mxu1 }
 0x283   : > { %26896 = vmatmul.mubr.msk.f32.vlgmr.msra.gmra.mrb[66].mxu1 %vm589_vm2, %v24934_v53  ;;  %vm19243_vm2 = vcmask 441344  }
 0x284   : > { %16731 = vmatprep.mubr.f32.mxu1 %v28635_v1 }
 0x286   : > { %v10256_v26 = vpop.f32.mrb[40].mxu0 }
 0x287   : > { %v10264_v48 = vadd.f32 %v10256_v26, %v10010_v37  ;;  %v26772_v0 = vpop.f32.mrb[41].mxu0 }
 0x291   : > { %v10510_v56 = vpop.f32.mrb[42].mxu1 }
 0x292   : > { %v10518_v4 = vadd.f32 %v10510_v56, %v10264_v48  ;;  %v26777_v38 = vpop.f32.mrb[43].mxu1 }
 0x297   : > { %v10764_v39 = vpop.f32.mrb[42].mxu0 }
 0x298   : > { %v10772_v41 = vadd.f32 %v10764_v39, %v10518_v4  ;;  %v26782_v46 = vpop.f32.mrb[43].mxu0 }
 0x2a2   : > { %v11018_v23 = vpop.f32.mrb[44].mxu1 }
 0x2a3   : > { %v11026_v57 = vadd.f32 %v11018_v23, %v10772_v41  ;;  %v26787_v9 = vpop.f32.mrb[45].mxu1 }
 0x2a8   : > { %v11272_v52 = vpop.f32.mrb[44].mxu0 }
 0x2a9   : > { %v11280_v25 = vadd.f32 %v11272_v52, %v11026_v57  ;;  %v26792_v58 = vpop.f32.mrb[45].mxu0 }
 0x2b3   : > { %v11526_v20 = vpop.f32.mrb[46].mxu1 }
 0x2b4   : > { %v11534_v43 = vadd.f32 %v11526_v20, %v11280_v25  ;;  %v26797_v24 = vpop.f32.mrb[47].mxu1  ;;  %v31140_v20 = vpop.permute.xlu0 %16618 }
 0x2b9   : > { %v11780_v50 = vpop.f32.mrb[46].mxu0 }
 0x2ba   : > { %v11788_v47 = vadd.f32 %v11780_v50, %v11534_v43  ;;  %v26802_v49 = vpop.f32.mrb[47].mxu0 }
 0x2c4   : > { %v12034_v51 = vpop.f32.mrb[48].mxu1 }
 0x2c5   : > { %v12042_v44 = vadd.f32 %v12034_v51, %v11788_v47  ;;  %v26807_v61 = vpop.f32.mrb[49].mxu1 }
 0x2ca   : > { %v12288_v7 = vpop.f32.mrb[48].mxu0 }
 0x2cb   : > { %v12296_v11 = vadd.f32 %v12288_v7, %v12042_v44  ;;  %v26812_v12 = vpop.f32.mrb[49].mxu0 }
 0x2d5   : > { %v12542_v33 = vpop.f32.mrb[50].mxu1 }
 0x2d6   : > { %v12550_v40 = vadd.f32 %v12542_v33, %v12296_v11  ;;  %v26817_v31 = vpop.f32.mrb[51].mxu1 }
 0x2db   : > { %v12796_v36 = vpop.f32.mrb[50].mxu0 }
 0x2dc   : > { %v12804_v14 = vadd.f32 %v12796_v36, %v12550_v40  ;;  %v26822_v29 = vpop.f32.mrb[51].mxu0 }
 0x2e6   : > { %v13050_v3 = vpop.f32.mrb[52].mxu1 }
 0x2e7   : > { %v13058_v21 = vadd.f32 %v13050_v3, %v12804_v14  ;;  %v26827_v60 = vpop.f32.mrb[53].mxu1  ;;  %v31169_v3 = vld [vmem:[%s34569_s3] sm:$0xff] }
 0x2e8   : > { %v31180_v60 = vld [vmem:[%s34569_s3 + $0x8] sm:$0xff] }
 0x2eb   : > { %v13304_v45 = vpop.f32.mrb[52].mxu0 }
 0x2ec   : > { %v13312_v63 = vadd.f32 %v13304_v45, %v13058_v21  ;;  %v26832_v34 = vpop.f32.mrb[53].mxu0 }
 0x2f6   : > { %v13558_v5 = vpop.f32.mrb[54].mxu1 }
 0x2f7   : > { %v13566_v17 = vadd.f32 %v13558_v5, %v13312_v63  ;;  %v26837_v28 = vpop.f32.mrb[55].mxu1 }
 0x2fb   : > { %v13812_v59 = vpop.f32.mrb[54].mxu0 }
 0x2fc   : > { %v13820_v19 = vadd.f32 %v13812_v59, %v13566_v17  ;;  %v26842_v32 = vpop.f32.mrb[55].mxu0 }
 0x2fd   : > { %v24943_v32 = vld [vmem:[%s34569_s3 + $0x10] sm:$0xff] }
 0x306   : > { %v14066_v42 = vpop.f32.mrb[56].mxu1 }
 0x307   : > { %v14074_v2 = vadd.f32 %v14066_v42, %v13820_v19  ;;  %v26847_v55 = vpop.f32.mrb[57].mxu1 }
 0x30b   : > { %v14320_v22 = vpop.f32.mrb[56].mxu0 }
 0x30c   : > { %v14328_v62 = vadd.f32 %v14320_v22, %v14074_v2  ;;  %v26852_v27 = vpop.f32.mrb[57].mxu0  ;;  %v19610_v2 = vld [vmem:[%s34570_s4] sm:$0xff] }
 0x30d   : > { %v24944_v27 = vld [vmem:[%s34569_s3 + $0x18] sm:$0xff] }
 0x316   : > { %v14574_v54 = vpop.f32.mrb[58].mxu1 }
 0x317   : > { %v14582_v6 = vadd.f32 %v14574_v54, %v14328_v62  ;;  %v26857_v16 = vpop.f32.mrb[59].mxu1 }
 0x31b   : > { %v14828_v10 = vpop.f32.mrb[58].mxu0 }
 0x31c   : > { %v14836_v30 = vadd.f32 %v14828_v10, %v14582_v6  ;;  %v26862_v18 = vpop.f32.mrb[59].mxu0 }
 0x31d   : > { %v24953_v18 = vld [vmem:[%s34569_s3 + $0x20] sm:$0xff] }
 0x326   : > { %v15082_v53 = vpop.f32.mrb[60].mxu1 }
 0x327   : > { %v15090_v35 = vadd.f32 %v15082_v53, %v14836_v30  ;;  %v26867_v37 = vpop.f32.mrb[61].mxu1 }
 0x32b   : > { %v15336_v8 = vpop.f32.mrb[60].mxu0 }
 0x32c   : > { %v15344_v26 = vadd.f32 %v15336_v8, %v15090_v35  ;;  %v26872_v48 = vpop.f32.mrb[61].mxu0  ;;  %v24954_v8 = vld [vmem:[%s34569_s3 + $0x28] sm:$0xff] }
 0x336   : > { %v15590_v0 = vpop.f32.mrb[62].mxu1 }
 0x337   : > { %v15598_v56 = vadd.f32 %v15590_v0, %v15344_v26  ;;  %v26877_v4 = vpop.f32.mrb[63].mxu1 }
 0x338   : > { %v24959_v4 = vld [vmem:[%s34569_s3 + $0x30] sm:$0xff] }
 0x33b   : > { %v15844_v38 = vpop.f32.mrb[62].mxu0 }
 0x33c   : > { %v15852_v39 = vadd.f32 %v15844_v38, %v15598_v56  ;;  %v26882_v41 = vpop.f32.mrb[63].mxu0 }
 0x346   : > { %v16098_v46 = vpop.f32.mrb[64].mxu1 }
 0x347   : > { %v16106_v23 = vadd.f32 %v16098_v46, %v15852_v39  ;;  %v26887_v57 = vpop.f32.mrb[65].mxu1  ;;  %v24960_v46 = vld [vmem:[%s34569_s3 + $0x38] sm:$0xff] }
 0x34b   : > { %v16352_v9 = vpop.f32.mrb[64].mxu0 }
 0x34c   : > { %v16360_v52 = vadd.f32 %v16352_v9, %v16106_v23  ;;  %v26892_v25 = vpop.f32.mrb[65].mxu0 }
 0x34d   : > { %v24965_v25 = vld [vmem:[%s34569_s3 + $0x40] sm:$0xff] }
 0x34f   : > { %v16464_v58 = vpop.f32.mrb[2].mxu0 }
 0x350   : > { %v27961_v43 = vadd.f32 %v16464_v58, %v29376_v13  ;;  %v16466_v24 = vpop.f32.mrb[3].mxu0 }
 0x351   : > { %v27962_v50 = vadd.f32 %v16466_v24, %v29380_v15  ;;  %v24966_v24 = vld [vmem:[%s34569_s3 + $0x48] sm:$0xff] }
 0x352   : > { %v16621_v47 = vadd.f32 %v27961_v43, %v31140_v20  ;;  %v16535_v49 = vpop.f32.mrb[2].mxu1 }
 0x353   : > { %v16622_v51 = vadd.f32 %v27962_v50, %v31140_v20  ;;  %v16623_v44 = vadd.f32 %v31140_v20, %v16535_v49  ;;  %v16537_v61 = vpop.f32.mrb[3].mxu1 }
 0x354   : > { %v16626_v7 = vmul.f32 0.01, %v16621_v47  ;;  %v16624_v13 = vadd.f32 %v31140_v20, %v16537_v61 }
 0x355   : > { %v16627_v11 = vmul.f32 0.01, %v16622_v51  ;;  %v16628_v33 = vmul.f32 0.01, %v16623_v44 }
 0x356   : > { %v31147_v12 = vmax.f32 %v16621_v47, %v16626_v7  ;;  %v16606_v40 = vpop.f32.mrb[66].mxu1  ;;  %v16629_v29 = vmul.f32 0.01, %v16624_v13 }
 0x357   : > { %v31149_v31 = vmax.f32 %v16622_v51, %v16627_v11  ;;  %v31152_v36 = vadd.f32 %v16606_v40, %v16360_v52  ;;  %v26897_v15 = vpop.f32.mrb[67].mxu1  ;;  %v31159_v14 = vmax.f32 %v16623_v44, %v16628_v33  ;;  %v24971_v44 = vld [vmem:[%s34569_s3 + $0x50] sm:$0xff] }
 0x358   : > { %16645 = vrot.lane.b32.xlu0 %v31147_v12, %s28637_s21  ;;  %v31173_v21 = vmax.f32 %v16624_v13, %v16629_v29 }
 0x359   : > { %16647 = vrot.lane.b32.xlu1 %v31149_v31, %s28637_s21  ;;  %16827 = vmatprep.subr.mxu0 %v31149_v31  ;;  %v16625_v45 = vadd.f32 %v31140_v20, %v31152_v36  ;;  %v24977_v36 = vld [vmem:[%s34569_s3 + $0x60] sm:$0xff] }
 0x35a   : > { %16828 = vmatpush1.msra.mxu0 %v31147_v12 }
 0x35b   : > { %24949 = vmatmul.mubr.msk.f32.vlgmr.msra.gmra.mrb[66].mxu0 %vm16660_vm6, %v31169_v3  ;;  %v16630_v63 = vmul.f32 0.01, %v16625_v45 }
 0x35c   : > { %16988 = vrot.lane.b32.xlu0 %v31159_v14, %s28641_s19  ;;  %16897 = vmatprep.mubr.f32.mxu0 %v28635_v1 }
 0x35d   : > { %16649 = vrot.lane.b32.xlu1 %v31159_v14, %s28637_s21  ;;  %v16635_v34 = vmax.f32 %v16625_v45, %v16630_v63 }
 0x35f   : > { %24950 = vmatmul.mubr.msk.f32.gmra.mrb[68].mxu0 %vm16660_vm6, %v31180_v60 }
 0x360   : > { %17175 = vrot.lane.b32.xlu0 %v31159_v14, %s28642_s2  ;;  %17070 = vmatprep.mubr.f32.mxu0 %v28635_v1 }
 0x361   : > { %16651 = vrot.lane.b32.xlu1 %v31173_v21, %s28637_s21  ;;  %s28643_s21 = smov 102  }
 0x364   : > { %17362 = vrot.lane.b32.xlu0 %v31159_v14, %s28638_s17 }
 0x365   : > { %16990 = vrot.lane.b32.xlu1 %v31173_v21, %s28641_s19 }
 0x368   : > { %16986 = vrot.lane.b32.xlu0 %v31149_v31, %s28641_s19 }
 0x369   : > { %16984 = vrot.lane.b32.xlu1 %v31147_v12, %s28641_s19 }
 0x36c   : > { %17548 = vrot.lane.b32.xlu0 %v31159_v14, %s28639_s0 }
 0x36d   : > { %17177 = vrot.lane.b32.xlu1 %v31173_v21, %s28642_s2 }
 0x370   : > { %17173 = vrot.lane.b32.xlu0 %v31149_v31, %s28642_s2 }
 0x371   : > { %17171 = vrot.lane.b32.xlu1 %v31147_v12, %s28642_s2  ;;  %s28652_s2 = smov 53  }
 0x374   : > { %17734 = vrot.lane.b32.xlu0 %v31159_v14, %s28643_s21 }
 0x375   : > { %17364 = vrot.lane.b32.xlu1 %v31173_v21, %s28638_s17 }
 0x378   : > { %17360 = vrot.lane.b32.xlu0 %v31149_v31, %s28638_s17 }
 0x379   : > { %17358 = vrot.lane.b32.xlu1 %v31147_v12, %s28638_s17  ;;  %s28646_s17 = smov 79  }
 0x37c   : > { %17921 = vrot.lane.b32.xlu0 %v31159_v14, %s28644_s26 }
 0x37d   : > { %17550 = vrot.lane.b32.xlu1 %v31173_v21, %s28639_s0 }
 0x380   : > { %17546 = vrot.lane.b32.xlu0 %v31149_v31, %s28639_s0 }
 0x381   : > { %17544 = vrot.lane.b32.xlu1 %v31147_v12, %s28639_s0  ;;  %s28647_s0 = smov 78  }
 0x384   : > { %18108 = vrot.lane.b32.xlu0 %v31159_v14, %s28645_s20 }
 0x385   : > { %17736 = vrot.lane.b32.xlu1 %v31173_v21, %s28643_s21 }
 0x388   : > { %17732 = vrot.lane.b32.xlu0 %v31149_v31, %s28643_s21 }
 0x389   : > { %17730 = vrot.lane.b32.xlu1 %v31147_v12, %s28643_s21 }
 0x38c   : > { %18295 = vrot.lane.b32.xlu0 %v31159_v14, %s28646_s17 }
 0x38d   : > { %17923 = vrot.lane.b32.xlu1 %v31173_v21, %s28644_s26 }
 0x390   : > { %17919 = vrot.lane.b32.xlu0 %v31149_v31, %s28644_s26 }
 0x391   : > { %17917 = vrot.lane.b32.xlu1 %v31147_v12, %s28644_s26 }
 0x394   : > { %18482 = vrot.lane.b32.xlu0 %v31159_v14, %s28647_s0 }
 0x395   : > { %18110 = vrot.lane.b32.xlu1 %v31173_v21, %s28645_s20 }
 0x398   : > { %18106 = vrot.lane.b32.xlu0 %v31149_v31, %s28645_s20 }
 0x399   : > { %18104 = vrot.lane.b32.xlu1 %v31147_v12, %s28645_s20 }
 0x39c   : > { %18669 = vrot.lane.b32.xlu0 %v31159_v14, %s28648_s27 }
 0x39d   : > { %18297 = vrot.lane.b32.xlu1 %v31173_v21, %s28646_s17 }
 0x3a0   : > { %18293 = vrot.lane.b32.xlu0 %v31149_v31, %s28646_s17 }
 0x3a1   : > { %18291 = vrot.lane.b32.xlu1 %v31147_v12, %s28646_s17 }
 0x3a4   : > { %18857 = vrot.lane.b32.xlu0 %v31159_v14, %s28649_s28 }
 0x3a5   : > { %18484 = vrot.lane.b32.xlu1 %v31173_v21, %s28647_s0 }
 0x3a8   : > { %18480 = vrot.lane.b32.xlu0 %v31149_v31, %s28647_s0 }
 0x3a9   : > { %18478 = vrot.lane.b32.xlu1 %v31147_v12, %s28647_s0 }
 0x3ac   : > { %18667 = vrot.lane.b32.xlu0 %v31149_v31, %s28648_s27 }
 0x3ad   : > { %18671 = vrot.lane.b32.xlu1 %v31173_v21, %s28648_s27 }
 0x3b0   : > { %18861 = vrot.lane.b32.xlu0 %v16635_v34, %s28649_s28 }
 0x3b1   : > { %18859 = vrot.lane.b32.xlu1 %v31173_v21, %s28649_s28 }
 0x3b4   : > { %19049 = vrot.lane.b32.xlu0 %v31173_v21, %s28650_s1 }
 0x3b5   : > { %18665 = vrot.lane.b32.xlu1 %v31147_v12, %s28648_s27  ;;  %s573_s27 = scalar_lea.vmem %s34584_s18, %s34593_s30 }
 0x3b8   : > { %18853 = vrot.lane.b32.xlu0 %v31147_v12, %s28649_s28 }
 0x3b9   : > { %18855 = vrot.lane.b32.xlu1 %v31149_v31, %s28649_s28 }
 0x3bc   : > { %19045 = vrot.lane.b32.xlu0 %v31149_v31, %s28650_s1 }
 0x3bd   : > { %19047 = vrot.lane.b32.xlu1 %v31159_v14, %s28650_s1 }
 0x3c0   : > { %19241 = vrot.lane.b32.xlu0 %v16635_v34, %s28651_s22 }
 0x3c1   : > { %19051 = vrot.lane.b32.xlu1 %v16635_v34, %s28650_s1 }
 0x3c4   : > { %19237 = vrot.lane.b32.xlu0 %v31159_v14, %s28651_s22 }
 0x3c5   : > { %19239 = vrot.lane.b32.xlu1 %v31173_v21, %s28651_s22 }
 0x3c8   : > { %19429 = vrot.lane.b32.xlu0 %v31173_v21, %s28652_s2 }
 0x3c9   : > { %19043 = vrot.lane.b32.xlu1 %v31147_v12, %s28650_s1 }
 0x3ca   : > { %v16646_v5 = vpop.permute.xlu0 %16645 }
 0x3cb   : > { %v16648_v17 = vpop.permute.xlu1 %16647 }
 0x3cc   : > { %19233 = vrot.lane.b32.xlu0 %v31147_v12, %s28651_s22  ;;  %v16653_v42 = vsel %vm1548_vm3, %v16646_v5, %v16648_v17 }
 0x3cd   : > { %19235 = vrot.lane.b32.xlu1 %v31149_v31, %s28651_s22 }
 0x3ce   : > { %v16989_v28 = vpop.permute.xlu0 %16988 }
 0x3cf   : > { %v16650_v59 = vpop.permute.xlu1 %16649 }
 0x3d0   : > { %19425 = vrot.lane.b32.xlu0 %v31149_v31, %s28652_s2  ;;  %v16654_v19 = vsel %vm1548_vm3, %v16648_v17, %v16650_v59 }
 0x3d1   : > { %19431 = vrot.lane.b32.xlu1 %v16635_v34, %s28652_s2  ;;  %16667 = vmatprep.subr.mxu1 %v16654_v19  ;;  %v24983_v34 = vld [vmem:[%s34569_s3 + $0x70] sm:$0xff] }
 0x3d2   : > { %v17176_v55 = vpop.permute.xlu0 %17175  ;;  %16668 = vmatpush1.msra.mxu1 %v16653_v42 }
 0x3d3   : > { %24945 = vmatmul.mubr.msk.f32.vlgmr.msra.gmra.mrb[68].mxu1 %vm16660_vm6, %v24943_v32  ;;  %v16652_v22 = vpop.permute.xlu1 %16651 }
 0x3d4   : > { %v16655_v62 = vsel %vm1548_vm3, %v16650_v59, %v16652_v22  ;;  %19614 = vperm.xlu0 %28431, %v19610_v2   ;;  %16744 = vmatprep.subr.mxu1 %v16652_v22  ;;  %v24984_v59 = vld [vmem:[%s34569_s3 + $0x78] sm:$0xff]  ;;  %vm19433_vm3 = vcmask 433152  }
 0x3d5   : > { %19427 = vrot.lane.b32.xlu1 %v31159_v14, %s28652_s2  ;;  %16745 = vmatpush1.msra.mxu1 %v16655_v62 }
 0x3d6   : > { %v31278_v54 = vpop.permute.xlu0 %17362  ;;  %16737 = vmatprep.mubr.f32.mxu1 %v28635_v1  ;;  %16904 = vmatprep.subr.mxu1 %v31173_v21 }
 0x3d7   : > { %24946 = vmatmul.mubr.msk.f32.gmra.mrb[70].mxu1 %vm16660_vm6, %v24944_v27  ;;  %v16991_v6 = vpop.permute.xlu1 %16990 }
 0x3d8   : > { %16808 = vmatprep.mubr.f32.mxu1 %v28635_v1  ;;  %v16995_v48 = vsel %vm16992_vm7, %v16989_v28, %v16991_v6 }
 0x3d9   : > { %19423 = vrot.lane.b32.xlu1 %v31147_v12, %s28652_s2  ;;  %v24972_v12 = vld [vmem:[%s34569_s3 + $0x58] sm:$0xff] }
 0x3da   : > { %v16987_v16 = vpop.permute.xlu0 %16986 }
 0x3db   : > { %24947 = vmatmul.mubr.msk.f32.vlgmr.msra.gmra.mrb[72].mxu1 %vm16660_vm6, %v24943_v32  ;;  %v16985_v10 = vpop.permute.xlu1 %16984  ;;  %v16994_v30 = vsel %vm16992_vm7, %v16987_v16, %v16989_v28 }
 0x3dc   : > { %16905 = vmatpush1.msra.mxu1 %v31159_v14  ;;  %v16993_v53 = vsel %vm16992_vm7, %v16985_v10, %v16987_v16  ;;  %17006 = vmatprep.subr.mxu0 %v16994_v30 }
 0x3dd   : > { %17083 = vmatprep.subr.mxu1 %v16991_v6  ;;  %17007 = vmatpush1.msra.mxu0 %v16993_v53 }
 0x3de   : > { %v31293_v35 = vpop.permute.xlu0 %17548  ;;  %16814 = vmatprep.mubr.f32.mxu1 %v28635_v1  ;;  %24955 = vmatmul.mubr.msk.f32.vlgmr.msra.gmra.mrb[66].mxu0 %vm16660_vm6, %v24953_v18 }
 0x3df   : > { %24948 = vmatmul.mubr.msk.f32.gmra.mrb[74].mxu1 %vm16660_vm6, %v24944_v27  ;;  %v17178_v37 = vpop.permute.xlu1 %17177  ;;  %17076 = vmatprep.mubr.f32.mxu0 %v28635_v1 }
 0x3e0   : > { %16968 = vmatprep.mubr.f32.mxu1 %v28635_v1  ;;  %v17182_v57 = vsel %vm17179_vm8, %v17176_v55, %v17178_v37 }
 0x3e2   : > { %v17174_v26 = vpop.permute.xlu0 %17173  ;;  %24956 = vmatmul.mubr.msk.f32.gmra.mrb[68].mxu0 %vm16660_vm6, %v24954_v8 }
 0x3e3   : > { %24951 = vmatmul.mubr.msk.f32.vlgmr.msra.gmra.mrb[72].mxu1 %vm16660_vm6, %v31169_v3  ;;  %v17172_v0 = vpop.permute.xlu1 %17171  ;;  %v17181_v56 = vsel %vm17179_vm8, %v17174_v26, %v17176_v55  ;;  %17257 = vmatprep.mubr.f32.mxu0 %v28635_v1  ;;  %v24978_v3 = vld [vmem:[%s34569_s3 + $0x68] sm:$0xff]  ;;  %v24989_v55 = vld [vmem:[%s34569_s3 + $0x80] sm:$0xff] }
 0x3e4   : > { %17084 = vmatpush1.msra.mxu1 %v16995_v48  ;;  %v17180_v38 = vsel %vm17179_vm8, %v17172_v0, %v17174_v26  ;;  %17193 = vmatprep.subr.mxu0 %v17181_v56  ;;  %vm23821_vm8 = vcmask 523264  }
 0x3e5   : > { %17270 = vmatprep.subr.mxu1 %v17178_v37  ;;  %17194 = vmatpush1.msra.mxu0 %v17180_v38 }
 0x3e6   : > { %v31313_v39 = vpop.permute.xlu0 %17734  ;;  %16974 = vmatprep.mubr.f32.mxu1 %v28635_v1  ;;  %24961 = vmatmul.mubr.msk.f32.vlgmr.msra.gmra.mrb[66].mxu0 %vm16660_vm6, %v24959_v4 }
 0x3e7   : > { %24952 = vmatmul.mubr.msk.f32.gmra.mrb[74].mxu1 %vm16660_vm6, %v31180_v60  ;;  %v17365_v41 = vpop.permute.xlu1 %17364  ;;  %17263 = vmatprep.mubr.f32.mxu0 %v28635_v1 }
 0x3e8   : > { %17147 = vmatprep.mubr.f32.mxu1 %v28635_v1  ;;  %v17368_v47 = vsel %vm8505_vm4, %v31278_v54, %v17365_v41 }
 0x3ea   : > { %v17361_v23 = vpop.permute.xlu0 %17360  ;;  %24962 = vmatmul.mubr.msk.f32.gmra.mrb[68].mxu0 %vm16660_vm6, %v24960_v46 }
 0x3eb   : > { %24957 = vmatmul.mubr.msk.f32.vlgmr.msra.gmra.mrb[72].mxu1 %vm16660_vm6, %v24953_v18  ;;  %v17359_v9 = vpop.permute.xlu1 %17358  ;;  %v17367_v52 = vsel %vm8505_vm4, %v17361_v23, %v31278_v54  ;;  %17443 = vmatprep.mubr.f32.mxu0 %v28635_v1  ;;  %v24990_v54 = vld [vmem:[%s34569_s3 + $0x88] sm:$0xff]  ;;  %v24995_v18 = vld [vmem:[%s34569_s3 + $0x90] sm:$0xff] }
 0x3ec   : > { %17271 = vmatpush1.msra.mxu1 %v17182_v57  ;;  %v17366_v58 = vsel %vm8505_vm4, %v17359_v9, %v17361_v23  ;;  %17379 = vmatprep.subr.mxu0 %v17367_v52  ;;  %v25002_v23 = vld [vmem:[%s34569_s3 + $0xa8] sm:$0xff]  ;;  %vm19689_vm4 = vcmask 130048  }
 0x3ed   : > { %17456 = vmatprep.subr.mxu1 %v17365_v41  ;;  %17380 = vmatpush1.msra.mxu0 %v17366_v58  ;;  %v19611_v58 = vld [vmem:[%s34570_s4 + $0x8] sm:$0xff] }
 0x3ee   : > { %v31334_v20 = vpop.permute.xlu0 %17921  ;;  %17153 = vmatprep.mubr.f32.mxu1 %v28635_v1  ;;  %24967 = vmatmul.mubr.msk.f32.vlgmr.msra.gmra.mrb[66].mxu0 %vm16660_vm6, %v24965_v25 }
 0x3ef   : > { %24958 = vmatmul.mubr.msk.f32.gmra.mrb[74].mxu1 %vm16660_vm6, %v24954_v8  ;;  %v17551_v43 = vpop.permute.xlu1 %17550  ;;  %17449 = vmatprep.mubr.f32.mxu0 %v28635_v1  ;;  %v24996_v8 = vld [vmem:[%s34569_s3 + $0x98] sm:$0xff] }
 0x3f0   : > { %17334 = vmatprep.mubr.f32.mxu1 %v28635_v1  ;;  %v17554_v40 = vsel %vm9522_vm5, %v31293_v35, %v17551_v43  ;;  %19619 = vperm.xlu1 %28432, %v19611_v58  }
 0x3f2   : > { %v17547_v50 = vpop.permute.xlu0 %17546  ;;  %24968 = vmatmul.mubr.msk.f32.gmra.mrb[68].mxu0 %vm16660_vm6, %v24966_v24 }
 0x3f3   : > { %24963 = vmatmul.mubr.msk.f32.vlgmr.msra.gmra.mrb[72].mxu1 %vm16660_vm6, %v24959_v4  ;;  %v17545_v49 = vpop.permute.xlu1 %17544  ;;  %v17553_v51 = vsel %vm9522_vm5, %v17547_v50, %v31293_v35  ;;  %17629 = vmatprep.mubr.f32.mxu0 %v28635_v1  ;;  %v25001_v4 = vld [vmem:[%s34569_s3 + $0xa0] sm:$0xff] }
 0x3f4   : > { %17457 = vmatpush1.msra.mxu1 %v17368_v47  ;;  %v17552_v61 = vsel %vm9522_vm5, %v17545_v49, %v17547_v50  ;;  %17565 = vmatprep.subr.mxu0 %v17553_v51  ;;  %vm20504_vm5 = vcmask 1040384  }
 0x3f5   : > { %17642 = vmatprep.subr.mxu1 %v17551_v43  ;;  %17566 = vmatpush1.msra.mxu0 %v17552_v61  ;;  %v25007_v43 = vld [vmem:[%s34569_s3 + $0xb0] sm:$0xff] }
 0x3f6   : > { %v31355_v7 = vpop.permute.xlu0 %18108  ;;  %17340 = vmatprep.mubr.f32.mxu1 %v28635_v1  ;;  %24973 = vmatmul.mubr.msk.f32.vlgmr.msra.gmra.mrb[66].mxu0 %vm16660_vm6, %v24971_v44 }
 0x3f7   : > { %24964 = vmatmul.mubr.msk.f32.gmra.mrb[74].mxu1 %vm16660_vm6, %v24960_v46  ;;  %v17737_v11 = vpop.permute.xlu1 %17736  ;;  %17635 = vmatprep.mubr.f32.mxu0 %v28635_v1 }
 0x3f8   : > { %17520 = vmatprep.mubr.f32.mxu1 %v28635_v1  ;;  %v17741_v60 = vsel %vm17738_vm9, %v31313_v39, %v17737_v11 }
 0x3fa   : > { %v17733_v33 = vpop.permute.xlu0 %17732  ;;  %24974 = vmatmul.mubr.msk.f32.gmra.mrb[68].mxu0 %vm16660_vm6, %v24972_v12 }
 0x3fb   : > { %24969 = vmatmul.mubr.msk.f32.vlgmr.msra.gmra.mrb[72].mxu1 %vm16660_vm6, %v24965_v25  ;;  %v17731_v31 = vpop.permute.xlu1 %17730  ;;  %v17740_v13 = vsel %vm17738_vm9, %v17733_v33, %v31313_v39  ;;  %17816 = vmatprep.mubr.f32.mxu0 %v28635_v1 }
 0x3fc   : > { %17643 = vmatpush1.msra.mxu1 %v17554_v40  ;;  %v17739_v15 = vsel %vm17738_vm9, %v17731_v31, %v17733_v33  ;;  %17752 = vmatprep.subr.mxu0 %v17740_v13  ;;  %v25013_v40 = vld [vmem:[%s34569_s3 + $0xc0] sm:$0xff]  ;;  %vm23903_vm9 = vcmask 1041408  }
 0x3fd   : > { %17829 = vmatprep.subr.mxu1 %v17737_v11  ;;  %17753 = vmatpush1.msra.mxu0 %v17739_v15 }
 0x3fe   : > { %v31376_v14 = vpop.permute.xlu0 %18295  ;;  %17526 = vmatprep.mubr.f32.mxu1 %v28635_v1  ;;  %24979 = vmatmul.mubr.msk.f32.vlgmr.msra.gmra.mrb[66].mxu0 %vm16660_vm6, %v24977_v36 }
 0x3ff   : > { %24970 = vmatmul.mubr.msk.f32.gmra.mrb[74].mxu1 %vm16660_vm6, %v24966_v24  ;;  %v17924_v29 = vpop.permute.xlu1 %17923  ;;  %17822 = vmatprep.mubr.f32.mxu0 %v28635_v1 }
 0x400   : > { %17706 = vmatprep.mubr.f32.mxu1 %v28635_v1  ;;  %v17928_v32 = vsel %vm17925_vm10, %v31334_v20, %v17924_v29 }
 0x402   : > { %v17920_v21 = vpop.permute.xlu0 %17919  ;;  %24980 = vmatmul.mubr.msk.f32.gmra.mrb[68].mxu0 %vm16660_vm6, %v24978_v3 }
 0x403   : > { %24975 = vmatmul.mubr.msk.f32.vlgmr.msra.gmra.mrb[72].mxu1 %vm16660_vm6, %v24971_v44  ;;  %v17918_v45 = vpop.permute.xlu1 %17917  ;;  %v17927_v63 = vsel %vm17925_vm10, %v17920_v21, %v31334_v20  ;;  %18003 = vmatprep.mubr.f32.mxu0 %v28635_v1 }
 0x404   : > { %17830 = vmatpush1.msra.mxu1 %v17741_v60  ;;  %v17926_v5 = vsel %vm17925_vm10, %v17918_v45, %v17920_v21  ;;  %17939 = vmatprep.subr.mxu0 %v17927_v63  ;;  %v25019_v63 = vld [vmem:[%s34569_s3 + $0xd0] sm:$0xff]  ;;  %vm23899_vm10 = vcmask 15360  }
 0x405   : > { %18016 = vmatprep.subr.mxu1 %v17924_v29  ;;  %17940 = vmatpush1.msra.mxu0 %v17926_v5 }
 0x406   : > { %v31397_v17 = vpop.permute.xlu0 %18482  ;;  %17712 = vmatprep.mubr.f32.mxu1 %v28635_v1  ;;  %24985 = vmatmul.mubr.msk.f32.vlgmr.msra.gmra.mrb[66].mxu0 %vm16660_vm6, %v24983_v34 }
 0x407   : > { %24976 = vmatmul.mubr.msk.f32.gmra.mrb[74].mxu1 %vm16660_vm6, %v24972_v12  ;;  %v18111_v28 = vpop.permute.xlu1 %18110  ;;  %18009 = vmatprep.mubr.f32.mxu0 %v28635_v1 }
 0x408   : > { %17893 = vmatprep.mubr.f32.mxu1 %v28635_v1  ;;  %v18115_v16 = vsel %vm18112_vm11, %v31355_v7, %v18111_v28 }
 0x40a   : > { %v18107_v19 = vpop.permute.xlu0 %18106  ;;  %24986 = vmatmul.mubr.msk.f32.gmra.mrb[68].mxu0 %vm16660_vm6, %v24984_v59 }
 0x40b   : > { %24981 = vmatmul.mubr.msk.f32.vlgmr.msra.gmra.mrb[72].mxu1 %vm16660_vm6, %v24977_v36  ;;  %v18105_v42 = vpop.permute.xlu1 %18104  ;;  %v18114_v2 = vsel %vm18112_vm11, %v18107_v19, %v31355_v7  ;;  %18190 = vmatprep.mubr.f32.mxu0 %v28635_v1  ;;  %v25008_v7 = vld [vmem:[%s34569_s3 + $0xb8] sm:$0xff] }
 0x40c   : > { %18017 = vmatpush1.msra.mxu1 %v17928_v32  ;;  %v18113_v22 = vsel %vm18112_vm11, %v18105_v42, %v18107_v19  ;;  %18126 = vmatprep.subr.mxu0 %v18114_v2 }
 0x40d   : > { %18203 = vmatprep.subr.mxu1 %v18111_v28  ;;  %18127 = vmatpush1.msra.mxu0 %v18113_v22 }
 0x40e   : > { %v31418_v62 = vpop.permute.xlu0 %18669  ;;  %17899 = vmatprep.mubr.f32.mxu1 %v28635_v1  ;;  %24991 = vmatmul.mubr.msk.f32.vlgmr.msra.gmra.mrb[66].mxu0 %vm16660_vm6, %v24989_v55 }
 0x40f   : > { %24982 = vmatmul.mubr.msk.f32.gmra.mrb[74].mxu1 %vm16660_vm6, %v24978_v3  ;;  %v18298_v27 = vpop.permute.xlu1 %18297  ;;  %18196 = vmatprep.mubr.f32.mxu0 %v28635_v1 }
 0x410   : > { %18080 = vmatprep.mubr.f32.mxu1 %v28635_v1  ;;  %v18302_v48 = vsel %vm18299_vm12, %v31376_v14, %v18298_v27 }
 0x412   : > { %v18294_v6 = vpop.permute.xlu0 %18293  ;;  %24992 = vmatmul.mubr.msk.f32.gmra.mrb[68].mxu0 %vm16660_vm6, %v24990_v54 }
 0x413   : > { %24987 = vmatmul.mubr.msk.f32.vlgmr.msra.gmra.mrb[72].mxu1 %vm16660_vm6, %v24983_v34  ;;  %v18292_v10 = vpop.permute.xlu1 %18291  ;;  %v18301_v30 = vsel %vm18299_vm12, %v18294_v6, %v31376_v14  ;;  %18377 = vmatprep.mubr.f32.mxu0 %v28635_v1  ;;  %v25014_v14 = vld [vmem:[%s34569_s3 + $0xc8] sm:$0xff] }
 0x414   : > { %18204 = vmatpush1.msra.mxu1 %v18115_v16  ;;  %v18300_v53 = vsel %vm18299_vm12, %v18292_v10, %v18294_v6  ;;  %18313 = vmatprep.subr.mxu0 %v18301_v30  ;;  %v25031_v30 = vld [vmem:[%s34569_s3 + $0xf0] sm:$0xff] }
 0x415   : > { %18390 = vmatprep.subr.mxu1 %v18298_v27  ;;  %18314 = vmatpush1.msra.mxu0 %v18300_v53  ;;  %v25032_v53 = vld [vmem:[%s34569_s3 + $0xf8] sm:$0xff] }
 0x416   : > { %v31439_v35 = vpop.permute.xlu0 %18857  ;;  %18086 = vmatprep.mubr.f32.mxu1 %v28635_v1  ;;  %24997 = vmatmul.mubr.msk.f32.vlgmr.msra.gmra.mrb[66].mxu0 %vm16660_vm6, %v24995_v18 }
 0x417   : > { %24988 = vmatmul.mubr.msk.f32.gmra.mrb[74].mxu1 %vm16660_vm6, %v24984_v59  ;;  %v18485_v37 = vpop.permute.xlu1 %18484  ;;  %18383 = vmatprep.mubr.f32.mxu0 %v28635_v1  ;;  %v25020_v59 = vld [vmem:[%s34569_s3 + $0xd8] sm:$0xff] }
 0x418   : > { %18267 = vmatprep.mubr.f32.mxu1 %v28635_v1  ;;  %v18489_v9 = vsel %vm18486_vm13, %v31397_v17, %v18485_v37 }
 0x41a   : > { %v18481_v26 = vpop.permute.xlu0 %18480  ;;  %24998 = vmatmul.mubr.msk.f32.gmra.mrb[68].mxu0 %vm16660_vm6, %v24996_v8 }
 0x41b   : > { %24993 = vmatmul.mubr.msk.f32.vlgmr.msra.gmra.mrb[72].mxu1 %vm16660_vm6, %v24989_v55  ;;  %v18479_v0 = vpop.permute.xlu1 %18478  ;;  %v18488_v56 = vsel %vm18486_vm13, %v18481_v26, %v31397_v17  ;;  %18564 = vmatprep.mubr.f32.mxu0 %v28635_v1  ;;  %v25025_v55 = vld [vmem:[%s34569_s3 + $0xe0] sm:$0xff] }
 0x41c   : > { %18391 = vmatpush1.msra.mxu1 %v18302_v48  ;;  %v18487_v38 = vsel %vm18486_vm13, %v18479_v0, %v18481_v26  ;;  %18500 = vmatprep.subr.mxu0 %v18488_v56 }
 0x41d   : > { %18577 = vmatprep.subr.mxu1 %v18485_v37  ;;  %18501 = vmatpush1.msra.mxu0 %v18487_v38 }
 0x41e   : > { %v18668_v39 = vpop.permute.xlu0 %18667  ;;  %18273 = vmatprep.mubr.f32.mxu1 %v28635_v1  ;;  %25003 = vmatmul.mubr.msk.f32.vlgmr.msra.gmra.mrb[66].mxu0 %vm16660_vm6, %v25001_v4 }
 0x41f   : > { %24994 = vmatmul.mubr.msk.f32.gmra.mrb[74].mxu1 %vm16660_vm6, %v24990_v54  ;;  %v18672_v41 = vpop.permute.xlu1 %18671  ;;  %v18675_v46 = vsel %vm18673_vm14, %v18668_v39, %v31418_v62  ;;  %18570 = vmatprep.mubr.f32.mxu0 %v28635_v1  ;;  %v25026_v54 = vld [vmem:[%s34569_s3 + $0xe8] sm:$0xff] }
 0x420   : > { %18687 = vmatprep.subr.mxu0 %v18675_v46  ;;  %18454 = vmatprep.mubr.f32.mxu1 %v28635_v1  ;;  %v18676_v47 = vsel %vm18673_vm14, %v31418_v62, %v18672_v41 }
 0x422   : > { %v18862_v57 = vpop.permute.xlu0 %18861  ;;  %25004 = vmatmul.mubr.msk.f32.gmra.mrb[68].mxu0 %vm16660_vm6, %v25002_v23 }
 0x423   : > { %24999 = vmatmul.mubr.msk.f32.vlgmr.msra.gmra.mrb[72].mxu1 %vm16660_vm6, %v24995_v18  ;;  %v18860_v52 = vpop.permute.xlu1 %18859  ;;  %18751 = vmatprep.mubr.f32.mxu0 %v28635_v1 }
 0x424   : > { %18578 = vmatpush1.msra.mxu1 %v18489_v9  ;;  %18460 = vmatprep.mubr.f32.mxu1 %v28635_v1  ;;  %v18867_v44 = vsel %vm18863_vm15, %v18860_v52, %v18862_v57  ;;  %v18866_v13 = vsel %vm18863_vm15, %v31439_v35, %v18860_v52 }
 0x425   : > { %18764 = vmatprep.subr.mxu1 %v18672_v41 }
 0x426   : > { %v19050_v25 = vpop.permute.xlu0 %19049 }
 0x427   : > { %25000 = vmatmul.mubr.msk.f32.gmra.mrb[74].mxu1 %vm16660_vm6, %v24996_v8  ;;  %v18666_v20 = vpop.permute.xlu1 %18665 }
 0x428   : > { %v18674_v24 = vsel %vm18673_vm14, %v18666_v20, %v18668_v39  ;;  %18641 = vmatprep.mubr.f32.mxu1 %v28635_v1 }
 0x429   : > { %18688 = vmatpush1.msra.mxu0 %v18674_v24 }
 0x42a   : > { %v18854_v50 = vpop.permute.xlu0 %18853  ;;  %25009 = vmatmul.mubr.msk.f32.vlgmr.msra.gmra.mrb[66].mxu0 %vm16660_vm6, %v25007_v43 }
 0x42b   : > { %25005 = vmatmul.mubr.msk.f32.vlgmr.msra.gmra.mrb[72].mxu1 %vm16660_vm6, %v25001_v4  ;;  %v18856_v49 = vpop.permute.xlu1 %18855  ;;  %18757 = vmatprep.mubr.f32.mxu0 %v28635_v1 }
 0x42c   : > { %18765 = vmatpush1.msra.mxu1 %v18676_v47  ;;  %v18864_v51 = vsel %vm18863_vm15, %v18854_v50, %v18856_v49  ;;  %v18865_v61 = vsel %vm18863_vm15, %v18856_v49, %v31439_v35  ;;  %18647 = vmatprep.mubr.f32.mxu1 %v28635_v1 }
 0x42d   : > { %18955 = vmatprep.subr.mxu1 %v18867_v44  ;;  %18878 = vmatprep.subr.mxu0 %v18865_v61 }
 0x42e   : > { %v19046_v11 = vpop.permute.xlu0 %19045  ;;  %18879 = vmatpush1.msra.mxu0 %v18864_v51 }
 0x42f   : > { %25006 = vmatmul.mubr.msk.f32.gmra.mrb[74].mxu1 %vm16660_vm6, %v25002_v23  ;;  %v19048_v12 = vpop.permute.xlu1 %19047  ;;  %25010 = vmatmul.mubr.msk.f32.gmra.mrb[68].mxu0 %vm16660_vm6, %v25008_v7 }
 0x430   : > { %v19055_v33 = vsel %vm19053_vm1, %v19046_v11, %v19048_v12  ;;  %18828 = vmatprep.mubr.f32.mxu1 %v28635_v1  ;;  %18942 = vmatprep.mubr.f32.mxu0 %v28635_v1  ;;  %v19056_v60 = vsel %vm19053_vm1, %v19048_v12, %v19050_v25 }
 0x431   : > { %19068 = vmatprep.subr.mxu0 %v19055_v33 }
 0x432   : > { %v19242_v31 = vpop.permute.xlu0 %19241 }
 0x433   : > { %25011 = vmatmul.mubr.msk.f32.vlgmr.msra.gmra.mrb[72].mxu1 %vm16660_vm6, %v25007_v43  ;;  %v19052_v36 = vpop.permute.xlu1 %19051  ;;  %25015 = vmatmul.mubr.msk.f32.vlgmr.msra.gmra.mrb[66].mxu0 %vm16660_vm6, %v25013_v40 }
 0x434   : > { %18956 = vmatpush1.msra.mxu1 %v18866_v13  ;;  %v19057_v15 = vsel %vm19053_vm1, %v19050_v25, %v19052_v36  ;;  %18834 = vmatprep.mubr.f32.mxu1 %v28635_v1 }
 0x435   : > { %19145 = vmatprep.subr.mxu1 %v19057_v15  ;;  %18948 = vmatprep.mubr.f32.mxu0 %v28635_v1 }
 0x436   : > { %v19238_v29 = vpop.permute.xlu0 %19237 }
 0x437   : > { %25012 = vmatmul.mubr.msk.f32.gmra.mrb[74].mxu1 %vm16660_vm6, %v25008_v7  ;;  %v19240_v3 = vpop.permute.xlu1 %19239  ;;  %25016 = vmatmul.mubr.msk.f32.gmra.mrb[68].mxu0 %vm16660_vm6, %v25014_v14 }
 0x438   : > { %19019 = vmatprep.mubr.f32.mxu1 %v28635_v1  ;;  %19132 = vmatprep.mubr.f32.mxu0 %v28635_v1  ;;  %v19247_v5 = vsel %vm19243_vm2, %v19240_v3, %v19242_v31  ;;  %v19246_v42 = vsel %vm19243_vm2, %v19238_v29, %v19240_v3 }
 0x43a   : > { %v19430_v21 = vpop.permute.xlu0 %19429 }
 0x43b   : > { %25017 = vmatmul.mubr.msk.f32.vlgmr.msra.gmra.mrb[72].mxu1 %vm16660_vm6, %v25013_v40  ;;  %v19044_v45 = vpop.permute.xlu1 %19043 }
 0x43c   : > { %19146 = vmatpush1.msra.mxu1 %v19056_v60  ;;  %v19054_v34 = vsel %vm19053_vm1, %v19044_v45, %v19046_v11  ;;  %19025 = vmatprep.mubr.f32.mxu1 %v28635_v1 }
 0x43d   : > { %19335 = vmatprep.subr.mxu1 %v19247_v5  ;;  %19069 = vmatpush1.msra.mxu0 %v19054_v34 }
 0x43e   : > { %v19234_v17 = vpop.permute.xlu0 %19233  ;;  %25021 = vmatmul.mubr.msk.f32.vlgmr.msra.gmra.mrb[66].mxu0 %vm16660_vm6, %v25019_v63 }
 0x43f   : > { %25018 = vmatmul.mubr.msk.f32.gmra.mrb[74].mxu1 %vm16660_vm6, %v25014_v14  ;;  %v19236_v28 = vpop.permute.xlu1 %19235  ;;  %19138 = vmatprep.mubr.f32.mxu0 %v28635_v1 }
 0x440   : > { %v19244_v19 = vsel %vm19243_vm2, %v19234_v17, %v19236_v28  ;;  %v19245_v32 = vsel %vm19243_vm2, %v19236_v28, %v19238_v29  ;;  %19209 = vmatprep.mubr.f32.mxu1 %v28635_v1 }
 0x441   : > { %19258 = vmatprep.subr.mxu0 %v19245_v32 }
 0x442   : > { %25022 = vmatmul.mubr.msk.f32.gmra.mrb[68].mxu0 %vm16660_vm6, %v25020_v59  ;;  %v19426_v62 = vpop.permute.xlu0 %19425 }
 0x443   : > { %19259 = vmatpush1.msra.mxu0 %v19244_v19  ;;  %25023 = vmatmul.mubr.msk.f32.vlgmr.msra.gmra.mrb[72].mxu1 %vm16660_vm6, %v25019_v63  ;;  %v19432_v2 = vpop.permute.xlu1 %19431 }
 0x444   : > { %19336 = vmatpush1.msra.mxu1 %v19246_v42  ;;  %19322 = vmatprep.mubr.f32.mxu0 %v28635_v1  ;;  %v19437_v22 = vsel %vm19433_vm3, %v19430_v21, %v19432_v2  ;;  %v20412_v42 = vld [vmem:[%s34572_s6] sm:$0xff]  ;;  %v20413_v2 = vld [vmem:[%s34572_s6 + $0x8] sm:$0xff] }
 0x445   : > { %19525 = vmatprep.subr.mxu1 %v19437_v22  ;;  %19215 = vmatprep.mubr.f32.mxu1 %v28635_v1 }
 0x446   : > { %25027 = vmatmul.mubr.msk.f32.vlgmr.msra.gmra.mrb[66].mxu0 %vm16660_vm6, %v25025_v55 }
 0x447   : > { %25024 = vmatmul.mubr.msk.f32.gmra.mrb[74].mxu1 %vm16660_vm6, %v25020_v59  ;;  %v19428_v27 = vpop.permute.xlu1 %19427  ;;  %19328 = vmatprep.mubr.f32.mxu0 %v28635_v1 }
 0x448   : > { %v19435_v6 = vsel %vm19433_vm3, %v19426_v62, %v19428_v27  ;;  %19399 = vmatprep.mubr.f32.mxu1 %v28635_v1  ;;  %v19436_v16 = vsel %vm19433_vm3, %v19428_v27, %v19430_v21 }
 0x449   : > { %19448 = vmatprep.subr.mxu0 %v19435_v6 }
 0x44a   : > { %25028 = vmatmul.mubr.msk.f32.gmra.mrb[68].mxu0 %vm16660_vm6, %v25026_v54 }
 0x44b   : > { %25029 = vmatmul.mubr.msk.f32.vlgmr.msra.gmra.mrb[72].mxu1 %vm16660_vm6, %v25025_v55  ;;  %v19424_v10 = vpop.permute.xlu1 %19423  ;;  %19512 = vmatprep.mubr.f32.mxu0 %v28635_v1 }
 0x44c   : > { %19526 = vmatpush1.msra.mxu1 %v19436_v16  ;;  %v19434_v18 = vsel %vm19433_vm3, %v19424_v10, %v19426_v62  ;;  %19405 = vmatprep.mubr.f32.mxu1 %v28635_v1 }
 0x44d   : > { %19449 = vmatpush1.msra.mxu0 %v19434_v18 }
 0x44e   : > { %25033 = vmatmul.mubr.msk.f32.vlgmr.msra.gmra.mrb[66].mxu0 %vm16660_vm6, %v25031_v30 }
 0x44f   : > { %25030 = vmatmul.mubr.msk.f32.gmra.mrb[74].mxu1 %vm16660_vm6, %v25026_v54  ;;  %19518 = vmatprep.mubr.f32.mxu0 %v28635_v1 }
 0x450   : > { %19589 = vmatprep.mubr.f32.mxu1 %v28635_v1 }
 0x452   : > { %25034 = vmatmul.mubr.msk.f32.gmra.mrb[68].mxu0 %vm16660_vm6, %v25032_v53 }
 0x453   : > { %25035 = vmatmul.mubr.msk.f32.vlgmr.msra.gmra.mrb[72].mxu1 %vm16660_vm6, %v25031_v30  ;;  %19760 = vmatprep.mubr.f32.mxu0 %v28635_v1  ;;  %v19615_v4 = vpop.permute.xlu0 %19614 }
 0x454   : > { %19595 = vmatprep.mubr.f32.mxu1 %v28635_v1 }
 0x457   : > { %25036 = vmatmul.mubr.msk.f32.gmra.mrb[74].mxu1 %vm16660_vm6, %v25032_v53  ;;  %vm20500_vm6 = vcmask 138240  }
 0x458   : > { %19837 = vmatprep.mubr.f32.mxu1 %v28635_v1 }
 0x46f   : > { %v19620_v23 = vpop.permute.xlu1 %19619 }
 0x4a6   : > { %v16733_v35 = vpop.f32.mrb[68].mxu1 }
 0x4a7   : > { %v16735_v37 = vpop.f32.mrb[69].mxu1 }
 0x4aa   : > { %v16739_v8 = vpop.f32.mrb[70].mxu1 }
 0x4ab   : > { %v16741_v26 = vpop.f32.mrb[71].mxu1 }
 0x521   : > { %v19514_v48 = vpop.f32.mrb[66].mxu0 }
 0x522   : > { %v27963_v0 = vadd.f32 %v19514_v48, %v16733_v35  ;;  %v19516_v56 = vpop.f32.mrb[67].mxu0 }
 0x523   : > { %v27964_v38 = vadd.f32 %v19516_v56, %v16735_v37 }
 0x524   : > { %v19622_v39 = vadd.f32 %v27963_v0, %v19615_v4 }
 0x525   : > { %v19623_v41 = vadd.f32 %v27964_v38, %v19615_v4  ;;  %v19520_v46 = vpop.f32.mrb[68].mxu0 }
 0x526   : > { %v27965_v57 = vadd.f32 %v19520_v46, %v16739_v8  ;;  %v19522_v9 = vpop.f32.mrb[69].mxu0  ;;  %v19591_v52 = vpop.f32.mrb[72].mxu1  ;;  %v19630_v43 = vmul.f32 0.01, %v19622_v39 }
 0x527   : > { %v27966_v25 = vadd.f32 %v19522_v9, %v16741_v26  ;;  %v19624_v58 = vadd.f32 %v19615_v4, %v19591_v52  ;;  %v19593_v20 = vpop.f32.mrb[73].mxu1  ;;  %v19631_v47 = vmul.f32 0.01, %v19623_v41 }
 0x528   : > { %v19625_v24 = vadd.f32 %v19615_v4, %v19593_v20  ;;  %v19626_v50 = vadd.f32 %v27965_v57, %v19620_v23  ;;  %v31578_v31 = vmax.f32 %v19622_v39, %v19630_v43  ;;  %v25037_v39 = vld [vmem:[%s34571_s5 + $0x10] sm:$0xff]  ;;  %v25038_v20 = vld [vmem:[%s34571_s5 + $0x18] sm:$0xff] }
 0x529   : > { %v19632_v49 = vmul.f32 0.01, %v19624_v58  ;;  %v19627_v51 = vadd.f32 %v27966_v25, %v19620_v23  ;;  %v31582_v14 = vmax.f32 %v19623_v41, %v19631_v47 }
 0x52a   : > { %v19633_v44 = vmul.f32 0.01, %v19625_v24  ;;  %v19634_v61 = vmul.f32 0.01, %v19626_v50  ;;  %v19597_v7 = vpop.f32.mrb[74].mxu1 }
 0x52b   : > { %v31576_v11 = vmax.f32 %v19624_v58, %v19632_v49  ;;  %v19635_v12 = vmul.f32 0.01, %v19627_v51  ;;  %v19628_v33 = vadd.f32 %v19620_v23, %v19597_v7  ;;  %v19599_v40 = vpop.f32.mrb[75].mxu1 }
 0x52c   : > { %v19641_v13 = vmax.f32 %v19625_v24, %v19633_v44  ;;  %v31580_v36 = vmax.f32 %v19626_v50, %v19634_v61  ;;  %v19629_v15 = vadd.f32 %v19620_v23, %v19599_v40 }
 0x52d   : > { %v31584_v29 = vmax.f32 %v19627_v51, %v19635_v12  ;;  %v19636_v3 = vmul.f32 0.01, %v19628_v33 }
 0x52e   : > { %v19637_v21 = vmul.f32 0.01, %v19629_v15  ;;  %v28433_v60 = vpack.i.bf16 %v19641_v13, %v31576_v11  ;;  %v28448_v45 = vpack.i.bf16 %v31580_v36, %v31578_v31  ;;  %v26965_v59 = vpack.c.bf16 %v31580_v36, %v31578_v31 }
 0x52f   : > { %v19644_v63 = vmax.f32 %v19628_v33, %v19636_v3  ;;  %v28443_v34 = vpack.i.bf16 %v31584_v29, %v31582_v14  ;;  %v26963_v28 = vpack.c.bf16 %v31584_v29, %v31582_v14 }
 0x530   : > { %v19645_v5 = vmax.f32 %v19629_v15, %v19637_v21  ;;  %28434 = vrot.lane.b32.xlu0 %v28433_v60, %s28641_s19 }
 0x531   : > { %v26969_v17 = vpack.c.bf16 %v19644_v63, %v31576_v11  ;;  %v19646_v11 = vld [vmem:[%s34571_s5] sm:$0xff] }
 0x532   : > { %v28438_v19 = vpack.i.bf16 %v19645_v5, %v19644_v63  ;;  %v26967_v32 = vpack.c.bf16 %v19645_v5, %v19641_v13 }
 0x534   : > { %28439 = vrot.lane.b32.xlu1 %v28438_v19, %s28641_s19  ;;  %28444 = vrot.lane.b32.xlu0 %v28443_v34, %s28641_s19 }
 0x538   : > { %28449 = vrot.lane.b32.xlu1 %v28448_v45, %s28641_s19  ;;  %28454 = vrot.lane.b32.xlu0 %v28433_v60, %s28645_s20 }
 0x53c   : > { %28459 = vrot.lane.b32.xlu1 %v28438_v19, %s28645_s20  ;;  %28464 = vrot.lane.b32.xlu0 %v28433_v60, %s28647_s0 }
 0x540   : > { %28474 = vrot.lane.b32.xlu1 %v28438_v19, %s28647_s0  ;;  %28469 = vrot.lane.b32.xlu0 %v28443_v34, %s28645_s20 }
 0x544   : > { %28479 = vrot.lane.b32.xlu1 %v28448_v45, %s28645_s20  ;;  %28484 = vrot.lane.b32.xlu0 %v28443_v34, %s28647_s0  ;;  %v19647_v34 = vld [vmem:[%s34571_s5 + $0x8] sm:$0xff] }
 0x548   : > { %28489 = vrot.lane.b32.xlu1 %v28448_v45, %s28647_s0  ;;  %20416 = vperm.xlu0 %28431, %v20412_v42  }
 0x54c   : > { %20421 = vperm.xlu1 %28432, %v20413_v2  }
 0x5a2   : > { %v28435_v55 = vpop.permute.xlu0 %28434 }
 0x5a3   : > { %v28437_v22 = vunpack.i.h.bf16 %v28435_v55  ;;  %v28436_v62 = vunpack.i.l.bf16 %v28435_v55 }
 0x5a5   : > { %v19677_v18 = vsel %vm16992_vm7, %v28436_v62, %v28437_v22 }
 0x5a6   : > { %v28440_v27 = vpop.permute.xlu1 %28439  ;;  %v28445_v54 = vpop.permute.xlu0 %28444 }
 0x5a7   : > { %v28442_v6 = vunpack.i.h.bf16 %v28440_v27  ;;  %v28441_v16 = vunpack.i.l.bf16 %v28440_v27  ;;  %v28447_v10 = vunpack.i.h.bf16 %v28445_v54  ;;  %v28446_v30 = vunpack.i.l.bf16 %v28445_v54 }
 0x5a9   : > { %v26959_v53 = vpack.c.bf16 %v28442_v6, %v28437_v22  ;;  %v19680_v35 = vsel %vm16992_vm7, %v28441_v16, %v28442_v6  ;;  %v19676_v37 = vsel %vm16992_vm7, %v28446_v30, %v28436_v62  ;;  %v19679_v8 = vsel %vm16992_vm7, %v28447_v10, %v28441_v16  ;;  %v25047_v62 = vld [vmem:[%s34571_s5 + $0x20] sm:$0xff]  ;;  %v20466_v16 = vld [vmem:[%s34573_s7 + $0x88] sm:$0xff] }
 0x5aa   : > { %v26961_v26 = vpack.c.bf16 %v19680_v35, %v19677_v18  ;;  %v28450_v48 = vpop.permute.xlu1 %28449  ;;  %v28455_v0 = vpop.permute.xlu0 %28454  ;;  %v26955_v56 = vpack.c.bf16 %v19679_v8, %v19676_v37  ;;  %v20465_v6 = vld [vmem:[%s34573_s7 + $0x80] sm:$0xff]  ;;  %v25048_v18 = vld [vmem:[%s34571_s5 + $0x28] sm:$0xff]  ;;  %v25093_v8 = vld [vmem:[%s34573_s7 + $0x298] sm:$0xff] }
 0x5ab   : > { %v28452_v4 = vunpack.i.h.bf16 %v28450_v48  ;;  %v28451_v38 = vunpack.i.l.bf16 %v28450_v48  ;;  %26960 = vmatprep.subr.bf16.mxu1 %v26959_v53  ;;  %v28457_v52 = vunpack.i.h.bf16 %v28455_v0  ;;  %v28456_v43 = vunpack.i.l.bf16 %v28455_v0  ;;  %v25053_v48 = vld [vmem:[%s34571_s5 + $0x30] sm:$0xff] }
 0x5ac   : > { %26956 = vmatprep.subr.bf16.mxu0 %v26955_v56  ;;  %26962 = vmatpush1.bf16.msra.mxu1 %v26961_v26  ;;  %v28653_v53 = vmov 0.0|0.0   ;;  %v26987_v35 = vpack.c.bf16 %v20466_v16, %v20465_v6  ;;  %v25094_v26 = vld [vmem:[%s34573_s7 + $0x2a0] sm:$0xff]  ;;  %v25095_v56 = vld [vmem:[%s34573_s7 + $0x2a8] sm:$0xff] }
 0x5ad   : > { %v19675_v41 = vsel %vm16992_vm7, %v28451_v38, %v28446_v30  ;;  %v19678_v46 = vsel %vm16992_vm7, %v28452_v4, %v28447_v10  ;;  %26968 = vmatprep.subr.bf16.mxu1 %v26967_v32  ;;  %v20031_v12 = vsel %vm18112_vm11, %v28456_v43, %v28457_v52  ;;  %v27079_v0 = vpack.c.bf16 %v25094_v26, %v25093_v8  ;;  %v20449_v4 = vld [vmem:[%s34573_s7] sm:$0xff]  ;;  %v20450_v38 = vld [vmem:[%s34573_s7 + $0x8] sm:$0xff] }
 0x5ae   : > { %v26957_v23 = vpack.c.bf16 %v19678_v46, %v19675_v41  ;;  %v28460_v57 = vpop.permute.xlu1 %28459  ;;  %v31623_v9 = vpop.permute.xlu0 %28464  ;;  %v20467_v41 = vld [vmem:[%s34573_s7 + $0x90] sm:$0xff]  ;;  %v20468_v46 = vld [vmem:[%s34573_s7 + $0x98] sm:$0xff]  ;;  %v25107_v6 = vld [vmem:[%s34573_s7 + $0x308] sm:$0xff] }
 0x5af   : > { %v28462_v25 = vunpack.i.h.bf16 %v28460_v57  ;;  %v28461_v58 = vunpack.i.l.bf16 %v28460_v57  ;;  %25041 = vmatmul.mubr.msk.f32.vlgmr.msra.gmra.mrb[76].mxu1 %vm19689_vm4, %v25037_v39  ;;  %v28467_v50 = vunpack.i.h.bf16 %v31623_v9  ;;  %v28466_v15 = vunpack.i.l.bf16 %v31623_v9  ;;  %v20461_v8 = vld [vmem:[%s34573_s7 + $0x60] sm:$0xff]  ;;  %v20462_v26 = vld [vmem:[%s34573_s7 + $0x68] sm:$0xff] }
 0x5b0   : > { %26958 = vmatpush1.bf16.msra.mxu0 %v26957_v23  ;;  %26970 = vmatpush1.bf16.msra.mxu1 %v26969_v17  ;;  %v25054_v23 = vld [vmem:[%s34571_s5 + $0x38] sm:$0xff]  ;;  %v26989_v57 = vpack.c.bf16 %v20450_v38, %v20449_v4  ;;  %v20479_v38 = vld [vmem:[%s34573_s7 + $0xf0] sm:$0xff] }
 0x5b1   : > { %v26975_v24 = vpack.c.bf16 %v28462_v25, %v28457_v52  ;;  %26964 = vmatprep.subr.bf16.mxu0 %v26963_v28  ;;  %19843 = vmatprep.mubr.f32.mxu1 %v28635_v1  ;;  %v20034_v51 = vsel %vm18112_vm11, %v28461_v58, %v28462_v25  ;;  %v20232_v27 = vsel %vm18486_vm13, %v28466_v15, %v28467_v50  ;;  %v25097_v52 = vld [vmem:[%s34573_s7 + $0x2b8] sm:$0xff] }
 0x5b2   : > { %v28475_v47 = vpop.permute.xlu1 %28474  ;;  %v28470_v49 = vpop.permute.xlu0 %28469  ;;  %v26977_v13 = vpack.c.bf16 %v20034_v51, %v20031_v12  ;;  %v26991_v25 = vpack.c.bf16 %v20468_v46, %v20467_v41  ;;  %v25099_v51 = vld [vmem:[%s34573_s7 + $0x2c8] sm:$0xff]  ;;  %v20471_v12 = vld [vmem:[%s34573_s7 + $0xb0] sm:$0xff] }
 0x5b3   : > { %v28477_v44 = vunpack.i.h.bf16 %v28475_v47  ;;  %v28472_v61 = vunpack.i.h.bf16 %v28470_v49  ;;  %v28471_v7 = vunpack.i.l.bf16 %v28470_v49  ;;  %25039 = vmatmul.mubr.msk.f32.vlgmr.msra.gmra.mrb[70].mxu0 %vm19689_vm4, %v25037_v39  ;;  %25042 = vmatmul.mubr.msk.f32.gmra.mrb[78].mxu1 %vm19689_vm4, %v25038_v20  ;;  %v28476_v14 = vunpack.i.l.bf16 %v28475_v47  ;;  %v25096_v39 = vld [vmem:[%s34573_s7 + $0x2b0] sm:$0xff] }
 0x5b4   : > { %26976 = vmatprep.subr.bf16.mxu1 %v26975_v24  ;;  %26966 = vmatpush1.bf16.msra.mxu0 %v26965_v59  ;;  %v27082_v9 = vpack.c.bf16 %v25096_v39, %v25095_v56  ;;  %v20469_v24 = vld [vmem:[%s34573_s7 + $0xa0] sm:$0xff]  ;;  %v20480_v39 = vld [vmem:[%s34573_s7 + $0xf8] sm:$0xff]  ;;  %v20463_v46 = vld [vmem:[%s34573_s7 + $0x70] sm:$0xff] }
 0x5b5   : > { %v26983_v33 = vpack.c.bf16 %v28477_v44, %v28467_v50  ;;  %19997 = vmatprep.mubr.f32.mxu1 %v28635_v1  ;;  %19766 = vmatprep.mubr.f32.mxu0 %v28635_v1  ;;  %v20030_v40 = vsel %vm18112_vm11, %v28471_v7, %v28456_v43  ;;  %v20033_v36 = vsel %vm18112_vm11, %v28472_v61, %v28461_v58  ;;  %v20451_v58 = vld [vmem:[%s34573_s7 + $0x10] sm:$0xff]  ;;  %v25098_v43 = vld [vmem:[%s34573_s7 + $0x2c0] sm:$0xff]  ;;  %v20470_v50 = vld [vmem:[%s34573_s7 + $0xa8] sm:$0xff] }
 0x5b6   : > { %v28480_v29 = vpop.permute.xlu1 %28479  ;;  %v28485_v31 = vpop.permute.xlu0 %28484  ;;  %v26971_v63 = vpack.c.bf16 %v20033_v36, %v20030_v40  ;;  %v20235_v42 = vsel %vm18486_vm13, %v28476_v14, %v28477_v44  ;;  %v27085_v49 = vpack.c.bf16 %v25098_v43, %v25097_v52  ;;  %v26995_v44 = vpack.c.bf16 %v20470_v50, %v20469_v24  ;;  %v25102_v36 = vld [vmem:[%s34573_s7 + $0x2e0] sm:$0xff] }
 0x5b7   : > { %v28482_v3 = vunpack.i.h.bf16 %v28480_v29  ;;  %v28481_v21 = vunpack.i.l.bf16 %v28480_v29  ;;  %v28487_v60 = vunpack.i.h.bf16 %v28485_v31  ;;  %v28486_v45 = vunpack.i.l.bf16 %v28485_v31  ;;  %25040 = vmatmul.mubr.msk.f32.gmra.mrb[72].mxu0 %vm19689_vm4, %v25038_v20  ;;  %25045 = vmatmul.mubr.msk.f32.vlgmr.msra.gmra.mrb[76].mxu1 %vm19689_vm4, %v19646_v11  ;;  %v20452_v20 = vld [vmem:[%s34573_s7 + $0x18] sm:$0xff]  ;;  %v20455_v29 = vld [vmem:[%s34573_s7 + $0x30] sm:$0xff]  ;;  %v25110_v56 = vld [vmem:[%s34573_s7 + $0x320] sm:$0xff] }
 0x5b8   : > { %26978 = vmatpush1.bf16.msra.mxu1 %v26977_v13  ;;  %20003 = vmatprep.mubr.f32.mxu1 %v28635_v1  ;;  %v26985_v54 = vpack.c.bf16 %v20235_v42, %v20232_v27  ;;  %v26993_v47 = vpack.c.bf16 %v20452_v20, %v20451_v58  ;;  %v20456_v31 = vld [vmem:[%s34573_s7 + $0x38] sm:$0xff]  ;;  %v25106_v42 = vld [vmem:[%s34573_s7 + $0x300] sm:$0xff]  ;;  %v20459_v27 = vld [vmem:[%s34573_s7 + $0x50] sm:$0xff]  ;;  %v27015_v41 = vpack.c.bf16 %v20480_v39, %v20479_v38 }
 0x5b9   : > { %v20029_v5 = vsel %vm18112_vm11, %v28481_v21, %v28471_v7  ;;  %v20032_v17 = vsel %vm18112_vm11, %v28482_v3, %v28472_v61  ;;  %26984 = vmatprep.subr.bf16.mxu1 %v26983_v33  ;;  %19920 = vmatprep.mubr.f32.mxu0 %v28635_v1  ;;  %v20231_v28 = vsel %vm18486_vm13, %v28486_v45, %v28466_v15  ;;  %v20453_v61 = vld [vmem:[%s34573_s7 + $0x20] sm:$0xff]  ;;  %v20454_v7 = vld [vmem:[%s34573_s7 + $0x28] sm:$0xff]  ;;  %v20472_v33 = vld [vmem:[%s34573_s7 + $0xb8] sm:$0xff] }
 0x5ba   : > { %v26973_v59 = vpack.c.bf16 %v20032_v17, %v20029_v5  ;;  %26972 = vmatprep.subr.bf16.mxu0 %v26971_v63  ;;  %v28490_v19 = vpop.permute.xlu1 %28489  ;;  %v20234_v32 = vsel %vm18486_vm13, %v28487_v60, %v28476_v14  ;;  %v26997_v40 = vpack.c.bf16 %v20454_v7, %v20453_v61  ;;  %v25101_v15 = vld [vmem:[%s34573_s7 + $0x2d8] sm:$0xff]  ;;  %v26999_v14 = vpack.c.bf16 %v20472_v33, %v20471_v12  ;;  %v20473_v3 = vld [vmem:[%s34573_s7 + $0xc0] sm:$0xff]  ;;  %v20474_v21 = vld [vmem:[%s34573_s7 + $0xc8] sm:$0xff] }
 0x5bb   : > { %v28492_v2 = vunpack.i.h.bf16 %v28490_v19  ;;  %v28491_v55 = vunpack.i.l.bf16 %v28490_v19  ;;  %25043 = vmatmul.mubr.msk.f32.vlgmr.msra.gmra.mrb[70].mxu0 %vm19689_vm4, %v19646_v11  ;;  %25046 = vmatmul.mubr.msk.f32.gmra.mrb[78].mxu1 %vm19689_vm4, %v19647_v34  ;;  %v26979_v22 = vpack.c.bf16 %v20234_v32, %v20231_v28  ;;  %v25100_v11 = vld [vmem:[%s34573_s7 + $0x2d0] sm:$0xff]  ;;  %v27003_v63 = vpack.c.bf16 %v20474_v21, %v20473_v3  ;;  %v20458_v5 = vld [vmem:[%s34573_s7 + $0x48] sm:$0xff]  ;;  %v25105_v32 = vld [vmem:[%s34573_s7 + $0x2f8] sm:$0xff] }
 0x5bc   : > { %26974 = vmatpush1.bf16.msra.mxu0 %v26973_v59  ;;  %19926 = vmatprep.mubr.f32.mxu0 %v28635_v1  ;;  %v27088_v13 = vpack.c.bf16 %v25100_v11, %v25099_v51  ;;  %v25103_v17 = vld [vmem:[%s34573_s7 + $0x2e8] sm:$0xff]  ;;  %v25104_v28 = vld [vmem:[%s34573_s7 + $0x2f0] sm:$0xff]  ;;  %v25147_v12 = vld [vmem:[%s34573_s7 + $0x438] sm:$0xff] }
 0x5bd   : > { %26980 = vmatprep.subr.bf16.mxu0 %v26979_v22  ;;  %20190 = vmatprep.mubr.f32.mxu1 %v28635_v1  ;;  %v20230_v10 = vsel %vm18486_vm13, %v28491_v55, %v28486_v45  ;;  %v20233_v30 = vsel %vm18486_vm13, %v28492_v2, %v28487_v60  ;;  %v27001_v60 = vpack.c.bf16 %v20456_v31, %v20455_v29  ;;  %v20475_v55 = vld [vmem:[%s34573_s7 + $0xd0] sm:$0xff]  ;;  %v20476_v22 = vld [vmem:[%s34573_s7 + $0xd8] sm:$0xff]  ;;  %v25156_v38 = vld [vmem:[%s34573_s7 + $0x480] sm:$0xff] }
 0x5be   : > { %v26981_v37 = vpack.c.bf16 %v20233_v30, %v20230_v10  ;;  %v27091_v45 = vpack.c.bf16 %v25102_v36, %v25101_v15  ;;  %v27094_v19 = vpack.c.bf16 %v25104_v28, %v25103_v17  ;;  %v27097_v2 = vpack.c.bf16 %v25106_v42, %v25105_v32  ;;  %v25108_v10 = vld [vmem:[%s34573_s7 + $0x310] sm:$0xff]  ;;  %v20481_v15 = vld [vmem:[%s34573_s7 + $0x100] sm:$0xff]  ;;  %v20484_v42 = vld [vmem:[%s34573_s7 + $0x118] sm:$0xff] }
 0x5bf   : > { %25044 = vmatmul.mubr.msk.f32.gmra.mrb[72].mxu0 %vm19689_vm4, %v19647_v34  ;;  %25051 = vmatmul.mubr.msk.f32.vlgmr.msra.gmra.mrb[76].mxu1 %vm19689_vm4, %v25047_v62  ;;  %v20457_v34 = vld [vmem:[%s34573_s7 + $0x40] sm:$0xff]  ;;  %v27100_v30 = vpack.c.bf16 %v25108_v10, %v25107_v6  ;;  %v25146_v11 = vld [vmem:[%s34573_s7 + $0x430] sm:$0xff]  ;;  %v25153_v10 = vld [vmem:[%s34573_s7 + $0x468] sm:$0xff] }
 0x5c0   : > { %26986 = vmatpush1.bf16.msra.mxu1 %v26985_v54  ;;  %20113 = vmatprep.mubr.f32.mxu0 %v28635_v1  ;;  %v27005_v59 = vpack.c.bf16 %v20458_v5, %v20457_v34  ;;  %v20460_v54 = vld [vmem:[%s34573_s7 + $0x58] sm:$0xff]  ;;  %v27138_v21 = vpack.c.bf16 %v25147_v12, %v25146_v11  ;;  %v25148_v34 = vld [vmem:[%s34573_s7 + $0x440] sm:$0xff]  ;;  %v25149_v5 = vld [vmem:[%s34573_s7 + $0x448] sm:$0xff] }
 0x5c1   : > { %20196 = vmatprep.mubr.f32.mxu1 %v28635_v1  ;;  %27078 = vmatprep.subr.bf16.mxu1 %v28653_v53  ;;  %v27009_v16 = vpack.c.bf16 %v20460_v54, %v20459_v27  ;;  %v20483_v32 = vld [vmem:[%s34573_s7 + $0x110] sm:$0xff]  ;;  %v20485_v27 = vld [vmem:[%s34573_s7 + $0x120] sm:$0xff]  ;;  %v20486_v54 = vld [vmem:[%s34573_s7 + $0x128] sm:$0xff] }
 0x5c2   : > { %v25157_v39 = vld [vmem:[%s34573_s7 + $0x488] sm:$0xff]  ;;  %v25162_v12 = vld [vmem:[%s34573_s7 + $0x4b0] sm:$0xff] }
 0x5c3   : > { %25049 = vmatmul.mubr.msk.f32.vlgmr.msra.gmra.mrb[70].mxu0 %vm19689_vm4, %v25047_v62  ;;  %25052 = vmatmul.mubr.msk.f32.gmra.mrb[78].mxu1 %vm19689_vm4, %v25048_v18  ;;  %v27007_v62 = vpack.c.bf16 %v20476_v22, %v20475_v55  ;;  %v25150_v55 = vld [vmem:[%s34573_s7 + $0x450] sm:$0xff]  ;;  %v25151_v22 = vld [vmem:[%s34573_s7 + $0x458] sm:$0xff] }
 0x5c4   : > { %26982 = vmatpush1.bf16.msra.mxu0 %v26981_v37  ;;  %20119 = vmatprep.mubr.f32.mxu0 %v28635_v1  ;;  %v27144_v6 = vpack.c.bf16 %v25151_v22, %v25150_v55  ;;  %v25202_v22 = vld [vmem:[%s34573_s7 + $0x5e0] sm:$0xff] }
 0x5c5   : > { %20391 = vmatprep.mubr.f32.mxu1 %v28635_v1  ;;  %26988 = vmatprep.subr.bf16.mxu0 %v26987_v35  ;;  %v20478_v35 = vld [vmem:[%s34573_s7 + $0xe8] sm:$0xff] }
 0x5c7   : > { %25050 = vmatmul.mubr.msk.f32.gmra.mrb[72].mxu0 %vm19689_vm4, %v25048_v18  ;;  %25057 = vmatmul.mubr.msk.f32.vlgmr.msra.gmra.mrb[76].mxu1 %vm19689_vm4, %v25053_v48  ;;  %v20477_v18 = vld [vmem:[%s34573_s7 + $0xe0] sm:$0xff]  ;;  %v20417_v52 = vpop.permute.xlu0 %20416 }
 0x5c8   : > { %20314 = vmatprep.mubr.f32.mxu0 %v28635_v1  ;;  %20397 = vmatprep.mubr.f32.mxu1 %v28635_v1  ;;  %v27011_v37 = vpack.c.bf16 %v20478_v35, %v20477_v18  ;;  %v20487_v18 = vld [vmem:[%s34573_s7 + $0x130] sm:$0xff]  ;;  %v20488_v35 = vld [vmem:[%s34573_s7 + $0x138] sm:$0xff] }
 0x5c9   : > { %27080 = vmatpush1.bf16.msra.mxu1 %v27079_v0  ;;  %v27013_v0 = vpack.c.bf16 %v20462_v26, %v20461_v8  ;;  %v25154_v8 = vld [vmem:[%s34573_s7 + $0x470] sm:$0xff]  ;;  %v25155_v26 = vld [vmem:[%s34573_s7 + $0x478] sm:$0xff] }
 0x5ca   : > { %27081 = vmatprep.subr.bf16.mxu1 %v28653_v53 }
 0x5cb   : > { %25055 = vmatmul.mubr.msk.f32.vlgmr.msra.gmra.mrb[70].mxu0 %vm19689_vm4, %v25053_v48  ;;  %25058 = vmatmul.mubr.msk.f32.gmra.mrb[78].mxu1 %vm19689_vm4, %v25054_v23  ;;  %v25109_v48 = vld [vmem:[%s34573_s7 + $0x318] sm:$0xff]  ;;  %v31879_v29 = vpop.permute.xlu1 %20421 }
 0x5cc   : > { %20320 = vmatprep.mubr.f32.mxu0 %v28635_v1  ;;  %26990 = vmatpush3.bf16.msra.mxu0 %v26989_v57  ;;  %v27103_v4 = vpack.c.bf16 %v25110_v56, %v25109_v48  ;;  %v27029_v48 = vpack.c.bf16 %v20488_v35, %v20487_v18  ;;  %v20490_v56 = vld [vmem:[%s34573_s7 + $0x148] sm:$0xff] }
 0x5cd   : > { %27083 = vmatpush1.bf16.msra.mxu1 %v27082_v9  ;;  %26992 = vmatprep.subr.bf16.mxu0 %v26991_v25  ;;  %v25111_v9 = vld [vmem:[%s34573_s7 + $0x328] sm:$0x1] }
 0x5ce   : > { %27084 = vmatprep.subr.bf16.mxu1 %v28653_v53  ;;  %v25063_v35 = vld [vmem:[%s34573_s7 + $0x1a8] sm:$0xff] }
 0x5cf   : > { %25056 = vmatmul.mubr.msk.f32.gmra.mrb[72].mxu0 %vm19689_vm4, %v25054_v23  ;;  %v20464_v23 = vld [vmem:[%s34573_s7 + $0x78] sm:$0xff] }
 0x5d0   : > { %26994 = vmatpush3.bf16.msra.mxu0 %v26993_v47  ;;  %v27017_v57 = vpack.c.bf16 %v20464_v23, %v20463_v46  ;;  %v20491_v46 = vld [vmem:[%s34573_s7 + $0x150] sm:$0xff]  ;;  %v20492_v23 = vld [vmem:[%s34573_s7 + $0x158] sm:$0xff] }
 0x5d1   : > { %27086 = vmatpush1.bf16.msra.mxu1 %v27085_v49  ;;  %26996 = vmatprep.subr.bf16.mxu0 %v26995_v44 }
 0x5d2   : > { %27087 = vmatprep.subr.bf16.mxu1 %v28653_v53 }
 0x5d4   : > { %26998 = vmatpush3.bf16.msra.mxu0 %v26997_v40 }
 0x5d5   : > { %27089 = vmatpush1.bf16.msra.mxu1 %v27088_v13  ;;  %27000 = vmatprep.subr.bf16.mxu0 %v26999_v14  ;;  %v20482_v14 = vld [vmem:[%s34573_s7 + $0x108] sm:$0xff] }
 0x5d6   : > { %27090 = vmatprep.subr.bf16.mxu1 %v28653_v53  ;;  %v27020_v28 = vpack.c.bf16 %v20482_v14, %v20481_v15  ;;  %v20497_v15 = vld [vmem:[%s34573_s7 + $0x180] sm:$0xff]  ;;  %v20498_v14 = vld [vmem:[%s34573_s7 + $0x188] sm:$0xff] }
 0x5d8   : > { %27002 = vmatpush3.bf16.msra.mxu0 %v27001_v60 }
 0x5d9   : > { %27092 = vmatpush1.bf16.msra.mxu1 %v27091_v45  ;;  %27004 = vmatprep.subr.bf16.mxu0 %v27003_v63 }
 0x5da   : > { %27093 = vmatprep.subr.bf16.mxu1 %v28653_v53 }
 0x5dc   : > { %27006 = vmatpush3.bf16.msra.mxu0 %v27005_v59 }
 0x5dd   : > { %27095 = vmatpush1.bf16.msra.mxu1 %v27094_v19  ;;  %27008 = vmatprep.subr.bf16.mxu0 %v27007_v62  ;;  %v27023_v62 = vpack.c.bf16 %v20484_v42, %v20483_v32  ;;  %v25061_v32 = vld [vmem:[%s34573_s7 + $0x198] sm:$0xff]  ;;  %v25062_v42 = vld [vmem:[%s34573_s7 + $0x1a0] sm:$0xff] }
 0x5de   : > { %27096 = vmatprep.subr.bf16.mxu1 %v28653_v53 }
 0x5e0   : > { %27010 = vmatpush3.bf16.msra.mxu0 %v27009_v16  ;;  %v25152_v16 = vld [vmem:[%s34573_s7 + $0x460] sm:$0xff] }
 0x5e1   : > { %27098 = vmatpush1.bf16.msra.mxu1 %v27097_v2  ;;  %27012 = vmatprep.subr.bf16.mxu0 %v27011_v37  ;;  %v27141_v2 = vpack.c.bf16 %v25149_v5, %v25148_v34  ;;  %v27147_v37 = vpack.c.bf16 %v25153_v10, %v25152_v16  ;;  %v20499_v34 = vld [vmem:[%s34573_s7 + $0x190] sm:$0x1]  ;;  %v25077_v5 = vld [vmem:[%s34573_s7 + $0x218] sm:$0xff]  ;;  %v27048_v16 = vpack.c.bf16 %v25062_v42, %v25061_v32  ;;  %v25090_v42 = vld [vmem:[%s34573_s7 + $0x280] sm:$0xff] }
 0x5e2   : > { %27099 = vmatprep.subr.bf16.mxu1 %v28653_v53  ;;  %v25089_v32 = vld [vmem:[%s34573_s7 + $0x278] sm:$0xff] }
 0x5e4   : > { %27014 = vmatpush3.bf16.msra.mxu0 %v27013_v0  ;;  %v20489_v0 = vld [vmem:[%s34573_s7 + $0x140] sm:$0xff] }
 0x5e5   : > { %27101 = vmatpush1.bf16.msra.mxu1 %v27100_v30  ;;  %27016 = vmatprep.subr.bf16.mxu0 %v27015_v41  ;;  %v27026_v30 = vpack.c.bf16 %v20486_v54, %v20485_v27  ;;  %v27032_v41 = vpack.c.bf16 %v20490_v56, %v20489_v0  ;;  %v25080_v27 = vld [vmem:[%s34573_s7 + $0x230] sm:$0xff]  ;;  %v25082_v0 = vld [vmem:[%s34573_s7 + $0x240] sm:$0xff] }
 0x5e6   : > { %27102 = vmatprep.subr.bf16.mxu1 %v28653_v53 }
 0x5e8   : > { %27018 = vmatpush3.bf16.msra.mxu0 %v27017_v57  ;;  %v27153_v57 = vpack.c.bf16 %v25157_v39, %v25156_v38  ;;  %v25065_v39 = vld [vmem:[%s34573_s7 + $0x1b8] sm:$0xff] }
 0x5e9   : > { %27104 = vmatpush1.bf16.msra.mxu1 %v27103_v4  ;;  %27019 = vmatprep.subr.bf16.mxu0 %v28653_v53  ;;  %v27150_v4 = vpack.c.bf16 %v25155_v26, %v25154_v8  ;;  %v25203_v8 = vld [vmem:[%s34573_s7 + $0x5e8] sm:$0xff]  ;;  %v25204_v26 = vld [vmem:[%s34573_s7 + $0x5f0] sm:$0xff] }
 0x5ea   : > { %20822 = vmatprep.subr.mxu1 %v28635_v1 }
 0x5ed   : > { %25112 = vmatpush1.msk.msra.mxu1 %vm20504_vm5, %v25111_v9  ;;  %v25158_v9 = vld [vmem:[%s34573_s7 + $0x490] sm:$0xff] }
 0x5ee   : > { %27137 = vmatprep.subr.bf16.mxu1 %v28653_v53 }
 0x69a   : > { %v20393_v25 = vpop.f32.mrb[76].mxu1 }
 0x69b   : > { %v20426_v58 = vadd.f32 %v20417_v52, %v20393_v25  ;;  %v20395_v20 = vpop.f32.mrb[77].mxu1  ;;  %v27035_v25 = vpack.c.bf16 %v20492_v23, %v20491_v46  ;;  %v25205_v46 = vld [vmem:[%s34573_s7 + $0x5f8] sm:$0xff]  ;;  %v25206_v23 = vld [vmem:[%s34573_s7 + $0x600] sm:$0xff] }
 0x69c   : > { %v20427_v43 = vadd.f32 %v20417_v52, %v20395_v20  ;;  %v20494_v20 = vld [vmem:[%s34573_s7 + $0x168] sm:$0xff] }
 0x69d   : > { %v20434_v24 = vmul.f32 0.01, %v20426_v58 }
 0x69e   : > { %v20435_v50 = vmul.f32 0.01, %v20427_v43  ;;  %v20316_v47 = vpop.f32.mrb[70].mxu0  ;;  %v31859_v49 = vpop.f32.mrb[78].mxu1 }
 0x69f   : > { %v31861_v51 = vmax.f32 %v20426_v58, %v20434_v24  ;;  %v20424_v44 = vadd.f32 %v20417_v52, %v20316_v47  ;;  %v20318_v61 = vpop.f32.mrb[71].mxu0  ;;  %v31863_v7 = vpop.f32.mrb[79].mxu1  ;;  %v20493_v58 = vld [vmem:[%s34573_s7 + $0x160] sm:$0xff] }
 0x6a0   : > { %v31871_v33 = vmax.f32 %v20427_v43, %v20435_v50  ;;  %v20425_v40 = vadd.f32 %v20417_v52, %v20318_v61  ;;  %v25159_v52 = vld [vmem:[%s34573_s7 + $0x498] sm:$0xff]  ;;  %v25160_v24 = vld [vmem:[%s34573_s7 + $0x4a0] sm:$0xff]  ;;  %v25161_v50 = vld [vmem:[%s34573_s7 + $0x4a8] sm:$0xff]  ;;  %v27038_v47 = vpack.c.bf16 %v20494_v20, %v20493_v58 }
 0x6a1   : > { %v20432_v13 = vmul.f32 0.01, %v20424_v44  ;;  %v20706_v63 = vrot.slane %v31861_v51, 1  ;;  %v27156_v43 = vpack.c.bf16 %v25159_v52, %v25158_v9  ;;  %v20496_v61 = vld [vmem:[%s34573_s7 + $0x178] sm:$0xff]  ;;  %v27159_v11 = vpack.c.bf16 %v25161_v50, %v25160_v24  ;;  %v25084_v9 = vld [vmem:[%s34573_s7 + $0x250] sm:$0xff]  ;;  %v25067_v20 = vld [vmem:[%s34573_s7 + $0x1c8] sm:$0xff] }
 0x6a2   : > { %v20433_v31 = vmul.f32 0.01, %v20425_v40  ;;  %v20322_v36 = vpop.f32.mrb[72].mxu0  ;;  %v20707_v3 = vrot.slane %v31871_v33, 1  ;;  %v20912_v19 = vrot.slane %v31871_v33, 2  ;;  %v20911_v55 = vrot.slane %v31861_v51, 2 }
 0x6a3   : > { %v31883_v60 = vadd.f32 %v31879_v29, %v20322_v36  ;;  %v31885_v45 = vpop.f32.mrb[73].mxu0  ;;  %v31897_v59 = vmax.f32 %v20424_v44, %v20432_v13  ;;  %v20495_v44 = vld [vmem:[%s34573_s7 + $0x170] sm:$0xff]  ;;  %v27044_v36 = vpack.c.bf16 %v20498_v14, %v20497_v15  ;;  %v25207_v24 = vld [vmem:[%s34573_s7 + $0x608] sm:$0xff]  ;;  %v25209_v15 = vld [vmem:[%s34573_s7 + $0x618] sm:$0xff] }
 0x6a4   : > { %v31894_v17 = vmax.f32 %v20425_v40, %v20433_v31  ;;  %25113 = vmatprep.mubr.msk.f32.mxu1 %vm20500_vm6, %v20707_v3  ;;  %v25163_v40 = vld [vmem:[%s34573_s7 + $0x4b8] sm:$0xff]  ;;  %v27041_v13 = vpack.c.bf16 %v20496_v61, %v20495_v44  ;;  %v25199_v3 = vld [vmem:[%s34573_s7 + $0x5c8] sm:$0xff]  ;;  %v25208_v50 = vld [vmem:[%s34573_s7 + $0x610] sm:$0xff] }
 0x6a5   : > { %20851 = vmatmul.mubr.f32.vlgmr.msra.gmra.mrb[80].mxu1 %v20706_v63  ;;  %v27162_v31 = vpack.c.bf16 %v25163_v40, %v25162_v12  ;;  %v25164_v63 = vld [vmem:[%s34573_s7 + $0x4c0] sm:$0x1]  ;;  %v25069_v40 = vld [vmem:[%s34573_s7 + $0x1d8] sm:$0xff] }
 0x6a6   : > { %27139 = vmatpush1.bf16.msra.mxu1 %v27138_v21  ;;  %20572 = vmatprep.mubr.f32.mxu0 %v31894_v17  ;;  %v25200_v21 = vld [vmem:[%s34573_s7 + $0x5d0] sm:$0xff]  ;;  %v20705_v10 = vrot.slane %v31894_v17, 1  ;;  %v25086_v44 = vld [vmem:[%s34573_s7 + $0x260] sm:$0xff] }
 0x6a7   : > { %25166 = vmatprep.mubr.msk.f32.mxu1 %vm20500_vm6, %v20912_v19  ;;  %20573 = vmatmul.mubr.f32.vlgmr.msra.gmra.mrb[74].mxu0 %v31897_v59  ;;  %v27197_v19 = vpack.c.bf16 %v25200_v21, %v25199_v3  ;;  %v25210_v14 = vld [vmem:[%s34573_s7 + $0x620] sm:$0xff] }
 0x6a8   : > { %27021 = vmatpush1.bf16.msra.mxu0 %v27020_v28  ;;  %25060 = vmatprep.mubr.msk.f32.mxu0 %vm20500_vm6, %v31871_v33  ;;  %v25078_v28 = vld [vmem:[%s34573_s7 + $0x220] sm:$0xff]  ;;  %v27212_v21 = vpack.c.bf16 %v25210_v14, %v25209_v15  ;;  %v25255_v15 = vld [vmem:[%s34573_s7 + $0x778] sm:$0xff]  ;;  %v21322_v14 = vrot.slane %v31871_v33, 4 }
 0x6a9   : > { %27140 = vmatprep.subr.bf16.mxu1 %v28653_v53  ;;  %27022 = vmatprep.subr.bf16.mxu0 %v28653_v53  ;;  %v27046_v54 = vpack.c.bf16 %v25078_v28, %v25077_v5  ;;  %v25072_v5 = vld [vmem:[%s34573_s7 + $0x1f0] sm:$0xff]  ;;  %v25211_v28 = vld [vmem:[%s34573_s7 + $0x628] sm:$0xff] }
 0x6aa   : > { %27142 = vmatpush1.bf16.msra.mxu1 %v27141_v2  ;;  %v25201_v2 = vld [vmem:[%s34573_s7 + $0x5d8] sm:$0xff] }
 0x6ab   : > { %27143 = vmatprep.subr.bf16.mxu1 %v28653_v53 }
 0x6ac   : > { %27024 = vmatpush1.bf16.msra.mxu0 %v27023_v62  ;;  %v25079_v62 = vld [vmem:[%s34573_s7 + $0x228] sm:$0xff] }
 0x6ad   : > { %27025 = vmatprep.subr.bf16.mxu0 %v28653_v53  ;;  %v27050_v18 = vpack.c.bf16 %v25080_v27, %v25079_v62  ;;  %v25073_v62 = vld [vmem:[%s34573_s7 + $0x1f8] sm:$0xff]  ;;  %v25074_v27 = vld [vmem:[%s34573_s7 + $0x200] sm:$0xff] }
 0x6ae   : > { %27145 = vmatpush1.bf16.msra.mxu1 %v27144_v6  ;;  %v21117_v6 = vrot.slane %v31871_v33, 3 }
 0x6af   : > { %27146 = vmatprep.subr.bf16.mxu1 %v28653_v53 }
 0x6b0   : > { %27027 = vmatpush1.bf16.msra.mxu0 %v27026_v30  ;;  %v27200_v30 = vpack.c.bf16 %v25202_v22, %v25201_v2  ;;  %v27070_v22 = vpack.c.bf16 %v25090_v42, %v25089_v32  ;;  %v25120_v42 = vld [vmem:[%s34573_s7 + $0x360] sm:$0xff] }
 0x6b1   : > { %27028 = vmatprep.subr.bf16.mxu0 %v28653_v53 }
 0x6b2   : > { %27148 = vmatpush1.bf16.msra.mxu1 %v27147_v37  ;;  %v25064_v37 = vld [vmem:[%s34573_s7 + $0x1b0] sm:$0xff] }
 0x6b3   : > { %27149 = vmatprep.subr.bf16.mxu1 %v28653_v53  ;;  %v27052_v56 = vpack.c.bf16 %v25064_v37, %v25063_v35  ;;  %v25075_v37 = vld [vmem:[%s34573_s7 + $0x208] sm:$0xff] }
 0x6b4   : > { %27030 = vmatpush1.bf16.msra.mxu0 %v27029_v48  ;;  %v25081_v48 = vld [vmem:[%s34573_s7 + $0x238] sm:$0xff] }
 0x6b5   : > { %27031 = vmatprep.subr.bf16.mxu0 %v28653_v53  ;;  %v27054_v38 = vpack.c.bf16 %v25082_v0, %v25081_v48  ;;  %v25216_v48 = vld [vmem:[%s34573_s7 + $0x650] sm:$0xff] }
 0x6b6   : > { %27151 = vmatpush1.bf16.msra.mxu1 %v27150_v4  ;;  %v27203_v4 = vpack.c.bf16 %v25204_v26, %v25203_v8  ;;  %v25076_v8 = vld [vmem:[%s34573_s7 + $0x210] sm:$0xff]  ;;  %v25215_v26 = vld [vmem:[%s34573_s7 + $0x648] sm:$0xff] }
 0x6b7   : > { %27152 = vmatprep.subr.bf16.mxu1 %v28653_v53  ;;  %v25130_v0 = vld [vmem:[%s34573_s7 + $0x3b0] sm:$0xff] }
 0x6b8   : > { %27033 = vmatpush1.bf16.msra.mxu0 %v27032_v41  ;;  %v25066_v41 = vld [vmem:[%s34573_s7 + $0x1c0] sm:$0xff] }
 0x6b9   : > { %27034 = vmatprep.subr.bf16.mxu0 %v28653_v53  ;;  %v27056_v52 = vpack.c.bf16 %v25066_v41, %v25065_v39  ;;  %v25114_v41 = vld [vmem:[%s34573_s7 + $0x330] sm:$0xff] }
 0x6ba   : > { %27154 = vmatpush1.bf16.msra.mxu1 %v27153_v57  ;;  %v25083_v57 = vld [vmem:[%s34573_s7 + $0x248] sm:$0xff] }
 0x6bb   : > { %27155 = vmatprep.subr.bf16.mxu1 %v28653_v53  ;;  %v27058_v58 = vpack.c.bf16 %v25084_v9, %v25083_v57  ;;  %v25133_v57 = vld [vmem:[%s34573_s7 + $0x3c8] sm:$0xff] }
 0x6bc   : > { %27036 = vmatpush1.bf16.msra.mxu0 %v27035_v25  ;;  %v27206_v25 = vpack.c.bf16 %v25206_v23, %v25205_v46  ;;  %v25115_v46 = vld [vmem:[%s34573_s7 + $0x338] sm:$0xff]  ;;  %v25132_v23 = vld [vmem:[%s34573_s7 + $0x3c0] sm:$0xff] }
 0x6bd   : > { %27037 = vmatprep.subr.bf16.mxu0 %v28653_v53  ;;  %v27107_v9 = vpack.c.bf16 %v25115_v46, %v25114_v41 }
 0x6be   : > { %27157 = vmatpush1.bf16.msra.mxu1 %v27156_v43  ;;  %v25068_v43 = vld [vmem:[%s34573_s7 + $0x1d0] sm:$0xff] }
 0x6bf   : > { %27158 = vmatprep.subr.bf16.mxu1 %v28653_v53  ;;  %v27060_v61 = vpack.c.bf16 %v25068_v43, %v25067_v20  ;;  %v27109_v20 = vpack.c.bf16 %v25133_v57, %v25132_v23  ;;  %v25116_v43 = vld [vmem:[%s34573_s7 + $0x340] sm:$0xff]  ;;  %v25262_v23 = vld [vmem:[%s34573_s7 + $0x7b0] sm:$0xff]  ;;  %v25263_v57 = vld [vmem:[%s34573_s7 + $0x7b8] sm:$0xff] }
 0x6c0   : > { %27039 = vmatpush1.bf16.msra.mxu0 %v27038_v47  ;;  %v25085_v47 = vld [vmem:[%s34573_s7 + $0x258] sm:$0xff] }
 0x6c1   : > { %27040 = vmatprep.subr.bf16.mxu0 %v28653_v53  ;;  %v27062_v12 = vpack.c.bf16 %v25086_v44, %v25085_v47  ;;  %v25217_v47 = vld [vmem:[%s34573_s7 + $0x658] sm:$0x1]  ;;  %v25134_v44 = vld [vmem:[%s34573_s7 + $0x3d0] sm:$0xff] }
 0x6c2   : > { %27160 = vmatpush1.bf16.msra.mxu1 %v27159_v11  ;;  %v27209_v11 = vpack.c.bf16 %v25208_v50, %v25207_v24  ;;  %v25117_v24 = vld [vmem:[%s34573_s7 + $0x348] sm:$0xff]  ;;  %v20910_v50 = vrot.slane %v31894_v17, 2 }
 0x6c3   : > { %27161 = vmatprep.subr.bf16.mxu1 %v28653_v53 }
 0x6c4   : > { %27042 = vmatpush1.bf16.msra.mxu0 %v27041_v13  ;;  %v25070_v13 = vld [vmem:[%s34573_s7 + $0x1e0] sm:$0xff] }
 0x6c5   : > { %27043 = vmatprep.subr.bf16.mxu0 %v28653_v53  ;;  %v27064_v3 = vpack.c.bf16 %v25070_v13, %v25069_v40  ;;  %v27111_v40 = vpack.c.bf16 %v25117_v24, %v25116_v43  ;;  %v25254_v13 = vld [vmem:[%s34573_s7 + $0x770] sm:$0xff]  ;;  %v27271_v43 = vpack.c.bf16 %v25263_v57, %v25262_v23  ;;  %v21527_v57 = vrot.slane %v31871_v33, 5 }
 0x6c6   : > { %27163 = vmatpush1.bf16.msra.mxu1 %v27162_v31  ;;  %v25087_v31 = vld [vmem:[%s34573_s7 + $0x268] sm:$0xff]  ;;  %v25192_v23 = vld [vmem:[%s34573_s7 + $0x590] sm:$0xff] }
 0x6c7   : > { %21027 = vmatprep.subr.mxu1 %v28635_v1 }
 0x6c8   : > { %27045 = vmatpush1.bf16.msra.mxu0 %v27044_v36  ;;  %v25088_v36 = vld [vmem:[%s34573_s7 + $0x270] sm:$0xff] }
 0x6c9   : > { %20614 = vmatprep.subr.mxu0 %v28635_v1 }
 0x6ca   : > { %25165 = vmatpush1.msk.msra.mxu1 %vm20504_vm5, %v25164_v63  ;;  %v27066_v63 = vpack.c.bf16 %v25088_v36, %v25087_v31  ;;  %v25118_v36 = vld [vmem:[%s34573_s7 + $0x350] sm:$0xff] }
 0x6cb   : > { %21056 = vmatmul.mubr.f32.vlgmr.msra.gmra.mrb[80].mxu1 %v20911_v55  ;;  %27196 = vmatprep.subr.bf16.mxu1 %v28653_v53 }
 0x6cc   : > { %25059 = vmatpush1.msk.msra.mxu0 %vm20504_vm5, %v20499_v34  ;;  %27198 = vmatpush1.bf16.msra.mxu1 %v27197_v19  ;;  %v25071_v34 = vld [vmem:[%s34573_s7 + $0x1e8] sm:$0xff]  ;;  %v25212_v19 = vld [vmem:[%s34573_s7 + $0x630] sm:$0xff] }
 0x6cd   : > { %25219 = vmatprep.mubr.msk.f32.mxu1 %vm20500_vm6, %v21117_v6  ;;  %20643 = vmatmul.mubr.f32.vlgmr.msra.gmra.mrb[76].mxu0 %v31861_v51  ;;  %v27068_v2 = vpack.c.bf16 %v25072_v5, %v25071_v34  ;;  %v27215_v55 = vpack.c.bf16 %v25212_v19, %v25211_v28  ;;  %v25214_v6 = vld [vmem:[%s34573_s7 + $0x640] sm:$0xff]  ;;  %v27259_v34 = vpack.c.bf16 %v25255_v15, %v25254_v13  ;;  %v25257_v19 = vld [vmem:[%s34573_s7 + $0x788] sm:$0xff] }
 0x6ce   : > { %27047 = vmatprep.subr.bf16.mxu0 %v27046_v54  ;;  %20780 = vmatprep.mubr.f32.mxu0 %v20705_v10  ;;  %v25213_v54 = vld [vmem:[%s34573_s7 + $0x638] sm:$0xff]  ;;  %v25092_v10 = vld [vmem:[%s34573_s7 + $0x290] sm:$0xff]  ;;  %v25256_v28 = vld [vmem:[%s34573_s7 + $0x780] sm:$0xff] }
 0x6cf   : > { %27049 = vmatpush3.bf16.msra.mxu0 %v27048_v16  ;;  %27199 = vmatprep.subr.bf16.mxu1 %v28653_v53  ;;  %v25091_v16 = vld [vmem:[%s34573_s7 + $0x288] sm:$0xff] }
 0x6d0   : > { %27201 = vmatpush1.bf16.msra.mxu1 %v27200_v30  ;;  %27051 = vmatprep.subr.bf16.mxu0 %v27050_v18  ;;  %v27072_v30 = vpack.c.bf16 %v25074_v27, %v25073_v62  ;;  %v27218_v18 = vpack.c.bf16 %v25214_v6, %v25213_v54  ;;  %v27074_v35 = vpack.c.bf16 %v25092_v10, %v25091_v16  ;;  %v25258_v54 = vld [vmem:[%s34573_s7 + $0x790] sm:$0xff]  ;;  %v25259_v6 = vld [vmem:[%s34573_s7 + $0x798] sm:$0xff] }
 0x6d1   : > { %27202 = vmatprep.subr.bf16.mxu1 %v28653_v53  ;;  %v27262_v62 = vpack.c.bf16 %v25257_v19, %v25256_v28  ;;  %v25122_v10 = vld [vmem:[%s34573_s7 + $0x370] sm:$0xff]  ;;  %v25268_v19 = vld [vmem:[%s34573_s7 + $0x7e0] sm:$0xff] }
 0x6d3   : > { %27053 = vmatpush3.bf16.msra.mxu0 %v27052_v56  ;;  %v25131_v56 = vld [vmem:[%s34573_s7 + $0x3b8] sm:$0xff] }
 0x6d4   : > { %27204 = vmatpush1.bf16.msra.mxu1 %v27203_v4  ;;  %27055 = vmatprep.subr.bf16.mxu0 %v27054_v38  ;;  %v27076_v4 = vpack.c.bf16 %v25076_v8, %v25075_v37  ;;  %v27221_v38 = vpack.c.bf16 %v25216_v48, %v25215_v26  ;;  %v27105_v39 = vpack.c.bf16 %v25131_v56, %v25130_v0  ;;  %v25260_v26 = vld [vmem:[%s34573_s7 + $0x7a0] sm:$0xff]  ;;  %v25261_v48 = vld [vmem:[%s34573_s7 + $0x7a8] sm:$0xff] }
 0x6d5   : > { %27205 = vmatprep.subr.bf16.mxu1 %v28653_v53  ;;  %v27265_v37 = vpack.c.bf16 %v25259_v6, %v25258_v54  ;;  %v25124_v56 = vld [vmem:[%s34573_s7 + $0x380] sm:$0xff]  ;;  %v27268_v41 = vpack.c.bf16 %v25261_v48, %v25260_v26  ;;  %v25188_v54 = vld [vmem:[%s34573_s7 + $0x570] sm:$0xff] }
 0x6d6   : > { %v25190_v26 = vld [vmem:[%s34573_s7 + $0x580] sm:$0xff] }
 0x6d7   : > { %27057 = vmatpush3.bf16.msra.mxu0 %v27056_v52  ;;  %v25252_v52 = vld [vmem:[%s34573_s7 + $0x760] sm:$0xff] }
 0x6d8   : > { %27207 = vmatpush1.bf16.msra.mxu1 %v27206_v25  ;;  %27059 = vmatprep.subr.bf16.mxu0 %v27058_v58  ;;  %v25253_v25 = vld [vmem:[%s34573_s7 + $0x768] sm:$0xff]  ;;  %v20704_v58 = vrot.slane %v31897_v59, 1 }
 0x6d9   : > { %27208 = vmatprep.subr.bf16.mxu1 %v28653_v53 }
 0x6db   : > { %27061 = vmatpush3.bf16.msra.mxu0 %v27060_v61  ;;  %v25135_v61 = vld [vmem:[%s34573_s7 + $0x3d8] sm:$0xff] }
 0x6dc   : > { %27210 = vmatpush1.bf16.msra.mxu1 %v27209_v11  ;;  %27063 = vmatprep.subr.bf16.mxu0 %v27062_v12  ;;  %v27256_v11 = vpack.c.bf16 %v25253_v25, %v25252_v52  ;;  %v21116_v12 = vrot.slane %v31861_v51, 3  ;;  %v27113_v31 = vpack.c.bf16 %v25135_v61, %v25134_v44  ;;  %v25126_v52 = vld [vmem:[%s34573_s7 + $0x390] sm:$0xff]  ;;  %v25127_v25 = vld [vmem:[%s34573_s7 + $0x398] sm:$0xff]  ;;  %v25128_v61 = vld [vmem:[%s34573_s7 + $0x3a0] sm:$0xff] }
 0x6dd   : > { %27211 = vmatprep.subr.bf16.mxu1 %v28653_v53  ;;  %v27131_v24 = vpack.c.bf16 %v25127_v25, %v25126_v52  ;;  %v25308_v52 = vld [vmem:[%s34573_s7 + $0x910] sm:$0xff] }
 0x6df   : > { %27065 = vmatpush3.bf16.msra.mxu0 %v27064_v3  ;;  %v25119_v3 = vld [vmem:[%s34573_s7 + $0x358] sm:$0xff] }
 0x6e0   : > { %27213 = vmatpush1.bf16.msra.mxu1 %v27212_v21  ;;  %27067 = vmatprep.subr.bf16.mxu0 %v27066_v63  ;;  %v25136_v21 = vld [vmem:[%s34573_s7 + $0x3e0] sm:$0xff]  ;;  %v25137_v63 = vld [vmem:[%s34573_s7 + $0x3e8] sm:$0xff]  ;;  %v27115_v5 = vpack.c.bf16 %v25119_v3, %v25118_v36 }
 0x6e1   : > { %27214 = vmatprep.subr.bf16.mxu1 %v28653_v53  ;;  %v27117_v32 = vpack.c.bf16 %v25137_v63, %v25136_v21  ;;  %v25167_v3 = vld [vmem:[%s34573_s7 + $0x4c8] sm:$0xff]  ;;  %v25168_v21 = vld [vmem:[%s34573_s7 + $0x4d0] sm:$0xff]  ;;  %v25185_v63 = vld [vmem:[%s34573_s7 + $0x558] sm:$0xff] }
 0x6e2   : > { %v27166_v28 = vpack.c.bf16 %v25168_v21, %v25167_v3  ;;  %v25312_v3 = vld [vmem:[%s34573_s7 + $0x930] sm:$0xff] }
 0x6e3   : > { %27069 = vmatpush3.bf16.msra.mxu0 %v27068_v2  ;;  %v25121_v2 = vld [vmem:[%s34573_s7 + $0x368] sm:$0xff] }
 0x6e4   : > { %27216 = vmatpush1.bf16.msra.mxu1 %v27215_v55  ;;  %27071 = vmatprep.subr.bf16.mxu0 %v27070_v22  ;;  %v25138_v55 = vld [vmem:[%s34573_s7 + $0x3f0] sm:$0xff]  ;;  %v25139_v22 = vld [vmem:[%s34573_s7 + $0x3f8] sm:$0xff]  ;;  %v27119_v27 = vpack.c.bf16 %v25121_v2, %v25120_v42  ;;  %v20909_v42 = vrot.slane %v31897_v59, 2 }
 0x6e5   : > { %27217 = vmatprep.subr.bf16.mxu1 %v28653_v53  ;;  %v27121_v16 = vpack.c.bf16 %v25139_v22, %v25138_v55  ;;  %v25169_v55 = vld [vmem:[%s34573_s7 + $0x4d8] sm:$0xff]  ;;  %v25170_v22 = vld [vmem:[%s34573_s7 + $0x4e0] sm:$0xff] }
 0x6e7   : > { %27073 = vmatpush3.bf16.msra.mxu0 %v27072_v30  ;;  %v25123_v30 = vld [vmem:[%s34573_s7 + $0x378] sm:$0xff] }
 0x6e8   : > { %27219 = vmatpush1.bf16.msra.mxu1 %v27218_v18  ;;  %27075 = vmatprep.subr.bf16.mxu0 %v27074_v35  ;;  %v25140_v18 = vld [vmem:[%s34573_s7 + $0x400] sm:$0xff]  ;;  %v25141_v35 = vld [vmem:[%s34573_s7 + $0x408] sm:$0xff]  ;;  %v27123_v8 = vpack.c.bf16 %v25123_v30, %v25122_v10 }
 0x6e9   : > { %27220 = vmatprep.subr.bf16.mxu1 %v28653_v53  ;;  %v27125_v0 = vpack.c.bf16 %v25141_v35, %v25140_v18  ;;  %v25171_v30 = vld [vmem:[%s34573_s7 + $0x4e8] sm:$0xff]  ;;  %v25172_v18 = vld [vmem:[%s34573_s7 + $0x4f0] sm:$0xff]  ;;  %v25305_v35 = vld [vmem:[%s34573_s7 + $0x8f8] sm:$0xff] }
 0x6ea   : > { %v27174_v48 = vpack.c.bf16 %v25172_v18, %v25171_v30  ;;  %v25316_v30 = vld [vmem:[%s34573_s7 + $0x950] sm:$0xff] }
 0x6eb   : > { %27077 = vmatpush3.bf16.msra.mxu0 %v27076_v4  ;;  %v25125_v4 = vld [vmem:[%s34573_s7 + $0x388] sm:$0xff] }
 0x6ec   : > { %27222 = vmatpush1.bf16.msra.mxu1 %v27221_v38  ;;  %27106 = vmatprep.subr.bf16.mxu0 %v27105_v39  ;;  %v25142_v38 = vld [vmem:[%s34573_s7 + $0x410] sm:$0xff]  ;;  %v25143_v39 = vld [vmem:[%s34573_s7 + $0x418] sm:$0xff]  ;;  %v27127_v46 = vpack.c.bf16 %v25125_v4, %v25124_v56  ;;  %v25174_v4 = vld [vmem:[%s34573_s7 + $0x500] sm:$0xff] }
 0x6ed   : > { %21232 = vmatprep.subr.mxu1 %v28635_v1  ;;  %v25173_v56 = vld [vmem:[%s34573_s7 + $0x4f8] sm:$0xff] }
 0x6ee   : > { %20781 = vmatmul.mubr.f32.vlgmr.msra.gmra.mrb[78].mxu0 %v20704_v58  ;;  %v25144_v58 = vld [vmem:[%s34573_s7 + $0x420] sm:$0xff]  ;;  %v27178_v25 = vpack.c.bf16 %v25174_v4, %v25173_v56  ;;  %v25317_v56 = vld [vmem:[%s34573_s7 + $0x958] sm:$0xff] }
 0x6ef   : > { %27108 = vmatpush3.bf16.msra.mxu0 %v27107_v9  ;;  %20985 = vmatprep.mubr.f32.mxu0 %v20910_v50  ;;  %v27129_v9 = vpack.c.bf16 %v25143_v39, %v25142_v38  ;;  %v25264_v50 = vld [vmem:[%s34573_s7 + $0x7c0] sm:$0xff]  ;;  %v21321_v38 = vrot.slane %v31861_v51, 4 }
 0x6f0   : > { %25218 = vmatpush1.msk.msra.mxu1 %vm20504_vm5, %v25217_v47  ;;  %27110 = vmatprep.subr.bf16.mxu0 %v27109_v20  ;;  %v25145_v20 = vld [vmem:[%s34573_s7 + $0x428] sm:$0xff]  ;;  %v25318_v4 = vld [vmem:[%s34573_s7 + $0x960] sm:$0xff] }
 0x6f1   : > { %21261 = vmatmul.mubr.f32.vlgmr.msra.gmra.mrb[80].mxu1 %v21116_v12  ;;  %27255 = vmatprep.subr.bf16.mxu1 %v28653_v53  ;;  %v25265_v47 = vld [vmem:[%s34573_s7 + $0x7c8] sm:$0xff]  ;;  %v27133_v44 = vpack.c.bf16 %v25145_v20, %v25144_v58 }
 0x6f2   : > { %27257 = vmatpush1.bf16.msra.mxu1 %v27256_v11  ;;  %25272 = vmatprep.mubr.msk.f32.mxu1 %vm20500_vm6, %v21322_v14  ;;  %v25129_v11 = vld [vmem:[%s34573_s7 + $0x3a8] sm:$0xff]  ;;  %v27274_v13 = vpack.c.bf16 %v25265_v47, %v25264_v50  ;;  %v25266_v14 = vld [vmem:[%s34573_s7 + $0x7d0] sm:$0xff]  ;;  %v25193_v50 = vld [vmem:[%s34573_s7 + $0x598] sm:$0xff] }
 0x6f3   : > { %27112 = vmatpush3.bf16.msra.mxu0 %v27111_v40  ;;  %27258 = vmatprep.subr.bf16.mxu1 %v28653_v53  ;;  %v25183_v12 = vld [vmem:[%s34573_s7 + $0x548] sm:$0xff]  ;;  %v25184_v40 = vld [vmem:[%s34573_s7 + $0x550] sm:$0xff]  ;;  %v27135_v15 = vpack.c.bf16 %v25129_v11, %v25128_v61  ;;  %v25194_v47 = vld [vmem:[%s34573_s7 + $0x5a0] sm:$0xff] }
 0x6f4   : > { %27114 = vmatprep.subr.bf16.mxu0 %v27113_v31  ;;  %v25267_v31 = vld [vmem:[%s34573_s7 + $0x7d8] sm:$0xff]  ;;  %v27164_v36 = vpack.c.bf16 %v25184_v40, %v25183_v12  ;;  %v25175_v20 = vld [vmem:[%s34573_s7 + $0x508] sm:$0xff]  ;;  %v25310_v61 = vld [vmem:[%s34573_s7 + $0x920] sm:$0xff]  ;;  %v27184_v12 = vpack.c.bf16 %v25194_v47, %v25193_v50 }
 0x6f5   : > { %v25177_v40 = vld [vmem:[%s34573_s7 + $0x518] sm:$0xff]  ;;  %v25224_v50 = vld [vmem:[%s34573_s7 + $0x680] sm:$0xff]  ;;  %v25225_v47 = vld [vmem:[%s34573_s7 + $0x688] sm:$0xff] }
 0x6f6   : > { %27260 = vmatpush1.bf16.msra.mxu1 %v27259_v34  ;;  %v25186_v34 = vld [vmem:[%s34573_s7 + $0x560] sm:$0xff] }
 0x6f7   : > { %27116 = vmatpush3.bf16.msra.mxu0 %v27115_v5  ;;  %27261 = vmatprep.subr.bf16.mxu1 %v28653_v53  ;;  %v27277_v5 = vpack.c.bf16 %v25267_v31, %v25266_v14  ;;  %v27168_v2 = vpack.c.bf16 %v25186_v34, %v25185_v63  ;;  %v25195_v14 = vld [vmem:[%s34573_s7 + $0x5a8] sm:$0xff]  ;;  %v25196_v31 = vld [vmem:[%s34573_s7 + $0x5b0] sm:$0xff] }
 0x6f8   : > { %27118 = vmatprep.subr.bf16.mxu0 %v27117_v32  ;;  %v25269_v32 = vld [vmem:[%s34573_s7 + $0x7e8] sm:$0xff]  ;;  %v27188_v63 = vpack.c.bf16 %v25196_v31, %v25195_v14  ;;  %v25226_v14 = vld [vmem:[%s34573_s7 + $0x690] sm:$0xff]  ;;  %v25227_v31 = vld [vmem:[%s34573_s7 + $0x698] sm:$0xff] }
 0x6f9   : > { %v27280_v6 = vpack.c.bf16 %v25269_v32, %v25268_v19  ;;  %v25179_v34 = vld [vmem:[%s34573_s7 + $0x528] sm:$0xff]  ;;  %v25197_v19 = vld [vmem:[%s34573_s7 + $0x5b8] sm:$0xff]  ;;  %v25198_v32 = vld [vmem:[%s34573_s7 + $0x5c0] sm:$0xff] }
 0x6fa   : > { %27263 = vmatpush1.bf16.msra.mxu1 %v27262_v62  ;;  %v21115_v62 = vrot.slane %v31894_v17, 3 }
 0x6fb   : > { %27120 = vmatpush3.bf16.msra.mxu0 %v27119_v27  ;;  %27264 = vmatprep.subr.bf16.mxu1 %v28653_v53  ;;  %v25187_v27 = vld [vmem:[%s34573_s7 + $0x568] sm:$0xff] }
 0x6fc   : > { %27122 = vmatprep.subr.bf16.mxu0 %v27121_v16  ;;  %v27170_v16 = vpack.c.bf16 %v25170_v22, %v25169_v55  ;;  %v27172_v10 = vpack.c.bf16 %v25188_v54, %v25187_v27  ;;  %v27192_v22 = vpack.c.bf16 %v25198_v32, %v25197_v19  ;;  %v25182_v27 = vld [vmem:[%s34573_s7 + $0x540] sm:$0xff]  ;;  %v25358_v19 = vld [vmem:[%s34573_s7 + $0xa90] sm:$0xff]  ;;  %v25359_v32 = vld [vmem:[%s34573_s7 + $0xa98] sm:$0xff] }
 0x6fe   : > { %27266 = vmatpush1.bf16.msra.mxu1 %v27265_v37  ;;  %v25306_v37 = vld [vmem:[%s34573_s7 + $0x900] sm:$0xff] }
 0x6ff   : > { %27124 = vmatpush3.bf16.msra.mxu0 %v27123_v8  ;;  %27267 = vmatprep.subr.bf16.mxu1 %v28653_v53  ;;  %v25189_v8 = vld [vmem:[%s34573_s7 + $0x578] sm:$0xff]  ;;  %v27315_v39 = vpack.c.bf16 %v25306_v37, %v25305_v35  ;;  %v25220_v37 = vld [vmem:[%s34573_s7 + $0x660] sm:$0xff] }
 0x700   : > { %27126 = vmatprep.subr.bf16.mxu0 %v27125_v0  ;;  %v25270_v0 = vld [vmem:[%s34573_s7 + $0x7f0] sm:$0x1] }
 0x702   : > { %27269 = vmatpush1.bf16.msra.mxu1 %v27268_v41  ;;  %v27176_v41 = vpack.c.bf16 %v25190_v26, %v25189_v8  ;;  %v25221_v8 = vld [vmem:[%s34573_s7 + $0x668] sm:$0xff] }
 0x703   : > { %27128 = vmatpush3.bf16.msra.mxu0 %v27127_v46  ;;  %27270 = vmatprep.subr.bf16.mxu1 %v28653_v53  ;;  %v25191_v46 = vld [vmem:[%s34573_s7 + $0x588] sm:$0xff] }
 0x704   : > { %27130 = vmatprep.subr.bf16.mxu0 %v27129_v9  ;;  %v25307_v9 = vld [vmem:[%s34573_s7 + $0x908] sm:$0xff]  ;;  %v27180_v58 = vpack.c.bf16 %v25192_v23, %v25191_v46  ;;  %v25222_v46 = vld [vmem:[%s34573_s7 + $0x670] sm:$0xff]  ;;  %v25223_v23 = vld [vmem:[%s34573_s7 + $0x678] sm:$0xff] }
 0x706   : > { %27272 = vmatpush1.bf16.msra.mxu1 %v27271_v43  ;;  %v25176_v43 = vld [vmem:[%s34573_s7 + $0x510] sm:$0xff] }
 0x707   : > { %27132 = vmatpush3.bf16.msra.mxu0 %v27131_v24  ;;  %27273 = vmatprep.subr.bf16.mxu1 %v28653_v53  ;;  %v27318_v24 = vpack.c.bf16 %v25308_v52, %v25307_v9  ;;  %v27182_v11 = vpack.c.bf16 %v25176_v43, %v25175_v20  ;;  %v27333_v9 = vpack.c.bf16 %v25318_v4, %v25317_v56  ;;  %v25240_v52 = vld [vmem:[%s34573_s7 + $0x700] sm:$0xff]  ;;  %v25320_v20 = vld [vmem:[%s34573_s7 + $0x970] sm:$0xff]  ;;  %v25233_v56 = vld [vmem:[%s34573_s7 + $0x6c8] sm:$0xff] }
 0x708   : > { %27134 = vmatprep.subr.bf16.mxu0 %v27133_v44  ;;  %v25309_v44 = vld [vmem:[%s34573_s7 + $0x918] sm:$0xff]  ;;  %v27229_v43 = vpack.c.bf16 %v25223_v23, %v25222_v46  ;;  %v25362_v4 = vld [vmem:[%s34573_s7 + $0xab0] sm:$0xff] }
 0x70a   : > { %27275 = vmatpush1.bf16.msra.mxu1 %v27274_v13  ;;  %v25178_v13 = vld [vmem:[%s34573_s7 + $0x520] sm:$0xff] }
 0x70b   : > { %27136 = vmatpush3.bf16.msra.mxu0 %v27135_v15  ;;  %27276 = vmatprep.subr.bf16.mxu1 %v28653_v53  ;;  %v27321_v15 = vpack.c.bf16 %v25310_v61, %v25309_v44  ;;  %v27186_v21 = vpack.c.bf16 %v25178_v13, %v25177_v40  ;;  %v25242_v61 = vld [vmem:[%s34573_s7 + $0x710] sm:$0xff]  ;;  %v25322_v40 = vld [vmem:[%s34573_s7 + $0x980] sm:$0xff]  ;;  %v27233_v13 = vpack.c.bf16 %v25225_v47, %v25224_v50 }
 0x70c   : > { %27165 = vmatprep.subr.bf16.mxu0 %v27164_v36  ;;  %v25311_v36 = vld [vmem:[%s34573_s7 + $0x928] sm:$0xff] }
 0x70e   : > { %20986 = vmatmul.mubr.f32.vlgmr.msra.gmra.mrb[80].mxu0 %v20909_v42  ;;  %27278 = vmatpush1.bf16.msra.mxu1 %v27277_v5  ;;  %v25180_v5 = vld [vmem:[%s34573_s7 + $0x530] sm:$0xff]  ;;  %v25313_v42 = vld [vmem:[%s34573_s7 + $0x938] sm:$0xff] }
 0x70f   : > { %27167 = vmatpush3.bf16.msra.mxu0 %v27166_v28  ;;  %21190 = vmatprep.mubr.f32.mxu0 %v21115_v62  ;;  %v27324_v28 = vpack.c.bf16 %v25312_v3, %v25311_v36  ;;  %v27190_v55 = vpack.c.bf16 %v25180_v5, %v25179_v34  ;;  %v25181_v62 = vld [vmem:[%s34573_s7 + $0x538] sm:$0xff]  ;;  %v25244_v3 = vld [vmem:[%s34573_s7 + $0x720] sm:$0xff] }
 0x710   : > { %27169 = vmatprep.subr.bf16.mxu0 %v27168_v2  ;;  %27279 = vmatprep.subr.bf16.mxu1 %v28653_v53  ;;  %v25314_v2 = vld [vmem:[%s34573_s7 + $0x940] sm:$0xff]  ;;  %v27194_v18 = vpack.c.bf16 %v25182_v27, %v25181_v62  ;;  %v27374_v62 = vpack.c.bf16 %v25359_v32, %v25358_v19  ;;  %v25230_v27 = vld [vmem:[%s34573_s7 + $0x6b0] sm:$0xff] }
 0x711   : > { %v27327_v54 = vpack.c.bf16 %v25314_v2, %v25313_v42  ;;  %v25228_v34 = vld [vmem:[%s34573_s7 + $0x6a0] sm:$0xff]  ;;  %v25246_v42 = vld [vmem:[%s34573_s7 + $0x730] sm:$0xff]  ;;  %v25247_v2 = vld [vmem:[%s34573_s7 + $0x738] sm:$0xff] }
 0x712   : > { %27281 = vmatpush1.bf16.msra.mxu1 %v27280_v6  ;;  %v25236_v6 = vld [vmem:[%s34573_s7 + $0x6e0] sm:$0xff] }
 0x713   : > { %27171 = vmatpush3.bf16.msra.mxu0 %v27170_v16  ;;  %21437 = vmatprep.subr.mxu1 %v28635_v1  ;;  %v25237_v16 = vld [vmem:[%s34573_s7 + $0x6e8] sm:$0xff]  ;;  %v25294_v19 = vld [vmem:[%s34573_s7 + $0x8a0] sm:$0xff] }
 0x714   : > { %27173 = vmatprep.subr.bf16.mxu0 %v27172_v10  ;;  %v25315_v10 = vld [vmem:[%s34573_s7 + $0x948] sm:$0xff]  ;;  %v27223_v35 = vpack.c.bf16 %v25237_v16, %v25236_v6  ;;  %v27243_v6 = vpack.c.bf16 %v25247_v2, %v25246_v42  ;;  %v25231_v16 = vld [vmem:[%s34573_s7 + $0x6b8] sm:$0xff] }
 0x715   : > { %v27330_v26 = vpack.c.bf16 %v25316_v30, %v25315_v10  ;;  %v25360_v10 = vld [vmem:[%s34573_s7 + $0xaa0] sm:$0xff]  ;;  %v25361_v30 = vld [vmem:[%s34573_s7 + $0xaa8] sm:$0xff] }
 0x716   : > { %25271 = vmatpush1.msk.msra.mxu1 %vm20504_vm5, %v25270_v0  ;;  %v25239_v0 = vld [vmem:[%s34573_s7 + $0x6f8] sm:$0xff] }
 0x717   : > { %27175 = vmatpush3.bf16.msra.mxu0 %v27174_v48  ;;  %21466 = vmatmul.mubr.f32.vlgmr.msra.gmra.mrb[80].mxu1 %v21321_v38  ;;  %v25238_v48 = vld [vmem:[%s34573_s7 + $0x6f0] sm:$0xff]  ;;  %v27225_v38 = vpack.c.bf16 %v25221_v8, %v25220_v37  ;;  %v21732_v37 = vrot.slane %v31871_v33, 6  ;;  %v27245_v8 = vpack.c.bf16 %v25231_v16, %v25230_v27  ;;  %v25371_v27 = vld [vmem:[%s34573_s7 + $0xaf8] sm:$0xff] }
 0x718   : > { %27314 = vmatprep.subr.bf16.mxu1 %v28653_v53  ;;  %25325 = vmatprep.mubr.msk.f32.mxu1 %vm20500_vm6, %v21527_v57  ;;  %v21320_v57 = vrot.slane %v31894_v17, 4 }
 0x719   : > { %27316 = vmatpush1.bf16.msra.mxu1 %v27315_v39  ;;  %27177 = vmatprep.subr.bf16.mxu0 %v27176_v41  ;;  %v21114_v39 = vrot.slane %v31897_v59, 3  ;;  %v27227_v41 = vpack.c.bf16 %v25239_v0, %v25238_v48  ;;  %v25232_v48 = vld [vmem:[%s34573_s7 + $0x6c0] sm:$0xff] }
 0x71a   : > { %27317 = vmatprep.subr.bf16.mxu1 %v28653_v53  ;;  %v27249_v46 = vpack.c.bf16 %v25233_v56, %v25232_v48  ;;  %v25298_v48 = vld [vmem:[%s34573_s7 + $0x8c0] sm:$0xff] }
 0x71b   : > { %27179 = vmatpush3.bf16.msra.mxu0 %v27178_v25  ;;  %v25241_v25 = vld [vmem:[%s34573_s7 + $0x708] sm:$0xff] }
 0x71c   : > { %27181 = vmatprep.subr.bf16.mxu0 %v27180_v58  ;;  %v25319_v58 = vld [vmem:[%s34573_s7 + $0x968] sm:$0xff] }
 0x71d   : > { %27319 = vmatpush1.bf16.msra.mxu1 %v27318_v24  ;;  %v27231_v24 = vpack.c.bf16 %v25241_v25, %v25240_v52  ;;  %v27336_v44 = vpack.c.bf16 %v25320_v20, %v25319_v58  ;;  %v25235_v52 = vld [vmem:[%s34573_s7 + $0x6d8] sm:$0xff]  ;;  %v25364_v25 = vld [vmem:[%s34573_s7 + $0xac0] sm:$0xff]  ;;  %v25365_v58 = vld [vmem:[%s34573_s7 + $0xac8] sm:$0xff] }
 0x71e   : > { %27320 = vmatprep.subr.bf16.mxu1 %v28653_v53  ;;  %v25289_v20 = vld [vmem:[%s34573_s7 + $0x878] sm:$0xff]  ;;  %v27383_v50 = vpack.c.bf16 %v25365_v58, %v25364_v25  ;;  %v25283_v58 = vld [vmem:[%s34573_s7 + $0x848] sm:$0xff] }
 0x71f   : > { %27183 = vmatpush3.bf16.msra.mxu0 %v27182_v11  ;;  %v25243_v11 = vld [vmem:[%s34573_s7 + $0x718] sm:$0xff] }
 0x720   : > { %27185 = vmatprep.subr.bf16.mxu0 %v27184_v12  ;;  %v25321_v12 = vld [vmem:[%s34573_s7 + $0x978] sm:$0xff] }
 0x721   : > { %27322 = vmatpush1.bf16.msra.mxu1 %v27321_v15  ;;  %v27235_v15 = vpack.c.bf16 %v25243_v11, %v25242_v61  ;;  %v27339_v36 = vpack.c.bf16 %v25322_v40, %v25321_v12  ;;  %v25274_v61 = vld [vmem:[%s34573_s7 + $0x800] sm:$0xff]  ;;  %v25366_v11 = vld [vmem:[%s34573_s7 + $0xad0] sm:$0xff]  ;;  %v25367_v12 = vld [vmem:[%s34573_s7 + $0xad8] sm:$0xff] }
 0x722   : > { %27323 = vmatprep.subr.bf16.mxu1 %v28653_v53  ;;  %v25291_v40 = vld [vmem:[%s34573_s7 + $0x888] sm:$0xff] }
 0x723   : > { %27187 = vmatpush3.bf16.msra.mxu0 %v27186_v21  ;;  %v25245_v21 = vld [vmem:[%s34573_s7 + $0x728] sm:$0xff] }
 0x724   : > { %27189 = vmatprep.subr.bf16.mxu0 %v27188_v63  ;;  %v27237_v63 = vpack.c.bf16 %v25227_v31, %v25226_v14  ;;  %v27239_v5 = vpack.c.bf16 %v25245_v21, %v25244_v3  ;;  %v21319_v14 = vrot.slane %v31897_v59, 4  ;;  %v27386_v31 = vpack.c.bf16 %v25367_v12, %v25366_v11  ;;  %v25275_v3 = vld [vmem:[%s34573_s7 + $0x808] sm:$0xff]  ;;  %v25276_v21 = vld [vmem:[%s34573_s7 + $0x810] sm:$0xff]  ;;  %v25285_v11 = vld [vmem:[%s34573_s7 + $0x858] sm:$0xff] }
 0x725   : > { %27325 = vmatpush1.bf16.msra.mxu1 %v27324_v28  ;;  %v25229_v28 = vld [vmem:[%s34573_s7 + $0x6a8] sm:$0xff]  ;;  %v27288_v32 = vpack.c.bf16 %v25276_v21, %v25275_v3  ;;  %v25286_v12 = vld [vmem:[%s34573_s7 + $0x860] sm:$0xff]  ;;  %v25413_v3 = vld [vmem:[%s34573_s7 + $0xc38] sm:$0xff] }
 0x726   : > { %27326 = vmatprep.subr.bf16.mxu1 %v28653_v53  ;;  %v25414_v21 = vld [vmem:[%s34573_s7 + $0xc40] sm:$0xff] }
 0x727   : > { %27191 = vmatpush3.bf16.msra.mxu0 %v27190_v55  ;;  %v25323_v55 = vld [vmem:[%s34573_s7 + $0x988] sm:$0x1] }
 0x728   : > { %27193 = vmatprep.subr.bf16.mxu0 %v27192_v22  ;;  %v27241_v22 = vpack.c.bf16 %v25229_v28, %v25228_v34  ;;  %v21525_v34 = vrot.slane %v31894_v17, 5  ;;  %v25293_v28 = vld [vmem:[%s34573_s7 + $0x898] sm:$0xff] }
 0x729   : > { %27328 = vmatpush1.bf16.msra.mxu1 %v27327_v54  ;;  %v21526_v54 = vrot.slane %v31861_v51, 5  ;;  %v27290_v2 = vpack.c.bf16 %v25294_v19, %v25293_v28  ;;  %v25288_v28 = vld [vmem:[%s34573_s7 + $0x870] sm:$0xff] }
 0x72a   : > { %27329 = vmatprep.subr.bf16.mxu1 %v28653_v53  ;;  %v25342_v19 = vld [vmem:[%s34573_s7 + $0xa10] sm:$0xff] }
 0x72b   : > { %27195 = vmatpush3.bf16.msra.mxu0 %v27194_v18  ;;  %v25248_v18 = vld [vmem:[%s34573_s7 + $0x740] sm:$0xff] }
 0x72c   : > { %27224 = vmatprep.subr.bf16.mxu0 %v27223_v35  ;;  %v25249_v35 = vld [vmem:[%s34573_s7 + $0x748] sm:$0xff] }
 0x72d   : > { %27331 = vmatpush1.bf16.msra.mxu1 %v27330_v26  ;;  %v27377_v26 = vpack.c.bf16 %v25361_v30, %v25360_v10  ;;  %v27247_v0 = vpack.c.bf16 %v25249_v35, %v25248_v18  ;;  %v25279_v18 = vld [vmem:[%s34573_s7 + $0x828] sm:$0xff]  ;;  %v25280_v35 = vld [vmem:[%s34573_s7 + $0x830] sm:$0xff] }
 0x72e   : > { %21191 = vmatmul.mubr.f32.vlgmr.msra.gmra.mrb[82].mxu0 %v21114_v39  ;;  %27332 = vmatprep.subr.bf16.mxu1 %v28653_v53  ;;  %v25250_v39 = vld [vmem:[%s34573_s7 + $0x750] sm:$0xff] }
 0x72f   : > { %27226 = vmatpush3.bf16.msra.mxu0 %v27225_v38  ;;  %21395 = vmatprep.mubr.f32.mxu0 %v21320_v57  ;;  %v25363_v38 = vld [vmem:[%s34573_s7 + $0xab8] sm:$0xff]  ;;  %v25234_v57 = vld [vmem:[%s34573_s7 + $0x6d0] sm:$0xff] }
 0x730   : > { %27228 = vmatprep.subr.bf16.mxu0 %v27227_v41  ;;  %v25251_v41 = vld [vmem:[%s34573_s7 + $0x758] sm:$0xff]  ;;  %v27380_v23 = vpack.c.bf16 %v25363_v38, %v25362_v4 }
 0x731   : > { %27334 = vmatpush1.bf16.msra.mxu1 %v27333_v9  ;;  %v27251_v9 = vpack.c.bf16 %v25251_v41, %v25250_v39  ;;  %v25281_v38 = vld [vmem:[%s34573_s7 + $0x838] sm:$0xff]  ;;  %v25282_v39 = vld [vmem:[%s34573_s7 + $0x840] sm:$0xff]  ;;  %v25374_v41 = vld [vmem:[%s34573_s7 + $0xb10] sm:$0xff] }
 0x732   : > { %27335 = vmatprep.subr.bf16.mxu1 %v28653_v53 }
 0x733   : > { %27230 = vmatpush3.bf16.msra.mxu0 %v27229_v43  ;;  %v25290_v43 = vld [vmem:[%s34573_s7 + $0x880] sm:$0xff] }
 0x734   : > { %27232 = vmatprep.subr.bf16.mxu0 %v27231_v24  ;;  %v27253_v24 = vpack.c.bf16 %v25235_v52, %v25234_v57  ;;  %v27282_v47 = vpack.c.bf16 %v25290_v43, %v25289_v20  ;;  %v25300_v57 = vld [vmem:[%s34573_s7 + $0x8d0] sm:$0xff]  ;;  %v25301_v43 = vld [vmem:[%s34573_s7 + $0x8d8] sm:$0xff] }
 0x735   : > { %27337 = vmatpush1.bf16.msra.mxu1 %v27336_v44  ;;  %v25273_v44 = vld [vmem:[%s34573_s7 + $0x7f8] sm:$0xff]  ;;  %v25284_v20 = vld [vmem:[%s34573_s7 + $0x850] sm:$0xff] }
 0x736   : > { %27338 = vmatprep.subr.bf16.mxu1 %v28653_v53 }
 0x737   : > { %27234 = vmatpush3.bf16.msra.mxu0 %v27233_v13  ;;  %v25292_v13 = vld [vmem:[%s34573_s7 + $0x890] sm:$0xff] }
 0x738   : > { %27236 = vmatprep.subr.bf16.mxu0 %v27235_v15  ;;  %v27284_v15 = vpack.c.bf16 %v25274_v61, %v25273_v44  ;;  %v25412_v44 = vld [vmem:[%s34573_s7 + $0xc30] sm:$0xff] }
 0x739   : > { %27340 = vmatpush1.bf16.msra.mxu1 %v27339_v36  ;;  %v27286_v36 = vpack.c.bf16 %v25292_v13, %v25291_v40  ;;  %v25376_v40 = vld [vmem:[%s34573_s7 + $0xb20] sm:$0x1]  ;;  %v25303_v13 = vld [vmem:[%s34573_s7 + $0x8e8] sm:$0xff] }
 0x73a   : > { %21642 = vmatprep.subr.mxu1 %v28635_v1 }
 0x73b   : > { %27238 = vmatpush3.bf16.msra.mxu0 %v27237_v63  ;;  %v25368_v63 = vld [vmem:[%s34573_s7 + $0xae0] sm:$0xff] }
 0x73c   : > { %27240 = vmatprep.subr.bf16.mxu0 %v27239_v5  ;;  %v25369_v5 = vld [vmem:[%s34573_s7 + $0xae8] sm:$0xff] }
 0x73d   : > { %25324 = vmatpush1.msk.msra.mxu1 %vm20504_vm5, %v25323_v55  ;;  %v27389_v42 = vpack.c.bf16 %v25369_v5, %v25368_v63  ;;  %v25277_v55 = vld [vmem:[%s34573_s7 + $0x818] sm:$0xff]  ;;  %v21937_v63 = vrot.slane %v31871_v33, 7  ;;  %v25287_v5 = vld [vmem:[%s34573_s7 + $0x868] sm:$0xff] }
 0x73e   : > { %21671 = vmatmul.mubr.f32.vlgmr.msra.gmra.mrb[80].mxu1 %v21526_v54  ;;  %27373 = vmatprep.subr.bf16.mxu1 %v28653_v53  ;;  %v25295_v54 = vld [vmem:[%s34573_s7 + $0x8a8] sm:$0xff]  ;;  %v25343_v33 = vld [vmem:[%s34573_s7 + $0xa18] sm:$0xff] }
 0x73f   : > { %27242 = vmatpush3.bf16.msra.mxu0 %v27241_v22  ;;  %27375 = vmatpush1.bf16.msra.mxu1 %v27374_v62  ;;  %v25278_v22 = vld [vmem:[%s34573_s7 + $0x820] sm:$0xff]  ;;  %v25370_v62 = vld [vmem:[%s34573_s7 + $0xaf0] sm:$0xff] }
 0x740   : > { %25378 = vmatprep.mubr.msk.f32.mxu1 %vm20500_vm6, %v21732_v37  ;;  %27244 = vmatprep.subr.bf16.mxu0 %v27243_v6  ;;  %v25296_v6 = vld [vmem:[%s34573_s7 + $0x8b0] sm:$0xff]  ;;  %v27292_v16 = vpack.c.bf16 %v25278_v22, %v25277_v55  ;;  %v27392_v10 = vpack.c.bf16 %v25371_v27, %v25370_v62  ;;  %v25372_v37 = vld [vmem:[%s34573_s7 + $0xb00] sm:$0xff]  ;;  %v27341_v22 = vpack.c.bf16 %v25343_v33, %v25342_v19  ;;  %v25327_v27 = vld [vmem:[%s34573_s7 + $0x998] sm:$0xff] }
 0x741   : > { %27376 = vmatprep.subr.bf16.mxu1 %v28653_v53  ;;  %v27294_v30 = vpack.c.bf16 %v25296_v6, %v25295_v54  ;;  %v25416_v55 = vld [vmem:[%s34573_s7 + $0xc50] sm:$0xff]  ;;  %v25344_v54 = vld [vmem:[%s34573_s7 + $0xa20] sm:$0xff]  ;;  %v25345_v6 = vld [vmem:[%s34573_s7 + $0xa28] sm:$0xff] }
 0x742   : > { %v25326_v62 = vld [vmem:[%s34573_s7 + $0x990] sm:$0xff]  ;;  %v25426_v19 = vld [vmem:[%s34573_s7 + $0xca0] sm:$0xff] }
 0x743   : > { %27246 = vmatpush3.bf16.msra.mxu0 %v27245_v8  ;;  %27378 = vmatpush1.bf16.msra.mxu1 %v27377_v26  ;;  %v25373_v8 = vld [vmem:[%s34573_s7 + $0xb08] sm:$0xff]  ;;  %v25297_v26 = vld [vmem:[%s34573_s7 + $0x8b8] sm:$0xff] }
 0x744   : > { %27248 = vmatprep.subr.bf16.mxu0 %v27247_v0  ;;  %27379 = vmatprep.subr.bf16.mxu1 %v28653_v53  ;;  %v27296_v0 = vpack.c.bf16 %v25280_v35, %v25279_v18  ;;  %v27395_v56 = vpack.c.bf16 %v25373_v8, %v25372_v37  ;;  %v27298_v4 = vpack.c.bf16 %v25298_v48, %v25297_v26  ;;  %v25418_v18 = vld [vmem:[%s34573_s7 + $0xc60] sm:$0xff]  ;;  %v21524_v35 = vrot.slane %v31897_v59, 5  ;;  %v25329_v26 = vld [vmem:[%s34573_s7 + $0x9a8] sm:$0xff] }
 0x745   : > { %v27345_v37 = vpack.c.bf16 %v25345_v6, %v25344_v54  ;;  %v25328_v8 = vld [vmem:[%s34573_s7 + $0x9a0] sm:$0xff]  ;;  %v21730_v48 = vrot.slane %v31894_v17, 6  ;;  %v25427_v54 = vld [vmem:[%s34573_s7 + $0xca8] sm:$0xff]  ;;  %v25428_v6 = vld [vmem:[%s34573_s7 + $0xcb0] sm:$0xff] }
 0x747   : > { %27250 = vmatpush3.bf16.msra.mxu0 %v27249_v46  ;;  %27381 = vmatpush1.bf16.msra.mxu1 %v27380_v23  ;;  %v25375_v46 = vld [vmem:[%s34573_s7 + $0xb18] sm:$0xff]  ;;  %v25299_v23 = vld [vmem:[%s34573_s7 + $0x8c8] sm:$0xff] }
 0x748   : > { %27252 = vmatprep.subr.bf16.mxu0 %v27251_v9  ;;  %27382 = vmatprep.subr.bf16.mxu1 %v28653_v53  ;;  %v27300_v9 = vpack.c.bf16 %v25282_v39, %v25281_v38  ;;  %v27398_v52 = vpack.c.bf16 %v25375_v46, %v25374_v41  ;;  %v27302_v25 = vpack.c.bf16 %v25300_v57, %v25299_v23  ;;  %v25419_v39 = vld [vmem:[%s34573_s7 + $0xc68] sm:$0xff]  ;;  %v25420_v41 = vld [vmem:[%s34573_s7 + $0xc70] sm:$0xff]  ;;  %v25331_v57 = vld [vmem:[%s34573_s7 + $0x9b8] sm:$0xff] }
 0x749   : > { %v27347_v38 = vpack.c.bf16 %v25329_v26, %v25328_v8  ;;  %v25330_v23 = vld [vmem:[%s34573_s7 + $0x9b0] sm:$0xff]  ;;  %v20431_v8 = vadd.f32 %v31879_v29, %v31863_v7  ;;  %v25465_v7 = vld [vmem:[%s34573_s7 + $0xdc8] sm:$0xff] }
 0x74b   : > { %27254 = vmatpush3.bf16.msra.mxu0 %v27253_v24  ;;  %27384 = vmatpush1.bf16.msra.mxu1 %v27383_v50  ;;  %v25302_v24 = vld [vmem:[%s34573_s7 + $0x8e0] sm:$0xff]  ;;  %v27304_v50 = vpack.c.bf16 %v25284_v20, %v25283_v58  ;;  %v27351_v58 = vpack.c.bf16 %v25331_v57, %v25330_v23  ;;  %v25421_v20 = vld [vmem:[%s34573_s7 + $0xc78] sm:$0xff] }
 0x74c   : > { %27283 = vmatprep.subr.bf16.mxu0 %v27282_v47  ;;  %27385 = vmatprep.subr.bf16.mxu1 %v28653_v53  ;;  %v25411_v47 = vld [vmem:[%s34573_s7 + $0xc28] sm:$0xff]  ;;  %v27306_v61 = vpack.c.bf16 %v25302_v24, %v25301_v43  ;;  %v25422_v43 = vld [vmem:[%s34573_s7 + $0xc80] sm:$0xff] }
 0x74e   : > { %21396 = vmatmul.mubr.f32.vlgmr.msra.gmra.mrb[84].mxu0 %v21319_v14  ;;  %v27433_v14 = vpack.c.bf16 %v25412_v44, %v25411_v47  ;;  %v25333_v47 = vld [vmem:[%s34573_s7 + $0x9c8] sm:$0xff]  ;;  %v25350_v44 = vld [vmem:[%s34573_s7 + $0xa50] sm:$0xff] }
 0x74f   : > { %27285 = vmatpush3.bf16.msra.mxu0 %v27284_v15  ;;  %21600 = vmatprep.mubr.f32.mxu0 %v21525_v34  ;;  %v25304_v15 = vld [vmem:[%s34573_s7 + $0x8f0] sm:$0xff] }
 0x750   : > { %27387 = vmatpush1.bf16.msra.mxu1 %v27386_v31  ;;  %27287 = vmatprep.subr.bf16.mxu0 %v27286_v36  ;;  %v21731_v31 = vrot.slane %v31861_v51, 6  ;;  %v27308_v36 = vpack.c.bf16 %v25286_v12, %v25285_v11  ;;  %v27310_v34 = vpack.c.bf16 %v25304_v15, %v25303_v13  ;;  %v27448_v11 = vpack.c.bf16 %v25422_v43, %v25421_v20  ;;  %v25424_v13 = vld [vmem:[%s34573_s7 + $0xc90] sm:$0xff]  ;;  %v25467_v43 = vld [vmem:[%s34573_s7 + $0xdd8] sm:$0xff] }
 0x751   : > { %27388 = vmatprep.subr.bf16.mxu1 %v28653_v53  ;;  %v25466_v20 = vld [vmem:[%s34573_s7 + $0xdd0] sm:$0xff] }
 0x753   : > { %27289 = vmatpush3.bf16.msra.mxu0 %v27288_v32  ;;  %v27436_v32 = vpack.c.bf16 %v25414_v21, %v25413_v3  ;;  %v25353_v3 = vld [vmem:[%s34573_s7 + $0xa68] sm:$0xff] }
 0x754   : > { %27390 = vmatpush1.bf16.msra.mxu1 %v27389_v42  ;;  %27291 = vmatprep.subr.bf16.mxu0 %v27290_v2  ;;  %v27312_v42 = vpack.c.bf16 %v25288_v28, %v25287_v5  ;;  %v25415_v2 = vld [vmem:[%s34573_s7 + $0xc48] sm:$0xff]  ;;  %v25425_v28 = vld [vmem:[%s34573_s7 + $0xc98] sm:$0xff] }
 0x755   : > { %27391 = vmatprep.subr.bf16.mxu1 %v28653_v53 }
 0x757   : > { %27293 = vmatpush3.bf16.msra.mxu0 %v27292_v16  ;;  %v27439_v16 = vpack.c.bf16 %v25416_v55, %v25415_v2  ;;  %v25337_v2 = vld [vmem:[%s34573_s7 + $0x9e8] sm:$0xff]  ;;  %v25354_v55 = vld [vmem:[%s34573_s7 + $0xa70] sm:$0xff] }
 0x758   : > { %27393 = vmatpush1.bf16.msra.mxu1 %v27392_v10  ;;  %27295 = vmatprep.subr.bf16.mxu0 %v27294_v30  ;;  %v27343_v10 = vpack.c.bf16 %v25327_v27, %v25326_v62  ;;  %v25417_v30 = vld [vmem:[%s34573_s7 + $0xc58] sm:$0xff]  ;;  %v27454_v62 = vpack.c.bf16 %v25426_v19, %v25425_v28 }
 0x759   : > { %27394 = vmatprep.subr.bf16.mxu1 %v28653_v53  ;;  %v25471_v28 = vld [vmem:[%s34573_s7 + $0xdf8] sm:$0xff] }
 0x75a   : > { %v25401_v19 = vld [vmem:[%s34573_s7 + $0xbd8] sm:$0xff] }
 0x75b   : > { %27297 = vmatpush3.bf16.msra.mxu0 %v27296_v0  ;;  %v25346_v0 = vld [vmem:[%s34573_s7 + $0xa30] sm:$0xff] }
 0x75c   : > { %27396 = vmatpush1.bf16.msra.mxu1 %v27395_v56  ;;  %27299 = vmatprep.subr.bf16.mxu0 %v27298_v4  ;;  %v25347_v56 = vld [vmem:[%s34573_s7 + $0xa38] sm:$0xff]  ;;  %v27442_v4 = vpack.c.bf16 %v25418_v18, %v25417_v30  ;;  %v25356_v18 = vld [vmem:[%s34573_s7 + $0xa80] sm:$0xff] }
 0x75d   : > { %27397 = vmatprep.subr.bf16.mxu1 %v28653_v53  ;;  %v27349_v46 = vpack.c.bf16 %v25347_v56, %v25346_v0  ;;  %v25339_v30 = vld [vmem:[%s34573_s7 + $0x9f8] sm:$0xff]  ;;  %v25340_v0 = vld [vmem:[%s34573_s7 + $0xa00] sm:$0xff]  ;;  %v25341_v56 = vld [vmem:[%s34573_s7 + $0xa08] sm:$0xff] }
 0x75e   : > { %v27371_v23 = vpack.c.bf16 %v25341_v56, %v25340_v0  ;;  %v25406_v0 = vld [vmem:[%s34573_s7 + $0xc00] sm:$0xff] }
 0x75f   : > { %27301 = vmatpush3.bf16.msra.mxu0 %v27300_v9  ;;  %v25348_v9 = vld [vmem:[%s34573_s7 + $0xa40] sm:$0xff] }
 0x760   : > { %27399 = vmatpush1.bf16.msra.mxu1 %v27398_v52  ;;  %27303 = vmatprep.subr.bf16.mxu0 %v27302_v25  ;;  %v25349_v52 = vld [vmem:[%s34573_s7 + $0xa48] sm:$0xff]  ;;  %v27445_v25 = vpack.c.bf16 %v25420_v41, %v25419_v39  ;;  %v25396_v39 = vld [vmem:[%s34573_s7 + $0xbb0] sm:$0xff]  ;;  %v20439_v41 = vmul.f32 0.01, %v20431_v8 }
 0x761   : > { %21847 = vmatprep.subr.mxu1 %v28635_v1  ;;  %v27353_v24 = vpack.c.bf16 %v25349_v52, %v25348_v9  ;;  %v21936_v9 = vrot.slane %v31861_v51, 7  ;;  %v25397_v51 = vld [vmem:[%s34573_s7 + $0xbb8] sm:$0xff] }
 0x763   : > { %27305 = vmatpush3.bf16.msra.mxu0 %v27304_v50  ;;  %v25332_v50 = vld [vmem:[%s34573_s7 + $0x9c0] sm:$0xff] }
 0x764   : > { %25377 = vmatpush1.msk.msra.mxu1 %vm20504_vm5, %v25376_v40  ;;  %27307 = vmatprep.subr.bf16.mxu0 %v27306_v61  ;;  %v25351_v61 = vld [vmem:[%s34573_s7 + $0xa58] sm:$0xff]  ;;  %v27355_v12 = vpack.c.bf16 %v25333_v47, %v25332_v50  ;;  %v25423_v40 = vld [vmem:[%s34573_s7 + $0xc88] sm:$0xff]  ;;  %v32999_v50 = vmax.f32 %v20431_v8, %v20439_v41  ;;  %v25474_v8 = vld [vmem:[%s34573_s7 + $0xe10] sm:$0xff] }
 0x765   : > { %21876 = vmatmul.mubr.f32.vlgmr.msra.gmra.mrb[80].mxu1 %v21731_v31  ;;  %27432 = vmatprep.subr.bf16.mxu1 %v28653_v53  ;;  %v27357_v15 = vpack.c.bf16 %v25351_v61, %v25350_v44  ;;  %v25335_v31 = vld [vmem:[%s34573_s7 + $0x9d8] sm:$0xff]  ;;  %v21729_v44 = vrot.slane %v31897_v59, 6  ;;  %v27495_v61 = vpack.c.bf16 %v25467_v43, %v25466_v20  ;;  %v25390_v41 = vld [vmem:[%s34573_s7 + $0xb80] sm:$0xff] }
 0x766   : > { %27434 = vmatpush1.bf16.msra.mxu1 %v27433_v14  ;;  %25431 = vmatprep.mubr.msk.f32.mxu1 %vm20500_vm6, %v21937_v63  ;;  %v25334_v14 = vld [vmem:[%s34573_s7 + $0x9d0] sm:$0xff]  ;;  %v27451_v63 = vpack.c.bf16 %v25424_v13, %v25423_v40  ;;  %v25382_v40 = vld [vmem:[%s34573_s7 + $0xb40] sm:$0xff] }
 0x767   : > { %27309 = vmatpush3.bf16.msra.mxu0 %v27308_v36  ;;  %27435 = vmatprep.subr.bf16.mxu1 %v28653_v53  ;;  %v25352_v36 = vld [vmem:[%s34573_s7 + $0xa60] sm:$0xff]  ;;  %v27359_v5 = vpack.c.bf16 %v25335_v31, %v25334_v14  ;;  %v25469_v14 = vld [vmem:[%s34573_s7 + $0xde8] sm:$0xff] }
 0x768   : > { %27311 = vmatprep.subr.bf16.mxu0 %v27310_v34  ;;  %v25468_v13 = vld [vmem:[%s34573_s7 + $0xde0] sm:$0xff]  ;;  %v25399_v31 = vld [vmem:[%s34573_s7 + $0xbc8] sm:$0xff] }
 0x76a   : > { %27437 = vmatpush1.bf16.msra.mxu1 %v27436_v32  ;;  %v27361_v32 = vpack.c.bf16 %v25353_v3, %v25352_v36  ;;  %v25400_v36 = vld [vmem:[%s34573_s7 + $0xbd0] sm:$0xff] }
 0x76b   : > { %27313 = vmatpush3.bf16.msra.mxu0 %v27312_v42  ;;  %27438 = vmatprep.subr.bf16.mxu1 %v28653_v53  ;;  %v25336_v42 = vld [vmem:[%s34573_s7 + $0x9e0] sm:$0xff] }
 0x76c   : > { %27342 = vmatprep.subr.bf16.mxu0 %v27341_v22  ;;  %v25355_v22 = vld [vmem:[%s34573_s7 + $0xa78] sm:$0xff]  ;;  %v27363_v27 = vpack.c.bf16 %v25337_v2, %v25336_v42 }
 0x76e   : > { %27440 = vmatpush1.bf16.msra.mxu1 %v27439_v16  ;;  %21601 = vmatmul.mubr.f32.vlgmr.msra.gmra.mrb[86].mxu0 %v21524_v35  ;;  %v27365_v16 = vpack.c.bf16 %v25355_v22, %v25354_v55  ;;  %v25357_v35 = vld [vmem:[%s34573_s7 + $0xa88] sm:$0xff]  ;;  %v25385_v22 = vld [vmem:[%s34573_s7 + $0xb58] sm:$0xff] }
 0x76f   : > { %27344 = vmatpush3.bf16.msra.mxu0 %v27343_v10  ;;  %21805 = vmatprep.mubr.f32.mxu0 %v21730_v48  ;;  %v25338_v10 = vld [vmem:[%s34573_s7 + $0x9f0] sm:$0xff]  ;;  %v27369_v48 = vpack.c.bf16 %v25357_v35, %v25356_v18  ;;  %v25387_v35 = vld [vmem:[%s34573_s7 + $0xb68] sm:$0xff] }
 0x770   : > { %27441 = vmatprep.subr.bf16.mxu1 %v28653_v53  ;;  %27346 = vmatprep.subr.bf16.mxu0 %v27345_v37  ;;  %v27457_v37 = vpack.c.bf16 %v25428_v6, %v25427_v54  ;;  %v27367_v26 = vpack.c.bf16 %v25339_v30, %v25338_v10  ;;  %v25473_v54 = vld [vmem:[%s34573_s7 + $0xe08] sm:$0xff] }
 0x771   : > { %v25403_v6 = vld [vmem:[%s34573_s7 + $0xbe8] sm:$0xff] }
 0x772   : > { %27443 = vmatpush1.bf16.msra.mxu1 %v27442_v4  ;;  %v25464_v4 = vld [vmem:[%s34573_s7 + $0xdc0] sm:$0xff] }
 0x773   : > { %27348 = vmatpush3.bf16.msra.mxu0 %v27347_v38  ;;  %27444 = vmatprep.subr.bf16.mxu1 %v28653_v53  ;;  %v25395_v38 = vld [vmem:[%s34573_s7 + $0xba8] sm:$0xff]  ;;  %v27492_v57 = vpack.c.bf16 %v25465_v7, %v25464_v4  ;;  %v20448_v4 = vld [vmem:[%s34574_s8] sm:$0x1] }
 0x774   : > { %27350 = vmatprep.subr.bf16.mxu0 %v27349_v46  ;;  %v25429_v46 = vld [vmem:[%s34573_s7 + $0xcb8] sm:$0x1]  ;;  %v27400_v52 = vpack.c.bf16 %v25396_v39, %v25395_v38 }
 0x775   : > { %v25389_v39 = vld [vmem:[%s34573_s7 + $0xb78] sm:$0xff] }
 0x776   : > { %27446 = vmatpush1.bf16.msra.mxu1 %v27445_v25  ;;  %v25379_v25 = vld [vmem:[%s34573_s7 + $0xb28] sm:$0xff] }
 0x777   : > { %27352 = vmatpush3.bf16.msra.mxu0 %v27351_v58  ;;  %27447 = vmatprep.subr.bf16.mxu1 %v28653_v53  ;;  %v25380_v58 = vld [vmem:[%s34573_s7 + $0xb30] sm:$0xff] }
 0x778   : > { %27354 = vmatprep.subr.bf16.mxu0 %v27353_v24  ;;  %v25398_v24 = vld [vmem:[%s34573_s7 + $0xbc0] sm:$0xff]  ;;  %v27402_v47 = vpack.c.bf16 %v25380_v58, %v25379_v25  ;;  %v27422_v58 = vpack.c.bf16 %v25390_v41, %v25389_v39  ;;  %v25455_v39 = vld [vmem:[%s34573_s7 + $0xd78] sm:$0xff] }
 0x77a   : > { %27449 = vmatpush1.bf16.msra.mxu1 %v27448_v11  ;;  %v26024_v21 = vpop.f32.mrb[74].mxu0  ;;  %v27404_v11 = vpack.c.bf16 %v25398_v24, %v25397_v51 }
 0x77b   : > { %27356 = vmatpush3.bf16.msra.mxu0 %v27355_v12  ;;  %27450 = vmatprep.subr.bf16.mxu1 %v28653_v53  ;;  %v26025_v34 = vpop.f32.mrb[75].mxu0  ;;  %v25381_v12 = vld [vmem:[%s34573_s7 + $0xb38] sm:$0xff] }
 0x77c   : > { %v32921_v33 = vadd.f32 %v26025_v34, %v26024_v21  ;;  %27358 = vmatprep.subr.bf16.mxu0 %v27357_v15  ;;  %v21935_v15 = vrot.slane %v31894_v17, 7  ;;  %v27406_v3 = vpack.c.bf16 %v25382_v40, %v25381_v12  ;;  %v27498_v21 = vpack.c.bf16 %v25469_v14, %v25468_v13  ;;  %v25384_v34 = vld [vmem:[%s34573_s7 + $0xb50] sm:$0xff]  ;;  %v25410_v12 = vld [vmem:[%s34573_s7 + $0xc20] sm:$0xff]  ;;  %v25393_v14 = vld [vmem:[%s34573_s7 + $0xb98] sm:$0xff] }
 0x77d   : > { %v27408_v17 = vpack.c.bf16 %v25400_v36, %v25399_v31  ;;  %v25394_v31 = vld [vmem:[%s34573_s7 + $0xba0] sm:$0xff] }
 0x77e   : > { %27452 = vmatpush1.bf16.msra.mxu1 %v27451_v63  ;;  %v25383_v63 = vld [vmem:[%s34573_s7 + $0xb48] sm:$0xff]  ;;  %v25480_v36 = vld [vmem:[%s34573_s7 + $0xe40] sm:$0xff] }
 0x77f   : > { %27360 = vmatpush3.bf16.msra.mxu0 %v27359_v5  ;;  %27453 = vmatprep.subr.bf16.mxu1 %v28653_v53  ;;  %v25470_v5 = vld [vmem:[%s34573_s7 + $0xdf0] sm:$0xff]  ;;  %v27410_v42 = vpack.c.bf16 %v25384_v34, %v25383_v63  ;;  %v25449_v63 = vld [vmem:[%s34573_s7 + $0xd48] sm:$0xff]  ;;  %v20430_v34 = vadd.f32 %v31879_v29, %v31859_v49 }
 0x780   : > { %27362 = vmatprep.subr.bf16.mxu0 %v27361_v32  ;;  %v25402_v32 = vld [vmem:[%s34573_s7 + $0xbe0] sm:$0xff]  ;;  %v27501_v2 = vpack.c.bf16 %v25471_v28, %v25470_v5  ;;  %v27430_v5 = vpack.c.bf16 %v25394_v31, %v25393_v14  ;;  %v25450_v49 = vld [vmem:[%s34573_s7 + $0xd50] sm:$0xff]  ;;  %v25525_v14 = vld [vmem:[%s34573_s7 + $0xf98] sm:$0xff] }
 0x781   : > { %v27412_v55 = vpack.c.bf16 %v25402_v32, %v25401_v19  ;;  %v25432_v19 = vld [vmem:[%s34573_s7 + $0xcc0] sm:$0xff]  ;;  %v25433_v32 = vld [vmem:[%s34573_s7 + $0xcc8] sm:$0xff] }
 0x782   : > { %27455 = vmatpush1.bf16.msra.mxu1 %v27454_v62  ;;  %v25386_v62 = vld [vmem:[%s34573_s7 + $0xb60] sm:$0xff] }
 0x783   : > { %27364 = vmatpush3.bf16.msra.mxu0 %v27363_v27  ;;  %27456 = vmatprep.subr.bf16.mxu1 %v28653_v53  ;;  %v25472_v27 = vld [vmem:[%s34573_s7 + $0xe00] sm:$0xff]  ;;  %v27414_v10 = vpack.c.bf16 %v25386_v62, %v25385_v22  ;;  %v25517_v22 = vld [vmem:[%s34573_s7 + $0xf58] sm:$0xff] }
 0x784   : > { %27366 = vmatprep.subr.bf16.mxu0 %v27365_v16  ;;  %v25404_v16 = vld [vmem:[%s34573_s7 + $0xbf0] sm:$0xff]  ;;  %v27504_v30 = vpack.c.bf16 %v25473_v54, %v25472_v27  ;;  %v25518_v62 = vld [vmem:[%s34573_s7 + $0xf60] sm:$0xff]  ;;  %v21934_v27 = vrot.slane %v31897_v59, 7 }
 0x785   : > { %v27416_v18 = vpack.c.bf16 %v25404_v16, %v25403_v6  ;;  %v25434_v6 = vld [vmem:[%s34573_s7 + $0xcd0] sm:$0xff]  ;;  %v25435_v16 = vld [vmem:[%s34573_s7 + $0xcd8] sm:$0xff]  ;;  %v25452_v59 = vld [vmem:[%s34573_s7 + $0xd60] sm:$0xff] }
 0x786   : > { %27458 = vmatpush1.bf16.msra.mxu1 %v27457_v37  ;;  %v25388_v37 = vld [vmem:[%s34573_s7 + $0xb70] sm:$0xff]  ;;  %v25526_v31 = vld [vmem:[%s34573_s7 + $0xfa0] sm:$0xff] }
 0x787   : > { %27368 = vmatpush3.bf16.msra.mxu0 %v27367_v26  ;;  %22052 = vmatprep.subr.mxu1 %v28635_v1  ;;  %v25475_v26 = vld [vmem:[%s34573_s7 + $0xe18] sm:$0xff]  ;;  %v27418_v56 = vpack.c.bf16 %v25388_v37, %v25387_v35  ;;  %v27551_v35 = vpack.c.bf16 %v25518_v62, %v25517_v22 }
 0x788   : > { %27370 = vmatprep.subr.bf16.mxu0 %v27369_v48  ;;  %v25405_v48 = vld [vmem:[%s34573_s7 + $0xbf8] sm:$0xff]  ;;  %v27507_v7 = vpack.c.bf16 %v25475_v26, %v25474_v8  ;;  %v27465_v8 = vpack.c.bf16 %v25435_v16, %v25434_v6  ;;  %v25519_v26 = vld [vmem:[%s34573_s7 + $0xf68] sm:$0xff]  ;;  %v25530_v6 = vld [vmem:[%s34573_s7 + $0xfc0] sm:$0xff] }
 0x789   : > { %v27420_v38 = vpack.c.bf16 %v25406_v0, %v25405_v48  ;;  %v25520_v48 = vld [vmem:[%s34573_s7 + $0xf70] sm:$0xff]  ;;  %v22344_v0 = vrot.slane %v32999_v50, 1 }
 0x78a   : > { %25430 = vmatpush1.msk.msra.mxu1 %vm20504_vm5, %v25429_v46  ;;  %v25476_v46 = vld [vmem:[%s34573_s7 + $0xe20] sm:$0xff]  ;;  %v27554_v41 = vpack.c.bf16 %v25520_v48, %v25519_v26  ;;  %v25531_v48 = vld [vmem:[%s34573_s7 + $0xfc8] sm:$0xff] }
 0x78b   : > { %22081 = vmatmul.mubr.f32.vlgmr.msra.gmra.mrb[80].mxu1 %v21936_v9  ;;  %27491 = vmatprep.subr.bf16.mxu1 %v28653_v53  ;;  %v25408_v9 = vld [vmem:[%s34573_s7 + $0xc10] sm:$0xff] }
 0x78c   : > { %27372 = vmatpush3.bf16.msra.mxu0 %v27371_v23  ;;  %27493 = vmatpush1.bf16.msra.mxu1 %v27492_v57  ;;  %v25477_v23 = vld [vmem:[%s34573_s7 + $0xe28] sm:$0xff] }
 0x78d   : > { %25484 = vmatprep.mubr.msk.f32.mxu1 %vm20500_vm6, %v32999_v50  ;;  %27401 = vmatprep.subr.bf16.mxu0 %v27400_v52  ;;  %v25407_v57 = vld [vmem:[%s34573_s7 + $0xc08] sm:$0xff]  ;;  %v27967_v52 = vadd.f32 %v32921_v33, %v20448_v4  ;;  %v27510_v51 = vpack.c.bf16 %v25477_v23, %v25476_v46  ;;  %v25478_v33 = vld [vmem:[%s34573_s7 + $0xe30] sm:$0xff]  ;;  %v25436_v4 = vld [vmem:[%s34573_s7 + $0xce0] sm:$0xff] }
 0x78e   : > { %27494 = vmatprep.subr.bf16.mxu1 %v28653_v53  ;;  %v27424_v24 = vpack.c.bf16 %v25408_v9, %v25407_v57  ;;  %v25521_v23 = vld [vmem:[%s34573_s7 + $0xf78] sm:$0xff]  ;;  %v25522_v57 = vld [vmem:[%s34573_s7 + $0xf80] sm:$0xff] }
 0x78f   : > { %21806 = vmatmul.mubr.f32.vlgmr.msra.gmra.mrb[88].mxu0 %v21729_v44  ;;  %v25392_v44 = vld [vmem:[%s34573_s7 + $0xb90] sm:$0xff] }
 0x790   : > { %27403 = vmatpush3.bf16.msra.mxu0 %v27402_v47  ;;  %22010 = vmatprep.mubr.f32.mxu0 %v21935_v15  ;;  %v25391_v47 = vld [vmem:[%s34573_s7 + $0xb88] sm:$0xff] }
 0x791   : > { %27496 = vmatpush1.bf16.msra.mxu1 %v27495_v61  ;;  %27405 = vmatprep.subr.bf16.mxu0 %v27404_v11  ;;  %v25479_v61 = vld [vmem:[%s34573_s7 + $0xe38] sm:$0xff]  ;;  %v27426_v40 = vpack.c.bf16 %v25392_v44, %v25391_v47  ;;  %v25523_v47 = vld [vmem:[%s34573_s7 + $0xf88] sm:$0xff]  ;;  %v25524_v44 = vld [vmem:[%s34573_s7 + $0xf90] sm:$0xff] }
 0x792   : > { %27497 = vmatprep.subr.bf16.mxu1 %v28653_v53  ;;  %v25409_v11 = vld [vmem:[%s34573_s7 + $0xc18] sm:$0xff]  ;;  %v27513_v13 = vpack.c.bf16 %v25479_v61, %v25478_v33  ;;  %v25440_v61 = vld [vmem:[%s34573_s7 + $0xd00] sm:$0xff] }
 0x793   : > { %v27428_v15 = vpack.c.bf16 %v25410_v12, %v25409_v11  ;;  %v25441_v11 = vld [vmem:[%s34573_s7 + $0xd08] sm:$0xff]  ;;  %v25458_v12 = vld [vmem:[%s34573_s7 + $0xd90] sm:$0xff] }
 0x794   : > { %27407 = vmatpush3.bf16.msra.mxu0 %v27406_v3  ;;  %v20429_v3 = vadd.f32 %v31879_v29, %v31885_v45  ;;  %v25451_v29 = vld [vmem:[%s34573_s7 + $0xd58] sm:$0xff] }
 0x795   : > { %27499 = vmatpush1.bf16.msra.mxu1 %v27498_v21  ;;  %27409 = vmatprep.subr.bf16.mxu0 %v27408_v17  ;;  %v25481_v21 = vld [vmem:[%s34573_s7 + $0xe48] sm:$0xff]  ;;  %v25448_v17 = vld [vmem:[%s34573_s7 + $0xd40] sm:$0xff]  ;;  %v27463_v54 = vpack.c.bf16 %v25451_v29, %v25450_v49 }
 0x796   : > { %27500 = vmatprep.subr.bf16.mxu1 %v28653_v53  ;;  %v27516_v45 = vpack.c.bf16 %v25481_v21, %v25480_v36  ;;  %v27459_v28 = vpack.c.bf16 %v25449_v63, %v25448_v17  ;;  %v25443_v21 = vld [vmem:[%s34573_s7 + $0xd18] sm:$0xff]  ;;  %v25460_v17 = vld [vmem:[%s34573_s7 + $0xda0] sm:$0xff]  ;;  %v25461_v63 = vld [vmem:[%s34573_s7 + $0xda8] sm:$0xff] }
 0x797   : > { %v25445_v49 = vld [vmem:[%s34573_s7 + $0xd28] sm:$0xff] }
 0x798   : > { %27411 = vmatpush3.bf16.msra.mxu0 %v27410_v42  ;;  %v20437_v42 = vmul.f32 0.01, %v20429_v3 }
 0x799   : > { %27502 = vmatpush1.bf16.msra.mxu1 %v27501_v2  ;;  %27413 = vmatprep.subr.bf16.mxu0 %v27412_v55  ;;  %v20438_v2 = vmul.f32 0.01, %v20430_v34  ;;  %v27461_v55 = vpack.c.bf16 %v25433_v32, %v25432_v19  ;;  %v27483_v32 = vpack.c.bf16 %v25461_v63, %v25460_v17  ;;  %v25492_v63 = vld [vmem:[%s34573_s7 + $0xe90] sm:$0xff] }
 0x79a   : > { %27503 = vmatprep.subr.bf16.mxu1 %v28653_v53 }
 0x79b   : > { %v33187_v37 = vmax.f32 %v20430_v34, %v20438_v2  ;;  %v27563_v34 = vpack.c.bf16 %v25526_v31, %v25525_v14  ;;  %v25462_v2 = vld [vmem:[%s34573_s7 + $0xdb0] sm:$0xff]  ;;  %v25535_v14 = vld [vmem:[%s34573_s7 + $0xfe8] sm:$0x1] }
 0x79c   : > { %27415 = vmatpush3.bf16.msra.mxu0 %v27414_v10  ;;  %v33175_v10 = vmax.f32 %v20429_v3, %v20437_v42  ;;  %v25442_v3 = vld [vmem:[%s34573_s7 + $0xd10] sm:$0xff]  ;;  %v25444_v42 = vld [vmem:[%s34573_s7 + $0xd20] sm:$0xff] }
 0x79d   : > { %27505 = vmatpush1.bf16.msra.mxu1 %v27504_v30  ;;  %27417 = vmatprep.subr.bf16.mxu0 %v27416_v18  ;;  %v25482_v30 = vld [vmem:[%s34573_s7 + $0xe50] sm:$0x1]  ;;  %v25453_v18 = vld [vmem:[%s34573_s7 + $0xd68] sm:$0xff] }
 0x79e   : > { %27506 = vmatprep.subr.bf16.mxu1 %v28653_v53 }
 0x7a0   : > { %27419 = vmatpush3.bf16.msra.mxu0 %v27418_v56  ;;  %v20644_v25 = vpop.f32.mrb[76].mxu0  ;;  %v27467_v56 = vpack.c.bf16 %v25453_v18, %v25452_v59  ;;  %v25446_v59 = vld [vmem:[%s34573_s7 + $0xd30] sm:$0xff]  ;;  %v25447_v18 = vld [vmem:[%s34573_s7 + $0xd38] sm:$0xff] }
 0x7a1   : > { %27508 = vmatpush1.bf16.msra.mxu1 %v27507_v7  ;;  %v33105_v20 = vadd.f32 %v27967_v52, %v20644_v25  ;;  %v20646_v43 = vpop.f32.mrb[77].mxu0  ;;  %27421 = vmatprep.subr.bf16.mxu0 %v27420_v38  ;;  %v25437_v7 = vld [vmem:[%s34573_s7 + $0xce8] sm:$0xff]  ;;  %v25454_v38 = vld [vmem:[%s34573_s7 + $0xd70] sm:$0xff]  ;;  %v25439_v25 = vld [vmem:[%s34573_s7 + $0xcf8] sm:$0xff]  ;;  %v27489_v26 = vpack.c.bf16 %v25447_v18, %v25446_v59 }
 0x7a2   : > { %27509 = vmatprep.subr.bf16.mxu1 %v28653_v53  ;;  %v27469_v46 = vpack.c.bf16 %v25437_v7, %v25436_v4  ;;  %v27471_v9 = vpack.c.bf16 %v25455_v39, %v25454_v38  ;;  %v25438_v52 = vld [vmem:[%s34573_s7 + $0xcf0] sm:$0xff]  ;;  %v25457_v43 = vld [vmem:[%s34573_s7 + $0xd88] sm:$0xff]  ;;  %v25485_v7 = vld [vmem:[%s34573_s7 + $0xe58] sm:$0xff] }
 0x7a3   : > { %v25486_v38 = vld [vmem:[%s34573_s7 + $0xe60] sm:$0xff]  ;;  %v25503_v39 = vld [vmem:[%s34573_s7 + $0xee8] sm:$0xff]  ;;  %v25496_v18 = vld [vmem:[%s34573_s7 + $0xeb0] sm:$0xff] }
 0x7a4   : > { %27423 = vmatpush3.bf16.msra.mxu0 %v27422_v58  ;;  %v25456_v58 = vld [vmem:[%s34573_s7 + $0xd80] sm:$0xff] }
 0x7a5   : > { %27511 = vmatpush1.bf16.msra.mxu1 %v27510_v51  ;;  %27425 = vmatprep.subr.bf16.mxu0 %v27424_v24  ;;  %v27557_v51 = vpack.c.bf16 %v25522_v57, %v25521_v23  ;;  %v27473_v24 = vpack.c.bf16 %v25439_v25, %v25438_v52  ;;  %v27475_v33 = vpack.c.bf16 %v25457_v43, %v25456_v58  ;;  %v25533_v57 = vld [vmem:[%s34573_s7 + $0xfd8] sm:$0xff]  ;;  %v25487_v58 = vld [vmem:[%s34573_s7 + $0xe68] sm:$0xff]  ;;  %v25488_v43 = vld [vmem:[%s34573_s7 + $0xe70] sm:$0xff] }
 0x7a6   : > { %27512 = vmatprep.subr.bf16.mxu1 %v28653_v53  ;;  %v27520_v23 = vpack.c.bf16 %v25486_v38, %v25485_v7 }
 0x7a8   : > { %27427 = vmatpush3.bf16.msra.mxu0 %v27426_v40  ;;  %v25459_v40 = vld [vmem:[%s34573_s7 + $0xd98] sm:$0xff] }
 0x7a9   : > { %27514 = vmatpush1.bf16.msra.mxu1 %v27513_v13  ;;  %27429 = vmatprep.subr.bf16.mxu0 %v27428_v15  ;;  %v27560_v13 = vpack.c.bf16 %v25524_v44, %v25523_v47  ;;  %v27477_v15 = vpack.c.bf16 %v25441_v11, %v25440_v61  ;;  %v27479_v36 = vpack.c.bf16 %v25459_v40, %v25458_v12  ;;  %v25489_v61 = vld [vmem:[%s34573_s7 + $0xe78] sm:$0xff]  ;;  %v25490_v11 = vld [vmem:[%s34573_s7 + $0xe80] sm:$0xff]  ;;  %v25570_v12 = vld [vmem:[%s34573_s7 + $0x10f0] sm:$0xff] }
 0x7aa   : > { %27515 = vmatprep.subr.bf16.mxu1 %v28653_v53  ;;  %v27524_v44 = vpack.c.bf16 %v25488_v43, %v25487_v58  ;;  %v25571_v40 = vld [vmem:[%s34573_s7 + $0x10f8] sm:$0xff]  ;;  %v27528_v31 = vpack.c.bf16 %v25490_v11, %v25489_v61 }
 0x7ac   : > { %27431 = vmatpush3.bf16.msra.mxu0 %v27430_v5  ;;  %v27481_v5 = vpack.c.bf16 %v25443_v21, %v25442_v3  ;;  %v25491_v3 = vld [vmem:[%s34573_s7 + $0xe88] sm:$0xff]  ;;  %v22343_v21 = vrot.slane %v33187_v37, 1 }
 0x7ad   : > { %27517 = vmatpush1.bf16.msra.mxu1 %v27516_v45  ;;  %27460 = vmatprep.subr.bf16.mxu0 %v27459_v28  ;;  %v25527_v45 = vld [vmem:[%s34573_s7 + $0xfa8] sm:$0xff]  ;;  %v25528_v28 = vld [vmem:[%s34573_s7 + $0xfb0] sm:$0xff] }
 0x7ae   : > { %22251 = vmatprep.subr.mxu1 %v28635_v1  ;;  %v27566_v62 = vpack.c.bf16 %v25528_v28, %v25527_v45  ;;  %v25509_v45 = vld [vmem:[%s34573_s7 + $0xf18] sm:$0xff]  ;;  %v25510_v28 = vld [vmem:[%s34573_s7 + $0xf20] sm:$0xff] }
 0x7af   : > { %22011 = vmatmul.mubr.f32.vlgmr.msra.gmra.mrb[90].mxu0 %v21934_v27  ;;  %v27485_v27 = vpack.c.bf16 %v25445_v49, %v25444_v42  ;;  %v25493_v49 = vld [vmem:[%s34573_s7 + $0xe98] sm:$0xff] }
 0x7b0   : > { %27462 = vmatpush3.bf16.msra.mxu0 %v27461_v55  ;;  %22209 = vmatprep.mubr.f32.mxu0 %v33175_v10  ;;  %v25463_v55 = vld [vmem:[%s34573_s7 + $0xdb8] sm:$0xff] }
 0x7b1   : > { %25483 = vmatpush1.msk.msra.mxu1 %vm20504_vm5, %v25482_v30  ;;  %27464 = vmatprep.subr.bf16.mxu0 %v27463_v54  ;;  %v25529_v54 = vld [vmem:[%s34573_s7 + $0xfb8] sm:$0xff]  ;;  %v27487_v30 = vpack.c.bf16 %v25463_v55, %v25462_v2  ;;  %v25494_v2 = vld [vmem:[%s34573_s7 + $0xea0] sm:$0xff]  ;;  %v25574_v55 = vld [vmem:[%s34573_s7 + $0x1110] sm:$0xff] }
 0x7b2   : > { %22280 = vmatmul.mubr.f32.vlgmr.msra.gmra.mrb[80].mxu1 %v33187_v37  ;;  %27550 = vmatprep.subr.bf16.mxu1 %v28653_v53 }
 0x7b3   : > { %27552 = vmatpush1.bf16.msra.mxu1 %v27551_v35  ;;  %25537 = vmatprep.mubr.msk.f32.mxu1 %vm20500_vm6, %v22344_v0  ;;  %v25501_v35 = vld [vmem:[%s34573_s7 + $0xed8] sm:$0xff]  ;;  %v25532_v0 = vld [vmem:[%s34573_s7 + $0xfd0] sm:$0xff] }
 0x7b4   : > { %27466 = vmatpush3.bf16.msra.mxu0 %v27465_v8  ;;  %27553 = vmatprep.subr.bf16.mxu1 %v28653_v53  ;;  %v25502_v8 = vld [vmem:[%s34573_s7 + $0xee0] sm:$0xff] }
 0x7b5   : > { %27468 = vmatprep.subr.bf16.mxu0 %v27467_v56  ;;  %v20436_v56 = vmul.f32 0.01, %v31883_v60  ;;  %v27518_v4 = vpack.c.bf16 %v25502_v8, %v25501_v35  ;;  %v25576_v35 = vld [vmem:[%s34573_s7 + $0x1120] sm:$0xff]  ;;  %v25577_v8 = vld [vmem:[%s34573_s7 + $0x1128] sm:$0xff] }
 0x7b7   : > { %27555 = vmatpush1.bf16.msra.mxu1 %v27554_v41  ;;  %v25504_v41 = vld [vmem:[%s34573_s7 + $0xef0] sm:$0xff]  ;;  %v33339_v52 = vmax.f32 %v31883_v60, %v20436_v56  ;;  %v25506_v60 = vld [vmem:[%s34573_s7 + $0xf00] sm:$0xff]  ;;  %v27619_v56 = vpack.c.bf16 %v25577_v8, %v25576_v35  ;;  %v25545_v8 = vld [vmem:[%s34573_s7 + $0x1028] sm:$0xff] }
 0x7b8   : > { %27470 = vmatpush3.bf16.msra.mxu0 %v27469_v46  ;;  %27556 = vmatprep.subr.bf16.mxu1 %v28653_v53  ;;  %v27572_v46 = vpack.c.bf16 %v25532_v0, %v25531_v48  ;;  %v27522_v25 = vpack.c.bf16 %v25504_v41, %v25503_v39  ;;  %v25498_v39 = vld [vmem:[%s34573_s7 + $0xec0] sm:$0xff]  ;;  %v25578_v41 = vld [vmem:[%s34573_s7 + $0x1130] sm:$0xff] }
 0x7b9   : > { %27472 = vmatprep.subr.bf16.mxu0 %v27471_v9  ;;  %v25534_v9 = vld [vmem:[%s34573_s7 + $0xfe0] sm:$0xff] }
 0x7ba   : > { %v27575_v47 = vpack.c.bf16 %v25534_v9, %v25533_v57  ;;  %v25515_v57 = vld [vmem:[%s34573_s7 + $0xf48] sm:$0xff]  ;;  %v25516_v9 = vld [vmem:[%s34573_s7 + $0xf50] sm:$0xff]  ;;  %v25544_v35 = vld [vmem:[%s34573_s7 + $0x1020] sm:$0xff] }
 0x7bb   : > { %27558 = vmatpush1.bf16.msra.mxu1 %v27557_v51  ;;  %v22342_v51 = vrot.slane %v33175_v10, 1 }
 0x7bc   : > { %27474 = vmatpush3.bf16.msra.mxu0 %v27473_v24  ;;  %27559 = vmatprep.subr.bf16.mxu1 %v28653_v53  ;;  %v25505_v24 = vld [vmem:[%s34573_s7 + $0xef8] sm:$0xff] }
 0x7bd   : > { %27476 = vmatprep.subr.bf16.mxu0 %v27475_v33  ;;  %v27526_v33 = vpack.c.bf16 %v25506_v60, %v25505_v24  ;;  %v27546_v24 = vpack.c.bf16 %v25516_v9, %v25515_v57  ;;  %v25500_v60 = vld [vmem:[%s34573_s7 + $0xed0] sm:$0xff]  ;;  %v22548_v57 = vrot.slane %v33187_v37, 2 }
 0x7bf   : > { %27561 = vmatpush1.bf16.msra.mxu1 %v27560_v13  ;;  %v25507_v13 = vld [vmem:[%s34573_s7 + $0xf08] sm:$0xff] }
 0x7c0   : > { %27478 = vmatpush3.bf16.msra.mxu0 %v27477_v15  ;;  %27562 = vmatprep.subr.bf16.mxu1 %v28653_v53  ;;  %v25508_v15 = vld [vmem:[%s34573_s7 + $0xf10] sm:$0xff] }
 0x7c1   : > { %v26059_v19 = vpop.f32.mrb[78].mxu0  ;;  %27480 = vmatprep.subr.bf16.mxu0 %v27479_v36  ;;  %v27610_v36 = vpack.c.bf16 %v25571_v40, %v25570_v12  ;;  %v27530_v17 = vpack.c.bf16 %v25508_v15, %v25507_v13  ;;  %v25538_v40 = vld [vmem:[%s34573_s7 + $0xff0] sm:$0xff]  ;;  %v25539_v13 = vld [vmem:[%s34573_s7 + $0xff8] sm:$0xff] }
 0x7c2   : > { %v26060_v29 = vpop.f32.mrb[79].mxu0  ;;  %v25582_v15 = vld [vmem:[%s34573_s7 + $0x1150] sm:$0xff] }
 0x7c3   : > { %27564 = vmatpush1.bf16.msra.mxu1 %v27563_v34  ;;  %v26061_v22 = vadd.f32 %v26060_v29, %v26059_v19  ;;  %v25572_v34 = vld [vmem:[%s34573_s7 + $0x1100] sm:$0xff]  ;;  %v22549_v19 = vrot.slane %v32999_v50, 2  ;;  %v27534_v29 = vpack.c.bf16 %v25510_v28, %v25509_v45  ;;  %v22547_v28 = vrot.slane %v33175_v10, 2 }
 0x7c4   : > { %27482 = vmatpush3.bf16.msra.mxu0 %v27481_v5  ;;  %27565 = vmatprep.subr.bf16.mxu1 %v28653_v53  ;;  %v25573_v5 = vld [vmem:[%s34573_s7 + $0x1108] sm:$0xff]  ;;  %v25584_v45 = vld [vmem:[%s34573_s7 + $0x1160] sm:$0xff] }
 0x7c5   : > { %v33297_v16 = vadd.f32 %v33105_v20, %v26061_v22  ;;  %27484 = vmatprep.subr.bf16.mxu0 %v27483_v32  ;;  %v27569_v20 = vpack.c.bf16 %v25530_v6, %v25529_v54  ;;  %v27532_v32 = vpack.c.bf16 %v25492_v63, %v25491_v3  ;;  %v27613_v42 = vpack.c.bf16 %v25573_v5, %v25572_v34  ;;  %v25575_v22 = vld [vmem:[%s34573_s7 + $0x1118] sm:$0xff]  ;;  %v25540_v34 = vld [vmem:[%s34573_s7 + $0x1000] sm:$0xff]  ;;  %v25541_v5 = vld [vmem:[%s34573_s7 + $0x1008] sm:$0xff] }
 0x7c6   : > { %v27536_v54 = vpack.c.bf16 %v25494_v2, %v25493_v49  ;;  %v27616_v6 = vpack.c.bf16 %v25575_v22, %v25574_v55  ;;  %v27579_v3 = vpack.c.bf16 %v25539_v13, %v25538_v40  ;;  %v27583_v49 = vpack.c.bf16 %v25541_v5, %v25540_v34  ;;  %v25542_v55 = vld [vmem:[%s34573_s7 + $0x1010] sm:$0xff]  ;;  %v25543_v22 = vld [vmem:[%s34573_s7 + $0x1018] sm:$0xff] }
 0x7c7   : > { %27567 = vmatpush1.bf16.msra.mxu1 %v27566_v62  ;;  %v25511_v62 = vld [vmem:[%s34573_s7 + $0xf28] sm:$0xff]  ;;  %v25628_v40 = vld [vmem:[%s34573_s7 + $0x12b0] sm:$0xff]  ;;  %v25629_v5 = vld [vmem:[%s34573_s7 + $0x12b8] sm:$0xff] }
 0x7c8   : > { %27486 = vmatpush3.bf16.msra.mxu0 %v27485_v27  ;;  %27568 = vmatprep.subr.bf16.mxu1 %v28653_v53  ;;  %v25512_v27 = vld [vmem:[%s34573_s7 + $0xf30] sm:$0xff] }
 0x7c9   : > { %27488 = vmatprep.subr.bf16.mxu0 %v27487_v30  ;;  %v25495_v30 = vld [vmem:[%s34573_s7 + $0xea8] sm:$0xff]  ;;  %v27538_v59 = vpack.c.bf16 %v25512_v27, %v25511_v62  ;;  %v25586_v62 = vld [vmem:[%s34573_s7 + $0x1170] sm:$0xff]  ;;  %v25587_v27 = vld [vmem:[%s34573_s7 + $0x1178] sm:$0xff] }
 0x7ca   : > { %v27540_v0 = vpack.c.bf16 %v25496_v18, %v25495_v30  ;;  %v27587_v30 = vpack.c.bf16 %v25543_v22, %v25542_v55  ;;  %v25632_v55 = vld [vmem:[%s34573_s7 + $0x12d0] sm:$0xff] }
 0x7cb   : > { %27570 = vmatpush1.bf16.msra.mxu1 %v27569_v20  ;;  %v25513_v20 = vld [vmem:[%s34573_s7 + $0xf38] sm:$0xff] }
 0x7cc   : > { %27490 = vmatpush3.bf16.msra.mxu0 %v27489_v26  ;;  %27571 = vmatprep.subr.bf16.mxu1 %v28653_v53  ;;  %v25514_v26 = vld [vmem:[%s34573_s7 + $0xf40] sm:$0xff] }
 0x7cd   : > { %27519 = vmatprep.subr.bf16.mxu0 %v27518_v4  ;;  %v25497_v4 = vld [vmem:[%s34573_s7 + $0xeb8] sm:$0xff]  ;;  %v27542_v38 = vpack.c.bf16 %v25514_v26, %v25513_v20  ;;  %v25562_v20 = vld [vmem:[%s34573_s7 + $0x10b0] sm:$0xff] }
 0x7ce   : > { %v27544_v58 = vpack.c.bf16 %v25498_v39, %v25497_v4  ;;  %v25563_v26 = vld [vmem:[%s34573_s7 + $0x10b8] sm:$0xff]  ;;  %v25588_v39 = vld [vmem:[%s34573_s7 + $0x1180] sm:$0x1] }
 0x7cf   : > { %27573 = vmatpush1.bf16.msra.mxu1 %v27572_v46  ;;  %22210 = vmatmul.mubr.f32.vlgmr.msra.gmra.mrb[92].mxu0 %v33339_v52  ;;  %v25579_v46 = vld [vmem:[%s34573_s7 + $0x1138] sm:$0xff]  ;;  %v27593_v4 = vpack.c.bf16 %v25563_v26, %v25562_v20 }
 0x7d0   : > { %27521 = vmatpush3.bf16.msra.mxu0 %v27520_v23  ;;  %22417 = vmatprep.mubr.f32.mxu0 %v22342_v51  ;;  %v27622_v43 = vpack.c.bf16 %v25579_v46, %v25578_v41  ;;  %v25499_v51 = vld [vmem:[%s34573_s7 + $0xec8] sm:$0xff]  ;;  %v25564_v41 = vld [vmem:[%s34573_s7 + $0x10c0] sm:$0xff]  ;;  %v25593_v26 = vld [vmem:[%s34573_s7 + $0x1198] sm:$0xff] }
 0x7d1   : > { %27574 = vmatprep.subr.bf16.mxu1 %v28653_v53  ;;  %27523 = vmatprep.subr.bf16.mxu0 %v27522_v25  ;;  %v27548_v61 = vpack.c.bf16 %v25500_v60, %v25499_v51  ;;  %v25565_v46 = vld [vmem:[%s34573_s7 + $0x10c8] sm:$0xff]  ;;  %v22754_v51 = vrot.slane %v32999_v50, 3  ;;  %v25548_v60 = vld [vmem:[%s34573_s7 + $0x1040] sm:$0xff] }
 0x7d3   : > { %27576 = vmatpush1.bf16.msra.mxu1 %v27575_v47  ;;  %v25581_v47 = vld [vmem:[%s34573_s7 + $0x1148] sm:$0xff] }
 0x7d4   : > { %27525 = vmatpush3.bf16.msra.mxu0 %v27524_v44  ;;  %22459 = vmatprep.subr.mxu1 %v28635_v1  ;;  %v25554_v44 = vld [vmem:[%s34573_s7 + $0x1070] sm:$0xff] }
 0x7d5   : > { %27527 = vmatprep.subr.bf16.mxu0 %v27526_v33  ;;  %v25555_v33 = vld [vmem:[%s34573_s7 + $0x1078] sm:$0xff] }
 0x7d6   : > { %v27577_v12 = vpack.c.bf16 %v25555_v33, %v25554_v44  ;;  %v25567_v44 = vld [vmem:[%s34573_s7 + $0x10d8] sm:$0xff] }
 0x7d7   : > { %25536 = vmatpush1.msk.msra.mxu1 %vm20504_vm5, %v25535_v14  ;;  %v25583_v14 = vld [vmem:[%s34573_s7 + $0x1158] sm:$0xff] }
 0x7d8   : > { %22488 = vmatmul.mubr.f32.vlgmr.msra.gmra.mrb[80].mxu1 %v22343_v21  ;;  %27609 = vmatprep.subr.bf16.mxu1 %v28653_v53  ;;  %v22341_v21 = vrot.slane %v33339_v52, 1 }
 0x7d9   : > { %27529 = vmatpush3.bf16.msra.mxu0 %v27528_v31  ;;  %27611 = vmatpush1.bf16.msra.mxu1 %v27610_v36  ;;  %v25556_v31 = vld [vmem:[%s34573_s7 + $0x1080] sm:$0xff]  ;;  %v25557_v36 = vld [vmem:[%s34573_s7 + $0x1088] sm:$0xff] }
 0x7da   : > { %25590 = vmatprep.mubr.msk.f32.mxu1 %vm20500_vm6, %v22549_v19  ;;  %27531 = vmatprep.subr.bf16.mxu0 %v27530_v17  ;;  %v27628_v17 = vpack.c.bf16 %v25583_v14, %v25582_v15  ;;  %v27581_v63 = vpack.c.bf16 %v25557_v36, %v25556_v31  ;;  %v25585_v19 = vld [vmem:[%s34573_s7 + $0x1168] sm:$0xff]  ;;  %v25550_v14 = vld [vmem:[%s34573_s7 + $0x1050] sm:$0xff]  ;;  %v25551_v31 = vld [vmem:[%s34573_s7 + $0x1058] sm:$0xff] }
 0x7db   : > { %27612 = vmatprep.subr.bf16.mxu1 %v28653_v53  ;;  %v27603_v34 = vpack.c.bf16 %v25551_v31, %v25550_v14  ;;  %v25599_v14 = vld [vmem:[%s34573_s7 + $0x11c8] sm:$0xff]  ;;  %v25600_v31 = vld [vmem:[%s34573_s7 + $0x11d0] sm:$0xff] }
 0x7dd   : > { %27533 = vmatpush3.bf16.msra.mxu0 %v27532_v32  ;;  %27614 = vmatpush1.bf16.msra.mxu1 %v27613_v42  ;;  %v25558_v32 = vld [vmem:[%s34573_s7 + $0x1090] sm:$0xff]  ;;  %v25559_v42 = vld [vmem:[%s34573_s7 + $0x1098] sm:$0xff] }
 0x7de   : > { %27535 = vmatprep.subr.bf16.mxu0 %v27534_v29  ;;  %27615 = vmatprep.subr.bf16.mxu1 %v28653_v53  ;;  %v27631_v29 = vpack.c.bf16 %v25585_v19, %v25584_v45  ;;  %v27585_v2 = vpack.c.bf16 %v25559_v42, %v25558_v32  ;;  %v25630_v45 = vld [vmem:[%s34573_s7 + $0x12c0] sm:$0xff]  ;;  %v25607_v32 = vld [vmem:[%s34573_s7 + $0x1208] sm:$0xff]  ;;  %v25608_v42 = vld [vmem:[%s34573_s7 + $0x1210] sm:$0xff] }
 0x7df   : > { %v25552_v19 = vld [vmem:[%s34573_s7 + $0x1060] sm:$0xff]  ;;  %v27636_v22 = vpack.c.bf16 %v25608_v42, %v25607_v32  ;;  %v25620_v32 = vld [vmem:[%s34573_s7 + $0x1270] sm:$0xff] }
 0x7e1   : > { %27537 = vmatpush3.bf16.msra.mxu0 %v27536_v54  ;;  %27617 = vmatpush1.bf16.msra.mxu1 %v27616_v6  ;;  %v26094_v48 = vpop.f32.mrb[80].mxu0  ;;  %v25560_v54 = vld [vmem:[%s34573_s7 + $0x10a0] sm:$0xff]  ;;  %v25561_v6 = vld [vmem:[%s34573_s7 + $0x10a8] sm:$0xff] }
 0x7e2   : > { %v26095_v7 = vpop.f32.mrb[81].mxu0  ;;  %27539 = vmatprep.subr.bf16.mxu0 %v27538_v59  ;;  %27618 = vmatprep.subr.bf16.mxu1 %v28653_v53  ;;  %v27634_v59 = vpack.c.bf16 %v25587_v27, %v25586_v62  ;;  %v27589_v18 = vpack.c.bf16 %v25561_v6, %v25560_v54  ;;  %v25591_v62 = vld [vmem:[%s34573_s7 + $0x1188] sm:$0xff]  ;;  %v25592_v27 = vld [vmem:[%s34573_s7 + $0x1190] sm:$0xff]  ;;  %v25609_v54 = vld [vmem:[%s34573_s7 + $0x1218] sm:$0xff] }
 0x7e3   : > { %v26096_v23 = vadd.f32 %v26095_v7, %v26094_v48  ;;  %v27591_v48 = vpack.c.bf16 %v25545_v8, %v25544_v35  ;;  %v25546_v7 = vld [vmem:[%s34573_s7 + $0x1030] sm:$0xff]  ;;  %v25610_v6 = vld [vmem:[%s34573_s7 + $0x1220] sm:$0xff]  ;;  %v22546_v8 = vrot.slane %v33339_v52, 2 }
 0x7e4   : > { %v25634_v35 = vld [vmem:[%s34573_s7 + $0x12e0] sm:$0xff]  ;;  %v27640_v20 = vpack.c.bf16 %v25610_v6, %v25609_v54  ;;  %v25604_v6 = vld [vmem:[%s34573_s7 + $0x11f0] sm:$0xff] }
 0x7e5   : > { %v33459_v25 = vadd.f32 %v33297_v16, %v26096_v23  ;;  %27541 = vmatpush3.bf16.msra.mxu0 %v27540_v0  ;;  %27620 = vmatpush1.bf16.msra.mxu1 %v27619_v56  ;;  %v25580_v16 = vld [vmem:[%s34573_s7 + $0x1140] sm:$0xff]  ;;  %v25623_v0 = vld [vmem:[%s34573_s7 + $0x1288] sm:$0xff]  ;;  %v25624_v56 = vld [vmem:[%s34573_s7 + $0x1290] sm:$0xff] }
 0x7e6   : > { %27543 = vmatprep.subr.bf16.mxu0 %v27542_v38  ;;  %27621 = vmatprep.subr.bf16.mxu1 %v28653_v53  ;;  %v27625_v11 = vpack.c.bf16 %v25581_v47, %v25580_v16  ;;  %v25547_v38 = vld [vmem:[%s34573_s7 + $0x1038] sm:$0xff]  ;;  %v27669_v23 = vpack.c.bf16 %v25624_v56, %v25623_v0  ;;  %v25549_v16 = vld [vmem:[%s34573_s7 + $0x1048] sm:$0xff]  ;;  %v25566_v47 = vld [vmem:[%s34573_s7 + $0x10d0] sm:$0xff]  ;;  %v22752_v0 = vrot.slane %v33175_v10, 3 }
 0x7e7   : > { %v27595_v9 = vpack.c.bf16 %v25547_v38, %v25546_v7  ;;  %v27601_v15 = vpack.c.bf16 %v25567_v44, %v25566_v47  ;;  %v25611_v56 = vld [vmem:[%s34573_s7 + $0x1228] sm:$0xff]  ;;  %v25597_v47 = vld [vmem:[%s34573_s7 + $0x11b8] sm:$0xff]  ;;  %v25598_v44 = vld [vmem:[%s34573_s7 + $0x11c0] sm:$0xff] }
 0x7e9   : > { %27545 = vmatpush3.bf16.msra.mxu0 %v27544_v58  ;;  %27623 = vmatpush1.bf16.msra.mxu1 %v27622_v43  ;;  %v25625_v58 = vld [vmem:[%s34573_s7 + $0x1298] sm:$0xff]  ;;  %v25626_v43 = vld [vmem:[%s34573_s7 + $0x12a0] sm:$0xff] }
 0x7ea   : > { %27547 = vmatprep.subr.bf16.mxu0 %v27546_v24  ;;  %27624 = vmatprep.subr.bf16.mxu1 %v28653_v53  ;;  %v27597_v24 = vpack.c.bf16 %v25565_v46, %v25564_v41  ;;  %v27672_v33 = vpack.c.bf16 %v25626_v43, %v25625_v58  ;;  %v25636_v41 = vld [vmem:[%s34573_s7 + $0x12f0] sm:$0xff]  ;;  %v25614_v58 = vld [vmem:[%s34573_s7 + $0x1240] sm:$0xff] }
 0x7ed   : > { %27549 = vmatpush3.bf16.msra.mxu0 %v27548_v61  ;;  %27626 = vmatpush1.bf16.msra.mxu1 %v27625_v11  ;;  %v27599_v11 = vpack.c.bf16 %v25549_v16, %v25548_v60  ;;  %v25638_v60 = vld [vmem:[%s34573_s7 + $0x1300] sm:$0xff] }
 0x7ee   : > { %27578 = vmatprep.subr.bf16.mxu0 %v27577_v12  ;;  %27627 = vmatprep.subr.bf16.mxu1 %v28653_v53  ;;  %v25627_v12 = vld [vmem:[%s34573_s7 + $0x12a8] sm:$0xff] }
 0x7f0   : > { %22418 = vmatmul.mubr.f32.vlgmr.msra.gmra.mrb[94].mxu0 %v22341_v21  ;;  %v25569_v21 = vld [vmem:[%s34573_s7 + $0x10e8] sm:$0xff] }
 0x7f1   : > { %27580 = vmatpush3.bf16.msra.mxu0 %v27579_v3  ;;  %22622 = vmatprep.mubr.f32.mxu0 %v22547_v28  ;;  %v25568_v3 = vld [vmem:[%s34573_s7 + $0x10e0] sm:$0xff] }
 0x7f2   : > { %27629 = vmatpush1.bf16.msra.mxu1 %v27628_v17  ;;  %27582 = vmatprep.subr.bf16.mxu0 %v27581_v63  ;;  %v27675_v17 = vpack.c.bf16 %v25628_v40, %v25627_v12  ;;  %v27605_v28 = vpack.c.bf16 %v25569_v21, %v25568_v3  ;;  %v27650_v12 = vpack.c.bf16 %v25598_v44, %v25597_v47  ;;  %v25639_v40 = vld [vmem:[%s34573_s7 + $0x1308] sm:$0xff]  ;;  %v25618_v3 = vld [vmem:[%s34573_s7 + $0x1260] sm:$0xff] }
 0x7f3   : > { %27630 = vmatprep.subr.bf16.mxu1 %v28653_v53 }
 0x7f5   : > { %27584 = vmatpush3.bf16.msra.mxu0 %v27583_v49  ;;  %v27678_v49 = vpack.c.bf16 %v25630_v45, %v25629_v5  ;;  %v25601_v5 = vld [vmem:[%s34573_s7 + $0x11d8] sm:$0xff]  ;;  %v25602_v45 = vld [vmem:[%s34573_s7 + $0x11e0] sm:$0xff] }
 0x7f6   : > { %27632 = vmatpush1.bf16.msra.mxu1 %v27631_v29  ;;  %27586 = vmatprep.subr.bf16.mxu0 %v27585_v2  ;;  %v25631_v2 = vld [vmem:[%s34573_s7 + $0x12c8] sm:$0xff] }
 0x7f7   : > { %27633 = vmatprep.subr.bf16.mxu1 %v28653_v53 }
 0x7f9   : > { %27588 = vmatpush3.bf16.msra.mxu0 %v27587_v30  ;;  %v27681_v30 = vpack.c.bf16 %v25632_v55, %v25631_v2  ;;  %v27658_v2 = vpack.c.bf16 %v25602_v45, %v25601_v5  ;;  %v25666_v5 = vld [vmem:[%s34573_s7 + $0x13d0] sm:$0xff]  ;;  %v25667_v45 = vld [vmem:[%s34573_s7 + $0x13d8] sm:$0xff] }
 0x7fa   : > { %27635 = vmatpush1.bf16.msra.mxu1 %v27634_v59  ;;  %27590 = vmatprep.subr.bf16.mxu0 %v27589_v18  ;;  %v27638_v59 = vpack.c.bf16 %v25592_v27, %v25591_v62  ;;  %v25633_v18 = vld [vmem:[%s34573_s7 + $0x12d8] sm:$0xff]  ;;  %v22753_v27 = vrot.slane %v33187_v37, 3 }
 0x7fb   : > { %22664 = vmatprep.subr.mxu1 %v28635_v1  ;;  %v27684_v7 = vpack.c.bf16 %v25634_v35, %v25633_v18  ;;  %v25621_v18 = vld [vmem:[%s34573_s7 + $0x1278] sm:$0xff]  ;;  %v25622_v35 = vld [vmem:[%s34573_s7 + $0x1280] sm:$0xff] }
 0x7fd   : > { %27592 = vmatpush3.bf16.msra.mxu0 %v27591_v48  ;;  %v25594_v48 = vld [vmem:[%s34573_s7 + $0x11a0] sm:$0xff] }
 0x7fe   : > { %25589 = vmatpush1.msk.msra.mxu1 %vm20504_vm5, %v25588_v39  ;;  %27594 = vmatprep.subr.bf16.mxu0 %v27593_v4  ;;  %v25612_v4 = vld [vmem:[%s34573_s7 + $0x1230] sm:$0xff]  ;;  %v27642_v38 = vpack.c.bf16 %v25594_v48, %v25593_v26  ;;  %v25635_v39 = vld [vmem:[%s34573_s7 + $0x12e8] sm:$0xff] }
 0x7ff   : > { %22693 = vmatmul.mubr.f32.vlgmr.msra.gmra.mrb[80].mxu1 %v22548_v57  ;;  %27668 = vmatprep.subr.bf16.mxu1 %v28653_v53  ;;  %v27644_v46 = vpack.c.bf16 %v25612_v4, %v25611_v56  ;;  %v25596_v57 = vld [vmem:[%s34573_s7 + $0x11b0] sm:$0xff]  ;;  %v27687_v43 = vpack.c.bf16 %v25636_v41, %v25635_v39  ;;  %v27664_v56 = vpack.c.bf16 %v25622_v35, %v25621_v18  ;;  %v25680_v4 = vld [vmem:[%s34573_s7 + $0x1440] sm:$0xff]  ;;  %v25661_v39 = vld [vmem:[%s34573_s7 + $0x13a8] sm:$0xff] }
 0x800   : > { %27670 = vmatpush1.bf16.msra.mxu1 %v27669_v23  ;;  %25643 = vmatprep.mubr.msk.f32.mxu1 %vm20500_vm6, %v22754_v51  ;;  %v25595_v23 = vld [vmem:[%s34573_s7 + $0x11a8] sm:$0xff]  ;;  %v25670_v18 = vld [vmem:[%s34573_s7 + $0x13f0] sm:$0xff]  ;;  %v25671_v35 = vld [vmem:[%s34573_s7 + $0x13f8] sm:$0xff] }
 0x801   : > { %27596 = vmatpush3.bf16.msra.mxu0 %v27595_v9  ;;  %27671 = vmatprep.subr.bf16.mxu1 %v28653_v53  ;;  %v26129_v61 = vpop.f32.mrb[82].mxu0  ;;  %v25613_v9 = vld [vmem:[%s34573_s7 + $0x1238] sm:$0xff]  ;;  %v27646_v51 = vpack.c.bf16 %v25596_v57, %v25595_v23  ;;  %v25644_v57 = vld [vmem:[%s34573_s7 + $0x1320] sm:$0xff] }
 0x802   : > { %v26130_v13 = vpop.f32.mrb[83].mxu0  ;;  %27598 = vmatprep.subr.bf16.mxu0 %v27597_v24  ;;  %v25637_v24 = vld [vmem:[%s34573_s7 + $0x12f8] sm:$0xff]  ;;  %v27648_v16 = vpack.c.bf16 %v25614_v58, %v25613_v9  ;;  %v25645_v9 = vld [vmem:[%s34573_s7 + $0x1328] sm:$0xff]  ;;  %v25682_v58 = vld [vmem:[%s34573_s7 + $0x1450] sm:$0xff] }
 0x803   : > { %v26131_v36 = vadd.f32 %v26130_v13, %v26129_v61  ;;  %v25616_v61 = vld [vmem:[%s34573_s7 + $0x1250] sm:$0xff] }
 0x804   : > { %27673 = vmatpush1.bf16.msra.mxu1 %v27672_v33  ;;  %v25615_v33 = vld [vmem:[%s34573_s7 + $0x1248] sm:$0xff]  ;;  %v25640_v13 = vld [vmem:[%s34573_s7 + $0x1310] sm:$0xff] }
 0x805   : > { %v33617_v63 = vadd.f32 %v33459_v25, %v26131_v36  ;;  %27600 = vmatpush3.bf16.msra.mxu0 %v27599_v11  ;;  %27674 = vmatprep.subr.bf16.mxu1 %v28653_v53  ;;  %v25553_v25 = vld [vmem:[%s34573_s7 + $0x1068] sm:$0xff]  ;;  %v27690_v11 = vpack.c.bf16 %v25638_v60, %v25637_v24  ;;  %v25617_v36 = vld [vmem:[%s34573_s7 + $0x1258] sm:$0xff]  ;;  %v27693_v21 = vpack.c.bf16 %v25640_v13, %v25639_v40  ;;  %v25664_v13 = vld [vmem:[%s34573_s7 + $0x13c0] sm:$0xff] }
 0x806   : > { %27602 = vmatprep.subr.bf16.mxu0 %v27601_v15  ;;  %v27607_v29 = vpack.c.bf16 %v25553_v25, %v25552_v19  ;;  %v27652_v15 = vpack.c.bf16 %v25616_v61, %v25615_v33  ;;  %v25677_v19 = vld [vmem:[%s34573_s7 + $0x1428] sm:$0xff]  ;;  %v25663_v24 = vld [vmem:[%s34573_s7 + $0x13b8] sm:$0xff]  ;;  %v27697_v60 = vpack.c.bf16 %v25645_v9, %v25644_v57  ;;  %v25646_v33 = vld [vmem:[%s34573_s7 + $0x1330] sm:$0xff] }
 0x807   : > { %v25619_v25 = vld [vmem:[%s34573_s7 + $0x1268] sm:$0xff]  ;;  %v25647_v61 = vld [vmem:[%s34573_s7 + $0x1338] sm:$0xff] }
 0x808   : > { %27676 = vmatpush1.bf16.msra.mxu1 %v27675_v17  ;;  %v27654_v17 = vpack.c.bf16 %v25600_v31, %v25599_v14  ;;  %v27660_v54 = vpack.c.bf16 %v25620_v32, %v25619_v25  ;;  %v25685_v40 = vld [vmem:[%s34573_s7 + $0x1468] sm:$0xff]  ;;  %v27701_v14 = vpack.c.bf16 %v25647_v61, %v25646_v33  ;;  %v27707_v25 = vpack.c.bf16 %v25667_v45, %v25666_v5  ;;  %v25650_v32 = vld [vmem:[%s34573_s7 + $0x1350] sm:$0xff] }
 0x809   : > { %27604 = vmatpush3.bf16.msra.mxu0 %v27603_v34  ;;  %27677 = vmatprep.subr.bf16.mxu1 %v28653_v53  ;;  %v27656_v34 = vpack.c.bf16 %v25618_v3, %v25617_v36  ;;  %v25648_v3 = vld [vmem:[%s34573_s7 + $0x1340] sm:$0xff]  ;;  %v25658_v61 = vld [vmem:[%s34573_s7 + $0x1390] sm:$0xff]  ;;  %v25715_v5 = vld [vmem:[%s34573_s7 + $0x1548] sm:$0xff] }
 0x80a   : > { %27606 = vmatprep.subr.bf16.mxu0 %v27605_v28  ;;  %v25676_v28 = vld [vmem:[%s34573_s7 + $0x1420] sm:$0xff]  ;;  %v25716_v45 = vld [vmem:[%s34573_s7 + $0x1550] sm:$0xff] }
 0x80b   : > { %v27728_v55 = vpack.c.bf16 %v25677_v19, %v25676_v28 }
 0x80c   : > { %27679 = vmatpush1.bf16.msra.mxu1 %v27678_v49  ;;  %v25641_v49 = vld [vmem:[%s34573_s7 + $0x1318] sm:$0x1] }
 0x80d   : > { %27608 = vmatpush3.bf16.msra.mxu0 %v27607_v29  ;;  %27680 = vmatprep.subr.bf16.mxu1 %v28653_v53 }
 0x80e   : > { %27637 = vmatprep.subr.bf16.mxu0 %v27636_v22  ;;  %v25603_v22 = vld [vmem:[%s34573_s7 + $0x11e8] sm:$0xff] }
 0x80f   : > { %v27662_v26 = vpack.c.bf16 %v25604_v6, %v25603_v22  ;;  %v25653_v6 = vld [vmem:[%s34573_s7 + $0x1368] sm:$0xff] }
 0x810   : > { %27682 = vmatpush1.bf16.msra.mxu1 %v27681_v30  ;;  %22623 = vmatmul.mubr.f32.vlgmr.msra.gmra.mrb[96].mxu0 %v22546_v8  ;;  %v25678_v30 = vld [vmem:[%s34573_s7 + $0x1430] sm:$0xff] }
 0x811   : > { %27639 = vmatpush3.bf16.msra.mxu0 %v27638_v59  ;;  %22827 = vmatprep.mubr.f32.mxu0 %v22752_v0  ;;  %v25679_v59 = vld [vmem:[%s34573_s7 + $0x1438] sm:$0xff] }
 0x812   : > { %27683 = vmatprep.subr.bf16.mxu1 %v28653_v53  ;;  %27641 = vmatprep.subr.bf16.mxu0 %v27640_v20  ;;  %v22959_v20 = vrot.slane %v32999_v50, 4  ;;  %v27731_v48 = vpack.c.bf16 %v25679_v59, %v25678_v30  ;;  %v25605_v0 = vld [vmem:[%s34573_s7 + $0x11f8] sm:$0xff]  ;;  %v25690_v30 = vld [vmem:[%s34573_s7 + $0x1490] sm:$0xff] }
 0x813   : > { %v25691_v59 = vld [vmem:[%s34573_s7 + $0x1498] sm:$0xff] }
 0x814   : > { %27685 = vmatpush1.bf16.msra.mxu1 %v27684_v7  ;;  %v25681_v7 = vld [vmem:[%s34573_s7 + $0x1448] sm:$0xff] }
 0x815   : > { %27643 = vmatpush3.bf16.msra.mxu0 %v27642_v38  ;;  %27686 = vmatprep.subr.bf16.mxu1 %v28653_v53  ;;  %v25660_v38 = vld [vmem:[%s34573_s7 + $0x13a0] sm:$0xff] }
 0x816   : > { %27645 = vmatprep.subr.bf16.mxu0 %v27644_v46  ;;  %v27734_v46 = vpack.c.bf16 %v25681_v7, %v25680_v4  ;;  %v27695_v23 = vpack.c.bf16 %v25661_v39, %v25660_v38  ;;  %v25693_v4 = vld [vmem:[%s34573_s7 + $0x14a8] sm:$0xff]  ;;  %v25672_v7 = vld [vmem:[%s34573_s7 + $0x1400] sm:$0xff] }
 0x817   : > { %v25673_v38 = vld [vmem:[%s34573_s7 + $0x1408] sm:$0xff] }
 0x818   : > { %27688 = vmatpush1.bf16.msra.mxu1 %v27687_v43  ;;  %v25683_v43 = vld [vmem:[%s34573_s7 + $0x1458] sm:$0xff]  ;;  %v27719_v9 = vpack.c.bf16 %v25673_v38, %v25672_v7  ;;  %v25703_v7 = vld [vmem:[%s34573_s7 + $0x14e8] sm:$0xff]  ;;  %v25704_v38 = vld [vmem:[%s34573_s7 + $0x14f0] sm:$0xff] }
 0x819   : > { %27647 = vmatpush3.bf16.msra.mxu0 %v27646_v51  ;;  %27689 = vmatprep.subr.bf16.mxu1 %v28653_v53  ;;  %v25662_v51 = vld [vmem:[%s34573_s7 + $0x13b0] sm:$0xff]  ;;  %v27737_v47 = vpack.c.bf16 %v25683_v43, %v25682_v58  ;;  %v25656_v58 = vld [vmem:[%s34573_s7 + $0x1380] sm:$0xff]  ;;  %v25657_v43 = vld [vmem:[%s34573_s7 + $0x1388] sm:$0xff] }
 0x81a   : > { %27649 = vmatprep.subr.bf16.mxu0 %v27648_v16  ;;  %v22751_v16 = vrot.slane %v33339_v52, 3  ;;  %v27699_v44 = vpack.c.bf16 %v25663_v24, %v25662_v51  ;;  %v25674_v51 = vld [vmem:[%s34573_s7 + $0x1410] sm:$0xff]  ;;  %v25675_v24 = vld [vmem:[%s34573_s7 + $0x1418] sm:$0xff] }
 0x81b   : > { %v27723_v33 = vpack.c.bf16 %v25675_v24, %v25674_v51  ;;  %v25706_v51 = vld [vmem:[%s34573_s7 + $0x1500] sm:$0xff]  ;;  %v25723_v24 = vld [vmem:[%s34573_s7 + $0x1588] sm:$0xff] }
 0x81c   : > { %27691 = vmatpush1.bf16.msra.mxu1 %v27690_v11  ;;  %v25684_v11 = vld [vmem:[%s34573_s7 + $0x1460] sm:$0xff] }
 0x81d   : > { %27651 = vmatpush3.bf16.msra.mxu0 %v27650_v12  ;;  %27692 = vmatprep.subr.bf16.mxu1 %v28653_v53  ;;  %v22957_v12 = vrot.slane %v33175_v10, 4  ;;  %v27740_v31 = vpack.c.bf16 %v25685_v40, %v25684_v11  ;;  %v25694_v11 = vld [vmem:[%s34573_s7 + $0x14b0] sm:$0x1]  ;;  %v25714_v40 = vld [vmem:[%s34573_s7 + $0x1540] sm:$0xff] }
 0x81e   : > { %27653 = vmatprep.subr.bf16.mxu0 %v27652_v15  ;;  %v25665_v15 = vld [vmem:[%s34573_s7 + $0x13c8] sm:$0xff] }
 0x81f   : > { %v27703_v36 = vpack.c.bf16 %v25665_v15, %v25664_v13  ;;  %v22958_v15 = vrot.slane %v33187_v37, 4 }
 0x820   : > { %27694 = vmatpush1.bf16.msra.mxu1 %v27693_v21  ;;  %v25649_v21 = vld [vmem:[%s34573_s7 + $0x1348] sm:$0xff] }
 0x821   : > { %27655 = vmatpush3.bf16.msra.mxu0 %v27654_v17  ;;  %22869 = vmatprep.subr.mxu1 %v28635_v1  ;;  %v26164_v42 = vpop.f32.mrb[84].mxu0  ;;  %v25686_v17 = vld [vmem:[%s34573_s7 + $0x1470] sm:$0xff]  ;;  %v27705_v28 = vpack.c.bf16 %v25649_v21, %v25648_v3  ;;  %v23164_v3 = vrot.slane %v32999_v50, 5 }
 0x822   : > { %v26165_v29 = vpop.f32.mrb[85].mxu0  ;;  %27657 = vmatprep.subr.bf16.mxu0 %v27656_v34  ;;  %v25687_v34 = vld [vmem:[%s34573_s7 + $0x1478] sm:$0xff] }
 0x823   : > { %v26166_v62 = vadd.f32 %v26165_v29, %v26164_v42  ;;  %v27743_v19 = vpack.c.bf16 %v25687_v34, %v25686_v17  ;;  %v25651_v42 = vld [vmem:[%s34573_s7 + $0x1358] sm:$0xff]  ;;  %v25689_v29 = vld [vmem:[%s34573_s7 + $0x1488] sm:$0xff]  ;;  %v25698_v34 = vld [vmem:[%s34573_s7 + $0x14c0] sm:$0xff] }
 0x824   : > { %25642 = vmatpush1.msk.msra.mxu1 %vm20504_vm5, %v25641_v49  ;;  %v25688_v49 = vld [vmem:[%s34573_s7 + $0x1480] sm:$0xff]  ;;  %v27709_v22 = vpack.c.bf16 %v25651_v42, %v25650_v32  ;;  %v25697_v17 = vld [vmem:[%s34573_s7 + $0x14b8] sm:$0xff]  ;;  %v22956_v42 = vrot.slane %v33339_v52, 4 }
 0x825   : > { %v33779_v8 = vadd.f32 %v33617_v63, %v26166_v62  ;;  %22898 = vmatmul.mubr.f32.vlgmr.msra.gmra.mrb[80].mxu1 %v22753_v27  ;;  %27727 = vmatprep.subr.bf16.mxu1 %v28653_v53  ;;  %v25606_v63 = vld [vmem:[%s34573_s7 + $0x1200] sm:$0xff]  ;;  %v27746_v62 = vpack.c.bf16 %v25689_v29, %v25688_v49  ;;  %v27758_v49 = vpack.c.bf16 %v25716_v45, %v25715_v5  ;;  %v25699_v29 = vld [vmem:[%s34573_s7 + $0x14c8] sm:$0xff] }
 0x826   : > { %27659 = vmatpush3.bf16.msra.mxu0 %v27658_v2  ;;  %27729 = vmatpush1.bf16.msra.mxu1 %v27728_v55  ;;  %v27666_v41 = vpack.c.bf16 %v25606_v63, %v25605_v0  ;;  %v25668_v2 = vld [vmem:[%s34573_s7 + $0x13e0] sm:$0xff]  ;;  %v25669_v55 = vld [vmem:[%s34573_s7 + $0x13e8] sm:$0xff]  ;;  %v25654_v0 = vld [vmem:[%s34573_s7 + $0x1370] sm:$0xff] }
 0x827   : > { %25696 = vmatprep.mubr.msk.f32.mxu1 %vm20500_vm6, %v22959_v20  ;;  %27661 = vmatprep.subr.bf16.mxu0 %v27660_v54  ;;  %v27711_v27 = vpack.c.bf16 %v25669_v55, %v25668_v2  ;;  %v25652_v54 = vld [vmem:[%s34573_s7 + $0x1360] sm:$0xff]  ;;  %v25700_v2 = vld [vmem:[%s34573_s7 + $0x14d0] sm:$0xff]  ;;  %v23162_v55 = vrot.slane %v33175_v10, 5 }
 0x828   : > { %27730 = vmatprep.subr.bf16.mxu1 %v28653_v53  ;;  %v27713_v20 = vpack.c.bf16 %v25653_v6, %v25652_v54  ;;  %v25692_v63 = vld [vmem:[%s34573_s7 + $0x14a0] sm:$0xff]  ;;  %v27760_v54 = vpack.c.bf16 %v25700_v2, %v25699_v29  ;;  %v25735_v6 = vld [vmem:[%s34573_s7 + $0x15e8] sm:$0xff] }
 0x829   : > { %v27752_v57 = vpack.c.bf16 %v25693_v4, %v25692_v63  ;;  %v25734_v32 = vld [vmem:[%s34573_s7 + $0x15e0] sm:$0xff] }
 0x82a   : > { %27663 = vmatpush3.bf16.msra.mxu0 %v27662_v26  ;;  %27732 = vmatpush1.bf16.msra.mxu1 %v27731_v48  ;;  %v27749_v26 = vpack.c.bf16 %v25691_v59, %v25690_v30  ;;  %v27715_v48 = vpack.c.bf16 %v25671_v35, %v25670_v18  ;;  %v25736_v30 = vld [vmem:[%s34573_s7 + $0x15f0] sm:$0xff]  ;;  %v25701_v18 = vld [vmem:[%s34573_s7 + $0x14d8] sm:$0xff]  ;;  %v25702_v35 = vld [vmem:[%s34573_s7 + $0x14e0] sm:$0xff] }
 0x82b   : > { %27665 = vmatprep.subr.bf16.mxu0 %v27664_v56  ;;  %27733 = vmatprep.subr.bf16.mxu1 %v28653_v53  ;;  %v25655_v56 = vld [vmem:[%s34573_s7 + $0x1378] sm:$0xff]  ;;  %v25738_v63 = vld [vmem:[%s34573_s7 + $0x1600] sm:$0xff] }
 0x82c   : > { %v25710_v5 = vld [vmem:[%s34573_s7 + $0x1520] sm:$0xff] }
 0x82d   : > { %v25746_v29 = vld [vmem:[%s34573_s7 + $0x1640] sm:$0xff] }
 0x82e   : > { %27667 = vmatpush3.bf16.msra.mxu0 %v27666_v41  ;;  %27735 = vmatpush1.bf16.msra.mxu1 %v27734_v46  ;;  %v27717_v46 = vpack.c.bf16 %v25655_v56, %v25654_v0  ;;  %v27764_v0 = vpack.c.bf16 %v25702_v35, %v25701_v18  ;;  %v25737_v56 = vld [vmem:[%s34573_s7 + $0x15f8] sm:$0xff]  ;;  %v25782_v18 = vld [vmem:[%s34573_s7 + $0x1750] sm:$0xff] }
 0x82f   : > { %27696 = vmatprep.subr.bf16.mxu0 %v27695_v23  ;;  %27736 = vmatprep.subr.bf16.mxu1 %v28653_v53  ;;  %v25783_v35 = vld [vmem:[%s34573_s7 + $0x1758] sm:$0xff] }
 0x831   : > { %22828 = vmatmul.mubr.f32.vlgmr.msra.gmra.mrb[98].mxu0 %v22751_v16  ;;  %v27721_v16 = vpack.c.bf16 %v25657_v43, %v25656_v58  ;;  %v25705_v43 = vld [vmem:[%s34573_s7 + $0x14f8] sm:$0xff] }
 0x832   : > { %27698 = vmatpush3.bf16.msra.mxu0 %v27697_v60  ;;  %23032 = vmatprep.mubr.f32.mxu0 %v22957_v12  ;;  %v25713_v12 = vld [vmem:[%s34573_s7 + $0x1538] sm:$0xff] }
 0x833   : > { %27738 = vmatpush1.bf16.msra.mxu1 %v27737_v47  ;;  %27700 = vmatprep.subr.bf16.mxu0 %v27699_v44  ;;  %v25729_v47 = vld [vmem:[%s34573_s7 + $0x15b8] sm:$0xff]  ;;  %v25730_v44 = vld [vmem:[%s34573_s7 + $0x15c0] sm:$0xff]  ;;  %v27754_v21 = vpack.c.bf16 %v25714_v40, %v25713_v12  ;;  %v25708_v12 = vld [vmem:[%s34573_s7 + $0x1510] sm:$0xff] }
 0x834   : > { %27739 = vmatprep.subr.bf16.mxu1 %v28653_v53  ;;  %v27787_v13 = vpack.c.bf16 %v25730_v44, %v25729_v47  ;;  %v27772_v44 = vpack.c.bf16 %v25706_v51, %v25705_v43  ;;  %v25725_v40 = vld [vmem:[%s34573_s7 + $0x1598] sm:$0xff] }
 0x836   : > { %27702 = vmatpush3.bf16.msra.mxu0 %v27701_v14 }
 0x837   : > { %27741 = vmatpush1.bf16.msra.mxu1 %v27740_v31  ;;  %27704 = vmatprep.subr.bf16.mxu0 %v27703_v36  ;;  %v25731_v31 = vld [vmem:[%s34573_s7 + $0x15c8] sm:$0xff]  ;;  %v25732_v36 = vld [vmem:[%s34573_s7 + $0x15d0] sm:$0xff] }
 0x838   : > { %27742 = vmatprep.subr.bf16.mxu1 %v28653_v53 }
 0x83a   : > { %27706 = vmatpush3.bf16.msra.mxu0 %v27705_v28  ;;  %v27790_v28 = vpack.c.bf16 %v25732_v36, %v25731_v31  ;;  %v25743_v36 = vld [vmem:[%s34573_s7 + $0x1628] sm:$0xff] }
 0x83b   : > { %27744 = vmatpush1.bf16.msra.mxu1 %v27743_v19  ;;  %27708 = vmatprep.subr.bf16.mxu0 %v27707_v25  ;;  %v27756_v19 = vpack.c.bf16 %v25698_v34, %v25697_v17  ;;  %v25733_v25 = vld [vmem:[%s34573_s7 + $0x15d8] sm:$0xff] }
 0x83c   : > { %27745 = vmatprep.subr.bf16.mxu1 %v28653_v53  ;;  %v25709_v34 = vld [vmem:[%s34573_s7 + $0x1518] sm:$0xff] }
 0x83e   : > { %27710 = vmatpush3.bf16.msra.mxu0 %v27709_v22  ;;  %v25717_v22 = vld [vmem:[%s34573_s7 + $0x1558] sm:$0xff] }
 0x83f   : > { %27747 = vmatpush1.bf16.msra.mxu1 %v27746_v62  ;;  %27712 = vmatprep.subr.bf16.mxu0 %v27711_v27  ;;  %v25718_v62 = vld [vmem:[%s34573_s7 + $0x1560] sm:$0xff]  ;;  %v27793_v27 = vpack.c.bf16 %v25734_v32, %v25733_v25 }
 0x840   : > { %27748 = vmatprep.subr.bf16.mxu1 %v28653_v53  ;;  %v27762_v59 = vpack.c.bf16 %v25718_v62, %v25717_v22  ;;  %v25766_v22 = vld [vmem:[%s34573_s7 + $0x16d0] sm:$0xff]  ;;  %v25767_v62 = vld [vmem:[%s34573_s7 + $0x16d8] sm:$0xff] }
 0x841   : > { %v26199_v39 = vpop.f32.mrb[86].mxu0 }
 0x842   : > { %27714 = vmatpush3.bf16.msra.mxu0 %v27713_v20  ;;  %v26200_v41 = vpop.f32.mrb[87].mxu0  ;;  %v25719_v20 = vld [vmem:[%s34573_s7 + $0x1568] sm:$0xff] }
 0x843   : > { %27750 = vmatpush1.bf16.msra.mxu1 %v27749_v26  ;;  %v26201_v23 = vadd.f32 %v26200_v41, %v26199_v39  ;;  %27716 = vmatprep.subr.bf16.mxu0 %v27715_v48  ;;  %v25720_v26 = vld [vmem:[%s34573_s7 + $0x1570] sm:$0xff]  ;;  %v27796_v48 = vpack.c.bf16 %v25736_v30, %v25735_v6  ;;  %v25721_v39 = vld [vmem:[%s34573_s7 + $0x1578] sm:$0xff]  ;;  %v25722_v41 = vld [vmem:[%s34573_s7 + $0x1580] sm:$0xff]  ;;  %v27813_v6 = vpack.c.bf16 %v25767_v62, %v25766_v22 }
 0x844   : > { %27751 = vmatprep.subr.bf16.mxu1 %v28653_v53  ;;  %v27766_v4 = vpack.c.bf16 %v25720_v26, %v25719_v20  ;;  %v27770_v58 = vpack.c.bf16 %v25722_v41, %v25721_v39  ;;  %v25750_v30 = vld [vmem:[%s34573_s7 + $0x1650] sm:$0xff]  ;;  %v25747_v20 = vld [vmem:[%s34573_s7 + $0x1648] sm:$0x1]  ;;  %v25768_v26 = vld [vmem:[%s34573_s7 + $0x16e0] sm:$0xff]  ;;  %v23367_v41 = vrot.slane %v33175_v10, 6 }
 0x845   : > { %v33933_v60 = vadd.f32 %v33779_v8, %v26201_v23  ;;  %v25659_v8 = vld [vmem:[%s34573_s7 + $0x1398] sm:$0xff]  ;;  %v27768_v23 = vpack.c.bf16 %v25704_v38, %v25703_v7  ;;  %v25752_v7 = vld [vmem:[%s34573_s7 + $0x1660] sm:$0xff]  ;;  %v25753_v38 = vld [vmem:[%s34573_s7 + $0x1668] sm:$0xff] }
 0x846   : > { %27718 = vmatpush3.bf16.msra.mxu0 %v27717_v46  ;;  %v27725_v14 = vpack.c.bf16 %v25659_v8, %v25658_v61  ;;  %v27799_v46 = vpack.c.bf16 %v25738_v63, %v25737_v56  ;;  %v25742_v61 = vld [vmem:[%s34573_s7 + $0x1620] sm:$0xff]  ;;  %v23163_v63 = vrot.slane %v33187_v37, 5  ;;  %v27819_v43 = vpack.c.bf16 %v25753_v38, %v25752_v7  ;;  %v25793_v62 = vld [vmem:[%s34573_s7 + $0x17a8] sm:$0xff] }
 0x847   : > { %27753 = vmatpush1.bf16.msra.mxu1 %v27752_v57  ;;  %27720 = vmatprep.subr.bf16.mxu0 %v27719_v9  ;;  %v25739_v57 = vld [vmem:[%s34573_s7 + $0x1608] sm:$0xff]  ;;  %v25740_v9 = vld [vmem:[%s34573_s7 + $0x1610] sm:$0xff]  ;;  %v25784_v39 = vld [vmem:[%s34573_s7 + $0x1760] sm:$0xff] }
 0x848   : > { %23074 = vmatprep.subr.mxu1 %v28635_v1  ;;  %v27802_v47 = vpack.c.bf16 %v25740_v9, %v25739_v57  ;;  %v25770_v57 = vld [vmem:[%s34573_s7 + $0x16f0] sm:$0xff]  ;;  %v25771_v9 = vld [vmem:[%s34573_s7 + $0x16f8] sm:$0xff]  ;;  %v25792_v22 = vld [vmem:[%s34573_s7 + $0x17a0] sm:$0xff] }
 0x84a   : > { %27722 = vmatpush3.bf16.msra.mxu0 %v27721_v16  ;;  %v25724_v16 = vld [vmem:[%s34573_s7 + $0x1590] sm:$0xff] }
 0x84b   : > { %25695 = vmatpush1.msk.msra.mxu1 %vm20504_vm5, %v25694_v11  ;;  %27724 = vmatprep.subr.bf16.mxu0 %v27723_v33  ;;  %v25741_v33 = vld [vmem:[%s34573_s7 + $0x1618] sm:$0xff]  ;;  %v27774_v8 = vpack.c.bf16 %v25724_v16, %v25723_v24  ;;  %v25707_v11 = vld [vmem:[%s34573_s7 + $0x1508] sm:$0xff]  ;;  %v27821_v24 = vpack.c.bf16 %v25771_v9, %v25770_v57  ;;  %v25754_v16 = vld [vmem:[%s34573_s7 + $0x1670] sm:$0xff] }
 0x84c   : > { %23103 = vmatmul.mubr.f32.vlgmr.msra.gmra.mrb[80].mxu1 %v22958_v15  ;;  %27786 = vmatprep.subr.bf16.mxu1 %v28653_v53  ;;  %v27805_v15 = vpack.c.bf16 %v25742_v61, %v25741_v33  ;;  %v27776_v31 = vpack.c.bf16 %v25708_v12, %v25707_v11  ;;  %v25787_v33 = vld [vmem:[%s34573_s7 + $0x1778] sm:$0xff]  ;;  %v25772_v61 = vld [vmem:[%s34573_s7 + $0x1700] sm:$0xff]  ;;  %v25819_v9 = vld [vmem:[%s34573_s7 + $0x1868] sm:$0xff] }
 0x84d   : > { %27788 = vmatpush1.bf16.msra.mxu1 %v27787_v13  ;;  %25749 = vmatprep.mubr.msk.f32.mxu1 %vm20500_vm6, %v23164_v3  ;;  %v25726_v13 = vld [vmem:[%s34573_s7 + $0x15a0] sm:$0xff]  ;;  %v25744_v3 = vld [vmem:[%s34573_s7 + $0x1630] sm:$0xff] }
 0x84e   : > { %27726 = vmatpush3.bf16.msra.mxu0 %v27725_v14  ;;  %27789 = vmatprep.subr.bf16.mxu1 %v28653_v53  ;;  %v27778_v17 = vpack.c.bf16 %v25726_v13, %v25725_v40  ;;  %v27808_v25 = vpack.c.bf16 %v25744_v3, %v25743_v36  ;;  %v25756_v13 = vld [vmem:[%s34573_s7 + $0x1680] sm:$0xff]  ;;  %v25774_v36 = vld [vmem:[%s34573_s7 + $0x1710] sm:$0xff]  ;;  %v25775_v3 = vld [vmem:[%s34573_s7 + $0x1718] sm:$0xff] }
 0x84f   : > { %27755 = vmatprep.subr.bf16.mxu0 %v27754_v21  ;;  %v25796_v57 = vld [vmem:[%s34573_s7 + $0x17c0] sm:$0xff] }
 0x851   : > { %27791 = vmatpush1.bf16.msra.mxu1 %v27790_v28  ;;  %23033 = vmatmul.mubr.f32.vlgmr.msra.gmra.mrb[100].mxu0 %v22956_v42  ;;  %v25727_v28 = vld [vmem:[%s34573_s7 + $0x15a8] sm:$0xff]  ;;  %v27780_v42 = vpack.c.bf16 %v25710_v5, %v25709_v34  ;;  %v27829_v34 = vpack.c.bf16 %v25775_v3, %v25774_v36  ;;  %v25758_v5 = vld [vmem:[%s34573_s7 + $0x1690] sm:$0xff] }
 0x852   : > { %27757 = vmatpush3.bf16.msra.mxu0 %v27756_v19  ;;  %23237 = vmatprep.mubr.f32.mxu0 %v23162_v55  ;;  %v25728_v19 = vld [vmem:[%s34573_s7 + $0x15b0] sm:$0xff]  ;;  %v25711_v55 = vld [vmem:[%s34573_s7 + $0x1528] sm:$0xff] }
 0x853   : > { %27792 = vmatprep.subr.bf16.mxu1 %v28653_v53  ;;  %27759 = vmatprep.subr.bf16.mxu0 %v27758_v49  ;;  %v25745_v49 = vld [vmem:[%s34573_s7 + $0x1638] sm:$0xff]  ;;  %v27782_v2 = vpack.c.bf16 %v25728_v19, %v25727_v28  ;;  %v25790_v28 = vld [vmem:[%s34573_s7 + $0x1790] sm:$0xff]  ;;  %v25823_v36 = vld [vmem:[%s34573_s7 + $0x1888] sm:$0xff] }
 0x854   : > { %v25791_v19 = vld [vmem:[%s34573_s7 + $0x1798] sm:$0xff]  ;;  %v25824_v3 = vld [vmem:[%s34573_s7 + $0x1890] sm:$0xff] }
 0x855   : > { %27794 = vmatpush1.bf16.msra.mxu1 %v27793_v27  ;;  %v27811_v27 = vpack.c.bf16 %v25746_v29, %v25745_v49  ;;  %v27858_v29 = vpack.c.bf16 %v25791_v19, %v25790_v28  ;;  %v25800_v28 = vld [vmem:[%s34573_s7 + $0x17e0] sm:$0x1]  ;;  %v25825_v19 = vld [vmem:[%s34573_s7 + $0x1898] sm:$0xff] }
 0x856   : > { %27761 = vmatpush3.bf16.msra.mxu0 %v27760_v54  ;;  %27795 = vmatprep.subr.bf16.mxu1 %v28653_v53 }
 0x857   : > { %27763 = vmatprep.subr.bf16.mxu0 %v27762_v59  ;;  %v25751_v59 = vld [vmem:[%s34573_s7 + $0x1658] sm:$0xff] }
 0x858   : > { %v27815_v56 = vpack.c.bf16 %v25751_v59, %v25750_v30 }
 0x859   : > { %27797 = vmatpush1.bf16.msra.mxu1 %v27796_v48  ;;  %v25769_v48 = vld [vmem:[%s34573_s7 + $0x16e8] sm:$0xff] }
 0x85a   : > { %27765 = vmatpush3.bf16.msra.mxu0 %v27764_v0  ;;  %27798 = vmatprep.subr.bf16.mxu1 %v28653_v53  ;;  %v23161_v0 = vrot.slane %v33339_v52, 5 }
 0x85b   : > { %27767 = vmatprep.subr.bf16.mxu0 %v27766_v4  ;;  %v27846_v4 = vpack.c.bf16 %v25783_v35, %v25782_v18  ;;  %v27861_v35 = vpack.c.bf16 %v25793_v62, %v25792_v22  ;;  %v25809_v62 = vld [vmem:[%s34573_s7 + $0x1818] sm:$0xff] }
 0x85d   : > { %27800 = vmatpush1.bf16.msra.mxu1 %v27799_v46  ;;  %v27817_v46 = vpack.c.bf16 %v25769_v48, %v25768_v26  ;;  %v25762_v26 = vld [vmem:[%s34573_s7 + $0x16b0] sm:$0xff]  ;;  %v25763_v48 = vld [vmem:[%s34573_s7 + $0x16b8] sm:$0xff] }
 0x85e   : > { %27769 = vmatpush3.bf16.msra.mxu0 %v27768_v23  ;;  %27801 = vmatprep.subr.bf16.mxu1 %v28653_v53  ;;  %v25785_v23 = vld [vmem:[%s34573_s7 + $0x1768] sm:$0xff]  ;;  %v27839_v38 = vpack.c.bf16 %v25763_v48, %v25762_v26  ;;  %v25812_v26 = vld [vmem:[%s34573_s7 + $0x1830] sm:$0xff]  ;;  %v25829_v48 = vld [vmem:[%s34573_s7 + $0x18b8] sm:$0xff] }
 0x85f   : > { %27771 = vmatprep.subr.bf16.mxu0 %v27770_v58  ;;  %v23369_v58 = vrot.slane %v32999_v50, 6  ;;  %v27849_v51 = vpack.c.bf16 %v25785_v23, %v25784_v39  ;;  %v25765_v23 = vld [vmem:[%s34573_s7 + $0x16c8] sm:$0xff] }
 0x861   : > { %27803 = vmatpush1.bf16.msra.mxu1 %v27802_v47  ;;  %v25755_v47 = vld [vmem:[%s34573_s7 + $0x1678] sm:$0xff] }
 0x862   : > { %27773 = vmatpush3.bf16.msra.mxu0 %v27772_v44  ;;  %27804 = vmatprep.subr.bf16.mxu1 %v28653_v53  ;;  %v26234_v14 = vpop.f32.mrb[88].mxu0  ;;  %v25786_v44 = vld [vmem:[%s34573_s7 + $0x1770] sm:$0xff]  ;;  %v27823_v11 = vpack.c.bf16 %v25755_v47, %v25754_v16  ;;  %v25803_v47 = vld [vmem:[%s34573_s7 + $0x17e8] sm:$0xff] }
 0x863   : > { %v26235_v21 = vpop.f32.mrb[89].mxu0  ;;  %27775 = vmatprep.subr.bf16.mxu0 %v27774_v8  ;;  %v25773_v8 = vld [vmem:[%s34573_s7 + $0x1708] sm:$0xff]  ;;  %v27852_v12 = vpack.c.bf16 %v25787_v33, %v25786_v44  ;;  %v25798_v16 = vld [vmem:[%s34573_s7 + $0x17d0] sm:$0xff]  ;;  %v25799_v33 = vld [vmem:[%s34573_s7 + $0x17d8] sm:$0xff] }
 0x864   : > { %v26236_v45 = vadd.f32 %v26235_v21, %v26234_v14  ;;  %v27825_v40 = vpack.c.bf16 %v25773_v8, %v25772_v61  ;;  %v25788_v14 = vld [vmem:[%s34573_s7 + $0x1780] sm:$0xff]  ;;  %v25804_v44 = vld [vmem:[%s34573_s7 + $0x17f0] sm:$0xff]  ;;  %v25821_v61 = vld [vmem:[%s34573_s7 + $0x1878] sm:$0xff] }
 0x865   : > { %27806 = vmatpush1.bf16.msra.mxu1 %v27805_v15  ;;  %v25757_v15 = vld [vmem:[%s34573_s7 + $0x1688] sm:$0xff]  ;;  %v25822_v8 = vld [vmem:[%s34573_s7 + $0x1880] sm:$0xff] }
 0x866   : > { %v34097_v32 = vadd.f32 %v33933_v60, %v26236_v45  ;;  %27777 = vmatpush3.bf16.msra.mxu0 %v27776_v31  ;;  %27807 = vmatprep.subr.bf16.mxu1 %v28653_v53  ;;  %v25712_v60 = vld [vmem:[%s34573_s7 + $0x1530] sm:$0xff]  ;;  %v25789_v31 = vld [vmem:[%s34573_s7 + $0x1788] sm:$0xff]  ;;  %v27827_v21 = vpack.c.bf16 %v25757_v15, %v25756_v13  ;;  %v25759_v45 = vld [vmem:[%s34573_s7 + $0x1698] sm:$0xff]  ;;  %v27876_v13 = vpack.c.bf16 %v25822_v8, %v25821_v61 }
 0x867   : > { %27779 = vmatprep.subr.bf16.mxu0 %v27778_v17  ;;  %v27784_v54 = vpack.c.bf16 %v25712_v60, %v25711_v55  ;;  %v27855_v17 = vpack.c.bf16 %v25789_v31, %v25788_v14  ;;  %v27831_v49 = vpack.c.bf16 %v25759_v45, %v25758_v5  ;;  %v25760_v55 = vld [vmem:[%s34573_s7 + $0x16a0] sm:$0xff]  ;;  %v25761_v60 = vld [vmem:[%s34573_s7 + $0x16a8] sm:$0xff]  ;;  %v25805_v15 = vld [vmem:[%s34573_s7 + $0x17f8] sm:$0xff]  ;;  %v23572_v31 = vrot.slane %v33175_v10, 7 }
 0x868   : > { %v27835_v59 = vpack.c.bf16 %v25761_v60, %v25760_v55  ;;  %v25806_v14 = vld [vmem:[%s34573_s7 + $0x1800] sm:$0xff]  ;;  %v25836_v10 = vld [vmem:[%s34573_s7 + $0x18f0] sm:$0xff]  ;;  %v25807_v5 = vld [vmem:[%s34573_s7 + $0x1808] sm:$0xff]  ;;  %v23574_v60 = vrot.slane %v32999_v50, 7 }
 0x869   : > { %27809 = vmatpush1.bf16.msra.mxu1 %v27808_v25  ;;  %v25776_v25 = vld [vmem:[%s34573_s7 + $0x1720] sm:$0xff]  ;;  %v25808_v45 = vld [vmem:[%s34573_s7 + $0x1810] sm:$0xff]  ;;  %v25833_v61 = vld [vmem:[%s34573_s7 + $0x18d8] sm:$0xff] }
 0x86a   : > { %27781 = vmatpush3.bf16.msra.mxu0 %v27780_v42  ;;  %27810 = vmatprep.subr.bf16.mxu1 %v28653_v53  ;;  %v25777_v42 = vld [vmem:[%s34573_s7 + $0x1728] sm:$0xff]  ;;  %v25838_v55 = vld [vmem:[%s34573_s7 + $0x1900] sm:$0xff]  ;;  %v25828_v50 = vld [vmem:[%s34573_s7 + $0x18b0] sm:$0xff] }
 0x86b   : > { %27783 = vmatprep.subr.bf16.mxu0 %v27782_v2  ;;  %v27833_v2 = vpack.c.bf16 %v25777_v42, %v25776_v25  ;;  %v25826_v25 = vld [vmem:[%s34573_s7 + $0x18a0] sm:$0xff] }
 0x86c   : > { %v27884_v22 = vpack.c.bf16 %v25826_v25, %v25825_v19  ;;  %v25834_v8 = vld [vmem:[%s34573_s7 + $0x18e0] sm:$0xff]  ;;  %v25851_v19 = vld [vmem:[%s34573_s7 + $0x1968] sm:$0xff]  ;;  %v25852_v25 = vld [vmem:[%s34573_s7 + $0x1970] sm:$0xff] }
 0x86d   : > { %27812 = vmatpush1.bf16.msra.mxu1 %v27811_v27  ;;  %v25778_v27 = vld [vmem:[%s34573_s7 + $0x1730] sm:$0xff] }
 0x86e   : > { %27785 = vmatpush3.bf16.msra.mxu0 %v27784_v54  ;;  %23279 = vmatprep.subr.mxu1 %v28635_v1  ;;  %v25779_v54 = vld [vmem:[%s34573_s7 + $0x1738] sm:$0xff] }
 0x86f   : > { %27814 = vmatprep.subr.bf16.mxu0 %v27813_v6 }
 0x871   : > { %25748 = vmatpush1.msk.msra.mxu1 %vm20504_vm5, %v25747_v20  ;;  %23238 = vmatmul.mubr.f32.vlgmr.msra.gmra.mrb[102].mxu0 %v23161_v0  ;;  %v27837_v20 = vpack.c.bf16 %v25779_v54, %v25778_v27  ;;  %v25794_v0 = vld [vmem:[%s34573_s7 + $0x17b0] sm:$0xff]  ;;  %v25810_v27 = vld [vmem:[%s34573_s7 + $0x1820] sm:$0xff]  ;;  %v25827_v54 = vld [vmem:[%s34573_s7 + $0x18a8] sm:$0xff] }
 0x872   : > { %23308 = vmatmul.mubr.f32.vlgmr.msra.gmra.mrb[80].mxu1 %v23163_v63  ;;  %27845 = vmatprep.subr.bf16.mxu1 %v28653_v53  ;;  %v25780_v63 = vld [vmem:[%s34573_s7 + $0x1740] sm:$0xff] }
 0x873   : > { %27816 = vmatpush3.bf16.msra.mxu0 %v27815_v56  ;;  %23442 = vmatprep.mubr.f32.mxu0 %v23367_v41  ;;  %v25795_v56 = vld [vmem:[%s34573_s7 + $0x17b8] sm:$0xff] }
 0x874   : > { %27847 = vmatpush1.bf16.msra.mxu1 %v27846_v4  ;;  %25802 = vmatprep.mubr.msk.f32.mxu1 %vm20500_vm6, %v23369_v58  ;;  %v25781_v4 = vld [vmem:[%s34573_s7 + $0x1748] sm:$0xff]  ;;  %v27864_v39 = vpack.c.bf16 %v25795_v56, %v25794_v0  ;;  %v25820_v58 = vld [vmem:[%s34573_s7 + $0x1870] sm:$0xff]  ;;  %v25830_v0 = vld [vmem:[%s34573_s7 + $0x18c0] sm:$0xff] }
 0x875   : > { %27818 = vmatprep.subr.bf16.mxu0 %v27817_v46  ;;  %27848 = vmatprep.subr.bf16.mxu1 %v28653_v53  ;;  %v27841_v41 = vpack.c.bf16 %v25781_v4, %v25780_v63  ;;  %v25764_v46 = vld [vmem:[%s34573_s7 + $0x16c0] sm:$0xff]  ;;  %v25841_v4 = vld [vmem:[%s34573_s7 + $0x1918] sm:$0xff] }
 0x877   : > { %27820 = vmatpush3.bf16.msra.mxu0 %v27819_v43  ;;  %v27843_v43 = vpack.c.bf16 %v25765_v23, %v25764_v46  ;;  %v25814_v46 = vld [vmem:[%s34573_s7 + $0x1840] sm:$0xff]  ;;  %v25831_v23 = vld [vmem:[%s34573_s7 + $0x18c8] sm:$0xff] }
 0x878   : > { %27850 = vmatpush1.bf16.msra.mxu1 %v27849_v51  ;;  %27822 = vmatprep.subr.bf16.mxu0 %v27821_v24  ;;  %v27872_v24 = vpack.c.bf16 %v25820_v58, %v25819_v9 }
 0x879   : > { %27851 = vmatprep.subr.bf16.mxu1 %v28653_v53 }
 0x87b   : > { %27824 = vmatpush3.bf16.msra.mxu0 %v27823_v11  ;;  %v27874_v11 = vpack.c.bf16 %v25804_v44, %v25803_v47  ;;  %v25815_v44 = vld [vmem:[%s34573_s7 + $0x1848] sm:$0xff] }
 0x87c   : > { %27853 = vmatpush1.bf16.msra.mxu1 %v27852_v12  ;;  %27826 = vmatprep.subr.bf16.mxu0 %v27825_v40  ;;  %v23366_v12 = vrot.slane %v33339_v52, 6  ;;  %v27870_v40 = vpack.c.bf16 %v25799_v33, %v25798_v16  ;;  %v25816_v33 = vld [vmem:[%s34573_s7 + $0x1850] sm:$0xff] }
 0x87d   : > { %27854 = vmatprep.subr.bf16.mxu1 %v28653_v53 }
 0x87f   : > { %27828 = vmatpush3.bf16.msra.mxu0 %v27827_v21  ;;  %v27878_v21 = vpack.c.bf16 %v25806_v14, %v25805_v15  ;;  %v25846_v15 = vld [vmem:[%s34573_s7 + $0x1940] sm:$0xff]  ;;  %v27900_v14 = vpack.c.bf16 %v25834_v8, %v25833_v61 }
 0x880   : > { %27856 = vmatpush1.bf16.msra.mxu1 %v27855_v17  ;;  %27830 = vmatprep.subr.bf16.mxu0 %v27829_v34  ;;  %v25835_v17 = vld [vmem:[%s34573_s7 + $0x18e8] sm:$0xff]  ;;  %v27880_v34 = vpack.c.bf16 %v25824_v3, %v25823_v36  ;;  %v23812_v8 = vld [vmem:[%s34577_s11] sm:$0xff] }
 0x881   : > { %27857 = vmatprep.subr.bf16.mxu1 %v28653_v53  ;;  %v27905_v42 = vpack.c.bf16 %v25836_v10, %v25835_v17  ;;  %v25848_v17 = vld [vmem:[%s34573_s7 + $0x1950] sm:$0xff] }
 0x882   : > { %v26269_v6 = vpop.f32.mrb[90].mxu0 }
 0x883   : > { %27832 = vmatpush3.bf16.msra.mxu0 %v27831_v49  ;;  %v26270_v30 = vpop.f32.mrb[91].mxu0  ;;  %v23368_v49 = vrot.slane %v33187_v37, 6 }
 0x884   : > { %27859 = vmatpush1.bf16.msra.mxu1 %v27858_v29  ;;  %v26271_v18 = vadd.f32 %v26270_v30, %v26269_v6  ;;  %27834 = vmatprep.subr.bf16.mxu0 %v27833_v2  ;;  %v27882_v29 = vpack.c.bf16 %v25808_v45, %v25807_v5  ;;  %v25837_v2 = vld [vmem:[%s34573_s7 + $0x18f8] sm:$0xff]  ;;  %v27886_v30 = vpack.c.bf16 %v25810_v27, %v25809_v62  ;;  %v25850_v5 = vld [vmem:[%s34573_s7 + $0x1960] sm:$0xff]  ;;  %v23571_v45 = vrot.slane %v33339_v52, 7 }
 0x885   : > { %27860 = vmatprep.subr.bf16.mxu1 %v28653_v53  ;;  %v27908_v6 = vpack.c.bf16 %v25838_v55, %v25837_v2  ;;  %v27929_v52 = vpack.c.bf16 %v25852_v25, %v25851_v19 }
 0x886   : > { %v34262_v7 = vadd.f32 %v34097_v32, %v26271_v18  ;;  %v25797_v32 = vld [vmem:[%s34573_s7 + $0x17c8] sm:$0xff]  ;;  %v25840_v18 = vld [vmem:[%s34573_s7 + $0x1910] sm:$0xff] }
 0x887   : > { %27836 = vmatpush3.bf16.msra.mxu0 %v27835_v59  ;;  %v27867_v51 = vpack.c.bf16 %v25797_v32, %v25796_v57  ;;  %v25839_v59 = vld [vmem:[%s34573_s7 + $0x1908] sm:$0xff]  ;;  %v25832_v57 = vld [vmem:[%s34573_s7 + $0x18d0] sm:$0xff] }
 0x888   : > { %27862 = vmatpush1.bf16.msra.mxu1 %v27861_v35  ;;  %27838 = vmatprep.subr.bf16.mxu0 %v27837_v20  ;;  %v27888_v35 = vpack.c.bf16 %v25828_v50, %v25827_v54  ;;  %v25811_v20 = vld [vmem:[%s34573_s7 + $0x1828] sm:$0xff]  ;;  %v27911_v56 = vpack.c.bf16 %v25840_v18, %v25839_v59  ;;  %v27896_v47 = vpack.c.bf16 %v25832_v57, %v25831_v23 }
 0x889   : > { %27863 = vmatprep.subr.bf16.mxu1 %v28653_v53  ;;  %v27890_v63 = vpack.c.bf16 %v25812_v26, %v25811_v20 }
 0x88b   : > { %27840 = vmatpush3.bf16.msra.mxu0 %v27839_v38  ;;  %v25842_v38 = vld [vmem:[%s34573_s7 + $0x1920] sm:$0xff] }
 0x88c   : > { %27865 = vmatpush1.bf16.msra.mxu1 %v27864_v39  ;;  %27842 = vmatprep.subr.bf16.mxu0 %v27841_v41  ;;  %v27892_v39 = vpack.c.bf16 %v25830_v0, %v25829_v48  ;;  %v25813_v41 = vld [vmem:[%s34573_s7 + $0x1838] sm:$0xff]  ;;  %v27914_v9 = vpack.c.bf16 %v25842_v38, %v25841_v4  ;;  %v23735_v48 = vld [vmem:[%s34575_s9 + $0x8] sm:$0xff] }
 0x88d   : > { %27866 = vmatprep.subr.bf16.mxu1 %v28653_v53 }
 0x88f   : > { %27844 = vmatpush3.bf16.msra.mxu0 %v27843_v43  ;;  %v27894_v43 = vpack.c.bf16 %v25814_v46, %v25813_v41 }
 0x890   : > { %27868 = vmatpush1.bf16.msra.mxu1 %v27867_v51  ;;  %27873 = vmatprep.subr.bf16.mxu0 %v27872_v24  ;;  %v25843_v51 = vld [vmem:[%s34573_s7 + $0x1928] sm:$0xff]  ;;  %v25844_v24 = vld [vmem:[%s34573_s7 + $0x1930] sm:$0xff] }
 0x891   : > { %27869 = vmatprep.subr.bf16.mxu1 %v28653_v53 }
 0x892   : > { %23443 = vmatmul.mubr.f32.vlgmr.msra.gmra.mrb[104].mxu0 %v23366_v12  ;;  %v27917_v12 = vpack.c.bf16 %v25844_v24, %v25843_v51 }
 0x893   : > { %27875 = vmatpush3.bf16.msra.mxu0 %v27874_v11  ;;  %23647 = vmatprep.mubr.f32.mxu0 %v23572_v31  ;;  %v25817_v31 = vld [vmem:[%s34573_s7 + $0x1858] sm:$0xff] }
 0x894   : > { %27871 = vmatpush1.bf16.msra.mxu1 %v27870_v40  ;;  %27877 = vmatprep.subr.bf16.mxu0 %v27876_v13  ;;  %v27898_v40 = vpack.c.bf16 %v25816_v33, %v25815_v44  ;;  %v25845_v13 = vld [vmem:[%s34573_s7 + $0x1938] sm:$0xff] }
 0x895   : > { %23484 = vmatprep.subr.mxu1 %v28635_v1  ;;  %v27920_v36 = vpack.c.bf16 %v25846_v15, %v25845_v13  ;;  %v23814_v15 = vld [vmem:[%s34577_s11 + $0x10] sm:$0xff] }
 0x897   : > { %27879 = vmatpush3.bf16.msra.mxu0 %v27878_v21  ;;  %v25847_v21 = vld [vmem:[%s34573_s7 + $0x1948] sm:$0xff] }
 0x898   : > { %25801 = vmatpush1.msk.msra.mxu1 %vm20504_vm5, %v25800_v28  ;;  %27881 = vmatprep.subr.bf16.mxu0 %v27880_v34  ;;  %v27923_v10 = vpack.c.bf16 %v25848_v17, %v25847_v21  ;;  %v25849_v34 = vld [vmem:[%s34573_s7 + $0x1958] sm:$0xff]  ;;  %v23818_v21 = vld [vmem:[%s34577_s11 + $0x30] sm:$0xff] }
 0x899   : > { %23513 = vmatmul.mubr.f32.vlgmr.msra.gmra.mrb[80].mxu1 %v23368_v49  ;;  %27904 = vmatprep.subr.bf16.mxu1 %v28653_v53  ;;  %v27926_v28 = vpack.c.bf16 %v25850_v5, %v25849_v34  ;;  %v23573_v49 = vrot.slane %v33187_v37, 7  ;;  %v23734_v37 = vld [vmem:[%s34575_s9] sm:$0xff] }
 0x89a   : > { %27906 = vmatpush1.bf16.msra.mxu1 %v27905_v42  ;;  %25855 = vmatprep.mubr.msk.f32.mxu1 %vm20500_vm6, %v23574_v60  ;;  %v25853_v42 = vld [vmem:[%s34573_s7 + $0x1978] sm:$0x1]  ;;  %v27932_v0 = vpack.c.bf16 %v23735_v48, %v23734_v37  ;;  %v23736_v5 = vld [vmem:[%s34576_s10] sm:$0x1] }
 0x89b   : > { %27883 = vmatpush3.bf16.msra.mxu0 %v27882_v29  ;;  %27907 = vmatprep.subr.bf16.mxu1 %v28653_v53  ;;  %v24058_v37 = vld [vmem:[%s34582_s16 + $0x38] sm:$0xff] }
 0x89c   : > { %27885 = vmatprep.subr.bf16.mxu0 %v27884_v22 }
 0x89e   : > { %27909 = vmatpush1.bf16.msra.mxu1 %v27908_v6 }
 0x89f   : > { %27887 = vmatpush3.bf16.msra.mxu0 %v27886_v30  ;;  %27910 = vmatprep.subr.bf16.mxu1 %v28653_v53 }
 0x8a0   : > { %27889 = vmatprep.subr.bf16.mxu0 %v27888_v35 }
 0x8a2   : > { %27912 = vmatpush1.bf16.msra.mxu1 %v27911_v56  ;;  %v26304_v32 = vpop.f32.mrb[92].mxu0 }
 0x8a3   : > { %27891 = vmatpush3.bf16.msra.mxu0 %v27890_v63  ;;  %27913 = vmatprep.subr.bf16.mxu1 %v28653_v53  ;;  %v26305_v58 = vpop.f32.mrb[93].mxu0 }
 0x8a4   : > { %v26306_v16 = vadd.f32 %v26305_v58, %v26304_v32  ;;  %27893 = vmatprep.subr.bf16.mxu0 %v27892_v39 }
 0x8a6   : > { %27915 = vmatpush1.bf16.msra.mxu1 %v27914_v9  ;;  %v27976_v11 = vadd.f32 %v34262_v7, %v26306_v16  ;;  %v25818_v7 = vld [vmem:[%s34573_s7 + $0x1860] sm:$0xff] }
 0x8a7   : > { %27895 = vmatpush3.bf16.msra.mxu0 %v27894_v43  ;;  %27916 = vmatprep.subr.bf16.mxu1 %v28653_v53  ;;  %v27902_v3 = vpack.c.bf16 %v25818_v7, %v25817_v31 }
 0x8a8   : > { %27897 = vmatprep.subr.bf16.mxu0 %v27896_v47 }
 0x8aa   : > { %27918 = vmatpush1.bf16.msra.mxu1 %v27917_v12 }
 0x8ab   : > { %27899 = vmatpush3.bf16.msra.mxu0 %v27898_v40  ;;  %27919 = vmatprep.subr.bf16.mxu1 %v28653_v53 }
 0x8ac   : > { %27901 = vmatprep.subr.bf16.mxu0 %v27900_v14  ;;  %v23815_v14 = vld [vmem:[%s34577_s11 + $0x18] sm:$0xff] }
 0x8ad   : > { %v27938_v7 = vpack.c.bf16 %v23815_v14, %v23814_v15 }
 0x8ae   : > { %27921 = vmatpush1.bf16.msra.mxu1 %v27920_v36  ;;  %v23816_v36 = vld [vmem:[%s34577_s11 + $0x20] sm:$0xff] }
 0x8af   : > { %27903 = vmatpush3.bf16.msra.mxu0 %v27902_v3  ;;  %27922 = vmatprep.subr.bf16.mxu1 %v28653_v53  ;;  %v23817_v3 = vld [vmem:[%s34577_s11 + $0x28] sm:$0xff] }
 0x8b0   : > { %27931 = vmatprep.subr.bf16.mxu0 %v28653_v53  ;;  %v27941_v17 = vpack.c.bf16 %v23817_v3, %v23816_v36 }
 0x8b2   : > { %27924 = vmatpush1.bf16.msra.mxu1 %v27923_v10  ;;  %23648 = vmatmul.mubr.f32.vlgmr.msra.gmra.mrb[106].mxu0 %v23571_v45  ;;  %v23819_v10 = vld [vmem:[%s34577_s11 + $0x38] sm:$0xff] }
 0x8b3   : > { %27925 = vmatprep.subr.bf16.mxu1 %v28653_v53  ;;  %26902 = vmatprep.mubr.msk.f32.mxu0 %vm28636_vm0, %v28635_v1  ;;  %v27944_v34 = vpack.c.bf16 %v23819_v10, %v23818_v21 }
 0x8b4   : > { %27933 = vmatpush3.bf16.msra.mxu0 %v27932_v0 }
 0x8b5   : > { %27934 = vmatprep.subr.bf16.mxu0 %v28653_v53 }
 0x8b6   : > { %27927 = vmatpush1.bf16.msra.mxu1 %v27926_v28 }
 0x8b7   : > { %27928 = vmatprep.subr.bf16.mxu1 %v28653_v53 }
 0x8ba   : > { %27930 = vmatpush1.bf16.msra.mxu1 %v27929_v52 }
 0x8bb   : > { %23689 = vmatprep.subr.mxu1 %v28635_v1 }
 0x8be   : > { %25854 = vmatpush1.msk.msra.mxu1 %vm20504_vm5, %v25853_v42  ;;  %v23898_v42 = vld [vmem:[%s34580_s14] sm:$0x3] }
 0x8bf   : > { %23718 = vmatmul.mubr.f32.vlgmr.msra.gmra.mrb[80].mxu1 %v23573_v49  ;;  %v23820_v49 = vld [vmem:[%s34578_s12] sm:$0x1] }
 0x8c3   : > { %v26339_v29 = vpop.f32.mrb[94].mxu0 }
 0x8c4   : > { %v26340_v2 = vpop.f32.mrb[95].mxu0 }
 0x8c5   : > { %v26341_v55 = vadd.f32 %v26340_v2, %v26339_v29 }
 0x8c7   : > { %v27977_v60 = vadd.f32 %v27976_v11, %v26341_v55  ;;  %v23813_v11 = vld [vmem:[%s34577_s11 + $0x8] sm:$0xff] }
 0x8c8   : > { %v27935_v13 = vpack.c.bf16 %v23813_v11, %v23812_v8 }
 0x8e3   : > { %v26374_v22 = vpop.f32.mrb[96].mxu0 }
 0x8e4   : > { %v26375_v62 = vpop.f32.mrb[97].mxu0 }
 0x8e5   : > { %v26376_v27 = vadd.f32 %v26375_v62, %v26374_v22  ;;  %v23897_v22 = vld [vmem:[%s34579_s13 + $0x8] sm:$0xff] }
 0x8e7   : > { %v27978_v54 = vadd.f32 %v27977_v60, %v26376_v27  ;;  %v23896_v60 = vld [vmem:[%s34579_s13] sm:$0xff] }
 0x8e8   : > { %v27947_v62 = vpack.c.bf16 %v23897_v22, %v23896_v60  ;;  %v24051_v27 = vld [vmem:[%s34582_s16] sm:$0xff] }
 0x904   : > { %v26409_v50 = vpop.f32.mrb[98].mxu0 }
 0x905   : > { %v26410_v6 = vpop.f32.mrb[99].mxu0 }
 0x906   : > { %v26411_v30 = vadd.f32 %v26410_v6, %v26409_v50 }
 0x908   : > { %v27979_v59 = vadd.f32 %v27978_v54, %v26411_v30  ;;  %v24052_v54 = vld [vmem:[%s34582_s16 + $0x8] sm:$0xff]  ;;  %v24053_v30 = vld [vmem:[%s34582_s16 + $0x10] sm:$0xff] }
 0x909   : > { %v27950_v6 = vpack.c.bf16 %v24052_v54, %v24051_v27 }
 0x924   : > { %v26444_v18 = vpop.f32.mrb[100].mxu0 }
 0x925   : > { %v26445_v35 = vpop.f32.mrb[101].mxu0 }
 0x926   : > { %v26446_v20 = vadd.f32 %v26445_v35, %v26444_v18  ;;  %v24055_v35 = vld [vmem:[%s34582_s16 + $0x20] sm:$0xff] }
 0x928   : > { %v27980_v26 = vadd.f32 %v27979_v59, %v26446_v20  ;;  %v24054_v59 = vld [vmem:[%s34582_s16 + $0x18] sm:$0xff]  ;;  %v24057_v20 = vld [vmem:[%s34582_s16 + $0x30] sm:$0xff] }
 0x929   : > { %v27953_v18 = vpack.c.bf16 %v24054_v59, %v24053_v30  ;;  %v27959_v48 = vpack.c.bf16 %v24058_v37, %v24057_v20 }
 0x944   : > { %v26479_v56 = vpop.f32.mrb[102].mxu0 }
 0x945   : > { %v26480_v63 = vpop.f32.mrb[103].mxu0 }
 0x946   : > { %v26481_v4 = vadd.f32 %v26480_v63, %v26479_v56 }
 0x948   : > { %v27981_v38 = vadd.f32 %v27980_v26, %v26481_v4  ;;  %v24047_v4 = vld [vmem:[%s34581_s15] sm:$0x1] }
 0x965   : > { %v26514_v39 = vpop.f32.mrb[104].mxu0 }
 0x966   : > { %v26515_v41 = vpop.f32.mrb[105].mxu0 }
 0x967   : > { %v26516_v46 = vadd.f32 %v26515_v41, %v26514_v39 }
 0x969   : > { %v27982_v23 = vadd.f32 %v27981_v38, %v26516_v46 }
 0x985   : > { %v26549_v57 = vpop.f32.mrb[106].mxu0 }
 0x986   : > { %v26550_v32 = vpop.f32.mrb[107].mxu0 }
 0x987   : > { %v26551_v9 = vadd.f32 %v26550_v32, %v26549_v57  ;;  %v24059_v57 = vld [vmem:[#allocation2] sm:$0x1] }
 0x989   : > { %v27983_v58 = vadd.f32 %v27982_v23, %v26551_v9 }
 0x992   : > { %v23719_v43 = vpop.f32.mrb[80].mxu1 }
 0x993   : > { %v27984_v51 = vadd.f32 %v27983_v58, %v23719_v43  ;;  %v23721_v24 = vpop.f32.mrb[81].mxu1 }
 0x995   : > { %v23724_v16 = vand.u32 2147483647, %v27984_v51  ;;  %vm23731_vm7 = vcmp.ge.f32.partialorder %v27984_v51, 0.0 }
 0x997   : > { %v23725_v47 = vsub.f32 0.0, %v23724_v16 }
 0x999   : > { %v23726_v44 = vmul.f32 1.442695, %v23725_v47 }
 0x99b   : > { %28621 = vpow2.f32 %v23726_v44 }
 0x9a5   : > { %v28622_v33 = vpop.eup %28621 }
 0x9a6   : > { %v23728_v61 = vadd.f32 1.0, %v28622_v33 }
 0x9a8   : > { %28623 = vrcp.f32 %v23728_v61 }
 0x9b2   : > { %v28624_v12 = vpop.eup %28623 }
 0x9b3   : > { %v23732_v40 = vmul.f32 %v28624_v12, %v28622_v33 }
 0x9b5   : > { %v23733_v31 = vsel %vm23731_vm7, %v28624_v12, %v23732_v40 }
 0x9b6   : > { %26903 = vmatmul.mubr.msk.f32.vlgmr.msra.gmra.mrb[108].mxu0 %vm19689_vm4, %v23733_v31 }
 0x9b7   : > { %27936 = vmatpush3.bf16.msra.mxu0 %v27935_v13  ;;  %26921 = vmatprep.mubr.msk.f32.mxu0 %vm28636_vm0, %v28635_v1 }
 0x9b8   : > { %27937 = vmatprep.subr.bf16.mxu0 %v28653_v53 }
 0x9bb   : > { %27939 = vmatpush3.bf16.msra.mxu0 %v27938_v7 }
 0x9bc   : > { %27940 = vmatprep.subr.bf16.mxu0 %v28653_v53 }
 0x9bf   : > { %27942 = vmatpush3.bf16.msra.mxu0 %v27941_v17 }
 0x9c0   : > { %27943 = vmatprep.subr.bf16.mxu0 %v28653_v53 }
 0x9c3   : > { %27945 = vmatpush3.bf16.msra.mxu0 %v27944_v34 }
 0x9c4   : > { %26924 = vmatprep.subr.mxu0 %v28635_v1 }
 0xa89   : > { %v23806_v45 = vpop.f32.mrb[108].mxu0 }
 0xa8a   : > { %v23807_v28 = vadd.f32 %v23806_v45, %v23736_v5  ;;  %v26904_v19 = vpop.f32.mrb[109].mxu0 }
 0xa8c   : > { %v23810_v25 = vmul.f32 0.01, %v23807_v28 }
 0xa8e   : > { %v23811_v52 = vmax.f32 %v23807_v28, %v23810_v25 }
 0xa90   : > { %26922 = vmatmul.mubr.msk.f32.vlgmr.msra.gmra.mrb[110].mxu0 %vm23821_vm8, %v23811_v52 }
 0xa91   : > { %26926 = vmatprep.mubr.msk.f32.mxu0 %vm28636_vm0, %v28635_v1  ;;  %26925 = vmatpush3.msk.msra.mxu0 %vm23903_vm9, %v23898_v42 }
 0xa92   : > { %27946 = vmatprep.subr.bf16.mxu0 %v28653_v53 }
 0xb63   : > { %v23891_v29 = vpop.f32.mrb[110].mxu0 }
 0xb64   : > { %v23892_v2 = vadd.f32 %v23891_v29, %v23820_v49  ;;  %v26923_v55 = vpop.f32.mrb[111].mxu0 }
 0xb66   : > { %28625 = vtanh.f32 %v23892_v2 }
 0xb70   : > { %v28626_v50 = vpop.eup %28625 }
 0xb71   : > { %26927 = vmatmul.mubr.msk.f32.vlgmr.msra.gmra.mrb[112].mxu0 %vm23899_vm10, %v28626_v50 }
 0xb72   : > { %27948 = vmatpush3.bf16.msra.mxu0 %v27947_v62  ;;  %26933 = vmatprep.mubr.msk.f32.mxu0 %vm28636_vm0, %v28635_v1 }
 0xb73   : > { %27949 = vmatprep.subr.bf16.mxu0 %v28653_v53 }
 0xb75   : > { %26934 = vmatmul.mubr.msk.f32.vlgmr.msra.gmra.mrb[114].mxu0 %vm19689_vm4, %v23733_v31 }
 0xb76   : > { %27951 = vmatpush3.bf16.msra.mxu0 %v27950_v6  ;;  %26952 = vmatprep.mubr.msk.f32.mxu0 %vm28636_vm0, %v28635_v1  ;;  %v24056_v1 = vld [vmem:[%s34582_s16 + $0x28] sm:$0xff]  ;;  %vm24133_vm0 = vcmask 0  }
 0xb77   : > { %27952 = vmatprep.subr.bf16.mxu0 %v28653_v53  ;;  %v27956_v26 = vpack.c.bf16 %v24056_v1, %v24055_v35 }
 0xb7a   : > { %27954 = vmatpush3.bf16.msra.mxu0 %v27953_v18 }
 0xb7b   : > { %27955 = vmatprep.subr.bf16.mxu0 %v28653_v53 }
 0xb7e   : > { %27957 = vmatpush3.bf16.msra.mxu0 %v27956_v26 }
 0xb7f   : > { %27958 = vmatprep.subr.bf16.mxu0 %v28653_v53 }
 0xb82   : > { %27960 = vmatpush3.bf16.msra.mxu0 %v27959_v48 }
 0xc44   : > { %v23973_v0 = vpop.f32.mrb[112].mxu0 }
 0xc45   : > { %v26928_v56 = vpop.f32.mrb[113].mxu0 }
 0xc48   : > { %v24043_v63 = vpop.f32.mrb[114].mxu0 }
 0xc49   : > { %v24044_v38 = vadd.f32 %v24043_v63, %v23973_v0  ;;  %v26935_v39 = vpop.f32.mrb[115].mxu0 }
 0xc4b   : > { %v24048_v41 = vadd.f32 %v24047_v4, %v24044_v38 }
 0xc4d   : > { %v24049_v46 = vmul.f32 0.01, %v24048_v41 }
 0xc4f   : > { %v24050_v23 = vmax.f32 %v24048_v41, %v24049_v46 }
 0xc51   : > { %26953 = vmatmul.mubr.msk.f32.vlgmr.msra.gmra.mrb[116].mxu0 %vm23821_vm8, %v24050_v23 }
 0xd24   : > { %v24129_v53 = vpop.f32.mrb[116].mxu0 }
 0xd25   : > { %v24130_v32 = vadd.f32 %v24129_v53, %v24059_v57  ;;  %v26954_v9 = vpop.f32.mrb[117].mxu0 }
 0xd27   : > { %24134 = vst.msk [vmem:[%s573_s27] sm:$0x1] %vm24133_vm0, %v24130_v32 }
 0xd28 PF: > { %s30_s29 = sadd.s32 1, %s28633_s29  }
 0xd29   : > { %p27_p4 = scmp.ge.s32.totalorder %s30_s29, 4  }
 0xd2b   :  { %29 = sbr.rel (!%p27_p4) target bundleno = 4 (0x4), region = 233 }

</bundles_post_ra>
